<compile_context>
chip_gen: v5e
topology: v5e:2x2
jax: 0.10.0
libtpu: 0.0.40
codegen_flags: <defaults>
</compile_context>

<pallas_src>
import functools

import jax
import jax.numpy as jnp
from jax.experimental import pallas as pl
from jax.experimental.pallas import tpu as pltpu


def _round_up(v, m):
    return (v + m - 1) // m * m


def _pad_len(h, w):
    """Per-image flattened spatial length: (H+2)*W (one zero guard row above and
    below the image), rounded up to a lane-dense multiple of 128."""
    return _round_up((h + 2) * w, 128)


# ----------------------------------------------------------------------------
# In-kernel 3x3 tap construction (shared by the conv kernel and the fused head)
# ----------------------------------------------------------------------------
def _build_taps(srcs, tap_ref, *, cpad, width):
    """Write the nine shifted 3x3 taps into tap_ref ((9*cpad, L) bf16).

    srcs = (x_left, x_center, x_right): (cpad, L) f32 activations. x_left has
    source column W-1 zeroed (pre-mask for the kx==0 taps), x_right has source
    column 0 zeroed (pre-mask for the kx==2 taps). cpad is a multiple of 16 so
    every tap-block store is bf16-tile aligned and unmasked.
    """
    L = srcs[1].shape[-1]
    for ky in range(3):
        for kx in range(3):
            t = ky * 3 + kx
            s = (ky - 1) * width + (kx - 1)          # flat offset of this tap
            v = srcs[kx]
            if s != 0:
                v = pltpu.roll(v, shift=(-s) % L, axis=1)   # lane rotation (XLU)
            tap_ref[t * cpad:(t + 1) * cpad, :] = v.astype(tap_ref.dtype)


# ----------------------------------------------------------------------------
# Pallas kernel 1: 3x3 conv (single deep-K matmul) + folded BN shift + ReLU
# ----------------------------------------------------------------------------
def _conv3x3_kernel(x_ref, w_ref, sh_ref, m_ref, o_ref, tap_ref, *, width, relu):
    # x_ref: (cpad, L) bf16        w_ref: (cout, 9*cpad) bf16 (BN scale folded)
    # sh_ref: (cout, 1) f32        m_ref: (3, L) f32
    # o_ref: (cout, L) bf16        tap_ref: (9*cpad, L) bf16 scratch
    cpad = x_ref.shape[0]
    x = x_ref[...].astype(jnp.float32)
    src_l = m_ref[0:1, :]        # zeros source col W-1 (feeds the kx==0 taps)
    src_r = m_ref[1:2, :]        # zeros source col 0   (feeds the kx==2 taps)
    valid = m_ref[2:3, :]        # interior rows only (no guard rows / lane pad)
    xl = x * src_l
    xr = x * src_r
    _build_taps((xl, x, xr), tap_ref, cpad=cpad, width=width)
    acc = jnp.dot(w_ref[...], tap_ref[...],
                  preferred_element_type=jnp.float32)        # (cout, L)
    y = acc + sh_ref[...]
    if relu:
        y = jnp.maximum(y, 0.0)
    o_ref[...] = (y * valid).astype(o_ref.dtype)


def _conv_call(x_flat, w, shift, masks, *, width, relu):
    cin, L = x_flat.shape
    cout = w.shape[0]
    cpad = w.shape[1] // 9
    if cpad > cin:                                   # zero channel padding
        x_flat = jnp.pad(x_flat, ((0, cpad - cin), (0, 0)))
    kernel = functools.partial(_conv3x3_kernel, width=width, relu=relu)
    # Whole batch folded into the lane dim -> single invocation, single MXU dot.
    # TODO(synk): for v7x (2 TensorCores) split cout or lane-blocks across a
    # parallel grid axis of 2; for big images add a row-block (+halo) grid axis.
    return pl.pallas_call(
        kernel,
        out_shape=jax.ShapeDtypeStruct((cout, L), jnp.bfloat16),
        grid=(1,),
        in_specs=[
            pl.BlockSpec((cpad, L), lambda i: (0, 0)),
            pl.BlockSpec((cout, 9 * cpad), lambda i: (0, 0)),
            pl.BlockSpec((cout, 1), lambda i: (0, 0)),
            pl.BlockSpec((3, L), lambda i: (0, 0)),
        ],
        out_specs=pl.BlockSpec((cout, L), lambda i: (0, 0)),
        scratch_shapes=[pltpu.VMEM((9 * cpad, L), jnp.bfloat16)],
        compiler_params=pltpu.CompilerParams(
            dimension_semantics=("arbitrary",)),
    )(x_flat, w, shift, masks)


# ----------------------------------------------------------------------------
# Pallas kernel 2: fused last conv + softplus + normalize + keypoint expectation
# ----------------------------------------------------------------------------
def _head_kernel(x_ref, w_ref, m_ref, g_ref, heat_ref, kp_ref, tap_ref, *, width):
    # x_ref: (cpad, Lp) bf16   w_ref: (K, 9*cpad) bf16   m_ref: (3, Lp) f32
    # g_ref: (2, Lp) f32       heat_ref: (1, K, Lp) f32  kp_ref: (1, K, 2) f32
    cpad = x_ref.shape[0]
    x = x_ref[...].astype(jnp.float32)
    src_l = m_ref[0:1, :]
    src_r = m_ref[1:2, :]
    valid = m_ref[2:3, :]
    xl = x * src_l
    xr = x * src_r
    _build_taps((xl, x, xr), tap_ref, cpad=cpad, width=width)
    score = jnp.dot(w_ref[...], tap_ref[...],
                    preferred_element_type=jnp.float32)      # (K, Lp)
    # PyTorch softplus(beta=1, threshold=20)
    sp = jnp.where(score > 20.0, score,
                   jnp.log1p(jnp.exp(jnp.minimum(score, 20.0))))
    sp = sp * valid                                          # drop guard/pad lanes
    denom = jnp.sum(sp, axis=1, keepdims=True)               # (K, 1)
    hm = sp * pl.reciprocal(denom)                           # exact reciprocal
    heat_ref[0] = hm.astype(heat_ref.dtype)
    gx = g_ref[0:1, :]
    gy = g_ref[1:2, :]
    kpx = jnp.sum(hm * gx, axis=1, keepdims=True)            # (K, 1)
    kpy = jnp.sum(hm * gy, axis=1, keepdims=True)            # (K, 1)
    kp_ref[0] = jnp.concatenate([kpx, kpy], axis=1).astype(kp_ref.dtype)


def _head_call(x_flat, w, masks, coords, *, n, width):
    cin, L = x_flat.shape
    lp = L // n
    k = w.shape[0]
    cpad = w.shape[1] // 9
    if cpad > cin:
        x_flat = jnp.pad(x_flat, ((0, cpad - cin), (0, 0)))
    kernel = functools.partial(_head_kernel, width=width)
    heat, kp = pl.pallas_call(
        kernel,
        out_shape=(jax.ShapeDtypeStruct((n, k, lp), jnp.float32),
                   jax.ShapeDtypeStruct((n, k, 2), jnp.float32)),
        grid=(n,),
        in_specs=[
            pl.BlockSpec((cpad, lp), lambda i: (0, i)),
            pl.BlockSpec((k, 9 * cpad), lambda i: (0, 0)),
            pl.BlockSpec((3, lp), lambda i: (0, 0)),
            pl.BlockSpec((2, lp), lambda i: (0, 0)),
        ],
        out_specs=(pl.BlockSpec((1, k, lp), lambda i: (i, 0, 0)),
                   pl.BlockSpec((1, k, 2), lambda i: (i, 0, 0))),
        scratch_shapes=[pltpu.VMEM((9 * cpad, lp), jnp.bfloat16)],
        compiler_params=pltpu.CompilerParams(
            dimension_semantics=("parallel",)),
    )(x_flat, w, masks, coords)
    return heat, kp


# ----------------------------------------------------------------------------
# XLA-side glue: channel-major flat layout, masks, coordinate rows
# ----------------------------------------------------------------------------
def _flatten_cn(x_cnhw):
    """(C, N, H, W) -> (C, N*Lp) bf16 with zero guard rows and zero lane padding."""
    c, n, h, w = x_cnhw.shape
    lp = _pad_len(h, w)
    xp = jnp.pad(x_cnhw, ((0, 0), (0, 0), (1, 1), (0, 0)))
    xf = xp.reshape(c, n, (h + 2) * w)
    xf = jnp.pad(xf, ((0, 0), (0, 0), (0, lp - (h + 2) * w)))
    return xf.reshape(c, n * lp).astype(jnp.bfloat16)


def _unflatten_cn(y_flat, n, h, w):
    """(C, N*Lp) -> (C, N, H, W) interior rows."""
    c = y_flat.shape[0]
    lp = _pad_len(h, w)
    y = y_flat.reshape(c, n, lp)[:, :, w:w + h * w]
    return y.reshape(c, n, h, w)


def _conv_masks(n, h, w):
    """(3, n*Lp) f32: [src mask for kx==0 taps, src mask for kx==2 taps, valid]."""
    lp = _pad_len(h, w)
    q = jnp.arange(lp, dtype=jnp.int32)
    col = q % w
    src_l = (col != w - 1).astype(jnp.float32)
    src_r = (col != 0).astype(jnp.float32)
    valid = ((q >= w) & (q < w + h * w)).astype(jnp.float32)
    m = jnp.stack([src_l, src_r, valid], axis=0)
    return jnp.tile(m, (1, n)) if n > 1 else m


def _coord_rows(h, w):
    """(2, Lp) f32: rows of (x, y) coords in [-1, 1]; zeros on guard/pad lanes."""
    lp = _pad_len(h, w)
    wden = max(w - 1, 1)
    hden = max(h - 1, 1)
    xs = 2.0 * (jnp.arange(w, dtype=jnp.float32) / wden) - 1.0
    ys = 2.0 * (jnp.arange(h, dtype=jnp.float32) / hden) - 1.0
    gx = jnp.tile(xs[None, :], (h, 1)).reshape(h * w)
    gy = jnp.repeat(ys, w)
    zrow = jnp.zeros((w,), jnp.float32)
    zpad = jnp.zeros((lp - (h + 2) * w,), jnp.float32)
    gx = jnp.concatenate([zrow, gx, zrow, zpad])
    gy = jnp.concatenate([zrow, gy, zrow, zpad])
    return jnp.stack([gx, gy], axis=0)


# ----------------------------------------------------------------------------
# Parameter construction (deterministic, He-style) in the packed kernel layout
# ----------------------------------------------------------------------------
def _pack_weight(w9, scale=None):
    """(9, Cin, Cout) taps -> (Cout, 9*Cpad) bf16, BN scale folded, zero pad."""
    _, cin, cout = w9.shape
    cpad = _round_up(cin, 16)                    # bf16 sublane-tile alignment
    if scale is not None:
        w9 = w9 * scale[None, None, :]
    wt = jnp.transpose(w9, (2, 0, 1))            # (Cout, 9, Cin)
    wt = jnp.pad(wt, ((0, 0), (0, 0), (0, cpad - cin)))
    return wt.reshape(cout, 9 * cpad).astype(jnp.bfloat16)


def _init_conv_block(key, cin, cout, *, bias=True):
    kw, kb = jax.random.split(key)
    std = (2.0 / (9 * cin)) ** 0.5               # He init, fan_in = 9*Cin
    w9 = jax.random.normal(kw, (9, cin, cout), jnp.float32) * std
    eps = 1e-5
    bn_scale = 1.0 / (1.0 + eps) ** 0.5          # gamma=1, running_var=1
    if bias:
        bound = 1.0 / (9 * cin) ** 0.5
        b = jax.random.uniform(kb, (cout,), jnp.float32, -bound, bound)
    else:
        b = jnp.zeros((cout,), jnp.float32)
    scale = jnp.full((cout,), bn_scale, jnp.float32)
    shift = (b * bn_scale).reshape(cout, 1)      # beta=0, running_mean=0
    return {"w": _pack_weight(w9, scale=scale), "shift": shift}


def init_detector(key, *, num_keypoints, in_channels, hidden_channels,
                  num_blocks, max_channels):
    keys = jax.random.split(key, 2 + 2 * num_blocks)
    enc_ch = [min(max_channels, hidden_channels * (2 ** i))
              for i in range(num_blocks + 1)]
    params = {
        "first": _init_conv_block(keys[0], in_channels, hidden_channels),
        "down": [_init_conv_block(keys[1 + i], enc_ch[i], enc_ch[i + 1])
                 for i in range(num_blocks)],
        "up": [],
    }
    for i in range(num_blocks):
        lvl = num_blocks - 1 - i
        cin = enc_ch[lvl + 1] + enc_ch[lvl]      # upsampled + skip concat
        params["up"].append(
            _init_conv_block(keys[1 + num_blocks + i], cin, enc_ch[lvl]))
    # last: Conv2d(hidden -> num_keypoints, 3x3, pad 1, bias=False), no BN/ReLU
    kstd = (2.0 / (9 * hidden_channels)) ** 0.5
    w_last = jax.random.normal(keys[-1], (9, hidden_channels, num_keypoints),
                               jnp.float32) * kstd
    params["last"] = {"w": _pack_weight(w_last)}
    return params


# ----------------------------------------------------------------------------
# Forward pass
# ----------------------------------------------------------------------------
def siarohin_keypoint_detector_forward(params, x_nchw):
    """x_nchw: (N, C, H, W) f32 -> [keypoints (N, K, 2), heatmap (N, K, H, W)]."""
    n, _, h, w = x_nchw.shape
    nb = len(params["down"])
    if (h % (2 ** nb)) or (w % (2 ** nb)):
        raise ValueError("H and W must be divisible by 2**num_blocks")

    x = jnp.transpose(x_nchw, (1, 0, 2, 3)).astype(jnp.bfloat16)  # (C, N, H, W)

    mask_cache = {}

    def conv_masks(hh, ww):
        if (hh, ww) not in mask_cache:
            mask_cache[(hh, ww)] = _conv_masks(n, hh, ww)
        return mask_cache[(hh, ww)]

    # first block (level 0); output stays in the flat lane layout
    featf = _conv_call(_flatten_cn(x), params["first"]["w"],
                       params["first"]["shift"], conv_masks(h, w),
                       width=w, relu=True)

    # U-Net encoder: conv -> 2x2 avgpool
    skips = [_unflatten_cn(featf, n, h, w)]                 # (C, N, h, w) per level
    cur_flat, cur_hw = featf, (h, w)
    for p in params["down"]:
        hh, ww = cur_hw
        yf = _conv_call(cur_flat, p["w"], p["shift"], conv_masks(hh, ww),
                        width=ww, relu=True)
        y4 = _unflatten_cn(yf, n, hh, ww)
        cc = y4.shape[0]
        y4 = y4.reshape(cc, n, hh // 2, 2, ww // 2, 2).mean(axis=(3, 5))
        cur_hw = (hh // 2, ww // 2)
        skips.append(y4)
        cur_flat = _flatten_cn(y4)
    # TODO(synk): fuse the 2x2 avgpool into the conv epilogue (strided lane select)
    # to save one HBM round trip of the activation per encoder level.

    # U-Net decoder: nearest 2x upsample -> skip concat -> conv
    if params["up"]:
        out4 = skips[-1]
        out_flat = None
        for i, p in enumerate(params["up"]):
            lvl = nb - 1 - i
            out4 = jnp.repeat(jnp.repeat(out4, 2, axis=2), 2, axis=3)
            skip = skips[lvl]
            hh, ww = skip.shape[2], skip.shape[3]
            # TODO(synk): feed upsampled + skip as two kernel inputs (taps written at
            # separate channel offsets) to avoid materializing this concat in HBM.
            cat = jnp.concatenate([out4, skip], axis=0)
            of = _conv_call(_flatten_cn(cat), p["w"], p["shift"],
                            conv_masks(hh, ww), width=ww, relu=True)
            if lvl > 0:
                out4 = _unflatten_cn(of, n, hh, ww)
            else:
                out_flat = of                                # level 0: stay flat
    else:
        out_flat = featf

    # fused last conv + softplus + spatial normalization + keypoint expectation
    heat3, keypoints = _head_call(out_flat, params["last"]["w"],
                                  _conv_masks(1, h, w), _coord_rows(h, w),
                                  n=n, width=w)
    k = heat3.shape[1]
    heatmap = heat3[:, :, w:w + h * w].reshape(n, k, h, w)   # (N, K, H, W) f32
    return [keypoints, heatmap]


# ----------------------------------------------------------------------------
if __name__ == "__main__":
    num_keypoints = 8
    in_channels = 3
    hidden_channels = 8
    num_blocks = 2
    max_channels = 32
    batch, height, width = 2, 16, 16

    key = jax.random.PRNGKey(0)
    pkey, xkey = jax.random.split(key)

    params = init_detector(
        pkey,
        num_keypoints=num_keypoints,
        in_channels=in_channels,
        hidden_channels=hidden_channels,
        num_blocks=num_blocks,
        max_channels=max_channels,
    )
    x = jax.random.normal(xkey, (batch, in_channels, height, width), jnp.float32)

    fwd = jax.jit(lambda inp: siarohin_keypoint_detector_forward(params, inp))
    keypoints, heatmap = fwd(x)
    jax.block_until_ready((keypoints, heatmap))

    assert keypoints.shape == (batch, num_keypoints, 2), keypoints.shape
    assert heatmap.shape == (batch, num_keypoints, height, width), heatmap.shape
    # heatmap must be a spatial probability distribution per keypoint
    sums = jnp.sum(heatmap.reshape(batch, num_keypoints, -1), axis=-1)
    assert bool(jnp.all(jnp.abs(sums - 1.0) < 1e-4))
    assert bool(jnp.all(heatmap >= 0.0))
    assert bool(jnp.all(jnp.isfinite(keypoints)))
    # keypoints are expectations over a [-1, 1] grid
    assert bool(jnp.all(jnp.abs(keypoints) <= 1.0 + 1e-5))

    print("KERNEL_OK")
</pallas_src>

<mosaic_0001>
module attributes {stable_mosaic.version = 11 : i64} {
  func.func @_conv3x3_kernel(%arg0: i32, %arg1: memref<16x768xbf16, #tpu.memory_space<vmem>>, %arg2: memref<8x144xbf16, #tpu.memory_space<vmem>>, %arg3: memref<8x1xf32, #tpu.memory_space<vmem>>, %arg4: memref<3x768xf32, #tpu.memory_space<vmem>>, %arg5: memref<8x768xbf16, #tpu.memory_space<vmem>>, %arg6: memref<144x768xbf16, #tpu.memory_space<vmem>>) attributes {dimension_semantics = [#tpu.dimension_semantics<arbitrary>], iteration_bounds = array<i64: 1>, scalar_prefetch = 0 : i64, scratch_operands = 1 : i64, tpu.core_type = #tpu.core_type<tc>, window_params = [{pipeline_mode = #tpu.pipeline_mode<synchronous>, transform_indices = @transform_0, window_bounds = array<i64: 16, 768>}, {pipeline_mode = #tpu.pipeline_mode<synchronous>, transform_indices = @transform_1, window_bounds = array<i64: 8, 144>}, {pipeline_mode = #tpu.pipeline_mode<synchronous>, transform_indices = @transform_2, window_bounds = array<i64: 8, 1>}, {pipeline_mode = #tpu.pipeline_mode<synchronous>, transform_indices = @transform_3, window_bounds = array<i64: 3, 768>}, {pipeline_mode = #tpu.pipeline_mode<synchronous>, transform_indices = @transform_4, window_bounds = array<i64: 8, 768>}]} {
    %c0 = arith.constant 0 : index
    %c0_0 = arith.constant 0 : index
    %0 = vector.load %arg1[%c0, %c0_0] : memref<16x768xbf16, #tpu.memory_space<vmem>>, vector<16x768xbf16>
    %1 = arith.extf %0 : vector<16x768xbf16> to vector<16x768xf32>
    %c0_1 = arith.constant 0 : index
    %c0_2 = arith.constant 0 : index
    %2 = vector.load %arg4[%c0_1, %c0_2] : memref<3x768xf32, #tpu.memory_space<vmem>>, vector<1x768xf32>
    %c1 = arith.constant 1 : index
    %c0_3 = arith.constant 0 : index
    %3 = vector.load %arg4[%c1, %c0_3] : memref<3x768xf32, #tpu.memory_space<vmem>>, vector<1x768xf32>
    %c2 = arith.constant 2 : index
    %c0_4 = arith.constant 0 : index
    %4 = vector.load %arg4[%c2, %c0_4] : memref<3x768xf32, #tpu.memory_space<vmem>>, vector<1x768xf32>
    %5 = vector.broadcast %2 : vector<1x768xf32> to vector<16x768xf32>
    %6 = arith.mulf %1, %5 : vector<16x768xf32>
    %7 = vector.broadcast %3 : vector<1x768xf32> to vector<16x768xf32>
    %8 = arith.mulf %1, %7 : vector<16x768xf32>
    %c17_i32 = arith.constant 17 : i32
    %9 = tpu.dynamic_rotate %6 by %c17_i32 dim 1 : vector<16x768xf32>, i32 -> vector<16x768xf32>
    %10 = arith.truncf %9 : vector<16x768xf32> to vector<16x768xbf16>
    %c0_5 = arith.constant 0 : index
    %c0_6 = arith.constant 0 : index
    %11 = vector.load %arg6[%c0_5, %c0_6] : memref<144x768xbf16, #tpu.memory_space<vmem>>, vector<16x768xbf16>
    tpu.vector_store %arg6[%c0_5, %c0_6], %10 {strides = array<i32>} : memref<144x768xbf16, #tpu.memory_space<vmem>>, vector<16x768xbf16>,
    %c16_i32 = arith.constant 16 : i32
    %12 = tpu.dynamic_rotate %1 by %c16_i32 dim 1 : vector<16x768xf32>, i32 -> vector<16x768xf32>
    %13 = arith.truncf %12 : vector<16x768xf32> to vector<16x768xbf16>
    %c16 = arith.constant 16 : index
    %c0_7 = arith.constant 0 : index
    %14 = vector.load %arg6[%c16, %c0_7] : memref<144x768xbf16, #tpu.memory_space<vmem>>, vector<16x768xbf16>
    tpu.vector_store %arg6[%c16, %c0_7], %13 {strides = array<i32>} : memref<144x768xbf16, #tpu.memory_space<vmem>>, vector<16x768xbf16>,
    %c15_i32 = arith.constant 15 : i32
    %15 = tpu.dynamic_rotate %8 by %c15_i32 dim 1 : vector<16x768xf32>, i32 -> vector<16x768xf32>
    %16 = arith.truncf %15 : vector<16x768xf32> to vector<16x768xbf16>
    %c32 = arith.constant 32 : index
    %c0_8 = arith.constant 0 : index
    %17 = vector.load %arg6[%c32, %c0_8] : memref<144x768xbf16, #tpu.memory_space<vmem>>, vector<16x768xbf16>
    tpu.vector_store %arg6[%c32, %c0_8], %16 {strides = array<i32>} : memref<144x768xbf16, #tpu.memory_space<vmem>>, vector<16x768xbf16>,
    %c1_i32 = arith.constant 1 : i32
    %18 = tpu.dynamic_rotate %6 by %c1_i32 dim 1 : vector<16x768xf32>, i32 -> vector<16x768xf32>
    %19 = arith.truncf %18 : vector<16x768xf32> to vector<16x768xbf16>
    %c48 = arith.constant 48 : index
    %c0_9 = arith.constant 0 : index
    %20 = vector.load %arg6[%c48, %c0_9] : memref<144x768xbf16, #tpu.memory_space<vmem>>, vector<16x768xbf16>
    tpu.vector_store %arg6[%c48, %c0_9], %19 {strides = array<i32>} : memref<144x768xbf16, #tpu.memory_space<vmem>>, vector<16x768xbf16>,
    %21 = arith.truncf %1 : vector<16x768xf32> to vector<16x768xbf16>
    %c64 = arith.constant 64 : index
    %c0_10 = arith.constant 0 : index
    %22 = vector.load %arg6[%c64, %c0_10] : memref<144x768xbf16, #tpu.memory_space<vmem>>, vector<16x768xbf16>
    tpu.vector_store %arg6[%c64, %c0_10], %21 {strides = array<i32>} : memref<144x768xbf16, #tpu.memory_space<vmem>>, vector<16x768xbf16>,
    %c767_i32 = arith.constant 767 : i32
    %23 = tpu.dynamic_rotate %8 by %c767_i32 dim 1 : vector<16x768xf32>, i32 -> vector<16x768xf32>
    %24 = arith.truncf %23 : vector<16x768xf32> to vector<16x768xbf16>
    %c80 = arith.constant 80 : index
    %c0_11 = arith.constant 0 : index
    %25 = vector.load %arg6[%c80, %c0_11] : memref<144x768xbf16, #tpu.memory_space<vmem>>, vector<16x768xbf16>
    tpu.vector_store %arg6[%c80, %c0_11], %24 {strides = array<i32>} : memref<144x768xbf16, #tpu.memory_space<vmem>>, vector<16x768xbf16>,
    %c753_i32 = arith.constant 753 : i32
    %26 = tpu.dynamic_rotate %6 by %c753_i32 dim 1 : vector<16x768xf32>, i32 -> vector<16x768xf32>
    %27 = arith.truncf %26 : vector<16x768xf32> to vector<16x768xbf16>
    %c96 = arith.constant 96 : index
    %c0_12 = arith.constant 0 : index
    %28 = vector.load %arg6[%c96, %c0_12] : memref<144x768xbf16, #tpu.memory_space<vmem>>, vector<16x768xbf16>
    tpu.vector_store %arg6[%c96, %c0_12], %27 {strides = array<i32>} : memref<144x768xbf16, #tpu.memory_space<vmem>>, vector<16x768xbf16>,
    %c752_i32 = arith.constant 752 : i32
    %29 = tpu.dynamic_rotate %1 by %c752_i32 dim 1 : vector<16x768xf32>, i32 -> vector<16x768xf32>
    %30 = arith.truncf %29 : vector<16x768xf32> to vector<16x768xbf16>
    %c112 = arith.constant 112 : index
    %c0_13 = arith.constant 0 : index
    %31 = vector.load %arg6[%c112, %c0_13] : memref<144x768xbf16, #tpu.memory_space<vmem>>, vector<16x768xbf16>
    tpu.vector_store %arg6[%c112, %c0_13], %30 {strides = array<i32>} : memref<144x768xbf16, #tpu.memory_space<vmem>>, vector<16x768xbf16>,
    %c751_i32 = arith.constant 751 : i32
    %32 = tpu.dynamic_rotate %8 by %c751_i32 dim 1 : vector<16x768xf32>, i32 -> vector<16x768xf32>
    %33 = arith.truncf %32 : vector<16x768xf32> to vector<16x768xbf16>
    %c128 = arith.constant 128 : index
    %c0_14 = arith.constant 0 : index
    %34 = vector.load %arg6[%c128, %c0_14] : memref<144x768xbf16, #tpu.memory_space<vmem>>, vector<16x768xbf16>
    tpu.vector_store %arg6[%c128, %c0_14], %33 {strides = array<i32>} : memref<144x768xbf16, #tpu.memory_space<vmem>>, vector<16x768xbf16>,
    %c0_15 = arith.constant 0 : index
    %c0_16 = arith.constant 0 : index
    %35 = vector.load %arg2[%c0_15, %c0_16] : memref<8x144xbf16, #tpu.memory_space<vmem>>, vector<8x144xbf16>
    %c0_17 = arith.constant 0 : index
    %c0_18 = arith.constant 0 : index
    %36 = vector.load %arg6[%c0_17, %c0_18] : memref<144x768xbf16, #tpu.memory_space<vmem>>, vector<144x768xbf16>
    %cst = arith.constant dense<0.000000e+00> : vector<8x768xf32>
    %37 = tpu.matmul %35, %36, %cst {dimension_numbers = #tpu.dot_dimension_numbers<[1], [0], [0], [1], [0, 0, 1, 1], [], []>} : vector<8x144xbf16>, vector<144x768xbf16>, vector<8x768xf32> -> vector<8x768xf32>
    %c0_19 = arith.constant 0 : index
    %c0_20 = arith.constant 0 : index
    %38 = vector.load %arg3[%c0_19, %c0_20] : memref<8x1xf32, #tpu.memory_space<vmem>>, vector<8x1xf32>
    %39 = vector.broadcast %38 : vector<8x1xf32> to vector<8x768xf32>
    %40 = arith.addf %37, %39 : vector<8x768xf32>
    %cst_21 = arith.constant 0.000000e+00 : f32
    %41 = vector.broadcast %cst_21 : f32 to vector<8x768xf32>
    %42 = arith.maximumf %40, %41 : vector<8x768xf32>
    %43 = vector.broadcast %4 : vector<1x768xf32> to vector<8x768xf32>
    %44 = arith.mulf %42, %43 : vector<8x768xf32>
    %45 = arith.truncf %44 : vector<8x768xf32> to vector<8x768xbf16>
    %c0_22 = arith.constant 0 : index
    %c0_23 = arith.constant 0 : index
    %46 = vector.load %arg5[%c0_22, %c0_23] : memref<8x768xbf16, #tpu.memory_space<vmem>>, vector<8x768xbf16>
    tpu.vector_store %arg5[%c0_22, %c0_23], %45 {strides = array<i32>} : memref<8x768xbf16, #tpu.memory_space<vmem>>, vector<8x768xbf16>,
    return
  }
  func.func @transform_0(%arg0: i32) -> (i32, i32) {
    %c0_i32 = arith.constant 0 : i32
    %c0_i32_0 = arith.constant 0 : i32
    %c0_i32_1 = arith.constant 0 : i32
    return %c0_i32, %c0_i32_0 : i32, i32
  }
  func.func @transform_1(%arg0: i32) -> (i32, i32) {
    %c0_i32 = arith.constant 0 : i32
    %c0_i32_0 = arith.constant 0 : i32
    %c0_i32_1 = arith.constant 0 : i32
    return %c0_i32, %c0_i32_0 : i32, i32
  }
  func.func @transform_2(%arg0: i32) -> (i32, i32) {
    %c0_i32 = arith.constant 0 : i32
    %c0_i32_0 = arith.constant 0 : i32
    %c0_i32_1 = arith.constant 0 : i32
    return %c0_i32, %c0_i32_0 : i32, i32
  }
  func.func @transform_3(%arg0: i32) -> (i32, i32) {
    %c0_i32 = arith.constant 0 : i32
    %c0_i32_0 = arith.constant 0 : i32
    %c0_i32_1 = arith.constant 0 : i32
    return %c0_i32, %c0_i32_0 : i32, i32
  }
  func.func @transform_4(%arg0: i32) -> (i32, i32) {
    %c0_i32 = arith.constant 0 : i32
    %c0_i32_0 = arith.constant 0 : i32
    %c0_i32_1 = arith.constant 0 : i32
    return %c0_i32, %c0_i32_0 : i32, i32
  }
}

module attributes {stable_mosaic.version = 11 : i64} {
  func.func @_conv3x3_kernel(%arg0: i32, %arg1: memref<16x768xbf16, #tpu.memory_space<vmem>>, %arg2: memref<16x144xbf16, #tpu.memory_space<vmem>>, %arg3: memref<16x1xf32, #tpu.memory_space<vmem>>, %arg4: memref<3x768xf32, #tpu.memory_space<vmem>>, %arg5: memref<16x768xbf16, #tpu.memory_space<vmem>>, %arg6: memref<144x768xbf16, #tpu.memory_space<vmem>>) attributes {dimension_semantics = [#tpu.dimension_semantics<arbitrary>], iteration_bounds = array<i64: 1>, scalar_prefetch = 0 : i64, scratch_operands = 1 : i64, tpu.core_type = #tpu.core_type<tc>, window_params = [{pipeline_mode = #tpu.pipeline_mode<synchronous>, transform_indices = @transform_0, window_bounds = array<i64: 16, 768>}, {pipeline_mode = #tpu.pipeline_mode<synchronous>, transform_indices = @transform_1, window_bounds = array<i64: 16, 144>}, {pipeline_mode = #tpu.pipeline_mode<synchronous>, transform_indices = @transform_2, window_bounds = array<i64: 16, 1>}, {pipeline_mode = #tpu.pipeline_mode<synchronous>, transform_indices = @transform_3, window_bounds = array<i64: 3, 768>}, {pipeline_mode = #tpu.pipeline_mode<synchronous>, transform_indices = @transform_4, window_bounds = array<i64: 16, 768>}]} {
    %c0 = arith.constant 0 : index
    %c0_0 = arith.constant 0 : index
    %0 = vector.load %arg1[%c0, %c0_0] : memref<16x768xbf16, #tpu.memory_space<vmem>>, vector<16x768xbf16>
    %1 = arith.extf %0 : vector<16x768xbf16> to vector<16x768xf32>
    %c0_1 = arith.constant 0 : index
    %c0_2 = arith.constant 0 : index
    %2 = vector.load %arg4[%c0_1, %c0_2] : memref<3x768xf32, #tpu.memory_space<vmem>>, vector<1x768xf32>
    %c1 = arith.constant 1 : index
    %c0_3 = arith.constant 0 : index
    %3 = vector.load %arg4[%c1, %c0_3] : memref<3x768xf32, #tpu.memory_space<vmem>>, vector<1x768xf32>
    %c2 = arith.constant 2 : index
    %c0_4 = arith.constant 0 : index
    %4 = vector.load %arg4[%c2, %c0_4] : memref<3x768xf32, #tpu.memory_space<vmem>>, vector<1x768xf32>
    %5 = vector.broadcast %2 : vector<1x768xf32> to vector<16x768xf32>
    %6 = arith.mulf %1, %5 : vector<16x768xf32>
    %7 = vector.broadcast %3 : vector<1x768xf32> to vector<16x768xf32>
    %8 = arith.mulf %1, %7 : vector<16x768xf32>
    %c17_i32 = arith.constant 17 : i32
    %9 = tpu.dynamic_rotate %6 by %c17_i32 dim 1 : vector<16x768xf32>, i32 -> vector<16x768xf32>
    %10 = arith.truncf %9 : vector<16x768xf32> to vector<16x768xbf16>
    %c0_5 = arith.constant 0 : index
    %c0_6 = arith.constant 0 : index
    %11 = vector.load %arg6[%c0_5, %c0_6] : memref<144x768xbf16, #tpu.memory_space<vmem>>, vector<16x768xbf16>
    tpu.vector_store %arg6[%c0_5, %c0_6], %10 {strides = array<i32>} : memref<144x768xbf16, #tpu.memory_space<vmem>>, vector<16x768xbf16>,
    %c16_i32 = arith.constant 16 : i32
    %12 = tpu.dynamic_rotate %1 by %c16_i32 dim 1 : vector<16x768xf32>, i32 -> vector<16x768xf32>
    %13 = arith.truncf %12 : vector<16x768xf32> to vector<16x768xbf16>
    %c16 = arith.constant 16 : index
    %c0_7 = arith.constant 0 : index
    %14 = vector.load %arg6[%c16, %c0_7] : memref<144x768xbf16, #tpu.memory_space<vmem>>, vector<16x768xbf16>
    tpu.vector_store %arg6[%c16, %c0_7], %13 {strides = array<i32>} : memref<144x768xbf16, #tpu.memory_space<vmem>>, vector<16x768xbf16>,
    %c15_i32 = arith.constant 15 : i32
    %15 = tpu.dynamic_rotate %8 by %c15_i32 dim 1 : vector<16x768xf32>, i32 -> vector<16x768xf32>
    %16 = arith.truncf %15 : vector<16x768xf32> to vector<16x768xbf16>
    %c32 = arith.constant 32 : index
    %c0_8 = arith.constant 0 : index
    %17 = vector.load %arg6[%c32, %c0_8] : memref<144x768xbf16, #tpu.memory_space<vmem>>, vector<16x768xbf16>
    tpu.vector_store %arg6[%c32, %c0_8], %16 {strides = array<i32>} : memref<144x768xbf16, #tpu.memory_space<vmem>>, vector<16x768xbf16>,
    %c1_i32 = arith.constant 1 : i32
    %18 = tpu.dynamic_rotate %6 by %c1_i32 dim 1 : vector<16x768xf32>, i32 -> vector<16x768xf32>
    %19 = arith.truncf %18 : vector<16x768xf32> to vector<16x768xbf16>
    %c48 = arith.constant 48 : index
    %c0_9 = arith.constant 0 : index
    %20 = vector.load %arg6[%c48, %c0_9] : memref<144x768xbf16, #tpu.memory_space<vmem>>, vector<16x768xbf16>
    tpu.vector_store %arg6[%c48, %c0_9], %19 {strides = array<i32>} : memref<144x768xbf16, #tpu.memory_space<vmem>>, vector<16x768xbf16>,
    %21 = arith.truncf %1 : vector<16x768xf32> to vector<16x768xbf16>
    %c64 = arith.constant 64 : index
    %c0_10 = arith.constant 0 : index
    %22 = vector.load %arg6[%c64, %c0_10] : memref<144x768xbf16, #tpu.memory_space<vmem>>, vector<16x768xbf16>
    tpu.vector_store %arg6[%c64, %c0_10], %21 {strides = array<i32>} : memref<144x768xbf16, #tpu.memory_space<vmem>>, vector<16x768xbf16>,
    %c767_i32 = arith.constant 767 : i32
    %23 = tpu.dynamic_rotate %8 by %c767_i32 dim 1 : vector<16x768xf32>, i32 -> vector<16x768xf32>
    %24 = arith.truncf %23 : vector<16x768xf32> to vector<16x768xbf16>
    %c80 = arith.constant 80 : index
    %c0_11 = arith.constant 0 : index
    %25 = vector.load %arg6[%c80, %c0_11] : memref<144x768xbf16, #tpu.memory_space<vmem>>, vector<16x768xbf16>
    tpu.vector_store %arg6[%c80, %c0_11], %24 {strides = array<i32>} : memref<144x768xbf16, #tpu.memory_space<vmem>>, vector<16x768xbf16>,
    %c753_i32 = arith.constant 753 : i32
    %26 = tpu.dynamic_rotate %6 by %c753_i32 dim 1 : vector<16x768xf32>, i32 -> vector<16x768xf32>
    %27 = arith.truncf %26 : vector<16x768xf32> to vector<16x768xbf16>
    %c96 = arith.constant 96 : index
    %c0_12 = arith.constant 0 : index
    %28 = vector.load %arg6[%c96, %c0_12] : memref<144x768xbf16, #tpu.memory_space<vmem>>, vector<16x768xbf16>
    tpu.vector_store %arg6[%c96, %c0_12], %27 {strides = array<i32>} : memref<144x768xbf16, #tpu.memory_space<vmem>>, vector<16x768xbf16>,
    %c752_i32 = arith.constant 752 : i32
    %29 = tpu.dynamic_rotate %1 by %c752_i32 dim 1 : vector<16x768xf32>, i32 -> vector<16x768xf32>
    %30 = arith.truncf %29 : vector<16x768xf32> to vector<16x768xbf16>
    %c112 = arith.constant 112 : index
    %c0_13 = arith.constant 0 : index
    %31 = vector.load %arg6[%c112, %c0_13] : memref<144x768xbf16, #tpu.memory_space<vmem>>, vector<16x768xbf16>
    tpu.vector_store %arg6[%c112, %c0_13], %30 {strides = array<i32>} : memref<144x768xbf16, #tpu.memory_space<vmem>>, vector<16x768xbf16>,
    %c751_i32 = arith.constant 751 : i32
    %32 = tpu.dynamic_rotate %8 by %c751_i32 dim 1 : vector<16x768xf32>, i32 -> vector<16x768xf32>
    %33 = arith.truncf %32 : vector<16x768xf32> to vector<16x768xbf16>
    %c128 = arith.constant 128 : index
    %c0_14 = arith.constant 0 : index
    %34 = vector.load %arg6[%c128, %c0_14] : memref<144x768xbf16, #tpu.memory_space<vmem>>, vector<16x768xbf16>
    tpu.vector_store %arg6[%c128, %c0_14], %33 {strides = array<i32>} : memref<144x768xbf16, #tpu.memory_space<vmem>>, vector<16x768xbf16>,
    %c0_15 = arith.constant 0 : index
    %c0_16 = arith.constant 0 : index
    %35 = vector.load %arg2[%c0_15, %c0_16] : memref<16x144xbf16, #tpu.memory_space<vmem>>, vector<16x144xbf16>
    %c0_17 = arith.constant 0 : index
    %c0_18 = arith.constant 0 : index
    %36 = vector.load %arg6[%c0_17, %c0_18] : memref<144x768xbf16, #tpu.memory_space<vmem>>, vector<144x768xbf16>
    %cst = arith.constant dense<0.000000e+00> : vector<16x768xf32>
    %37 = tpu.matmul %35, %36, %cst {dimension_numbers = #tpu.dot_dimension_numbers<[1], [0], [0], [1], [0, 0, 1, 1], [], []>} : vector<16x144xbf16>, vector<144x768xbf16>, vector<16x768xf32> -> vector<16x768xf32>
    %c0_19 = arith.constant 0 : index
    %c0_20 = arith.constant 0 : index
    %38 = vector.load %arg3[%c0_19, %c0_20] : memref<16x1xf32, #tpu.memory_space<vmem>>, vector<16x1xf32>
    %39 = vector.broadcast %38 : vector<16x1xf32> to vector<16x768xf32>
    %40 = arith.addf %37, %39 : vector<16x768xf32>
    %cst_21 = arith.constant 0.000000e+00 : f32
    %41 = vector.broadcast %cst_21 : f32 to vector<16x768xf32>
    %42 = arith.maximumf %40, %41 : vector<16x768xf32>
    %43 = vector.broadcast %4 : vector<1x768xf32> to vector<16x768xf32>
    %44 = arith.mulf %42, %43 : vector<16x768xf32>
    %45 = arith.truncf %44 : vector<16x768xf32> to vector<16x768xbf16>
    %c0_22 = arith.constant 0 : index
    %c0_23 = arith.constant 0 : index
    %46 = vector.load %arg5[%c0_22, %c0_23] : memref<16x768xbf16, #tpu.memory_space<vmem>>, vector<16x768xbf16>
    tpu.vector_store %arg5[%c0_22, %c0_23], %45 {strides = array<i32>} : memref<16x768xbf16, #tpu.memory_space<vmem>>, vector<16x768xbf16>,
    return
  }
  func.func @transform_0(%arg0: i32) -> (i32, i32) {
    %c0_i32 = arith.constant 0 : i32
    %c0_i32_0 = arith.constant 0 : i32
    %c0_i32_1 = arith.constant 0 : i32
    return %c0_i32, %c0_i32_0 : i32, i32
  }
  func.func @transform_1(%arg0: i32) -> (i32, i32) {
    %c0_i32 = arith.constant 0 : i32
    %c0_i32_0 = arith.constant 0 : i32
    %c0_i32_1 = arith.constant 0 : i32
    return %c0_i32, %c0_i32_0 : i32, i32
  }
  func.func @transform_2(%arg0: i32) -> (i32, i32) {
    %c0_i32 = arith.constant 0 : i32
    %c0_i32_0 = arith.constant 0 : i32
    %c0_i32_1 = arith.constant 0 : i32
    return %c0_i32, %c0_i32_0 : i32, i32
  }
  func.func @transform_3(%arg0: i32) -> (i32, i32) {
    %c0_i32 = arith.constant 0 : i32
    %c0_i32_0 = arith.constant 0 : i32
    %c0_i32_1 = arith.constant 0 : i32
    return %c0_i32, %c0_i32_0 : i32, i32
  }
  func.func @transform_4(%arg0: i32) -> (i32, i32) {
    %c0_i32 = arith.constant 0 : i32
    %c0_i32_0 = arith.constant 0 : i32
    %c0_i32_1 = arith.constant 0 : i32
    return %c0_i32, %c0_i32_0 : i32, i32
  }
}

module attributes {stable_mosaic.version = 11 : i64} {
  func.func @_conv3x3_kernel(%arg0: i32, %arg1: memref<16x256xbf16, #tpu.memory_space<vmem>>, %arg2: memref<32x144xbf16, #tpu.memory_space<vmem>>, %arg3: memref<32x1xf32, #tpu.memory_space<vmem>>, %arg4: memref<3x256xf32, #tpu.memory_space<vmem>>, %arg5: memref<32x256xbf16, #tpu.memory_space<vmem>>, %arg6: memref<144x256xbf16, #tpu.memory_space<vmem>>) attributes {dimension_semantics = [#tpu.dimension_semantics<arbitrary>], iteration_bounds = array<i64: 1>, scalar_prefetch = 0 : i64, scratch_operands = 1 : i64, tpu.core_type = #tpu.core_type<tc>, window_params = [{pipeline_mode = #tpu.pipeline_mode<synchronous>, transform_indices = @transform_0, window_bounds = array<i64: 16, 256>}, {pipeline_mode = #tpu.pipeline_mode<synchronous>, transform_indices = @transform_1, window_bounds = array<i64: 32, 144>}, {pipeline_mode = #tpu.pipeline_mode<synchronous>, transform_indices = @transform_2, window_bounds = array<i64: 32, 1>}, {pipeline_mode = #tpu.pipeline_mode<synchronous>, transform_indices = @transform_3, window_bounds = array<i64: 3, 256>}, {pipeline_mode = #tpu.pipeline_mode<synchronous>, transform_indices = @transform_4, window_bounds = array<i64: 32, 256>}]} {
    %c0 = arith.constant 0 : index
    %c0_0 = arith.constant 0 : index
    %0 = vector.load %arg1[%c0, %c0_0] : memref<16x256xbf16, #tpu.memory_space<vmem>>, vector<16x256xbf16>
    %1 = arith.extf %0 : vector<16x256xbf16> to vector<16x256xf32>
    %c0_1 = arith.constant 0 : index
    %c0_2 = arith.constant 0 : index
    %2 = vector.load %arg4[%c0_1, %c0_2] : memref<3x256xf32, #tpu.memory_space<vmem>>, vector<1x256xf32>
    %c1 = arith.constant 1 : index
    %c0_3 = arith.constant 0 : index
    %3 = vector.load %arg4[%c1, %c0_3] : memref<3x256xf32, #tpu.memory_space<vmem>>, vector<1x256xf32>
    %c2 = arith.constant 2 : index
    %c0_4 = arith.constant 0 : index
    %4 = vector.load %arg4[%c2, %c0_4] : memref<3x256xf32, #tpu.memory_space<vmem>>, vector<1x256xf32>
    %5 = vector.broadcast %2 : vector<1x256xf32> to vector<16x256xf32>
    %6 = arith.mulf %1, %5 : vector<16x256xf32>
    %7 = vector.broadcast %3 : vector<1x256xf32> to vector<16x256xf32>
    %8 = arith.mulf %1, %7 : vector<16x256xf32>
    %c9_i32 = arith.constant 9 : i32
    %9 = tpu.dynamic_rotate %6 by %c9_i32 dim 1 : vector<16x256xf32>, i32 -> vector<16x256xf32>
    %10 = arith.truncf %9 : vector<16x256xf32> to vector<16x256xbf16>
    %c0_5 = arith.constant 0 : index
    %c0_6 = arith.constant 0 : index
    %11 = vector.load %arg6[%c0_5, %c0_6] : memref<144x256xbf16, #tpu.memory_space<vmem>>, vector<16x256xbf16>
    tpu.vector_store %arg6[%c0_5, %c0_6], %10 {strides = array<i32>} : memref<144x256xbf16, #tpu.memory_space<vmem>>, vector<16x256xbf16>,
    %c8_i32 = arith.constant 8 : i32
    %12 = tpu.dynamic_rotate %1 by %c8_i32 dim 1 : vector<16x256xf32>, i32 -> vector<16x256xf32>
    %13 = arith.truncf %12 : vector<16x256xf32> to vector<16x256xbf16>
    %c16 = arith.constant 16 : index
    %c0_7 = arith.constant 0 : index
    %14 = vector.load %arg6[%c16, %c0_7] : memref<144x256xbf16, #tpu.memory_space<vmem>>, vector<16x256xbf16>
    tpu.vector_store %arg6[%c16, %c0_7], %13 {strides = array<i32>} : memref<144x256xbf16, #tpu.memory_space<vmem>>, vector<16x256xbf16>,
    %c7_i32 = arith.constant 7 : i32
    %15 = tpu.dynamic_rotate %8 by %c7_i32 dim 1 : vector<16x256xf32>, i32 -> vector<16x256xf32>
    %16 = arith.truncf %15 : vector<16x256xf32> to vector<16x256xbf16>
    %c32 = arith.constant 32 : index
    %c0_8 = arith.constant 0 : index
    %17 = vector.load %arg6[%c32, %c0_8] : memref<144x256xbf16, #tpu.memory_space<vmem>>, vector<16x256xbf16>
    tpu.vector_store %arg6[%c32, %c0_8], %16 {strides = array<i32>} : memref<144x256xbf16, #tpu.memory_space<vmem>>, vector<16x256xbf16>,
    %c1_i32 = arith.constant 1 : i32
    %18 = tpu.dynamic_rotate %6 by %c1_i32 dim 1 : vector<16x256xf32>, i32 -> vector<16x256xf32>
    %19 = arith.truncf %18 : vector<16x256xf32> to vector<16x256xbf16>
    %c48 = arith.constant 48 : index
    %c0_9 = arith.constant 0 : index
    %20 = vector.load %arg6[%c48, %c0_9] : memref<144x256xbf16, #tpu.memory_space<vmem>>, vector<16x256xbf16>
    tpu.vector_store %arg6[%c48, %c0_9], %19 {strides = array<i32>} : memref<144x256xbf16, #tpu.memory_space<vmem>>, vector<16x256xbf16>,
    %21 = arith.truncf %1 : vector<16x256xf32> to vector<16x256xbf16>
    %c64 = arith.constant 64 : index
    %c0_10 = arith.constant 0 : index
    %22 = vector.load %arg6[%c64, %c0_10] : memref<144x256xbf16, #tpu.memory_space<vmem>>, vector<16x256xbf16>
    tpu.vector_store %arg6[%c64, %c0_10], %21 {strides = array<i32>} : memref<144x256xbf16, #tpu.memory_space<vmem>>, vector<16x256xbf16>,
    %c255_i32 = arith.constant 255 : i32
    %23 = tpu.dynamic_rotate %8 by %c255_i32 dim 1 : vector<16x256xf32>, i32 -> vector<16x256xf32>
    %24 = arith.truncf %23 : vector<16x256xf32> to vector<16x256xbf16>
    %c80 = arith.constant 80 : index
    %c0_11 = arith.constant 0 : index
    %25 = vector.load %arg6[%c80, %c0_11] : memref<144x256xbf16, #tpu.memory_space<vmem>>, vector<16x256xbf16>
    tpu.vector_store %arg6[%c80, %c0_11], %24 {strides = array<i32>} : memref<144x256xbf16, #tpu.memory_space<vmem>>, vector<16x256xbf16>,
    %c249_i32 = arith.constant 249 : i32
    %26 = tpu.dynamic_rotate %6 by %c249_i32 dim 1 : vector<16x256xf32>, i32 -> vector<16x256xf32>
    %27 = arith.truncf %26 : vector<16x256xf32> to vector<16x256xbf16>
    %c96 = arith.constant 96 : index
    %c0_12 = arith.constant 0 : index
    %28 = vector.load %arg6[%c96, %c0_12] : memref<144x256xbf16, #tpu.memory_space<vmem>>, vector<16x256xbf16>
    tpu.vector_store %arg6[%c96, %c0_12], %27 {strides = array<i32>} : memref<144x256xbf16, #tpu.memory_space<vmem>>, vector<16x256xbf16>,
    %c248_i32 = arith.constant 248 : i32
    %29 = tpu.dynamic_rotate %1 by %c248_i32 dim 1 : vector<16x256xf32>, i32 -> vector<16x256xf32>
    %30 = arith.truncf %29 : vector<16x256xf32> to vector<16x256xbf16>
    %c112 = arith.constant 112 : index
    %c0_13 = arith.constant 0 : index
    %31 = vector.load %arg6[%c112, %c0_13] : memref<144x256xbf16, #tpu.memory_space<vmem>>, vector<16x256xbf16>
    tpu.vector_store %arg6[%c112, %c0_13], %30 {strides = array<i32>} : memref<144x256xbf16, #tpu.memory_space<vmem>>, vector<16x256xbf16>,
    %c247_i32 = arith.constant 247 : i32
    %32 = tpu.dynamic_rotate %8 by %c247_i32 dim 1 : vector<16x256xf32>, i32 -> vector<16x256xf32>
    %33 = arith.truncf %32 : vector<16x256xf32> to vector<16x256xbf16>
    %c128 = arith.constant 128 : index
    %c0_14 = arith.constant 0 : index
    %34 = vector.load %arg6[%c128, %c0_14] : memref<144x256xbf16, #tpu.memory_space<vmem>>, vector<16x256xbf16>
    tpu.vector_store %arg6[%c128, %c0_14], %33 {strides = array<i32>} : memref<144x256xbf16, #tpu.memory_space<vmem>>, vector<16x256xbf16>,
    %c0_15 = arith.constant 0 : index
    %c0_16 = arith.constant 0 : index
    %35 = vector.load %arg2[%c0_15, %c0_16] : memref<32x144xbf16, #tpu.memory_space<vmem>>, vector<32x144xbf16>
    %c0_17 = arith.constant 0 : index
    %c0_18 = arith.constant 0 : index
    %36 = vector.load %arg6[%c0_17, %c0_18] : memref<144x256xbf16, #tpu.memory_space<vmem>>, vector<144x256xbf16>
    %cst = arith.constant dense<0.000000e+00> : vector<32x256xf32>
    %37 = tpu.matmul %35, %36, %cst {dimension_numbers = #tpu.dot_dimension_numbers<[1], [0], [0], [1], [0, 0, 1, 1], [], []>} : vector<32x144xbf16>, vector<144x256xbf16>, vector<32x256xf32> -> vector<32x256xf32>
    %c0_19 = arith.constant 0 : index
    %c0_20 = arith.constant 0 : index
    %38 = vector.load %arg3[%c0_19, %c0_20] : memref<32x1xf32, #tpu.memory_space<vmem>>, vector<32x1xf32>
    %39 = vector.broadcast %38 : vector<32x1xf32> to vector<32x256xf32>
    %40 = arith.addf %37, %39 : vector<32x256xf32>
    %cst_21 = arith.constant 0.000000e+00 : f32
    %41 = vector.broadcast %cst_21 : f32 to vector<32x256xf32>
    %42 = arith.maximumf %40, %41 : vector<32x256xf32>
    %43 = vector.broadcast %4 : vector<1x256xf32> to vector<32x256xf32>
    %44 = arith.mulf %42, %43 : vector<32x256xf32>
    %45 = arith.truncf %44 : vector<32x256xf32> to vector<32x256xbf16>
    %c0_22 = arith.constant 0 : index
    %c0_23 = arith.constant 0 : index
    %46 = vector.load %arg5[%c0_22, %c0_23] : memref<32x256xbf16, #tpu.memory_space<vmem>>, vector<32x256xbf16>
    tpu.vector_store %arg5[%c0_22, %c0_23], %45 {strides = array<i32>} : memref<32x256xbf16, #tpu.memory_space<vmem>>, vector<32x256xbf16>,
    return
  }
  func.func @transform_0(%arg0: i32) -> (i32, i32) {
    %c0_i32 = arith.constant 0 : i32
    %c0_i32_0 = arith.constant 0 : i32
    %c0_i32_1 = arith.constant 0 : i32
    return %c0_i32, %c0_i32_0 : i32, i32
  }
  func.func @transform_1(%arg0: i32) -> (i32, i32) {
    %c0_i32 = arith.constant 0 : i32
    %c0_i32_0 = arith.constant 0 : i32
    %c0_i32_1 = arith.constant 0 : i32
    return %c0_i32, %c0_i32_0 : i32, i32
  }
  func.func @transform_2(%arg0: i32) -> (i32, i32) {
    %c0_i32 = arith.constant 0 : i32
    %c0_i32_0 = arith.constant 0 : i32
    %c0_i32_1 = arith.constant 0 : i32
    return %c0_i32, %c0_i32_0 : i32, i32
  }
  func.func @transform_3(%arg0: i32) -> (i32, i32) {
    %c0_i32 = arith.constant 0 : i32
    %c0_i32_0 = arith.constant 0 : i32
    %c0_i32_1 = arith.constant 0 : i32
    return %c0_i32, %c0_i32_0 : i32, i32
  }
  func.func @transform_4(%arg0: i32) -> (i32, i32) {
    %c0_i32 = arith.constant 0 : i32
    %c0_i32_0 = arith.constant 0 : i32
    %c0_i32_1 = arith.constant 0 : i32
    return %c0_i32, %c0_i32_0 : i32, i32
  }
}

module attributes {stable_mosaic.version = 11 : i64} {
  func.func @_conv3x3_kernel(%arg0: i32, %arg1: memref<48x256xbf16, #tpu.memory_space<vmem>>, %arg2: memref<16x432xbf16, #tpu.memory_space<vmem>>, %arg3: memref<16x1xf32, #tpu.memory_space<vmem>>, %arg4: memref<3x256xf32, #tpu.memory_space<vmem>>, %arg5: memref<16x256xbf16, #tpu.memory_space<vmem>>, %arg6: memref<432x256xbf16, #tpu.memory_space<vmem>>) attributes {dimension_semantics = [#tpu.dimension_semantics<arbitrary>], iteration_bounds = array<i64: 1>, scalar_prefetch = 0 : i64, scratch_operands = 1 : i64, tpu.core_type = #tpu.core_type<tc>, window_params = [{pipeline_mode = #tpu.pipeline_mode<synchronous>, transform_indices = @transform_0, window_bounds = array<i64: 48, 256>}, {pipeline_mode = #tpu.pipeline_mode<synchronous>, transform_indices = @transform_1, window_bounds = array<i64: 16, 432>}, {pipeline_mode = #tpu.pipeline_mode<synchronous>, transform_indices = @transform_2, window_bounds = array<i64: 16, 1>}, {pipeline_mode = #tpu.pipeline_mode<synchronous>, transform_indices = @transform_3, window_bounds = array<i64: 3, 256>}, {pipeline_mode = #tpu.pipeline_mode<synchronous>, transform_indices = @transform_4, window_bounds = array<i64: 16, 256>}]} {
    %c0 = arith.constant 0 : index
    %c0_0 = arith.constant 0 : index
    %0 = vector.load %arg1[%c0, %c0_0] : memref<48x256xbf16, #tpu.memory_space<vmem>>, vector<48x256xbf16>
    %1 = arith.extf %0 : vector<48x256xbf16> to vector<48x256xf32>
    %c0_1 = arith.constant 0 : index
    %c0_2 = arith.constant 0 : index
    %2 = vector.load %arg4[%c0_1, %c0_2] : memref<3x256xf32, #tpu.memory_space<vmem>>, vector<1x256xf32>
    %c1 = arith.constant 1 : index
    %c0_3 = arith.constant 0 : index
    %3 = vector.load %arg4[%c1, %c0_3] : memref<3x256xf32, #tpu.memory_space<vmem>>, vector<1x256xf32>
    %c2 = arith.constant 2 : index
    %c0_4 = arith.constant 0 : index
    %4 = vector.load %arg4[%c2, %c0_4] : memref<3x256xf32, #tpu.memory_space<vmem>>, vector<1x256xf32>
    %5 = vector.broadcast %2 : vector<1x256xf32> to vector<48x256xf32>
    %6 = arith.mulf %1, %5 : vector<48x256xf32>
    %7 = vector.broadcast %3 : vector<1x256xf32> to vector<48x256xf32>
    %8 = arith.mulf %1, %7 : vector<48x256xf32>
    %c9_i32 = arith.constant 9 : i32
    %9 = tpu.dynamic_rotate %6 by %c9_i32 dim 1 : vector<48x256xf32>, i32 -> vector<48x256xf32>
    %10 = arith.truncf %9 : vector<48x256xf32> to vector<48x256xbf16>
    %c0_5 = arith.constant 0 : index
    %c0_6 = arith.constant 0 : index
    %11 = vector.load %arg6[%c0_5, %c0_6] : memref<432x256xbf16, #tpu.memory_space<vmem>>, vector<48x256xbf16>
    tpu.vector_store %arg6[%c0_5, %c0_6], %10 {strides = array<i32>} : memref<432x256xbf16, #tpu.memory_space<vmem>>, vector<48x256xbf16>,
    %c8_i32 = arith.constant 8 : i32
    %12 = tpu.dynamic_rotate %1 by %c8_i32 dim 1 : vector<48x256xf32>, i32 -> vector<48x256xf32>
    %13 = arith.truncf %12 : vector<48x256xf32> to vector<48x256xbf16>
    %c48 = arith.constant 48 : index
    %c0_7 = arith.constant 0 : index
    %14 = vector.load %arg6[%c48, %c0_7] : memref<432x256xbf16, #tpu.memory_space<vmem>>, vector<48x256xbf16>
    tpu.vector_store %arg6[%c48, %c0_7], %13 {strides = array<i32>} : memref<432x256xbf16, #tpu.memory_space<vmem>>, vector<48x256xbf16>,
    %c7_i32 = arith.constant 7 : i32
    %15 = tpu.dynamic_rotate %8 by %c7_i32 dim 1 : vector<48x256xf32>, i32 -> vector<48x256xf32>
    %16 = arith.truncf %15 : vector<48x256xf32> to vector<48x256xbf16>
    %c96 = arith.constant 96 : index
    %c0_8 = arith.constant 0 : index
    %17 = vector.load %arg6[%c96, %c0_8] : memref<432x256xbf16, #tpu.memory_space<vmem>>, vector<48x256xbf16>
    tpu.vector_store %arg6[%c96, %c0_8], %16 {strides = array<i32>} : memref<432x256xbf16, #tpu.memory_space<vmem>>, vector<48x256xbf16>,
    %c1_i32 = arith.constant 1 : i32
    %18 = tpu.dynamic_rotate %6 by %c1_i32 dim 1 : vector<48x256xf32>, i32 -> vector<48x256xf32>
    %19 = arith.truncf %18 : vector<48x256xf32> to vector<48x256xbf16>
    %c144 = arith.constant 144 : index
    %c0_9 = arith.constant 0 : index
    %20 = vector.load %arg6[%c144, %c0_9] : memref<432x256xbf16, #tpu.memory_space<vmem>>, vector<48x256xbf16>
    tpu.vector_store %arg6[%c144, %c0_9], %19 {strides = array<i32>} : memref<432x256xbf16, #tpu.memory_space<vmem>>, vector<48x256xbf16>,
    %21 = arith.truncf %1 : vector<48x256xf32> to vector<48x256xbf16>
    %c192 = arith.constant 192 : index
    %c0_10 = arith.constant 0 : index
    %22 = vector.load %arg6[%c192, %c0_10] : memref<432x256xbf16, #tpu.memory_space<vmem>>, vector<48x256xbf16>
    tpu.vector_store %arg6[%c192, %c0_10], %21 {strides = array<i32>} : memref<432x256xbf16, #tpu.memory_space<vmem>>, vector<48x256xbf16>,
    %c255_i32 = arith.constant 255 : i32
    %23 = tpu.dynamic_rotate %8 by %c255_i32 dim 1 : vector<48x256xf32>, i32 -> vector<48x256xf32>
    %24 = arith.truncf %23 : vector<48x256xf32> to vector<48x256xbf16>
    %c240 = arith.constant 240 : index
    %c0_11 = arith.constant 0 : index
    %25 = vector.load %arg6[%c240, %c0_11] : memref<432x256xbf16, #tpu.memory_space<vmem>>, vector<48x256xbf16>
    tpu.vector_store %arg6[%c240, %c0_11], %24 {strides = array<i32>} : memref<432x256xbf16, #tpu.memory_space<vmem>>, vector<48x256xbf16>,
    %c249_i32 = arith.constant 249 : i32
    %26 = tpu.dynamic_rotate %6 by %c249_i32 dim 1 : vector<48x256xf32>, i32 -> vector<48x256xf32>
    %27 = arith.truncf %26 : vector<48x256xf32> to vector<48x256xbf16>
    %c288 = arith.constant 288 : index
    %c0_12 = arith.constant 0 : index
    %28 = vector.load %arg6[%c288, %c0_12] : memref<432x256xbf16, #tpu.memory_space<vmem>>, vector<48x256xbf16>
    tpu.vector_store %arg6[%c288, %c0_12], %27 {strides = array<i32>} : memref<432x256xbf16, #tpu.memory_space<vmem>>, vector<48x256xbf16>,
    %c248_i32 = arith.constant 248 : i32
    %29 = tpu.dynamic_rotate %1 by %c248_i32 dim 1 : vector<48x256xf32>, i32 -> vector<48x256xf32>
    %30 = arith.truncf %29 : vector<48x256xf32> to vector<48x256xbf16>
    %c336 = arith.constant 336 : index
    %c0_13 = arith.constant 0 : index
    %31 = vector.load %arg6[%c336, %c0_13] : memref<432x256xbf16, #tpu.memory_space<vmem>>, vector<48x256xbf16>
    tpu.vector_store %arg6[%c336, %c0_13], %30 {strides = array<i32>} : memref<432x256xbf16, #tpu.memory_space<vmem>>, vector<48x256xbf16>,
    %c247_i32 = arith.constant 247 : i32
    %32 = tpu.dynamic_rotate %8 by %c247_i32 dim 1 : vector<48x256xf32>, i32 -> vector<48x256xf32>
    %33 = arith.truncf %32 : vector<48x256xf32> to vector<48x256xbf16>
    %c384 = arith.constant 384 : index
    %c0_14 = arith.constant 0 : index
    %34 = vector.load %arg6[%c384, %c0_14] : memref<432x256xbf16, #tpu.memory_space<vmem>>, vector<48x256xbf16>
    tpu.vector_store %arg6[%c384, %c0_14], %33 {strides = array<i32>} : memref<432x256xbf16, #tpu.memory_space<vmem>>, vector<48x256xbf16>,
    %c0_15 = arith.constant 0 : index
    %c0_16 = arith.constant 0 : index
    %35 = vector.load %arg2[%c0_15, %c0_16] : memref<16x432xbf16, #tpu.memory_space<vmem>>, vector<16x432xbf16>
    %c0_17 = arith.constant 0 : index
    %c0_18 = arith.constant 0 : index
    %36 = vector.load %arg6[%c0_17, %c0_18] : memref<432x256xbf16, #tpu.memory_space<vmem>>, vector<432x256xbf16>
    %cst = arith.constant dense<0.000000e+00> : vector<16x256xf32>
    %37 = tpu.matmul %35, %36, %cst {dimension_numbers = #tpu.dot_dimension_numbers<[1], [0], [0], [1], [0, 0, 1, 1], [], []>} : vector<16x432xbf16>, vector<432x256xbf16>, vector<16x256xf32> -> vector<16x256xf32>
    %c0_19 = arith.constant 0 : index
    %c0_20 = arith.constant 0 : index
    %38 = vector.load %arg3[%c0_19, %c0_20] : memref<16x1xf32, #tpu.memory_space<vmem>>, vector<16x1xf32>
    %39 = vector.broadcast %38 : vector<16x1xf32> to vector<16x256xf32>
    %40 = arith.addf %37, %39 : vector<16x256xf32>
    %cst_21 = arith.constant 0.000000e+00 : f32
    %41 = vector.broadcast %cst_21 : f32 to vector<16x256xf32>
    %42 = arith.maximumf %40, %41 : vector<16x256xf32>
    %43 = vector.broadcast %4 : vector<1x256xf32> to vector<16x256xf32>
    %44 = arith.mulf %42, %43 : vector<16x256xf32>
    %45 = arith.truncf %44 : vector<16x256xf32> to vector<16x256xbf16>
    %c0_22 = arith.constant 0 : index
    %c0_23 = arith.constant 0 : index
    %46 = vector.load %arg5[%c0_22, %c0_23] : memref<16x256xbf16, #tpu.memory_space<vmem>>, vector<16x256xbf16>
    tpu.vector_store %arg5[%c0_22, %c0_23], %45 {strides = array<i32>} : memref<16x256xbf16, #tpu.memory_space<vmem>>, vector<16x256xbf16>,
    return
  }
  func.func @transform_0(%arg0: i32) -> (i32, i32) {
    %c0_i32 = arith.constant 0 : i32
    %c0_i32_0 = arith.constant 0 : i32
    %c0_i32_1 = arith.constant 0 : i32
    return %c0_i32, %c0_i32_0 : i32, i32
  }
  func.func @transform_1(%arg0: i32) -> (i32, i32) {
    %c0_i32 = arith.constant 0 : i32
    %c0_i32_0 = arith.constant 0 : i32
    %c0_i32_1 = arith.constant 0 : i32
    return %c0_i32, %c0_i32_0 : i32, i32
  }
  func.func @transform_2(%arg0: i32) -> (i32, i32) {
    %c0_i32 = arith.constant 0 : i32
    %c0_i32_0 = arith.constant 0 : i32
    %c0_i32_1 = arith.constant 0 : i32
    return %c0_i32, %c0_i32_0 : i32, i32
  }
  func.func @transform_3(%arg0: i32) -> (i32, i32) {
    %c0_i32 = arith.constant 0 : i32
    %c0_i32_0 = arith.constant 0 : i32
    %c0_i32_1 = arith.constant 0 : i32
    return %c0_i32, %c0_i32_0 : i32, i32
  }
  func.func @transform_4(%arg0: i32) -> (i32, i32) {
    %c0_i32 = arith.constant 0 : i32
    %c0_i32_0 = arith.constant 0 : i32
    %c0_i32_1 = arith.constant 0 : i32
    return %c0_i32, %c0_i32_0 : i32, i32
  }
}

module attributes {stable_mosaic.version = 11 : i64} {
  func.func @_conv3x3_kernel(%arg0: i32, %arg1: memref<32x768xbf16, #tpu.memory_space<vmem>>, %arg2: memref<8x288xbf16, #tpu.memory_space<vmem>>, %arg3: memref<8x1xf32, #tpu.memory_space<vmem>>, %arg4: memref<3x768xf32, #tpu.memory_space<vmem>>, %arg5: memref<8x768xbf16, #tpu.memory_space<vmem>>, %arg6: memref<288x768xbf16, #tpu.memory_space<vmem>>) attributes {dimension_semantics = [#tpu.dimension_semantics<arbitrary>], iteration_bounds = array<i64: 1>, scalar_prefetch = 0 : i64, scratch_operands = 1 : i64, tpu.core_type = #tpu.core_type<tc>, window_params = [{pipeline_mode = #tpu.pipeline_mode<synchronous>, transform_indices = @transform_0, window_bounds = array<i64: 32, 768>}, {pipeline_mode = #tpu.pipeline_mode<synchronous>, transform_indices = @transform_1, window_bounds = array<i64: 8, 288>}, {pipeline_mode = #tpu.pipeline_mode<synchronous>, transform_indices = @transform_2, window_bounds = array<i64: 8, 1>}, {pipeline_mode = #tpu.pipeline_mode<synchronous>, transform_indices = @transform_3, window_bounds = array<i64: 3, 768>}, {pipeline_mode = #tpu.pipeline_mode<synchronous>, transform_indices = @transform_4, window_bounds = array<i64: 8, 768>}]} {
    %c0 = arith.constant 0 : index
    %c0_0 = arith.constant 0 : index
    %0 = vector.load %arg1[%c0, %c0_0] : memref<32x768xbf16, #tpu.memory_space<vmem>>, vector<32x768xbf16>
    %1 = arith.extf %0 : vector<32x768xbf16> to vector<32x768xf32>
    %c0_1 = arith.constant 0 : index
    %c0_2 = arith.constant 0 : index
    %2 = vector.load %arg4[%c0_1, %c0_2] : memref<3x768xf32, #tpu.memory_space<vmem>>, vector<1x768xf32>
    %c1 = arith.constant 1 : index
    %c0_3 = arith.constant 0 : index
    %3 = vector.load %arg4[%c1, %c0_3] : memref<3x768xf32, #tpu.memory_space<vmem>>, vector<1x768xf32>
    %c2 = arith.constant 2 : index
    %c0_4 = arith.constant 0 : index
    %4 = vector.load %arg4[%c2, %c0_4] : memref<3x768xf32, #tpu.memory_space<vmem>>, vector<1x768xf32>
    %5 = vector.broadcast %2 : vector<1x768xf32> to vector<32x768xf32>
    %6 = arith.mulf %1, %5 : vector<32x768xf32>
    %7 = vector.broadcast %3 : vector<1x768xf32> to vector<32x768xf32>
    %8 = arith.mulf %1, %7 : vector<32x768xf32>
    %c17_i32 = arith.constant 17 : i32
    %9 = tpu.dynamic_rotate %6 by %c17_i32 dim 1 : vector<32x768xf32>, i32 -> vector<32x768xf32>
    %10 = arith.truncf %9 : vector<32x768xf32> to vector<32x768xbf16>
    %c0_5 = arith.constant 0 : index
    %c0_6 = arith.constant 0 : index
    %11 = vector.load %arg6[%c0_5, %c0_6] : memref<288x768xbf16, #tpu.memory_space<vmem>>, vector<32x768xbf16>
    tpu.vector_store %arg6[%c0_5, %c0_6], %10 {strides = array<i32>} : memref<288x768xbf16, #tpu.memory_space<vmem>>, vector<32x768xbf16>,
    %c16_i32 = arith.constant 16 : i32
    %12 = tpu.dynamic_rotate %1 by %c16_i32 dim 1 : vector<32x768xf32>, i32 -> vector<32x768xf32>
    %13 = arith.truncf %12 : vector<32x768xf32> to vector<32x768xbf16>
    %c32 = arith.constant 32 : index
    %c0_7 = arith.constant 0 : index
    %14 = vector.load %arg6[%c32, %c0_7] : memref<288x768xbf16, #tpu.memory_space<vmem>>, vector<32x768xbf16>
    tpu.vector_store %arg6[%c32, %c0_7], %13 {strides = array<i32>} : memref<288x768xbf16, #tpu.memory_space<vmem>>, vector<32x768xbf16>,
    %c15_i32 = arith.constant 15 : i32
    %15 = tpu.dynamic_rotate %8 by %c15_i32 dim 1 : vector<32x768xf32>, i32 -> vector<32x768xf32>
    %16 = arith.truncf %15 : vector<32x768xf32> to vector<32x768xbf16>
    %c64 = arith.constant 64 : index
    %c0_8 = arith.constant 0 : index
    %17 = vector.load %arg6[%c64, %c0_8] : memref<288x768xbf16, #tpu.memory_space<vmem>>, vector<32x768xbf16>
    tpu.vector_store %arg6[%c64, %c0_8], %16 {strides = array<i32>} : memref<288x768xbf16, #tpu.memory_space<vmem>>, vector<32x768xbf16>,
    %c1_i32 = arith.constant 1 : i32
    %18 = tpu.dynamic_rotate %6 by %c1_i32 dim 1 : vector<32x768xf32>, i32 -> vector<32x768xf32>
    %19 = arith.truncf %18 : vector<32x768xf32> to vector<32x768xbf16>
    %c96 = arith.constant 96 : index
    %c0_9 = arith.constant 0 : index
    %20 = vector.load %arg6[%c96, %c0_9] : memref<288x768xbf16, #tpu.memory_space<vmem>>, vector<32x768xbf16>
    tpu.vector_store %arg6[%c96, %c0_9], %19 {strides = array<i32>} : memref<288x768xbf16, #tpu.memory_space<vmem>>, vector<32x768xbf16>,
    %21 = arith.truncf %1 : vector<32x768xf32> to vector<32x768xbf16>
    %c128 = arith.constant 128 : index
    %c0_10 = arith.constant 0 : index
    %22 = vector.load %arg6[%c128, %c0_10] : memref<288x768xbf16, #tpu.memory_space<vmem>>, vector<32x768xbf16>
    tpu.vector_store %arg6[%c128, %c0_10], %21 {strides = array<i32>} : memref<288x768xbf16, #tpu.memory_space<vmem>>, vector<32x768xbf16>,
    %c767_i32 = arith.constant 767 : i32
    %23 = tpu.dynamic_rotate %8 by %c767_i32 dim 1 : vector<32x768xf32>, i32 -> vector<32x768xf32>
    %24 = arith.truncf %23 : vector<32x768xf32> to vector<32x768xbf16>
    %c160 = arith.constant 160 : index
    %c0_11 = arith.constant 0 : index
    %25 = vector.load %arg6[%c160, %c0_11] : memref<288x768xbf16, #tpu.memory_space<vmem>>, vector<32x768xbf16>
    tpu.vector_store %arg6[%c160, %c0_11], %24 {strides = array<i32>} : memref<288x768xbf16, #tpu.memory_space<vmem>>, vector<32x768xbf16>,
    %c753_i32 = arith.constant 753 : i32
    %26 = tpu.dynamic_rotate %6 by %c753_i32 dim 1 : vector<32x768xf32>, i32 -> vector<32x768xf32>
    %27 = arith.truncf %26 : vector<32x768xf32> to vector<32x768xbf16>
    %c192 = arith.constant 192 : index
    %c0_12 = arith.constant 0 : index
    %28 = vector.load %arg6[%c192, %c0_12] : memref<288x768xbf16, #tpu.memory_space<vmem>>, vector<32x768xbf16>
    tpu.vector_store %arg6[%c192, %c0_12], %27 {strides = array<i32>} : memref<288x768xbf16, #tpu.memory_space<vmem>>, vector<32x768xbf16>,
    %c752_i32 = arith.constant 752 : i32
    %29 = tpu.dynamic_rotate %1 by %c752_i32 dim 1 : vector<32x768xf32>, i32 -> vector<32x768xf32>
    %30 = arith.truncf %29 : vector<32x768xf32> to vector<32x768xbf16>
    %c224 = arith.constant 224 : index
    %c0_13 = arith.constant 0 : index
    %31 = vector.load %arg6[%c224, %c0_13] : memref<288x768xbf16, #tpu.memory_space<vmem>>, vector<32x768xbf16>
    tpu.vector_store %arg6[%c224, %c0_13], %30 {strides = array<i32>} : memref<288x768xbf16, #tpu.memory_space<vmem>>, vector<32x768xbf16>,
    %c751_i32 = arith.constant 751 : i32
    %32 = tpu.dynamic_rotate %8 by %c751_i32 dim 1 : vector<32x768xf32>, i32 -> vector<32x768xf32>
    %33 = arith.truncf %32 : vector<32x768xf32> to vector<32x768xbf16>
    %c256 = arith.constant 256 : index
    %c0_14 = arith.constant 0 : index
    %34 = vector.load %arg6[%c256, %c0_14] : memref<288x768xbf16, #tpu.memory_space<vmem>>, vector<32x768xbf16>
    tpu.vector_store %arg6[%c256, %c0_14], %33 {strides = array<i32>} : memref<288x768xbf16, #tpu.memory_space<vmem>>, vector<32x768xbf16>,
    %c0_15 = arith.constant 0 : index
    %c0_16 = arith.constant 0 : index
    %35 = vector.load %arg2[%c0_15, %c0_16] : memref<8x288xbf16, #tpu.memory_space<vmem>>, vector<8x288xbf16>
    %c0_17 = arith.constant 0 : index
    %c0_18 = arith.constant 0 : index
    %36 = vector.load %arg6[%c0_17, %c0_18] : memref<288x768xbf16, #tpu.memory_space<vmem>>, vector<288x768xbf16>
    %cst = arith.constant dense<0.000000e+00> : vector<8x768xf32>
    %37 = tpu.matmul %35, %36, %cst {dimension_numbers = #tpu.dot_dimension_numbers<[1], [0], [0], [1], [0, 0, 1, 1], [], []>} : vector<8x288xbf16>, vector<288x768xbf16>, vector<8x768xf32> -> vector<8x768xf32>
    %c0_19 = arith.constant 0 : index
    %c0_20 = arith.constant 0 : index
    %38 = vector.load %arg3[%c0_19, %c0_20] : memref<8x1xf32, #tpu.memory_space<vmem>>, vector<8x1xf32>
    %39 = vector.broadcast %38 : vector<8x1xf32> to vector<8x768xf32>
    %40 = arith.addf %37, %39 : vector<8x768xf32>
    %cst_21 = arith.constant 0.000000e+00 : f32
    %41 = vector.broadcast %cst_21 : f32 to vector<8x768xf32>
    %42 = arith.maximumf %40, %41 : vector<8x768xf32>
    %43 = vector.broadcast %4 : vector<1x768xf32> to vector<8x768xf32>
    %44 = arith.mulf %42, %43 : vector<8x768xf32>
    %45 = arith.truncf %44 : vector<8x768xf32> to vector<8x768xbf16>
    %c0_22 = arith.constant 0 : index
    %c0_23 = arith.constant 0 : index
    %46 = vector.load %arg5[%c0_22, %c0_23] : memref<8x768xbf16, #tpu.memory_space<vmem>>, vector<8x768xbf16>
    tpu.vector_store %arg5[%c0_22, %c0_23], %45 {strides = array<i32>} : memref<8x768xbf16, #tpu.memory_space<vmem>>, vector<8x768xbf16>,
    return
  }
  func.func @transform_0(%arg0: i32) -> (i32, i32) {
    %c0_i32 = arith.constant 0 : i32
    %c0_i32_0 = arith.constant 0 : i32
    %c0_i32_1 = arith.constant 0 : i32
    return %c0_i32, %c0_i32_0 : i32, i32
  }
  func.func @transform_1(%arg0: i32) -> (i32, i32) {
    %c0_i32 = arith.constant 0 : i32
    %c0_i32_0 = arith.constant 0 : i32
    %c0_i32_1 = arith.constant 0 : i32
    return %c0_i32, %c0_i32_0 : i32, i32
  }
  func.func @transform_2(%arg0: i32) -> (i32, i32) {
    %c0_i32 = arith.constant 0 : i32
    %c0_i32_0 = arith.constant 0 : i32
    %c0_i32_1 = arith.constant 0 : i32
    return %c0_i32, %c0_i32_0 : i32, i32
  }
  func.func @transform_3(%arg0: i32) -> (i32, i32) {
    %c0_i32 = arith.constant 0 : i32
    %c0_i32_0 = arith.constant 0 : i32
    %c0_i32_1 = arith.constant 0 : i32
    return %c0_i32, %c0_i32_0 : i32, i32
  }
  func.func @transform_4(%arg0: i32) -> (i32, i32) {
    %c0_i32 = arith.constant 0 : i32
    %c0_i32_0 = arith.constant 0 : i32
    %c0_i32_1 = arith.constant 0 : i32
    return %c0_i32, %c0_i32_0 : i32, i32
  }
}

module attributes {stable_mosaic.version = 11 : i64} {
  func.func @_head_kernel(%arg0: i32, %arg1: memref<16x384xbf16, #tpu.memory_space<vmem>>, %arg2: memref<8x144xbf16, #tpu.memory_space<vmem>>, %arg3: memref<3x384xf32, #tpu.memory_space<vmem>>, %arg4: memref<2x384xf32, #tpu.memory_space<vmem>>, %arg5: memref<1x8x384xf32, #tpu.memory_space<vmem>>, %arg6: memref<1x8x2xf32, #tpu.memory_space<vmem>>, %arg7: memref<144x384xbf16, #tpu.memory_space<vmem>>) attributes {dimension_semantics = [#tpu.dimension_semantics<parallel>], iteration_bounds = array<i64: 2>, scalar_prefetch = 0 : i64, scratch_operands = 1 : i64, tpu.core_type = #tpu.core_type<tc>, window_params = [{transform_indices = @transform_0, window_bounds = array<i64: 16, 384>}, {pipeline_mode = #tpu.pipeline_mode<synchronous>, transform_indices = @transform_1, window_bounds = array<i64: 8, 144>}, {pipeline_mode = #tpu.pipeline_mode<synchronous>, transform_indices = @transform_2, window_bounds = array<i64: 3, 384>}, {pipeline_mode = #tpu.pipeline_mode<synchronous>, transform_indices = @transform_3, window_bounds = array<i64: 2, 384>}, {transform_indices = @transform_4, window_bounds = array<i64: 1, 8, 384>}, {transform_indices = @transform_5, window_bounds = array<i64: 1, 8, 2>}]} {
    %c0 = arith.constant 0 : index
    %c0_0 = arith.constant 0 : index
    %0 = vector.load %arg1[%c0, %c0_0] : memref<16x384xbf16, #tpu.memory_space<vmem>>, vector<16x384xbf16>
    %1 = arith.extf %0 : vector<16x384xbf16> to vector<16x384xf32>
    %c0_1 = arith.constant 0 : index
    %c0_2 = arith.constant 0 : index
    %2 = vector.load %arg3[%c0_1, %c0_2] : memref<3x384xf32, #tpu.memory_space<vmem>>, vector<1x384xf32>
    %c1 = arith.constant 1 : index
    %c0_3 = arith.constant 0 : index
    %3 = vector.load %arg3[%c1, %c0_3] : memref<3x384xf32, #tpu.memory_space<vmem>>, vector<1x384xf32>
    %c2 = arith.constant 2 : index
    %c0_4 = arith.constant 0 : index
    %4 = vector.load %arg3[%c2, %c0_4] : memref<3x384xf32, #tpu.memory_space<vmem>>, vector<1x384xf32>
    %5 = vector.broadcast %2 : vector<1x384xf32> to vector<16x384xf32>
    %6 = arith.mulf %1, %5 : vector<16x384xf32>
    %7 = vector.broadcast %3 : vector<1x384xf32> to vector<16x384xf32>
    %8 = arith.mulf %1, %7 : vector<16x384xf32>
    %c17_i32 = arith.constant 17 : i32
    %9 = tpu.dynamic_rotate %6 by %c17_i32 dim 1 : vector<16x384xf32>, i32 -> vector<16x384xf32>
    %10 = arith.truncf %9 : vector<16x384xf32> to vector<16x384xbf16>
    %c0_5 = arith.constant 0 : index
    %c0_6 = arith.constant 0 : index
    %11 = vector.load %arg7[%c0_5, %c0_6] : memref<144x384xbf16, #tpu.memory_space<vmem>>, vector<16x384xbf16>
    tpu.vector_store %arg7[%c0_5, %c0_6], %10 {strides = array<i32>} : memref<144x384xbf16, #tpu.memory_space<vmem>>, vector<16x384xbf16>,
    %c16_i32 = arith.constant 16 : i32
    %12 = tpu.dynamic_rotate %1 by %c16_i32 dim 1 : vector<16x384xf32>, i32 -> vector<16x384xf32>
    %13 = arith.truncf %12 : vector<16x384xf32> to vector<16x384xbf16>
    %c16 = arith.constant 16 : index
    %c0_7 = arith.constant 0 : index
    %14 = vector.load %arg7[%c16, %c0_7] : memref<144x384xbf16, #tpu.memory_space<vmem>>, vector<16x384xbf16>
    tpu.vector_store %arg7[%c16, %c0_7], %13 {strides = array<i32>} : memref<144x384xbf16, #tpu.memory_space<vmem>>, vector<16x384xbf16>,
    %c15_i32 = arith.constant 15 : i32
    %15 = tpu.dynamic_rotate %8 by %c15_i32 dim 1 : vector<16x384xf32>, i32 -> vector<16x384xf32>
    %16 = arith.truncf %15 : vector<16x384xf32> to vector<16x384xbf16>
    %c32 = arith.constant 32 : index
    %c0_8 = arith.constant 0 : index
    %17 = vector.load %arg7[%c32, %c0_8] : memref<144x384xbf16, #tpu.memory_space<vmem>>, vector<16x384xbf16>
    tpu.vector_store %arg7[%c32, %c0_8], %16 {strides = array<i32>} : memref<144x384xbf16, #tpu.memory_space<vmem>>, vector<16x384xbf16>,
    %c1_i32 = arith.constant 1 : i32
    %18 = tpu.dynamic_rotate %6 by %c1_i32 dim 1 : vector<16x384xf32>, i32 -> vector<16x384xf32>
    %19 = arith.truncf %18 : vector<16x384xf32> to vector<16x384xbf16>
    %c48 = arith.constant 48 : index
    %c0_9 = arith.constant 0 : index
    %20 = vector.load %arg7[%c48, %c0_9] : memref<144x384xbf16, #tpu.memory_space<vmem>>, vector<16x384xbf16>
    tpu.vector_store %arg7[%c48, %c0_9], %19 {strides = array<i32>} : memref<144x384xbf16, #tpu.memory_space<vmem>>, vector<16x384xbf16>,
    %21 = arith.truncf %1 : vector<16x384xf32> to vector<16x384xbf16>
    %c64 = arith.constant 64 : index
    %c0_10 = arith.constant 0 : index
    %22 = vector.load %arg7[%c64, %c0_10] : memref<144x384xbf16, #tpu.memory_space<vmem>>, vector<16x384xbf16>
    tpu.vector_store %arg7[%c64, %c0_10], %21 {strides = array<i32>} : memref<144x384xbf16, #tpu.memory_space<vmem>>, vector<16x384xbf16>,
    %c383_i32 = arith.constant 383 : i32
    %23 = tpu.dynamic_rotate %8 by %c383_i32 dim 1 : vector<16x384xf32>, i32 -> vector<16x384xf32>
    %24 = arith.truncf %23 : vector<16x384xf32> to vector<16x384xbf16>
    %c80 = arith.constant 80 : index
    %c0_11 = arith.constant 0 : index
    %25 = vector.load %arg7[%c80, %c0_11] : memref<144x384xbf16, #tpu.memory_space<vmem>>, vector<16x384xbf16>
    tpu.vector_store %arg7[%c80, %c0_11], %24 {strides = array<i32>} : memref<144x384xbf16, #tpu.memory_space<vmem>>, vector<16x384xbf16>,
    %c369_i32 = arith.constant 369 : i32
    %26 = tpu.dynamic_rotate %6 by %c369_i32 dim 1 : vector<16x384xf32>, i32 -> vector<16x384xf32>
    %27 = arith.truncf %26 : vector<16x384xf32> to vector<16x384xbf16>
    %c96 = arith.constant 96 : index
    %c0_12 = arith.constant 0 : index
    %28 = vector.load %arg7[%c96, %c0_12] : memref<144x384xbf16, #tpu.memory_space<vmem>>, vector<16x384xbf16>
    tpu.vector_store %arg7[%c96, %c0_12], %27 {strides = array<i32>} : memref<144x384xbf16, #tpu.memory_space<vmem>>, vector<16x384xbf16>,
    %c368_i32 = arith.constant 368 : i32
    %29 = tpu.dynamic_rotate %1 by %c368_i32 dim 1 : vector<16x384xf32>, i32 -> vector<16x384xf32>
    %30 = arith.truncf %29 : vector<16x384xf32> to vector<16x384xbf16>
    %c112 = arith.constant 112 : index
    %c0_13 = arith.constant 0 : index
    %31 = vector.load %arg7[%c112, %c0_13] : memref<144x384xbf16, #tpu.memory_space<vmem>>, vector<16x384xbf16>
    tpu.vector_store %arg7[%c112, %c0_13], %30 {strides = array<i32>} : memref<144x384xbf16, #tpu.memory_space<vmem>>, vector<16x384xbf16>,
    %c367_i32 = arith.constant 367 : i32
    %32 = tpu.dynamic_rotate %8 by %c367_i32 dim 1 : vector<16x384xf32>, i32 -> vector<16x384xf32>
    %33 = arith.truncf %32 : vector<16x384xf32> to vector<16x384xbf16>
    %c128 = arith.constant 128 : index
    %c0_14 = arith.constant 0 : index
    %34 = vector.load %arg7[%c128, %c0_14] : memref<144x384xbf16, #tpu.memory_space<vmem>>, vector<16x384xbf16>
    tpu.vector_store %arg7[%c128, %c0_14], %33 {strides = array<i32>} : memref<144x384xbf16, #tpu.memory_space<vmem>>, vector<16x384xbf16>,
    %c0_15 = arith.constant 0 : index
    %c0_16 = arith.constant 0 : index
    %35 = vector.load %arg2[%c0_15, %c0_16] : memref<8x144xbf16, #tpu.memory_space<vmem>>, vector<8x144xbf16>
    %c0_17 = arith.constant 0 : index
    %c0_18 = arith.constant 0 : index
    %36 = vector.load %arg7[%c0_17, %c0_18] : memref<144x384xbf16, #tpu.memory_space<vmem>>, vector<144x384xbf16>
    %cst = arith.constant dense<0.000000e+00> : vector<8x384xf32>
    %37 = tpu.matmul %35, %36, %cst {dimension_numbers = #tpu.dot_dimension_numbers<[1], [0], [0], [1], [0, 0, 1, 1], [], []>} : vector<8x144xbf16>, vector<144x384xbf16>, vector<8x384xf32> -> vector<8x384xf32>
    %cst_19 = arith.constant 2.000000e+01 : f32
    %38 = vector.broadcast %cst_19 : f32 to vector<8x384xf32>
    %39 = arith.cmpf ogt, %37, %38 : vector<8x384xf32>
    %cst_20 = arith.constant 2.000000e+01 : f32
    %40 = vector.broadcast %cst_20 : f32 to vector<8x384xf32>
    %41 = arith.minimumf %37, %40 : vector<8x384xf32>
    %42 = math.exp %41 : vector<8x384xf32>
    %43 = math.log1p %42 : vector<8x384xf32>
    %44 = arith.select %39, %37, %43 : vector<8x384xi1>, vector<8x384xf32>
    %45 = vector.broadcast %4 : vector<1x384xf32> to vector<8x384xf32>
    %46 = arith.mulf %44, %45 : vector<8x384xf32>
    %cst_21 = arith.constant dense<0.000000e+00> : vector<8xf32>
    %47 = vector.multi_reduction <add>, %46, %cst_21 [1] : vector<8x384xf32> to vector<8xf32>
    %48 = vector.shape_cast %47 : vector<8xf32> to vector<8x1xf32>
    %49 = tpu.reciprocal %48 : vector<8x1xf32> -> vector<8x1xf32>
    %50 = vector.broadcast %49 : vector<8x1xf32> to vector<8x384xf32>
    %51 = arith.mulf %46, %50 : vector<8x384xf32>
    %c0_22 = arith.constant 0 : index
    %c0_23 = arith.constant 0 : index
    %c0_24 = arith.constant 0 : index
    %52 = vector.load %arg5[%c0_22, %c0_23, %c0_24] : memref<1x8x384xf32, #tpu.memory_space<vmem>>, vector<1x8x384xf32>
    %53 = vector.shape_cast %52 : vector<1x8x384xf32> to vector<8x384xf32>
    %54 = vector.shape_cast %51 : vector<8x384xf32> to vector<1x8x384xf32>
    tpu.vector_store %arg5[%c0_22, %c0_23, %c0_24], %54 {strides = array<i32>} : memref<1x8x384xf32, #tpu.memory_space<vmem>>, vector<1x8x384xf32>,
    %c0_25 = arith.constant 0 : index
    %c0_26 = arith.constant 0 : index
    %55 = vector.load %arg4[%c0_25, %c0_26] : memref<2x384xf32, #tpu.memory_space<vmem>>, vector<1x384xf32>
    %c1_27 = arith.constant 1 : index
    %c0_28 = arith.constant 0 : index
    %56 = vector.load %arg4[%c1_27, %c0_28] : memref<2x384xf32, #tpu.memory_space<vmem>>, vector<1x384xf32>
    %57 = vector.broadcast %55 : vector<1x384xf32> to vector<8x384xf32>
    %58 = arith.mulf %51, %57 : vector<8x384xf32>
    %cst_29 = arith.constant dense<0.000000e+00> : vector<8xf32>
    %59 = vector.multi_reduction <add>, %58, %cst_29 [1] : vector<8x384xf32> to vector<8xf32>
    %60 = vector.shape_cast %59 : vector<8xf32> to vector<8x1xf32>
    %61 = vector.broadcast %56 : vector<1x384xf32> to vector<8x384xf32>
    %62 = arith.mulf %51, %61 : vector<8x384xf32>
    %cst_30 = arith.constant dense<0.000000e+00> : vector<8xf32>
    %63 = vector.multi_reduction <add>, %62, %cst_30 [1] : vector<8x384xf32> to vector<8xf32>
    %64 = vector.shape_cast %63 : vector<8xf32> to vector<8x1xf32>
    %65 = tpu.concatenate %60, %64 in 1 : vector<8x1xf32>, vector<8x1xf32> -> vector<8x2xf32>
    %c0_31 = arith.constant 0 : index
    %c0_32 = arith.constant 0 : index
    %c0_33 = arith.constant 0 : index
    %66 = vector.load %arg6[%c0_31, %c0_32, %c0_33] : memref<1x8x2xf32, #tpu.memory_space<vmem>>, vector<1x8x2xf32>
    %67 = vector.shape_cast %66 : vector<1x8x2xf32> to vector<8x2xf32>
    %68 = vector.shape_cast %65 : vector<8x2xf32> to vector<1x8x2xf32>
    tpu.vector_store %arg6[%c0_31, %c0_32, %c0_33], %68 {strides = array<i32>} : memref<1x8x2xf32, #tpu.memory_space<vmem>>, vector<1x8x2xf32>,
    return
  }
  func.func @transform_0(%arg0: i32) -> (i32, i32) {
    %c0_i32 = arith.constant 0 : i32
    %c0_i32_0 = arith.constant 0 : i32
    return %c0_i32, %arg0 : i32, i32
  }
  func.func @transform_1(%arg0: i32) -> (i32, i32) {
    %c0_i32 = arith.constant 0 : i32
    %c0_i32_0 = arith.constant 0 : i32
    %c0_i32_1 = arith.constant 0 : i32
    return %c0_i32, %c0_i32_0 : i32, i32
  }
  func.func @transform_2(%arg0: i32) -> (i32, i32) {
    %c0_i32 = arith.constant 0 : i32
    %c0_i32_0 = arith.constant 0 : i32
    %c0_i32_1 = arith.constant 0 : i32
    return %c0_i32, %c0_i32_0 : i32, i32
  }
  func.func @transform_3(%arg0: i32) -> (i32, i32) {
    %c0_i32 = arith.constant 0 : i32
    %c0_i32_0 = arith.constant 0 : i32
    %c0_i32_1 = arith.constant 0 : i32
    return %c0_i32, %c0_i32_0 : i32, i32
  }
  func.func @transform_4(%arg0: i32) -> (i32, i32, i32) {
    %c0_i32 = arith.constant 0 : i32
    %c0_i32_0 = arith.constant 0 : i32
    %c0_i32_1 = arith.constant 0 : i32
    return %arg0, %c0_i32, %c0_i32_0 : i32, i32, i32
  }
  func.func @transform_5(%arg0: i32) -> (i32, i32, i32) {
    %c0_i32 = arith.constant 0 : i32
    %c0_i32_0 = arith.constant 0 : i32
    %c0_i32_1 = arith.constant 0 : i32
    return %arg0, %c0_i32, %c0_i32_0 : i32, i32, i32
  }
}

</mosaic_0001>

<bundles_post_ra>
// kernel: _lambda_.6
= control target key start
LH: loop header
LB: loop body
LE: loop exit
PB: predicated region body
PF: predicated region fallthrough
CT: control target
= control target key end

     0   :  { %s1552_s29 = smov 112   ;;  %s1553_s30 = smov 16   ;;  %vm828_vm7 = vcmask 130048   ;;  %s2212_s0 = inlined_call_operand.vmem [shape: bf16[16,768], index: 0, kind: input, shape index: {}]   ;;  %s2213_s3 = inlined_call_operand.vmem [shape: f32[3,768], index: 3, kind: input, shape index: {}]   ;;  %s2214_s1 = inlined_call_operand.vmem [shape: bf16[8,144], index: 1, kind: input, shape index: {}]   ;;  %s2215_s2 = inlined_call_operand.vmem [shape: f32[8,1], index: 2, kind: input, shape index: {}]   ;;  %s2216_s4 = inlined_call_operand.vmem [shape: bf16[8,768], index: 4, kind: output, shape index: {}]  }
   0x1   :  { %v20_v0 = vld [vmem:[%s2212_s0 + $0x10] sm:$0xff]  ;;  %v23_v1 = vld [vmem:[%s2212_s0 + $0x28] sm:$0xff]  ;;  %v22_v7 = vld [vmem:[%s2212_s0 + $0x20] sm:$0xff]  ;;  %s1554_s7 = smov 113   ;;  %s1555_s8 = smov 111  }
   0x2   :  { %v36_v2 = vld [vmem:[%s2213_s3] ss:$4 sm:$0x3f]  ;;  %v1594_v3 = vunpack.c.l.bf16 %v20_v0  ;;  %v1596_v4 = vunpack.c.l.bf16 %v23_v1  ;;  %291 = vst [vmem:[#allocation2 + $0xd0] sm:$0xff] %v20_v0  ;;  %v1609_v11 = vunpack.c.l.bf16 %v22_v7  ;;  %v21_v12 = vld [vmem:[%s2212_s0 + $0x18] sm:$0xff]  ;;  %v1616_v18 = vunpack.c.h.bf16 %v20_v0  ;;  %s1556_s9 = smov 127  }
   0x3   :  { %v46_v5 = vperm.slane %v36_v2, 4  ;;  %v19_v6 = vld [vmem:[%s2212_s0 + $0x8] sm:$0xff]  ;;  %v44_v8 = vperm.slane %v36_v2, 2  ;;  %v18_v9 = vld [vmem:[%s2212_s0] sm:$0xff]  ;;  %294 = vst [vmem:[#allocation2 + $0xe8] sm:$0xff] %v23_v1  ;;  %v42_v14 = vperm.slane %v36_v2, 0  ;;  %v30_v17 = vunpack.c.l.bf16 %v21_v12 }
   0x4   :  { %v1607_v10 = vunpack.c.l.bf16 %v19_v6  ;;  %v24_v13 = vunpack.c.l.bf16 %v18_v9  ;;  %290 = vst [vmem:[#allocation2 + $0xc8] sm:$0xff] %v19_v6  ;;  %v1620_v22 = vunpack.c.h.bf16 %v23_v1  ;;  %v47_v25 = vperm.slane %v36_v2, 5  ;;  %s1551_s0 = smov 17   ;;  %v1646_v46 = vld [vmem:[%s2213_s3 + $0x1] ss:$4 sm:$0x3f] }
   0x5   :  { %v58_v15 = vmul.f32 %v46_v5, %v1594_v3  ;;  %v64_v16 = vmul.f32 %v46_v5, %v1596_v4  ;;  %v62_v20 = vmul.f32 %v44_v8, %v1609_v11  ;;  %293 = vst [vmem:[#allocation2 + $0xe0] sm:$0xff] %v22_v7  ;;  %v60_v24 = vmul.f32 %v42_v14, %v30_v17  ;;  %s1557_s10 = smov 1   ;;  %s1558_s11 = smov 15  }
   0x6   :  { %v56_v19 = vmul.f32 %v44_v8, %v1607_v10  ;;  %v54_v21 = vmul.f32 %v42_v14, %v24_v13  ;;  %289 = vst [vmem:[#allocation2 + $0xc0] sm:$0xff] %v18_v9  ;;  %v1624_v26 = vunpack.c.h.bf16 %v19_v6  ;;  %v33_v28 = vunpack.c.h.bf16 %v22_v7 }
   0x7   :  { %v1622_v23 = vpack.i.bf16 %v64_v16, %v58_v15  ;;  %292 = vst [vmem:[#allocation2 + $0xd8] sm:$0xff] %v21_v12  ;;  %v45_v29 = vperm.slane %v36_v2, 3  ;;  %v25_v30 = vunpack.c.h.bf16 %v18_v9  ;;  %v59_v32 = vmul.f32 %v47_v25, %v1616_v18 }
   0x8   :  { %v1626_v27 = vpack.i.bf16 %v62_v20, %v56_v19  ;;  %v1629_v31 = vpack.i.bf16 %v60_v24, %v54_v21  ;;  %v65_v33 = vmul.f32 %v47_v25, %v1620_v22  ;;  %v31_v34 = vunpack.c.h.bf16 %v21_v12 }
   0x9   :  { %1331 = vrot.lane.b32.xlu2 %v1622_v23, %s1551_s0  ;;  %v57_v35 = vmul.f32 %v45_v29, %v1624_v26  ;;  %v63_v36 = vmul.f32 %v45_v29, %v33_v28  ;;  %v43_v37 = vperm.slane %v36_v2, 1  ;;  %v1350_v43 = vpack.i.bf16 %v1609_v11, %v1607_v10 }
   0xa   :  { %1321 = vrot.lane.b32.xlu1 %v1626_v27, %s1551_s0  ;;  %1311 = vrot.lane.b32.xlu0 %v1629_v31, %s1551_s0  ;;  %v1636_v40 = vpack.i.bf16 %v65_v33, %v59_v32  ;;  %v1345_v44 = vpack.i.bf16 %v31_v34, %v25_v30  ;;  %v1340_v45 = vpack.i.bf16 %v30_v17, %v24_v13  ;;  %v67_v47 = vperm.slane %v1646_v46, 0 }
   0xb   :  { %v55_v38 = vmul.f32 %v43_v37, %v25_v30  ;;  %v61_v39 = vmul.f32 %v43_v37, %v31_v34  ;;  %v1325_v41 = vpack.i.bf16 %v63_v36, %v57_v35  ;;  %v1652_v48 = vpack.i.bf16 %v1596_v4, %v1594_v3 }
   0xc   :  { %v1355_v49 = vpack.i.bf16 %v33_v28, %v1624_v26  ;;  %v79_v50 = vmul.f32 %v67_v47, %v24_v13  ;;  %v85_v51 = vmul.f32 %v67_v47, %v30_v17  ;;  %v69_v53 = vperm.slane %v1646_v46, 2 }
   0xd   :  { %v1315_v42 = vpack.i.bf16 %v61_v39, %v55_v38  ;;  %v68_v54 = vperm.slane %v1646_v46, 1  ;;  %v71_v60 = vperm.slane %v1646_v46, 4  ;;  %v70_v62 = vperm.slane %v1646_v46, 3 }
   0xe   :  { %v1380_v52 = vpack.i.bf16 %v85_v51, %v79_v50  ;;  %v81_v55 = vmul.f32 %v69_v53, %v1607_v10  ;;  %v87_v56 = vmul.f32 %v69_v53, %v1609_v11  ;;  %v72_v7 = vperm.slane %v1646_v46, 5 }
   0xf   :  { %v80_v57 = vmul.f32 %v68_v54, %v25_v30  ;;  %v86_v58 = vmul.f32 %v68_v54, %v31_v34  ;;  %v83_v63 = vmul.f32 %v71_v60, %v1594_v3  ;;  %v89_v0 = vmul.f32 %v71_v60, %v1596_v4 }
  0x10   :  { %v1395_v59 = vpack.i.bf16 %v87_v56, %v81_v55  ;;  %v82_v1 = vmul.f32 %v70_v62, %v1624_v26  ;;  %v88_v2 = vmul.f32 %v70_v62, %v33_v28  ;;  %v1500_v4 = vpack.i.bf16 %v1620_v22, %v1616_v18 }
  0x11   :  { %1336 = vrot.lane.b32.xlu2 %v1636_v40, %s1551_s0  ;;  %v1385_v61 = vpack.i.bf16 %v86_v58, %v80_v57  ;;  %v1405_v5 = vpack.i.bf16 %v89_v0, %v83_v63  ;;  %v84_v8 = vmul.f32 %v72_v7, %v1616_v18  ;;  %v90_v9 = vmul.f32 %v72_v7, %v1620_v22 }
  0x12   :  { %1326 = vrot.lane.b32.xlu1 %v1325_v41, %s1551_s0  ;;  %1316 = vrot.lane.b32.xlu0 %v1315_v42, %s1551_s0  ;;  %v1400_v6 = vpack.i.bf16 %v88_v2, %v82_v1  ;;  %v115_v13 = vlaneseq }
  0x13   :  { %v1510_v11 = vpack.i.bf16 %v90_v9, %v84_v8 }
  0x14   :  { %v1712_v17 = vand.u32 127, %v115_v13 }
  0x16   :  { %vm117_vm0 = vcmp.lt.s32.totalorder %v1712_v17, 17  ;;  %vm166_vm1 = vcmp.lt.s32.totalorder %v1712_v17, 16  ;;  %vm417_vm2 = vcmp.lt.s32.totalorder %v1712_v17, 112  ;;  %vm368_vm3 = vcmp.lt.s32.totalorder %v1712_v17, 113 }
  0x17   :  { %vm466_vm4 = vcmp.lt.s32.totalorder %v1712_v17, 111  ;;  %vm319_vm5 = vcmp.lt.s32.totalorder %v1712_v17, 127  ;;  %vm264_vm6 = vcmp.lt.s32.totalorder %v1712_v17, 1  ;;  %vm215_vm8 = vcmp.lt.s32.totalorder %v1712_v17, 15 }
  0x19   :  { %1351 = vrot.lane.b32.xlu2 %v1350_v43, %s1552_s29 }
  0x1a   :  { %1346 = vrot.lane.b32.xlu1 %v1345_v44, %s1553_s30  ;;  %1341 = vrot.lane.b32.xlu0 %v1340_v45, %s1553_s30 }
  0x21   :  { %1366 = vrot.lane.b32.xlu2 %v1626_v27, %s1554_s7 }
  0x22   :  { %1361 = vrot.lane.b32.xlu1 %v1652_v48, %s1552_s29  ;;  %1356 = vrot.lane.b32.xlu0 %v1355_v49, %s1552_s29 }
  0x29   :  { %1381 = vrot.lane.b32.xlu2 %v1380_v52, %s1555_s8 }
  0x2a   :  { %1376 = vrot.lane.b32.xlu1 %v1622_v23, %s1554_s7  ;;  %1371 = vrot.lane.b32.xlu0 %v1325_v41, %s1554_s7 }
  0x31   :  { %1396 = vrot.lane.b32.xlu2 %v1395_v59, %s1556_s9 }
  0x32   :  { %1391 = vrot.lane.b32.xlu1 %v1395_v59, %s1555_s8  ;;  %1386 = vrot.lane.b32.xlu0 %v1385_v61, %s1555_s8 }
  0x39   :  { %1411 = vrot.lane.b32.xlu2 %v1340_v45, %s1552_s29 }
  0x3a   :  { %1406 = vrot.lane.b32.xlu1 %v1405_v5, %s1556_s9  ;;  %1401 = vrot.lane.b32.xlu0 %v1400_v6, %s1556_s9 }
  0x41   :  { %1426 = vrot.lane.b32.xlu2 %v1315_v42, %s1554_s7 }
  0x42   :  { %1421 = vrot.lane.b32.xlu1 %v1629_v31, %s1554_s7  ;;  %1416 = vrot.lane.b32.xlu0 %v1345_v44, %s1552_s29 }
  0x49   :  { %1441 = vrot.lane.b32.xlu2 %v1325_v41, %s1557_s10 }
  0x4a   :  { %1436 = vrot.lane.b32.xlu1 %v1626_v27, %s1557_s10  ;;  %1431 = vrot.lane.b32.xlu0 %v1315_v42, %s1557_s10 }
  0x51   :  { %1456 = vrot.lane.b32.xlu2 %v1385_v61, %s1558_s11 }
  0x52   :  { %1451 = vrot.lane.b32.xlu1 %v1385_v61, %s1556_s9  ;;  %1446 = vrot.lane.b32.xlu0 %v1380_v52, %s1556_s9 }
  0x59   :  { %1471 = vrot.lane.b32.xlu2 %v1400_v6, %s1555_s8 }
  0x5a   :  { %1466 = vrot.lane.b32.xlu1 %v1400_v6, %s1558_s11  ;;  %1461 = vrot.lane.b32.xlu0 %v1395_v59, %s1558_s11 }
  0x61   :  { %1486 = vrot.lane.b32.xlu2 %v1355_v49, %s1553_s30 }
  0x62   :  { %1481 = vrot.lane.b32.xlu1 %v1350_v43, %s1553_s30  ;;  %1476 = vrot.lane.b32.xlu0 %v1405_v5, %s1555_s8 }
  0x63   :  { %v1332_v3 = vpop.permute.xlu2 %1331 }
  0x64   :  { %v1334_v18 = vunpack.i.h.bf16 %v1332_v3  ;;  %v1333_v19 = vunpack.i.l.bf16 %v1332_v3 }
  0x69   :  { %1501 = vrot.lane.b32.xlu2 %v1500_v4, %s1552_s29 }
  0x6a   :  { %1496 = vrot.lane.b32.xlu1 %v1636_v40, %s1557_s10  ;;  %1491 = vrot.lane.b32.xlu0 %v1629_v31, %s1557_s10 }
  0x6b   :  { %v1337_v10 = vpop.permute.xlu2 %1336 }
  0x6c   :  { %v1339_v20 = vunpack.i.h.bf16 %v1337_v10  ;;  %v1338_v21 = vunpack.i.l.bf16 %v1337_v10 }
  0x6e   :  { %v119_v24 = vsel %vm117_vm0, %v1334_v18, %v1339_v20 }
  0x71   :  { %1516 = vrot.lane.b32.xlu2 %v1636_v40, %s1554_s7 }
  0x72   :  { %1511 = vrot.lane.b32.xlu1 %v1510_v11, %s1558_s11  ;;  %1506 = vrot.lane.b32.xlu0 %v1380_v52, %s1558_s11 }
  0x73   :  { %v1705_v12 = vpop.permute.xlu2 %1351 }
  0x74   :  { %v1354_v61 = vunpack.i.h.bf16 %v1705_v12  ;;  %v1353_v62 = vunpack.i.l.bf16 %v1705_v12 }
  0x79   :  { %1531 = vrot.lane.b32.xlu2 %v1622_v23, %s1557_s10  ;;  %v118_v23 = vsel %vm117_vm0, %v1333_v19, %v1338_v21 }
  0x7a   :  { %1526 = vrot.lane.b32.xlu1 %v1510_v11, %s1556_s9  ;;  %1521 = vrot.lane.b32.xlu0 %v1500_v4, %s1553_s30 }
  0x7b   :  { %v1710_v14 = vpop.permute.xlu2 %1366 }
  0x7c   :  { %v1322_v15 = vpop.permute.xlu1 %1321  ;;  %v1312_v16 = vpop.permute.xlu0 %1311  ;;  %v1369_v13 = vunpack.i.h.bf16 %v1710_v14 }
  0x7d   :  { %v1324_v25 = vunpack.i.h.bf16 %v1322_v15  ;;  %v1323_v27 = vunpack.i.l.bf16 %v1322_v15  ;;  %v1313_v28 = vunpack.i.l.bf16 %v1312_v16  ;;  %v1314_v32 = vunpack.i.h.bf16 %v1312_v16 }
  0x7e   :  { %v1368_v15 = vunpack.i.l.bf16 %v1710_v14 }
  0x7f   :  { %v128_v43 = vsel %vm117_vm0, %v1338_v21, %v1313_v28  ;;  %v129_v47 = vsel %vm117_vm0, %v1339_v20, %v1314_v32 }
  0x81   :  { %1546 = vrot.lane.b32.xlu2 %v1652_v48, %s1553_s30 }
  0x82   :  { %1541 = vrot.lane.b32.xlu1 %v1510_v11, %s1555_s8  ;;  %1536 = vrot.lane.b32.xlu0 %v1405_v5, %s1558_s11 }
  0x83   :  { %v1719_v22 = vpop.permute.xlu2 %1381 }
  0x84   :  { %v1327_v26 = vpop.permute.xlu1 %1326  ;;  %v1317_v31 = vpop.permute.xlu0 %1316 }
  0x85   :  { %v1329_v29 = vunpack.i.h.bf16 %v1327_v26  ;;  %v1328_v30 = vunpack.i.l.bf16 %v1327_v26  ;;  %v1319_v33 = vunpack.i.h.bf16 %v1317_v31  ;;  %v1318_v34 = vunpack.i.l.bf16 %v1317_v31 }
  0x86   :  { %v1384_v31 = vunpack.i.h.bf16 %v1719_v22 }
  0x87   :  { %v121_v35 = vsel %vm117_vm0, %v1329_v29, %v1334_v18  ;;  %v120_v36 = vsel %vm117_vm0, %v1328_v30, %v1333_v19  ;;  %v122_v37 = vsel %vm117_vm0, %v1323_v27, %v1328_v30  ;;  %v123_v38 = vsel %vm117_vm0, %v1324_v25, %v1329_v29 }
  0x88   :  { %v135_v39 = vpack.c.bf16 %v119_v24, %v121_v35  ;;  %v132_v40 = vpack.c.bf16 %v118_v23, %v120_v36  ;;  %v125_v41 = vsel %vm117_vm0, %v1319_v33, %v1324_v25  ;;  %v124_v42 = vsel %vm117_vm0, %v1318_v34, %v1323_v27 }
  0x89   :  { %v134_v44 = vpack.c.bf16 %v123_v38, %v125_v41  ;;  %v126_v45 = vsel %vm117_vm0, %v1313_v28, %v1318_v34  ;;  %v127_v46 = vsel %vm117_vm0, %v1314_v32, %v1319_v33  ;;  %v131_v49 = vpack.c.bf16 %v122_v37, %v124_v42 }
  0x8a   :  { %141 = vst [vmem:[#allocation2 + $0x28] sm:$0xff] %v135_v39  ;;  %v130_v48 = vpack.c.bf16 %v126_v45, %v128_v43  ;;  %v133_v50 = vpack.c.bf16 %v127_v46, %v129_v47  ;;  %v1383_v32 = vunpack.i.l.bf16 %v1719_v22 }
  0x8b   :  { %138 = vst [vmem:[#allocation2 + $0x10] sm:$0xff] %v132_v40  ;;  %v1745_v51 = vpop.permute.xlu2 %1396 }
  0x8c   :  { %140 = vst [vmem:[#allocation2 + $0x20] sm:$0xff] %v134_v44  ;;  %v1747_v52 = vpop.permute.xlu1 %1346  ;;  %v1752_v55 = vpop.permute.xlu0 %1341  ;;  %v1399_v46 = vunpack.i.h.bf16 %v1745_v51  ;;  %v1398_v47 = vunpack.i.l.bf16 %v1745_v51 }
  0x8d   :  { %136 = vst [vmem:[#allocation2] sm:$0xff] %v130_v48  ;;  %v1349_v53 = vunpack.i.h.bf16 %v1747_v52  ;;  %v1348_v54 = vunpack.i.l.bf16 %v1747_v52  ;;  %v1344_v56 = vunpack.i.h.bf16 %v1752_v55  ;;  %v1343_v57 = vunpack.i.l.bf16 %v1752_v55  ;;  %v546_v55 = vld [vmem:[%s2215_s2] sm:$0xff] }
  0x8e   :  { %137 = vst [vmem:[#allocation2 + $0x8] sm:$0xff] %v131_v49 }
  0x8f   :  { %139 = vst [vmem:[#allocation2 + $0x18] sm:$0xff] %v133_v50  ;;  %v1762_v58 = vsel %vm166_vm1, %v1344_v56, %v1349_v53  ;;  %v1770_v59 = vsel %vm166_vm1, %v1343_v57, %v1348_v54 }
  0x93   :  { %v1772_v60 = vpop.permute.xlu2 %1411 }
  0x94   :  { %v1776_v63 = vpop.permute.xlu1 %1361  ;;  %v1357_v2 = vpop.permute.xlu0 %1356  ;;  %v1247_v17 = vld [vmem:[#allocation2 + $0x4] sm:$0xf] }
  0x95   :  { %v1364_v0 = vunpack.i.h.bf16 %v1776_v63  ;;  %v1363_v1 = vunpack.i.l.bf16 %v1776_v63  ;;  %v1359_v5 = vunpack.i.h.bf16 %v1357_v2  ;;  %v1358_v6 = vunpack.i.l.bf16 %v1357_v2 }
  0x97   :  { %v421_v3 = vsel %vm417_vm2, %v1359_v5, %v1364_v0  ;;  %v423_v4 = vsel %vm417_vm2, %v1354_v61, %v1359_v5  ;;  %v420_v7 = vsel %vm417_vm2, %v1358_v6, %v1363_v1  ;;  %v422_v8 = vsel %vm417_vm2, %v1353_v62, %v1358_v6 }
  0x98   :  { %v434_v9 = vpack.c.bf16 %v421_v3, %v423_v4  ;;  %v431_v10 = vpack.c.bf16 %v420_v7, %v422_v8 }
  0x9a   :  { %440 = vst [vmem:[#allocation2 + $0x170] sm:$0xff] %v434_v9 }
  0x9b   :  { %v1797_v11 = vpop.permute.xlu2 %1426  ;;  %437 = vst [vmem:[#allocation2 + $0x158] sm:$0xff] %v431_v10 }
  0x9c   :  { %v1801_v16 = vpop.permute.xlu1 %1376  ;;  %v1372_v20 = vpop.permute.xlu0 %1371 }
  0x9d   :  { %v1379_v18 = vunpack.i.h.bf16 %v1801_v16  ;;  %v1378_v19 = vunpack.i.l.bf16 %v1801_v16  ;;  %v1374_v21 = vunpack.i.h.bf16 %v1372_v20  ;;  %v1373_v23 = vunpack.i.l.bf16 %v1372_v20 }
  0x9f   :  { %v372_v24 = vsel %vm368_vm3, %v1374_v21, %v1379_v18  ;;  %v374_v25 = vsel %vm368_vm3, %v1369_v13, %v1374_v21  ;;  %v371_v26 = vsel %vm368_vm3, %v1373_v23, %v1378_v19  ;;  %v373_v27 = vsel %vm368_vm3, %v1368_v15, %v1373_v23 }
  0xa0   :  { %v385_v28 = vpack.c.bf16 %v372_v24, %v374_v25  ;;  %v382_v29 = vpack.c.bf16 %v371_v26, %v373_v27  ;;  %v1429_v25 = vunpack.i.h.bf16 %v1797_v11  ;;  %v1428_v26 = vunpack.i.l.bf16 %v1797_v11 }
  0xa1   :  { %v1293_v20 = vld [vmem:[#allocation2 + $0x16c] sm:$0xf0] }
  0xa2   :  { %391 = vst [vmem:[#allocation2 + $0x140] sm:$0xff] %v385_v28  ;;  %v1203_v24 = vld [vmem:[#allocation2 + $0x158] sm:$0xf] }
  0xa3   :  { %v1822_v30 = vpop.permute.xlu2 %1441  ;;  %388 = vst [vmem:[#allocation2 + $0x128] sm:$0xff] %v382_v29  ;;  %v1204_v11 = vor.u32 %v1293_v20, %v1203_v24 }
  0xa4   :  { %v1826_v33 = vpop.permute.xlu1 %1391  ;;  %v1387_v36 = vpop.permute.xlu0 %1386 }
  0xa5   :  { %v1394_v34 = vunpack.i.h.bf16 %v1826_v33  ;;  %v1393_v35 = vunpack.i.l.bf16 %v1826_v33  ;;  %v1389_v37 = vunpack.i.h.bf16 %v1387_v36  ;;  %v1388_v38 = vunpack.i.l.bf16 %v1387_v36 }
  0xa6   :  { %v1414_v36 = vunpack.i.h.bf16 %v1772_v60 }
  0xa7   :  { %v474_v39 = vsel %vm466_vm4, %v1389_v37, %v1394_v34  ;;  %v476_v40 = vsel %vm466_vm4, %v1384_v31, %v1389_v37  ;;  %v473_v41 = vsel %vm466_vm4, %v1388_v38, %v1393_v35  ;;  %v475_v42 = vsel %vm466_vm4, %v1383_v32, %v1388_v38 }
  0xa8   :  { %v482_v43 = vpack.c.bf16 %v474_v39, %v476_v40  ;;  %v479_v44 = vpack.c.bf16 %v473_v41, %v475_v42  ;;  %v1413_v40 = vunpack.i.l.bf16 %v1772_v60 }
  0xaa   :  { %488 = vst [vmem:[#allocation2 + $0x198] sm:$0xff] %v482_v43 }
  0xab   :  { %v1847_v45 = vpop.permute.xlu2 %1456  ;;  %485 = vst [vmem:[#allocation2 + $0x180] sm:$0xff] %v479_v44 }
  0xac   :  { %v1851_v48 = vpop.permute.xlu1 %1406  ;;  %v1402_v2 = vpop.permute.xlu0 %1401 }
  0xad   :  { %v1409_v49 = vunpack.i.h.bf16 %v1851_v48  ;;  %v1408_v50 = vunpack.i.l.bf16 %v1851_v48  ;;  %v1404_v5 = vunpack.i.h.bf16 %v1402_v2  ;;  %v1403_v6 = vunpack.i.l.bf16 %v1402_v2 }
  0xaf   :  { %v323_v3 = vsel %vm319_vm5, %v1404_v5, %v1409_v49  ;;  %v325_v4 = vsel %vm319_vm5, %v1399_v46, %v1404_v5  ;;  %v322_v7 = vsel %vm319_vm5, %v1403_v6, %v1408_v50  ;;  %v324_v8 = vsel %vm319_vm5, %v1398_v47, %v1403_v6  ;;  %v1179_v5 = vld [vmem:[#allocation2 + $0x128] sm:$0xf]  ;;  %v1287_v6 = vld [vmem:[#allocation2 + $0x13c] sm:$0xf0] }
  0xb0   :  { %v336_v9 = vpack.c.bf16 %v323_v3, %v325_v4  ;;  %v333_v10 = vpack.c.bf16 %v322_v7, %v324_v8  ;;  %v376_v3 = vsel %vm368_vm3, %v1429_v25, %v1369_v13  ;;  %v375_v4 = vsel %vm368_vm3, %v1428_v26, %v1368_v15 }
  0xb1   :  { %v1298_v21 = vld [vmem:[#allocation2 + $0x194] sm:$0xf0]  ;;  %v1221_v23 = vld [vmem:[#allocation2 + $0x198] sm:$0xf0] }
  0xb2   :  { %342 = vst [vmem:[#allocation2 + $0x110] sm:$0xff] %v336_v9  ;;  %v1219_v28 = vld [vmem:[#allocation2 + $0x180] sm:$0xf]  ;;  %v1295_v29 = vld [vmem:[#allocation2 + $0x184] sm:$0xf] }
  0xb3   :  { %v1874_v27 = vpop.permute.xlu2 %1471  ;;  %339 = vst [vmem:[#allocation2 + $0xf8] sm:$0xff] %v333_v10  ;;  %v1220_v38 = vor.u32 %v1298_v21, %v1219_v28  ;;  %v1224_v39 = vor.u32 %v1295_v29, %v1221_v23  ;;  %v1180_v23 = vor.u32 %v1287_v6, %v1179_v5 }
  0xb4   :  { %v1877_v37 = vpop.permute.xlu1 %1421  ;;  %v1417_v43 = vpop.permute.xlu0 %1416 }
  0xb5   :  { %v1424_v41 = vunpack.i.h.bf16 %v1877_v37  ;;  %v1423_v42 = vunpack.i.l.bf16 %v1877_v37  ;;  %v1419_v44 = vunpack.i.h.bf16 %v1417_v43  ;;  %v1418_v2 = vunpack.i.l.bf16 %v1417_v43  ;;  %852 = vmatpush.bf16.msra.mxu1 %v1220_v38  ;;  %878 = vmatpush.bf16.msra.mxu3 %v1224_v39  ;;  %v1131_v38 = vld [vmem:[#allocation2 + $0xc8] sm:$0xf]  ;;  %v1275_v39 = vld [vmem:[#allocation2 + $0xdc] sm:$0xf0] }
  0xb7   :  { %v378_v7 = vsel %vm368_vm3, %v1424_v41, %v1429_v25  ;;  %v377_v8 = vsel %vm368_vm3, %v1423_v42, %v1428_v26  ;;  %v425_v14 = vsel %vm417_vm2, %v1419_v44, %v1354_v61  ;;  %v427_v13 = vsel %vm417_vm2, %v1414_v36, %v1419_v44 }
  0xb8   :  { %v384_v9 = vpack.c.bf16 %v376_v3, %v378_v7  ;;  %v381_v10 = vpack.c.bf16 %v375_v4, %v377_v8  ;;  %v433_v15 = vpack.c.bf16 %v425_v14, %v427_v13  ;;  %v424_v20 = vsel %vm417_vm2, %v1418_v2, %v1353_v62 }
  0xb9   :  { %884 = vmatpush.bf16.msrb.mxu1 %v1204_v11  ;;  %v426_v21 = vsel %vm417_vm2, %v1413_v40, %v1418_v2  ;;  %v1281_v61 = vld [vmem:[#allocation2 + $0x10c] sm:$0xf0]  ;;  %v1444_v25 = vunpack.i.h.bf16 %v1822_v30  ;;  %v1443_v26 = vunpack.i.l.bf16 %v1822_v30  ;;  %v1132_v4 = vor.u32 %v1275_v39, %v1131_v38 }
  0xba   :  { %390 = vst [vmem:[#allocation2 + $0x138] sm:$0xff] %v384_v9  ;;  %v430_v24 = vpack.c.bf16 %v424_v20, %v426_v21  ;;  %v1155_v12 = vld [vmem:[#allocation2 + $0xf8] sm:$0xf] }
  0xbb   :  { %387 = vst [vmem:[#allocation2 + $0x120] sm:$0xff] %v381_v10  ;;  %v1916_v28 = vpop.permute.xlu2 %1486  ;;  %v1156_v29 = vor.u32 %v1281_v61, %v1155_v12 }
  0xbc   :  { %439 = vst [vmem:[#allocation2 + $0x168] sm:$0xff] %v433_v15  ;;  %v1437_v62 = vpop.permute.xlu1 %1436  ;;  %v1919_v44 = vpop.permute.xlu0 %1431 }
  0xbd   :  { %885 = vmatpush.bf16.msrb.mxu1 %v1180_v23  ;;  %436 = vst [vmem:[#allocation2 + $0x150] sm:$0xff] %v430_v24  ;;  %v1439_v43 = vunpack.i.h.bf16 %v1437_v62  ;;  %v1438_v11 = vunpack.i.l.bf16 %v1437_v62  ;;  %v1434_v2 = vunpack.i.h.bf16 %v1919_v44  ;;  %v1433_v5 = vunpack.i.l.bf16 %v1919_v44 }
  0xbf   :  { %v270_v6 = vsel %vm264_vm6, %v1439_v43, %v1444_v25  ;;  %v269_v3 = vsel %vm264_vm6, %v1438_v11, %v1443_v26  ;;  %v272_v7 = vsel %vm264_vm6, %v1434_v2, %v1439_v43  ;;  %v271_v8 = vsel %vm264_vm6, %v1433_v5, %v1438_v11 }
  0xc0   :  { %v281_v9 = vpack.c.bf16 %v270_v6, %v272_v7  ;;  %v278_v10 = vpack.c.bf16 %v269_v3, %v271_v8 }
  0xc1   :  { %886 = vmatpush.bf16.msrb.mxu1 %v1156_v29  ;;  %v1286_v43 = vld [vmem:[#allocation2 + $0x134] sm:$0xf0]  ;;  %v1173_v11 = vld [vmem:[#allocation2 + $0x138] sm:$0xf0] }
  0xc2   :  { %287 = vst [vmem:[#allocation2 + $0xb0] sm:$0xff] %v281_v9  ;;  %v1171_v8 = vld [vmem:[#allocation2 + $0x120] sm:$0xf]  ;;  %v1283_v9 = vld [vmem:[#allocation2 + $0x124] sm:$0xf] }
  0xc3   :  { %v1502_v14 = vpop.permute.xlu2 %1501  ;;  %v1292_v13 = vld [vmem:[#allocation2 + $0x164] sm:$0xf0]  ;;  %v1197_v15 = vld [vmem:[#allocation2 + $0x168] sm:$0xf0]  ;;  %284 = vst [vmem:[#allocation2 + $0x98] sm:$0xff] %v278_v10 }
  0xc4   :  { %v1504_v20 = vunpack.i.h.bf16 %v1502_v14  ;;  %v1503_v21 = vunpack.i.l.bf16 %v1502_v14  ;;  %v1452_v23 = vpop.permute.xlu1 %1451  ;;  %v1195_v24 = vld [vmem:[#allocation2 + $0x150] sm:$0xf]  ;;  %v1289_v61 = vld [vmem:[#allocation2 + $0x154] sm:$0xf]  ;;  %v1939_v29 = vpop.permute.xlu0 %1446 }
  0xc5   :  { %887 = vmatpush.bf16.msrb.mxu1 %v1132_v4  ;;  %v1454_v12 = vunpack.i.h.bf16 %v1452_v23  ;;  %v1453_v62 = vunpack.i.l.bf16 %v1452_v23  ;;  %v1196_v38 = vor.u32 %v1292_v13, %v1195_v24  ;;  %v1200_v39 = vor.u32 %v1289_v61, %v1197_v15 }
  0xc6   :  { %v419_v6 = vsel %vm417_vm2, %v1364_v0, %v1504_v20  ;;  %v418_v3 = vsel %vm417_vm2, %v1363_v1, %v1503_v21  ;;  %v428_v4 = vsel %vm417_vm2, %v1503_v21, %v1413_v40  ;;  %v429_v7 = vsel %vm417_vm2, %v1504_v20, %v1414_v36  ;;  %v1960_v0 = vld [vmem:[%s2214_s1] sm:$0xff] }
  0xc7   :  { %v432_v63 = vpack.c.bf16 %v428_v4, %v418_v3  ;;  %v435_v10 = vpack.c.bf16 %v429_v7, %v419_v6  ;;  %v327_v1 = vsel %vm319_vm5, %v1454_v12, %v1399_v46  ;;  %832 = vmatpush.bf16.msra.mxu0 %v1196_v38  ;;  %v326_v60 = vsel %vm319_vm5, %v1453_v62, %v1398_v47 }
  0xc8   :  { %v1449_v36 = vunpack.i.h.bf16 %v1939_v29  ;;  %v1448_v40 = vunpack.i.l.bf16 %v1939_v29  ;;  %858 = vmatpush.bf16.msra.mxu2 %v1200_v39  ;;  %v554_v14 = vunpack.c.h.b16 %v1960_v0  ;;  %v1172_v13 = vor.u32 %v1286_v43, %v1171_v8 }
  0xc9   :  { %438 = vst [vmem:[#allocation2 + $0x160] sm:$0xff] %v432_v63  ;;  %v1176_v15 = vor.u32 %v1283_v9, %v1173_v11  ;;  %v1269_v47 = vld [vmem:[#allocation2 + $0xac] sm:$0xf0]  ;;  %v1459_v38 = vunpack.i.h.bf16 %v1847_v45 }
  0xca   :  { %441 = vst [vmem:[#allocation2 + $0x178] sm:$0xff] %v435_v10  ;;  %v329_v46 = vsel %vm319_vm5, %v1449_v36, %v1454_v12  ;;  %v328_v51 = vsel %vm319_vm5, %v1448_v40, %v1453_v62  ;;  %v1981_v20 = vpack.c.b16 %v554_v14, %v554_v14  ;;  %v1107_v61 = vld [vmem:[#allocation2 + $0x98] sm:$0xf]  ;;  %v1458_v62 = vunpack.i.l.bf16 %v1847_v45 }
  0xcb   :  { %v335_v21 = vpack.c.bf16 %v327_v1, %v329_v46  ;;  %v332_v23 = vpack.c.bf16 %v326_v60, %v328_v51  ;;  %833 = vmatpush.bf16.msra.mxu0 %v1172_v13  ;;  %v1517_v24 = vpop.permute.xlu2 %1516  ;;  %v1108_v11 = vor.u32 %v1269_v47, %v1107_v61  ;;  %v1489_v46 = vunpack.i.h.bf16 %v1916_v28 }
  0xcc   :  { %859 = vmatpush.bf16.msra.mxu2 %v1176_v15  ;;  %v1519_v39 = vunpack.i.h.bf16 %v1517_v24  ;;  %v1518_v43 = vunpack.i.l.bf16 %v1517_v24  ;;  %v1984_v12 = vpop.permute.xlu1 %1466  ;;  %1242 = vmatmul.msk.bf16.vlgmr.msra.gmra.mxu3 %vm828_vm7, %v1981_v20  ;;  %v1462_v4 = vpop.permute.xlu0 %1461  ;;  %v1488_v51 = vunpack.i.l.bf16 %v1916_v28 }
  0xcd   :  { %341 = vst [vmem:[#allocation2 + $0x108] sm:$0xff] %v335_v21  ;;  %v1469_v6 = vunpack.i.h.bf16 %v1984_v12  ;;  %v1468_v3 = vunpack.i.l.bf16 %v1984_v12  ;;  %1241 = vmatmul.msk.bf16.vlgmr.msra.gmra.mxu1 %vm828_vm7, %v1981_v20  ;;  %v1464_v60 = vunpack.i.h.bf16 %v1462_v4  ;;  %v1463_v14 = vunpack.i.l.bf16 %v1462_v4 }
  0xce   :  { %338 = vst [vmem:[#allocation2 + $0xf0] sm:$0xff] %v332_v23  ;;  %v370_v7 = vsel %vm368_vm3, %v1379_v18, %v1519_v39  ;;  %v369_v8 = vsel %vm368_vm3, %v1378_v19, %v1518_v43  ;;  %v379_v9 = vsel %vm368_vm3, %v1518_v43, %v1423_v42  ;;  %v380_v63 = vsel %vm368_vm3, %v1519_v39, %v1424_v41 }
  0xcf   :  { %v383_v10 = vpack.c.bf16 %v379_v9, %v369_v8  ;;  %v386_v1 = vpack.c.bf16 %v380_v63, %v370_v7  ;;  %888 = vmatpush.bf16.msrb.mxu1 %v1108_v11  ;;  %v221_v16 = vsel %vm215_vm8, %v1464_v60, %v1469_v6  ;;  %v223_v18 = vsel %vm215_vm8, %v1459_v38, %v1464_v60 }
  0xd0   :  { %v220_v19 = vsel %vm215_vm8, %v1463_v14, %v1468_v3  ;;  %v222_v37 = vsel %vm215_vm8, %v1458_v62, %v1463_v14  ;;  %v1474_v41 = vunpack.i.h.bf16 %v1874_v27  ;;  %v1473_v42 = vunpack.i.l.bf16 %v1874_v27  ;;  %v1123_v14 = vld [vmem:[#allocation2 + $0xc0] sm:$0xf] }
  0xd1   :  { %389 = vst [vmem:[#allocation2 + $0x130] sm:$0xff] %v383_v10  ;;  %v232_v13 = vpack.c.bf16 %v221_v16, %v223_v18  ;;  %v229_v15 = vpack.c.bf16 %v220_v19, %v222_v37  ;;  %v1274_v16 = vld [vmem:[#allocation2 + $0xd4] sm:$0xf0] }
  0xd2   :  { %392 = vst [vmem:[#allocation2 + $0x148] sm:$0xff] %v386_v1  ;;  %v472_v27 = vsel %vm466_vm4, %v1394_v34, %v1474_v41  ;;  %v471_v39 = vsel %vm466_vm4, %v1393_v35, %v1473_v42 }
  0xd3   :  { %238 = vst [vmem:[#allocation2 + $0x80] sm:$0xff] %v232_v13  ;;  %v1532_v9 = vpop.permute.xlu2 %1531  ;;  %v1271_v13 = vld [vmem:[#allocation2 + $0xc4] sm:$0xf] }
  0xd4   :  { %v1482_v47 = vpop.permute.xlu1 %1481  ;;  %235 = vst [vmem:[#allocation2 + $0x68] sm:$0xff] %v229_v15  ;;  %v2030_v24 = vpop.permute.xlu0 %1476  ;;  %v1280_v61 = vld [vmem:[#allocation2 + $0x104] sm:$0xf0]  ;;  %v1149_v8 = vld [vmem:[#allocation2 + $0x108] sm:$0xf0]  ;;  %v1533_v15 = vunpack.i.l.bf16 %v1532_v9 }
  0xd5   :  { %v1484_v21 = vunpack.i.h.bf16 %v1482_v47  ;;  %v1483_v23 = vunpack.i.l.bf16 %v1482_v47  ;;  %v1479_v43 = vunpack.i.h.bf16 %v2030_v24  ;;  %v1478_v11 = vunpack.i.l.bf16 %v2030_v24  ;;  %v1147_v4 = vld [vmem:[#allocation2 + $0xf0] sm:$0xf]  ;;  %v1277_v7 = vld [vmem:[#allocation2 + $0xf4] sm:$0xf] }
  0xd6   :  { %v1148_v52 = vor.u32 %v1280_v61, %v1147_v4  ;;  %v1152_v37 = vor.u32 %v1277_v7, %v1149_v8  ;;  %v1534_v47 = vunpack.i.h.bf16 %v1532_v9  ;;  %v267_v4 = vsel %vm264_vm6, %v1443_v26, %v1533_v15 }
  0xd7   :  { %v172_v63 = vsel %vm166_vm1, %v1484_v21, %v1489_v46  ;;  %v174_v33 = vsel %vm166_vm1, %v1349_v53, %v1484_v21  ;;  %v171_v34 = vsel %vm166_vm1, %v1483_v23, %v1488_v51  ;;  %v173_v35 = vsel %vm166_vm1, %v1348_v54, %v1483_v23  ;;  %v1125_v54 = vld [vmem:[#allocation2 + $0xd8] sm:$0xf0] }
  0xd8   :  { %v183_v10 = vpack.c.bf16 %v172_v63, %v174_v33  ;;  %v180_v1 = vpack.c.bf16 %v171_v34, %v173_v35  ;;  %v470_v60 = vsel %vm466_vm4, %v1474_v41, %v1479_v43  ;;  %v469_v53 = vsel %vm466_vm4, %v1473_v42, %v1478_v11  ;;  %834 = vmatpush.bf16.msra.mxu0 %v1148_v52  ;;  %v1251_v52 = vld [vmem:[#allocation2 + $0x1c] sm:$0xf0] }
  0xd9   :  { %v483_v18 = vpack.c.bf16 %v470_v60, %v472_v27  ;;  %v480_v19 = vpack.c.bf16 %v469_v53, %v471_v39  ;;  %860 = vmatpush.bf16.msra.mxu2 %v1152_v37  ;;  %v1124_v21 = vor.u32 %v1274_v16, %v1123_v14  ;;  %v1128_v42 = vor.u32 %v1271_v13, %v1125_v54 }
  0xda   :  { %189 = vst [vmem:[#allocation2 + $0x50] sm:$0xff] %v183_v10  ;;  %v1263_v41 = vld [vmem:[#allocation2 + $0x7c] sm:$0xf0]  ;;  %v268_v9 = vsel %vm264_vm6, %v1444_v25, %v1534_v47  ;;  %v553_v54 = vunpack.c.l.b16 %v1960_v0  ;;  %v1284_v0 = vld [vmem:[#allocation2 + $0x12c] sm:$0xf] }
  0xdb   :  { %186 = vst [vmem:[#allocation2 + $0x38] sm:$0xff] %v180_v1  ;;  %v1083_v63 = vld [vmem:[#allocation2 + $0x68] sm:$0xf] }
  0xdc   :  { %489 = vst [vmem:[#allocation2 + $0x1a0] sm:$0xff] %v483_v18  ;;  %v1497_v23 = vpop.permute.xlu1 %1496  ;;  %v1492_v39 = vpop.permute.xlu0 %1491  ;;  %v1084_v61 = vor.u32 %v1263_v41, %v1083_v63  ;;  %835 = vmatpush.bf16.msra.mxu0 %v1124_v21 }
  0xdd   :  { %486 = vst [vmem:[#allocation2 + $0x188] sm:$0xff] %v480_v19  ;;  %v1499_v33 = vunpack.i.h.bf16 %v1497_v23  ;;  %v1498_v27 = vunpack.i.l.bf16 %v1497_v23  ;;  %v1494_v7 = vunpack.i.h.bf16 %v1492_v39  ;;  %v1493_v8 = vunpack.i.l.bf16 %v1492_v39  ;;  %861 = vmatpush.bf16.msra.mxu2 %v1128_v42  ;;  %v1205_v19 = vld [vmem:[#allocation2 + $0x170] sm:$0xf0] }
  0xde   :  { %889 = vmatpush.bf16.msrb.mxu1 %v1084_v61  ;;  %v1181_v61 = vld [vmem:[#allocation2 + $0x140] sm:$0xf0] }
  0xdf   :  { %v266_v34 = vsel %vm264_vm6, %v1534_v47, %v1499_v33  ;;  %v265_v35 = vsel %vm264_vm6, %v1533_v15, %v1498_v27  ;;  %v276_v26 = vsel %vm264_vm6, %v1499_v33, %v1494_v7  ;;  %v273_v30 = vsel %vm264_vm6, %v1493_v8, %v1433_v5  ;;  %v1290_v5 = vld [vmem:[#allocation2 + $0x15c] sm:$0xf]  ;;  %v1035_v15 = vld [vmem:[#allocation2 + $0x8] sm:$0xf] }
  0xe0   :  { %v282_v10 = vpack.c.bf16 %v266_v34, %v268_v9  ;;  %v279_v1 = vpack.c.bf16 %v265_v35, %v267_v4  ;;  %v274_v25 = vsel %vm264_vm6, %v1494_v7, %v1434_v2  ;;  %v275_v60 = vsel %vm264_vm6, %v1498_v27, %v1493_v8  ;;  %v1547_v27 = vpop.permute.xlu2 %1546 }
  0xe1   :  { %v1257_v53 = vld [vmem:[#allocation2 + $0x4c] sm:$0xf0]  ;;  %v277_v14 = vpack.c.bf16 %v273_v30, %v275_v60  ;;  %v280_v16 = vpack.c.bf16 %v274_v25, %v276_v26  ;;  %v1208_v33 = vor.u32 %v1290_v5, %v1205_v19  ;;  %v1036_v39 = vor.u32 %v1251_v52, %v1035_v15  ;;  %v1272_v25 = vld [vmem:[#allocation2 + $0xcc] sm:$0xf]  ;;  %v1133_v60 = vld [vmem:[#allocation2 + $0xe0] sm:$0xf0] }
  0xe2   :  { %288 = vst [vmem:[#allocation2 + $0xb8] sm:$0xff] %v282_v10  ;;  %v1059_v18 = vld [vmem:[#allocation2 + $0x38] sm:$0xf]  ;;  %v2095_v4 = vpack.c.b16 %v553_v54, %v553_v54  ;;  %v1549_v26 = vunpack.i.h.bf16 %v1547_v27  ;;  %v1184_v30 = vor.u32 %v1284_v0, %v1181_v61  ;;  %v1266_v0 = vld [vmem:[#allocation2 + $0x9c] sm:$0xf] }
  0xe3   :  { %285 = vst [vmem:[#allocation2 + $0xa0] sm:$0xff] %v279_v1  ;;  %v1060_v37 = vor.u32 %v1257_v53, %v1059_v18  ;;  %v1299_v13 = vld [vmem:[#allocation2 + $0x19c] sm:$0xf0]  ;;  %v1157_v1 = vld [vmem:[#allocation2 + $0x110] sm:$0xf0]  ;;  %v1548_v53 = vunpack.i.l.bf16 %v1547_v27 }
  0xe4   :  { %283 = vst [vmem:[#allocation2 + $0x90] sm:$0xff] %v277_v14  ;;  %v2091_v44 = vpop.permute.xlu1 %1511  ;;  %v1227_v2 = vld [vmem:[#allocation2 + $0x188] sm:$0xf]  ;;  %v1507_v21 = vpop.permute.xlu0 %1506  ;;  %v1109_v61 = vld [vmem:[#allocation2 + $0xb0] sm:$0xf0] }
  0xe5   :  { %286 = vst [vmem:[#allocation2 + $0xa8] sm:$0xff] %v280_v16  ;;  %v1514_v47 = vunpack.i.h.bf16 %v2091_v44  ;;  %v1513_v41 = vunpack.i.l.bf16 %v2091_v44  ;;  %890 = vmatpush.bf16.msrb.mxu1 %v1060_v37  ;;  %v1228_v23 = vor.u32 %v1299_v13, %v1227_v2  ;;  %v1509_v63 = vunpack.i.h.bf16 %v1507_v21  ;;  %v1061_v44 = vld [vmem:[#allocation2 + $0x50] sm:$0xf0] }
  0xe6   :  { %v1508_v42 = vunpack.i.l.bf16 %v1507_v21  ;;  %v170_v2 = vsel %vm166_vm1, %v1489_v46, %v1549_v26 }
  0xe7   :  { %904 = vmatpush.bf16.msrb.mxu3 %v1228_v23  ;;  %v225_v7 = vsel %vm215_vm8, %v1509_v63, %v1459_v38  ;;  %v227_v8 = vsel %vm215_vm8, %v1514_v47, %v1509_v63  ;;  %v1278_v38 = vld [vmem:[#allocation2 + $0xfc] sm:$0xf]  ;;  %v1136_v23 = vor.u32 %v1272_v25, %v1133_v60  ;;  %v1112_v25 = vor.u32 %v1266_v0, %v1109_v61 }
  0xe8   :  { %v224_v9 = vsel %vm215_vm8, %v1508_v42, %v1458_v62  ;;  %v226_v34 = vsel %vm215_vm8, %v1513_v41, %v1508_v42  ;;  %v231_v35 = vpack.c.bf16 %v225_v7, %v227_v8  ;;  %v1160_v19 = vor.u32 %v1278_v38, %v1157_v1 }
  0xe9   :  { %v228_v10 = vpack.c.bf16 %v224_v9, %v226_v34  ;;  %891 = vmatpush.bf16.msrb.mxu1 %v1036_v39 }
  0xea   :  { %1243 = vmatmul.msk.bf16.vlgmr.msrb.gmra.mxu3 %vm828_vm7, %v1981_v20  ;;  %237 = vst [vmem:[#allocation2 + $0x78] sm:$0xff] %v231_v35 }
  0xeb   :  { %910 = vmatpush.bf16.msra.mxu3 %v1208_v33  ;;  %v1099_v45 = vld [vmem:[#allocation2 + $0x90] sm:$0xf]  ;;  %v1265_v62 = vld [vmem:[#allocation2 + $0x94] sm:$0xf]  ;;  %234 = vst [vmem:[#allocation2 + $0x60] sm:$0xff] %v228_v10 }
  0xec   :  { %v1527_v14 = vpop.permute.xlu1 %1526  ;;  %v1268_v16 = vld [vmem:[#allocation2 + $0xa4] sm:$0xf0]  ;;  %v1101_v18 = vld [vmem:[#allocation2 + $0xa8] sm:$0xf0]  ;;  %892 = vmatmul.bf16.vlgmr.msrb.gmra.mxu1 %v2095_v4  ;;  %v1522_v13 = vpop.permute.xlu0 %1521 }
  0xed   :  { %v1529_v52 = vunpack.i.h.bf16 %v1527_v14  ;;  %v1528_v37 = vunpack.i.l.bf16 %v1527_v14  ;;  %v1100_v5 = vor.u32 %v1268_v16, %v1099_v45  ;;  %v1104_v54 = vor.u32 %v1265_v62, %v1101_v18  ;;  %v1085_v18 = vld [vmem:[#allocation2 + $0x80] sm:$0xf0] }
  0xee   :  { %v1524_v15 = vunpack.i.h.bf16 %v1522_v13  ;;  %v1523_v21 = vunpack.i.l.bf16 %v1522_v13 }
  0xef   :  { %911 = vmatpush.bf16.msra.mxu3 %v1184_v30  ;;  %v321_v63 = vsel %vm319_vm5, %v1409_v49, %v1529_v52  ;;  %v320_v42 = vsel %vm319_vm5, %v1408_v50, %v1528_v37  ;;  %v330_v33 = vsel %vm319_vm5, %v1528_v37, %v1448_v40  ;;  %v331_v46 = vsel %vm319_vm5, %v1529_v52, %v1449_v36  ;;  %v1254_v37 = vld [vmem:[#allocation2 + $0x3c] sm:$0xf] }
  0xf0   :  { %836 = vmatpush.bf16.msra.mxu0 %v1100_v5  ;;  %v334_v27 = vpack.c.bf16 %v330_v33, %v320_v42  ;;  %v337_v39 = vpack.c.bf16 %v331_v46, %v321_v63  ;;  %v168_v49 = vsel %vm166_vm1, %v1549_v26, %v1524_v15  ;;  %v167_v48 = vsel %vm166_vm1, %v1548_v53, %v1523_v21  ;;  %v1211_v63 = vld [vmem:[#allocation2 + $0x160] sm:$0xf]  ;;  %v1291_v42 = vld [vmem:[#allocation2 + $0x164] sm:$0xf]  ;;  %v1294_v33 = vld [vmem:[#allocation2 + $0x174] sm:$0xf0] }
  0xf1   :  { %862 = vmatpush.bf16.msra.mxu2 %v1104_v54  ;;  %v169_v50 = vsel %vm166_vm1, %v1488_v51, %v1548_v53  ;;  %v184_v40 = vpack.c.bf16 %v168_v49, %v170_v2  ;;  %v177_v29 = vsel %vm166_vm1, %v1523_v21, %v1343_v57  ;;  %v178_v36 = vsel %vm166_vm1, %v1524_v15, %v1344_v56  ;;  %v1262_v8 = vld [vmem:[#allocation2 + $0x74] sm:$0xf0]  ;;  %v1077_v9 = vld [vmem:[#allocation2 + $0x78] sm:$0xf0]  ;;  %v1037_v15 = vld [vmem:[#allocation2 + $0x20] sm:$0xf0] }
  0xf2   :  { %340 = vst [vmem:[#allocation2 + $0x100] sm:$0xff] %v334_v27  ;;  %v179_v28 = vpack.c.bf16 %v1770_v59, %v177_v29  ;;  %v181_v7 = vpack.c.bf16 %v167_v48, %v169_v50  ;;  %v182_v51 = vpack.c.bf16 %v1762_v58, %v178_v36  ;;  %v1075_v34 = vld [vmem:[#allocation2 + $0x60] sm:$0xf]  ;;  %v1259_v35 = vld [vmem:[#allocation2 + $0x64] sm:$0xf]  ;;  %v1559_v57 = vmov 0  }
  0xf3   :  { %912 = vmatpush.bf16.msra.mxu3 %v1160_v19  ;;  %343 = vst [vmem:[#allocation2 + $0x118] sm:$0xff] %v337_v39  ;;  %1550 = vset.pattern.permute.xlu0 %v1559_v57  ;;  %v1076_v10 = vor.u32 %v1262_v8, %v1075_v34  ;;  %v1080_v38 = vor.u32 %v1259_v35, %v1077_v9  ;;  %v1250_v2 = vld [vmem:[#allocation2 + $0x14] sm:$0xf0]  ;;  %v1213_v46 = vld [vmem:[#allocation2 + $0x178] sm:$0xf0] }
  0xf4   :  { %190 = vst [vmem:[#allocation2 + $0x58] sm:$0xff] %v184_v40  ;;  %v1542_v56 = vpop.permute.xlu1 %1541  ;;  %549 = vperm.xlu0 %1550, %v546_v55   ;;  %v1537_v1 = vpop.permute.xlu0 %1536  ;;  %v1064_v21 = vor.u32 %v1254_v37, %v1061_v44  ;;  %v1229_v27 = vld [vmem:[#allocation2 + $0x1a0] sm:$0xf0]  ;;  %v1296_v39 = vld [vmem:[#allocation2 + $0x18c] sm:$0xf]  ;;  %v1212_v61 = vor.u32 %v1294_v33, %v1211_v63 }
  0xf5   :  { %185 = vst [vmem:[#allocation2 + $0x30] sm:$0xff] %v179_v28  ;;  %v1544_v59 = vunpack.i.h.bf16 %v1542_v56  ;;  %v1543_v58 = vunpack.i.l.bf16 %v1542_v56  ;;  %v1539_v26 = vunpack.i.h.bf16 %v1537_v1  ;;  %v1538_v30 = vunpack.i.l.bf16 %v1537_v1  ;;  %837 = vmatpush.bf16.msra.mxu0 %v1076_v10  ;;  %863 = vmatpush.bf16.msra.mxu2 %v1080_v38  ;;  %v1187_v8 = vld [vmem:[#allocation2 + $0x130] sm:$0xf]  ;;  %v1288_v9 = vld [vmem:[#allocation2 + $0x144] sm:$0xf0] }
  0xf6   :  { %187 = vst [vmem:[#allocation2 + $0x40] sm:$0xff] %v181_v7  ;;  %v1216_v28 = vor.u32 %v1291_v42, %v1213_v46  ;;  %v1232_v7 = vor.u32 %v1296_v39, %v1229_v27  ;;  %v1285_v34 = vld [vmem:[#allocation2 + $0x134] sm:$0xf]  ;;  %v1189_v35 = vld [vmem:[#allocation2 + $0x148] sm:$0xf0]  ;;  %v1188_v55 = vor.u32 %v1288_v9, %v1187_v8 }
  0xf7   :  { %913 = vmatpush.bf16.msra.mxu3 %v1136_v23  ;;  %188 = vst [vmem:[#allocation2 + $0x48] sm:$0xff] %v182_v51  ;;  %v478_v60 = vsel %vm466_vm4, %v1544_v59, %v1384_v31  ;;  %v467_v45 = vsel %vm466_vm4, %v1478_v11, %v1543_v58  ;;  %v468_v62 = vsel %vm466_vm4, %v1479_v43, %v1544_v59  ;;  %v1260_v11 = vld [vmem:[#allocation2 + $0x6c] sm:$0xf]  ;;  %v1029_v23 = vld [vmem:[#allocation2 + $0x18] sm:$0xf0] }
  0xf8   :  { %v477_v53 = vsel %vm466_vm4, %v1543_v58, %v1383_v32  ;;  %v484_v16 = vpack.c.bf16 %v478_v60, %v468_v62  ;;  %v217_v31 = vsel %vm215_vm8, %v1539_v26, %v1514_v47  ;;  %v219_v24 = vsel %vm215_vm8, %v1469_v6, %v1539_v26  ;;  %v1139_v1 = vld [vmem:[#allocation2 + $0xd0] sm:$0xf]  ;;  %v1276_v26 = vld [vmem:[#allocation2 + $0xe4] sm:$0xf0]  ;;  %v1141_v60 = vld [vmem:[#allocation2 + $0xe8] sm:$0xf0] }
  0xf9   :  { %v481_v14 = vpack.c.bf16 %v477_v53, %v467_v45  ;;  %v233_v43 = vpack.c.bf16 %v217_v31, %v219_v24  ;;  %v216_v22 = vsel %vm215_vm8, %v1538_v30, %v1513_v41  ;;  %v218_v32 = vsel %vm215_vm8, %v1468_v3, %v1538_v30  ;;  %v1027_v41 = vld [vmem:[#allocation2] sm:$0xf]  ;;  %v1248_v3 = vld [vmem:[#allocation2 + $0xc] sm:$0xf]  ;;  %v1279_v59 = vld [vmem:[#allocation2 + $0x104] sm:$0xf] }
  0xfa   :  { %v230_v47 = vpack.c.bf16 %v216_v22, %v218_v32  ;;  %490 = vst [vmem:[#allocation2 + $0x1a8] sm:$0xff] %v484_v16  ;;  %v1088_v19 = vor.u32 %v1260_v11, %v1085_v18  ;;  %v1028_v50 = vor.u32 %v1250_v2, %v1027_v41  ;;  %v1032_v40 = vor.u32 %v1247_v17, %v1029_v23  ;;  %v1163_v10 = vld [vmem:[#allocation2 + $0x100] sm:$0xf]  ;;  %v1282_v38 = vld [vmem:[#allocation2 + $0x114] sm:$0xf0] }
  0xfb   :  { %914 = vmatpush.bf16.msra.mxu3 %v1112_v25  ;;  %487 = vst [vmem:[#allocation2 + $0x190] sm:$0xff] %v481_v14  ;;  %v1040_v0 = vor.u32 %v1248_v3, %v1037_v15  ;;  %v1192_v56 = vor.u32 %v1285_v34, %v1189_v35  ;;  %v1165_v58 = vld [vmem:[#allocation2 + $0x118] sm:$0xf0]  ;;  %v1164_v30 = vor.u32 %v1282_v38, %v1163_v10  ;;  %v1273_v25 = vld [vmem:[#allocation2 + $0xd4] sm:$0xf] }
  0xfc   :  { %239 = vst [vmem:[#allocation2 + $0x88] sm:$0xff] %v233_v43  ;;  %v1051_v6 = vld [vmem:[#allocation2 + $0x30] sm:$0xf]  ;;  %v1253_v52 = vld [vmem:[#allocation2 + $0x34] sm:$0xf]  ;;  %v1168_v45 = vor.u32 %v1279_v59, %v1165_v58  ;;  %v1140_v62 = vor.u32 %v1276_v26, %v1139_v1  ;;  %v1144_v53 = vor.u32 %v1273_v25, %v1141_v60 }
  0xfd   :  { %236 = vst [vmem:[#allocation2 + $0x70] sm:$0xff] %v230_v47  ;;  %v1115_v14 = vld [vmem:[#allocation2 + $0xa0] sm:$0xf]  ;;  %v1270_v16 = vld [vmem:[#allocation2 + $0xb4] sm:$0xf0] }
  0xfe   :  { %v1256_v13 = vld [vmem:[#allocation2 + $0x44] sm:$0xf0]  ;;  %v1053_v5 = vld [vmem:[#allocation2 + $0x48] sm:$0xf0]  ;;  %v1267_v31 = vld [vmem:[#allocation2 + $0xa4] sm:$0xf]  ;;  %v1116_v11 = vor.u32 %v1270_v16, %v1115_v14 }
  0xff   :  { %915 = vmatpush.bf16.msra.mxu3 %v1088_v19  ;;  %v1052_v54 = vor.u32 %v1256_v13, %v1051_v6  ;;  %v1056_v12 = vor.u32 %v1253_v52, %v1053_v5  ;;  %v1117_v24 = vld [vmem:[#allocation2 + $0xb8] sm:$0xf0]  ;;  %v1067_v52 = vld [vmem:[#allocation2 + $0x40] sm:$0xf]  ;;  %v1258_v37 = vld [vmem:[#allocation2 + $0x54] sm:$0xf0] }
 0x100   :  { %v1120_v18 = vor.u32 %v1267_v31, %v1117_v24  ;;  %v1255_v44 = vld [vmem:[#allocation2 + $0x44] sm:$0xf]  ;;  %v1069_v13 = vld [vmem:[#allocation2 + $0x58] sm:$0xf0]  ;;  %v1068_v5 = vor.u32 %v1258_v37, %v1067_v52  ;;  %v1249_v2 = vld [vmem:[#allocation2 + $0x14] sm:$0xf] }
 0x101   :  { %838 = vmatpush.bf16.msra.mxu0 %v1052_v54  ;;  %864 = vmatpush.bf16.msra.mxu2 %v1056_v12  ;;  %v1300_v48 = vld [vmem:[#allocation2 + $0x1a4] sm:$0xf0]  ;;  %v1237_v36 = vld [vmem:[#allocation2 + $0x1a8] sm:$0xf0]  ;;  %v1072_v41 = vor.u32 %v1255_v44, %v1069_v13  ;;  %v1043_v54 = vld [vmem:[#allocation2 + $0x10] sm:$0xf] }
 0x102   :  { %v1235_v49 = vld [vmem:[#allocation2 + $0x190] sm:$0xf]  ;;  %v1297_v29 = vld [vmem:[#allocation2 + $0x194] sm:$0xf]  ;;  %v1252_v12 = vld [vmem:[#allocation2 + $0x24] sm:$0xf0] }
 0x103   :  { %916 = vmatpush.bf16.msra.mxu3 %v1064_v21  ;;  %v1236_v51 = vor.u32 %v1300_v48, %v1235_v49  ;;  %v1240_v57 = vor.u32 %v1297_v29, %v1237_v36  ;;  %v1264_v22 = vld [vmem:[#allocation2 + $0x84] sm:$0xf0]  ;;  %v1093_v47 = vld [vmem:[#allocation2 + $0x88] sm:$0xf0]  ;;  %v1044_v3 = vor.u32 %v1252_v12, %v1043_v54 }
 0x104   :  { %v1091_v43 = vld [vmem:[#allocation2 + $0x70] sm:$0xf]  ;;  %v1261_v32 = vld [vmem:[#allocation2 + $0x74] sm:$0xf]  ;;  %v1045_v17 = vld [vmem:[#allocation2 + $0x28] sm:$0xf0] }
 0x105   :  { %839 = vmatpush.bf16.msra.mxu0 %v1028_v50  ;;  %865 = vmatpush.bf16.msra.mxu2 %v1032_v40  ;;  %v1092_v19 = vor.u32 %v1264_v22, %v1091_v43  ;;  %v1096_v6 = vor.u32 %v1261_v32, %v1093_v47  ;;  %v1048_v15 = vor.u32 %v1249_v2, %v1045_v17  ;;  %v1024_v29 = vld [vmem:[%s2213_s3 + $0x2] ss:$4 sm:$0x3f] }
 0x106   :  { %956 = vmatpush.bf16.msra.mxu1 %v1236_v51  ;;  %v996_v8 = vperm.slane %v1024_v29, 1  ;;  %v997_v60 = vperm.slane %v1024_v29, 2  ;;  %v1000_v47 = vperm.slane %v1024_v29, 5  ;;  %v999_v52 = vperm.slane %v1024_v29, 4 }
 0x107   :  { %917 = vmatpush.bf16.msra.mxu3 %v1040_v0 }
 0x108   :  { %840 = vmatmul.bf16.vlgmr.msra.gmra.mxu0 %v2095_v4  ;;  %866 = vmatmul.bf16.vlgmr.msra.gmra.mxu2 %v2095_v4 }
 0x109   :  { %936 = vmatpush.bf16.msrb.mxu2 %v1212_v61  ;;  %962 = vmatpush.bf16.msrb.mxu0 %v1216_v28 }
 0x10a   :  { %918 = vmatmul.bf16.vlgmr.msra.gmra.mxu3 %v2095_v4  ;;  %982 = vmatpush.bf16.msrb.mxu1 %v1240_v57 }
 0x10b   :  { %930 = vmatpush.bf16.msrb.mxu3 %v1232_v7  ;;  %1245 = vmatmul.msk.bf16.vlgmr.msra.gmra.mxu1 %vm828_vm7, %v1981_v20  ;;  %v995_v7 = vperm.slane %v1024_v29, 0 }
 0x10d   :  { %937 = vmatpush.bf16.msrb.mxu2 %v1188_v55  ;;  %963 = vmatpush.bf16.msrb.mxu0 %v1192_v56 }
 0x111   :  { %938 = vmatpush.bf16.msrb.mxu2 %v1164_v30  ;;  %964 = vmatpush.bf16.msrb.mxu0 %v1168_v45  ;;  %v998_v45 = vperm.slane %v1024_v29, 3 }
 0x115   :  { %939 = vmatpush.bf16.msrb.mxu2 %v1140_v62  ;;  %965 = vmatpush.bf16.msrb.mxu0 %v1144_v53 }
 0x119   :  { %940 = vmatpush.bf16.msrb.mxu2 %v1116_v11  ;;  %966 = vmatpush.bf16.msrb.mxu0 %v1120_v18 }
 0x11a   :  { %1244 = vmatmul.msk.bf16.vlgmr.msrb.gmra.mxu3 %vm828_vm7, %v1981_v20 }
 0x11b   :  { %1246 = vmatmul.msk.bf16.vlgmr.msrb.gmra.mxu1 %vm828_vm7, %v1981_v20 }
 0x11d   :  { %941 = vmatpush.bf16.msrb.mxu2 %v1092_v19  ;;  %967 = vmatpush.bf16.msrb.mxu0 %v1096_v6 }
 0x121   :  { %942 = vmatpush.bf16.msrb.mxu2 %v1068_v5  ;;  %968 = vmatpush.bf16.msrb.mxu0 %v1072_v41 }
 0x125   :  { %943 = vmatpush.bf16.msrb.mxu2 %v1044_v3  ;;  %969 = vmatpush.bf16.msrb.mxu0 %v1048_v15 }
 0x128   :  { %944 = vmatmul.bf16.vlgmr.msrb.gmra.mxu2 %v2095_v4  ;;  %970 = vmatmul.bf16.vlgmr.msrb.gmra.mxu0 %v2095_v4 }
 0x14a   :  { %v854_v21 = vpop.f32.mrf.mxu1 }
 0x14f   :  { %v880_v23 = vpop.f32.mrf.mxu3 }
 0x152   :  { %v856_v63 = vpop.f32.mrf.mxu1 }
 0x157   :  { %v882_v42 = vpop.f32.mrf.mxu3 }
 0x166   :  { %v550_v39 = vpop.permute.xlu0 %549 }
 0x169   :  { %v893_v20 = vpop.f32.mrf.mxu1 }
 0x16a   :  { %v894_v38 = vadd.f32 %v893_v20, %v550_v39 }
 0x16d   :  { %v906_v33 = vpop.f32.mrf.mxu3 }
 0x16e   :  { %v907_v58 = vadd.f32 %v906_v33, %v894_v38 }
 0x170   :  { %v990_v25 = vmax.f32 %v907_v58, 0.0 }
 0x171   :  { %v895_v46 = vpop.f32.mrf.mxu1 }
 0x172   :  { %v1009_v53 = vmul.f32 %v997_v60, %v990_v25 }
 0x175   :  { %v908_v27 = vpop.f32.mrf.mxu3 }
 0x185   :  { %v841_v49 = vpop.f32.mrf.mxu0 }
 0x186   :  { %v842_v48 = vadd.f32 %v841_v49, %v550_v39 }
 0x188   :  { %v958_v50 = vpop.f32.mrf.mxu1  ;;  %v855_v40 = vadd.f32 %v854_v21, %v842_v48 }
 0x18a   :  { %v988_v28 = vmax.f32 %v855_v40, 0.0 }
 0x18b   :  { %v867_v36 = vpop.f32.mrf.mxu2 }
 0x18c   :  { %v868_v0 = vadd.f32 %v867_v36, %v550_v39  ;;  %v1007_v35 = vmul.f32 %v995_v7, %v988_v28 }
 0x18d   :  { %v919_v4 = vpop.f32.mrf.mxu3  ;;  %v843_v61 = vpop.f32.mrf.mxu0 }
 0x18e   :  { %v881_v51 = vadd.f32 %v880_v23, %v868_v0  ;;  %v920_v59 = vadd.f32 %v919_v4, %v550_v39 }
 0x190   :  { %v989_v9 = vmax.f32 %v881_v51, 0.0  ;;  %v960_v34 = vpop.f32.mrf.mxu1 }
 0x192   :  { %v1008_v57 = vmul.f32 %v996_v8, %v989_v9 }
 0x193   :  { %v869_v55 = vpop.f32.mrf.mxu2 }
 0x194   :  { %v1013_v56 = vpack.c.bf16 %v1008_v57, %v1007_v35 }
 0x195   :  { %v921_v10 = vpop.f32.mrf.mxu3 }
 0x196   :  { %1016 = vst [vmem:[%s2216_s4] sm:$0xff] %v1013_v56 }
 0x198   :  { %v984_v1 = vpop.f32.mrf.mxu1 }
 0x19d   :  { %v932_v26 = vpop.f32.mrf.mxu3 }
 0x19e   :  { %v933_v30 = vadd.f32 %v932_v26, %v920_v59 }
 0x1a0   :  { %v991_v62 = vmax.f32 %v933_v30, 0.0  ;;  %v986_v16 = vpop.f32.mrf.mxu1 }
 0x1a2   :  { %v1010_v14 = vmul.f32 %v998_v45, %v991_v62 }
 0x1a4   :  { %v1014_v31 = vpack.c.bf16 %v1010_v14, %v1009_v53 }
 0x1a5   :  { %v971_v24 = vpop.f32.mrf.mxu0  ;;  %v934_v18 = vpop.f32.mrf.mxu3 }
 0x1a6   :  { %v972_v11 = vadd.f32 %v971_v24, %v550_v39  ;;  %1017 = vst [vmem:[%s2216_s4 + $0x8] sm:$0xff] %v1014_v31 }
 0x1a8   :  { %v985_v43 = vadd.f32 %v984_v1, %v972_v11 }
 0x1aa   :  { %v993_v32 = vmax.f32 %v985_v43, 0.0 }
 0x1ab   :  { %v945_v22 = vpop.f32.mrf.mxu2 }
 0x1ac   :  { %v946_v19 = vadd.f32 %v945_v22, %v550_v39  ;;  %v1012_v44 = vmul.f32 %v1000_v47, %v993_v32 }
 0x1ad   :  { %v973_v37 = vpop.f32.mrf.mxu0 }
 0x1ae   :  { %v959_v6 = vadd.f32 %v958_v50, %v946_v19 }
 0x1b0   :  { %v992_v13 = vmax.f32 %v959_v6, 0.0 }
 0x1b2   :  { %v1011_v5 = vmul.f32 %v999_v52, %v992_v13 }
 0x1b3   :  { %v947_v41 = vpop.f32.mrf.mxu2 }
 0x1b4   :  { %v1015_v54 = vpack.c.bf16 %v1012_v44, %v1011_v5 }
 0x1b6   :  { %1018 = vst [vmem:[%s2216_s4 + $0x10] sm:$0xff] %v1015_v54 }

// kernel: _lambda_.7
= control target key start
LH: loop header
LB: loop body
LE: loop exit
PB: predicated region body
PF: predicated region fallthrough
CT: control target
= control target key end

     0   :  { %s1603_s29 = smov 112   ;;  %s1604_s30 = smov 16   ;;  %vm838_vm7 = vcmask 130048   ;;  %s2304_s0 = inlined_call_operand.vmem [shape: bf16[16,768], index: 0, kind: input, shape index: {}]   ;;  %s2305_s3 = inlined_call_operand.vmem [shape: f32[3,768], index: 3, kind: input, shape index: {}]   ;;  %s2306_s1 = inlined_call_operand.vmem [shape: bf16[16,144], index: 1, kind: input, shape index: {}]   ;;  %s2307_s2 = inlined_call_operand.vmem [shape: f32[16,1], index: 2, kind: input, shape index: {}]   ;;  %s2308_s4 = inlined_call_operand.vmem [shape: bf16[16,768], index: 4, kind: output, shape index: {}]  }
   0x1   :  { %v20_v0 = vld [vmem:[%s2304_s0 + $0x10] sm:$0xff]  ;;  %v23_v1 = vld [vmem:[%s2304_s0 + $0x28] sm:$0xff]  ;;  %v22_v7 = vld [vmem:[%s2304_s0 + $0x20] sm:$0xff]  ;;  %s1605_s7 = smov 113   ;;  %s1606_s8 = smov 111  }
   0x2   :  { %v36_v2 = vld [vmem:[%s2305_s3] ss:$4 sm:$0x3f]  ;;  %v1645_v3 = vunpack.c.l.bf16 %v20_v0  ;;  %v1647_v4 = vunpack.c.l.bf16 %v23_v1  ;;  %291 = vst [vmem:[#allocation2 + $0xd0] sm:$0xff] %v20_v0  ;;  %v1660_v11 = vunpack.c.l.bf16 %v22_v7  ;;  %v21_v12 = vld [vmem:[%s2304_s0 + $0x18] sm:$0xff]  ;;  %v1667_v18 = vunpack.c.h.bf16 %v20_v0  ;;  %s1607_s9 = smov 127  }
   0x3   :  { %v46_v5 = vperm.slane %v36_v2, 4  ;;  %v19_v6 = vld [vmem:[%s2304_s0 + $0x8] sm:$0xff]  ;;  %v44_v8 = vperm.slane %v36_v2, 2  ;;  %v18_v9 = vld [vmem:[%s2304_s0] sm:$0xff]  ;;  %294 = vst [vmem:[#allocation2 + $0xe8] sm:$0xff] %v23_v1  ;;  %v42_v14 = vperm.slane %v36_v2, 0  ;;  %v30_v17 = vunpack.c.l.bf16 %v21_v12 }
   0x4   :  { %v1658_v10 = vunpack.c.l.bf16 %v19_v6  ;;  %v24_v13 = vunpack.c.l.bf16 %v18_v9  ;;  %290 = vst [vmem:[#allocation2 + $0xc8] sm:$0xff] %v19_v6  ;;  %v1671_v22 = vunpack.c.h.bf16 %v23_v1  ;;  %v47_v25 = vperm.slane %v36_v2, 5  ;;  %s1602_s0 = smov 17   ;;  %v1697_v46 = vld [vmem:[%s2305_s3 + $0x1] ss:$4 sm:$0x3f] }
   0x5   :  { %v58_v15 = vmul.f32 %v46_v5, %v1645_v3  ;;  %v64_v16 = vmul.f32 %v46_v5, %v1647_v4  ;;  %v62_v20 = vmul.f32 %v44_v8, %v1660_v11  ;;  %293 = vst [vmem:[#allocation2 + $0xe0] sm:$0xff] %v22_v7  ;;  %v60_v24 = vmul.f32 %v42_v14, %v30_v17  ;;  %s1608_s10 = smov 1   ;;  %s1609_s11 = smov 15  }
   0x6   :  { %v56_v19 = vmul.f32 %v44_v8, %v1658_v10  ;;  %v54_v21 = vmul.f32 %v42_v14, %v24_v13  ;;  %289 = vst [vmem:[#allocation2 + $0xc0] sm:$0xff] %v18_v9  ;;  %v1675_v26 = vunpack.c.h.bf16 %v19_v6  ;;  %v33_v28 = vunpack.c.h.bf16 %v22_v7 }
   0x7   :  { %v1673_v23 = vpack.i.bf16 %v64_v16, %v58_v15  ;;  %292 = vst [vmem:[#allocation2 + $0xd8] sm:$0xff] %v21_v12  ;;  %v45_v29 = vperm.slane %v36_v2, 3  ;;  %v25_v30 = vunpack.c.h.bf16 %v18_v9  ;;  %v59_v32 = vmul.f32 %v47_v25, %v1667_v18 }
   0x8   :  { %v1677_v27 = vpack.i.bf16 %v62_v20, %v56_v19  ;;  %v1680_v31 = vpack.i.bf16 %v60_v24, %v54_v21  ;;  %v65_v33 = vmul.f32 %v47_v25, %v1671_v22  ;;  %v31_v34 = vunpack.c.h.bf16 %v21_v12 }
   0x9   :  { %1381 = vrot.lane.b32.xlu2 %v1673_v23, %s1602_s0  ;;  %v57_v35 = vmul.f32 %v45_v29, %v1675_v26  ;;  %v63_v36 = vmul.f32 %v45_v29, %v33_v28  ;;  %v43_v37 = vperm.slane %v36_v2, 1  ;;  %v1400_v43 = vpack.i.bf16 %v1660_v11, %v1658_v10 }
   0xa   :  { %1371 = vrot.lane.b32.xlu1 %v1677_v27, %s1602_s0  ;;  %1361 = vrot.lane.b32.xlu0 %v1680_v31, %s1602_s0  ;;  %v1687_v40 = vpack.i.bf16 %v65_v33, %v59_v32  ;;  %v1395_v44 = vpack.i.bf16 %v31_v34, %v25_v30  ;;  %v1390_v45 = vpack.i.bf16 %v30_v17, %v24_v13  ;;  %v67_v47 = vperm.slane %v1697_v46, 0 }
   0xb   :  { %v55_v38 = vmul.f32 %v43_v37, %v25_v30  ;;  %v61_v39 = vmul.f32 %v43_v37, %v31_v34  ;;  %v1375_v41 = vpack.i.bf16 %v63_v36, %v57_v35  ;;  %v1703_v48 = vpack.i.bf16 %v1647_v4, %v1645_v3 }
   0xc   :  { %v1405_v49 = vpack.i.bf16 %v33_v28, %v1675_v26  ;;  %v79_v50 = vmul.f32 %v67_v47, %v24_v13  ;;  %v85_v51 = vmul.f32 %v67_v47, %v30_v17  ;;  %v69_v53 = vperm.slane %v1697_v46, 2 }
   0xd   :  { %v1365_v42 = vpack.i.bf16 %v61_v39, %v55_v38  ;;  %v68_v54 = vperm.slane %v1697_v46, 1  ;;  %v71_v60 = vperm.slane %v1697_v46, 4  ;;  %v70_v62 = vperm.slane %v1697_v46, 3 }
   0xe   :  { %v1430_v52 = vpack.i.bf16 %v85_v51, %v79_v50  ;;  %v81_v55 = vmul.f32 %v69_v53, %v1658_v10  ;;  %v87_v56 = vmul.f32 %v69_v53, %v1660_v11  ;;  %v72_v7 = vperm.slane %v1697_v46, 5 }
   0xf   :  { %v80_v57 = vmul.f32 %v68_v54, %v25_v30  ;;  %v86_v58 = vmul.f32 %v68_v54, %v31_v34  ;;  %v83_v63 = vmul.f32 %v71_v60, %v1645_v3  ;;  %v89_v0 = vmul.f32 %v71_v60, %v1647_v4 }
  0x10   :  { %v1445_v59 = vpack.i.bf16 %v87_v56, %v81_v55  ;;  %v82_v1 = vmul.f32 %v70_v62, %v1675_v26  ;;  %v88_v2 = vmul.f32 %v70_v62, %v33_v28  ;;  %v1550_v4 = vpack.i.bf16 %v1671_v22, %v1667_v18 }
  0x11   :  { %1386 = vrot.lane.b32.xlu2 %v1687_v40, %s1602_s0  ;;  %v1435_v61 = vpack.i.bf16 %v86_v58, %v80_v57  ;;  %v1455_v5 = vpack.i.bf16 %v89_v0, %v83_v63  ;;  %v84_v8 = vmul.f32 %v72_v7, %v1667_v18  ;;  %v90_v9 = vmul.f32 %v72_v7, %v1671_v22 }
  0x12   :  { %1376 = vrot.lane.b32.xlu1 %v1375_v41, %s1602_s0  ;;  %1366 = vrot.lane.b32.xlu0 %v1365_v42, %s1602_s0  ;;  %v1450_v6 = vpack.i.bf16 %v88_v2, %v82_v1  ;;  %v115_v13 = vlaneseq }
  0x13   :  { %v1560_v11 = vpack.i.bf16 %v90_v9, %v84_v8 }
  0x14   :  { %v1763_v17 = vand.u32 127, %v115_v13 }
  0x16   :  { %vm117_vm0 = vcmp.lt.s32.totalorder %v1763_v17, 17  ;;  %vm166_vm1 = vcmp.lt.s32.totalorder %v1763_v17, 16  ;;  %vm417_vm2 = vcmp.lt.s32.totalorder %v1763_v17, 112  ;;  %vm368_vm3 = vcmp.lt.s32.totalorder %v1763_v17, 113 }
  0x17   :  { %vm466_vm4 = vcmp.lt.s32.totalorder %v1763_v17, 111  ;;  %vm319_vm5 = vcmp.lt.s32.totalorder %v1763_v17, 127  ;;  %vm264_vm6 = vcmp.lt.s32.totalorder %v1763_v17, 1  ;;  %vm215_vm8 = vcmp.lt.s32.totalorder %v1763_v17, 15 }
  0x19   :  { %1401 = vrot.lane.b32.xlu2 %v1400_v43, %s1603_s29 }
  0x1a   :  { %1396 = vrot.lane.b32.xlu1 %v1395_v44, %s1604_s30  ;;  %1391 = vrot.lane.b32.xlu0 %v1390_v45, %s1604_s30 }
  0x21   :  { %1416 = vrot.lane.b32.xlu2 %v1677_v27, %s1605_s7 }
  0x22   :  { %1411 = vrot.lane.b32.xlu1 %v1703_v48, %s1603_s29  ;;  %1406 = vrot.lane.b32.xlu0 %v1405_v49, %s1603_s29 }
  0x29   :  { %1431 = vrot.lane.b32.xlu2 %v1430_v52, %s1606_s8 }
  0x2a   :  { %1426 = vrot.lane.b32.xlu1 %v1673_v23, %s1605_s7  ;;  %1421 = vrot.lane.b32.xlu0 %v1375_v41, %s1605_s7 }
  0x31   :  { %1446 = vrot.lane.b32.xlu2 %v1445_v59, %s1607_s9 }
  0x32   :  { %1441 = vrot.lane.b32.xlu1 %v1445_v59, %s1606_s8  ;;  %1436 = vrot.lane.b32.xlu0 %v1435_v61, %s1606_s8 }
  0x39   :  { %1461 = vrot.lane.b32.xlu2 %v1390_v45, %s1603_s29 }
  0x3a   :  { %1456 = vrot.lane.b32.xlu1 %v1455_v5, %s1607_s9  ;;  %1451 = vrot.lane.b32.xlu0 %v1450_v6, %s1607_s9 }
  0x41   :  { %1476 = vrot.lane.b32.xlu2 %v1365_v42, %s1605_s7 }
  0x42   :  { %1471 = vrot.lane.b32.xlu1 %v1680_v31, %s1605_s7  ;;  %1466 = vrot.lane.b32.xlu0 %v1395_v44, %s1603_s29 }
  0x49   :  { %1491 = vrot.lane.b32.xlu2 %v1375_v41, %s1608_s10 }
  0x4a   :  { %1486 = vrot.lane.b32.xlu1 %v1677_v27, %s1608_s10  ;;  %1481 = vrot.lane.b32.xlu0 %v1365_v42, %s1608_s10 }
  0x51   :  { %1506 = vrot.lane.b32.xlu2 %v1435_v61, %s1609_s11 }
  0x52   :  { %1501 = vrot.lane.b32.xlu1 %v1435_v61, %s1607_s9  ;;  %1496 = vrot.lane.b32.xlu0 %v1430_v52, %s1607_s9 }
  0x59   :  { %1521 = vrot.lane.b32.xlu2 %v1450_v6, %s1606_s8 }
  0x5a   :  { %1516 = vrot.lane.b32.xlu1 %v1450_v6, %s1609_s11  ;;  %1511 = vrot.lane.b32.xlu0 %v1445_v59, %s1609_s11 }
  0x61   :  { %1536 = vrot.lane.b32.xlu2 %v1405_v49, %s1604_s30 }
  0x62   :  { %1531 = vrot.lane.b32.xlu1 %v1400_v43, %s1604_s30  ;;  %1526 = vrot.lane.b32.xlu0 %v1455_v5, %s1606_s8 }
  0x63   :  { %v1382_v3 = vpop.permute.xlu2 %1381 }
  0x64   :  { %v1384_v18 = vunpack.i.h.bf16 %v1382_v3  ;;  %v1383_v19 = vunpack.i.l.bf16 %v1382_v3 }
  0x69   :  { %1551 = vrot.lane.b32.xlu2 %v1550_v4, %s1603_s29 }
  0x6a   :  { %1546 = vrot.lane.b32.xlu1 %v1687_v40, %s1608_s10  ;;  %1541 = vrot.lane.b32.xlu0 %v1680_v31, %s1608_s10 }
  0x6b   :  { %v1387_v10 = vpop.permute.xlu2 %1386 }
  0x6c   :  { %v1389_v20 = vunpack.i.h.bf16 %v1387_v10  ;;  %v1388_v21 = vunpack.i.l.bf16 %v1387_v10 }
  0x6e   :  { %v119_v24 = vsel %vm117_vm0, %v1384_v18, %v1389_v20 }
  0x71   :  { %1566 = vrot.lane.b32.xlu2 %v1687_v40, %s1605_s7 }
  0x72   :  { %1561 = vrot.lane.b32.xlu1 %v1560_v11, %s1609_s11  ;;  %1556 = vrot.lane.b32.xlu0 %v1430_v52, %s1609_s11 }
  0x73   :  { %v1756_v12 = vpop.permute.xlu2 %1401 }
  0x74   :  { %v1404_v61 = vunpack.i.h.bf16 %v1756_v12  ;;  %v1403_v62 = vunpack.i.l.bf16 %v1756_v12 }
  0x79   :  { %1581 = vrot.lane.b32.xlu2 %v1673_v23, %s1608_s10  ;;  %v118_v23 = vsel %vm117_vm0, %v1383_v19, %v1388_v21 }
  0x7a   :  { %1576 = vrot.lane.b32.xlu1 %v1560_v11, %s1607_s9  ;;  %1571 = vrot.lane.b32.xlu0 %v1550_v4, %s1604_s30 }
  0x7b   :  { %v1761_v14 = vpop.permute.xlu2 %1416 }
  0x7c   :  { %v1372_v15 = vpop.permute.xlu1 %1371  ;;  %v1362_v16 = vpop.permute.xlu0 %1361  ;;  %v1419_v13 = vunpack.i.h.bf16 %v1761_v14 }
  0x7d   :  { %v1374_v25 = vunpack.i.h.bf16 %v1372_v15  ;;  %v1373_v27 = vunpack.i.l.bf16 %v1372_v15  ;;  %v1363_v28 = vunpack.i.l.bf16 %v1362_v16  ;;  %v1364_v32 = vunpack.i.h.bf16 %v1362_v16 }
  0x7e   :  { %v1418_v15 = vunpack.i.l.bf16 %v1761_v14 }
  0x7f   :  { %v128_v43 = vsel %vm117_vm0, %v1388_v21, %v1363_v28  ;;  %v129_v47 = vsel %vm117_vm0, %v1389_v20, %v1364_v32 }
  0x81   :  { %1596 = vrot.lane.b32.xlu2 %v1703_v48, %s1604_s30 }
  0x82   :  { %1591 = vrot.lane.b32.xlu1 %v1560_v11, %s1606_s8  ;;  %1586 = vrot.lane.b32.xlu0 %v1455_v5, %s1609_s11 }
  0x83   :  { %v1770_v22 = vpop.permute.xlu2 %1431 }
  0x84   :  { %v1377_v26 = vpop.permute.xlu1 %1376  ;;  %v1367_v31 = vpop.permute.xlu0 %1366 }
  0x85   :  { %v1379_v29 = vunpack.i.h.bf16 %v1377_v26  ;;  %v1378_v30 = vunpack.i.l.bf16 %v1377_v26  ;;  %v1369_v33 = vunpack.i.h.bf16 %v1367_v31  ;;  %v1368_v34 = vunpack.i.l.bf16 %v1367_v31 }
  0x86   :  { %v1434_v31 = vunpack.i.h.bf16 %v1770_v22 }
  0x87   :  { %v121_v35 = vsel %vm117_vm0, %v1379_v29, %v1384_v18  ;;  %v120_v36 = vsel %vm117_vm0, %v1378_v30, %v1383_v19  ;;  %v122_v37 = vsel %vm117_vm0, %v1373_v27, %v1378_v30  ;;  %v123_v38 = vsel %vm117_vm0, %v1374_v25, %v1379_v29 }
  0x88   :  { %v135_v39 = vpack.c.bf16 %v119_v24, %v121_v35  ;;  %v132_v40 = vpack.c.bf16 %v118_v23, %v120_v36  ;;  %v125_v41 = vsel %vm117_vm0, %v1369_v33, %v1374_v25  ;;  %v124_v42 = vsel %vm117_vm0, %v1368_v34, %v1373_v27 }
  0x89   :  { %v134_v44 = vpack.c.bf16 %v123_v38, %v125_v41  ;;  %v126_v45 = vsel %vm117_vm0, %v1363_v28, %v1368_v34  ;;  %v127_v46 = vsel %vm117_vm0, %v1364_v32, %v1369_v33  ;;  %v131_v49 = vpack.c.bf16 %v122_v37, %v124_v42 }
  0x8a   :  { %141 = vst [vmem:[#allocation2 + $0x28] sm:$0xff] %v135_v39  ;;  %v130_v48 = vpack.c.bf16 %v126_v45, %v128_v43  ;;  %v133_v50 = vpack.c.bf16 %v127_v46, %v129_v47  ;;  %v1433_v32 = vunpack.i.l.bf16 %v1770_v22 }
  0x8b   :  { %138 = vst [vmem:[#allocation2 + $0x10] sm:$0xff] %v132_v40  ;;  %v1796_v51 = vpop.permute.xlu2 %1446 }
  0x8c   :  { %140 = vst [vmem:[#allocation2 + $0x20] sm:$0xff] %v134_v44  ;;  %v1798_v52 = vpop.permute.xlu1 %1396  ;;  %v1803_v55 = vpop.permute.xlu0 %1391  ;;  %v1449_v46 = vunpack.i.h.bf16 %v1796_v51  ;;  %v1448_v47 = vunpack.i.l.bf16 %v1796_v51 }
  0x8d   :  { %136 = vst [vmem:[#allocation2] sm:$0xff] %v130_v48  ;;  %v1399_v53 = vunpack.i.h.bf16 %v1798_v52  ;;  %v1398_v54 = vunpack.i.l.bf16 %v1798_v52  ;;  %v1394_v56 = vunpack.i.h.bf16 %v1803_v55  ;;  %v1393_v57 = vunpack.i.l.bf16 %v1803_v55  ;;  %v547_v55 = vld [vmem:[%s2307_s2] sm:$0xff] }
  0x8e   :  { %137 = vst [vmem:[#allocation2 + $0x8] sm:$0xff] %v131_v49 }
  0x8f   :  { %139 = vst [vmem:[#allocation2 + $0x18] sm:$0xff] %v133_v50  ;;  %v1813_v58 = vsel %vm166_vm1, %v1394_v56, %v1399_v53  ;;  %v1821_v59 = vsel %vm166_vm1, %v1393_v57, %v1398_v54 }
  0x93   :  { %v1823_v60 = vpop.permute.xlu2 %1461 }
  0x94   :  { %v1827_v63 = vpop.permute.xlu1 %1411  ;;  %v1407_v2 = vpop.permute.xlu0 %1406  ;;  %v1297_v17 = vld [vmem:[#allocation2 + $0x4] sm:$0xf] }
  0x95   :  { %v1414_v0 = vunpack.i.h.bf16 %v1827_v63  ;;  %v1413_v1 = vunpack.i.l.bf16 %v1827_v63  ;;  %v1409_v5 = vunpack.i.h.bf16 %v1407_v2  ;;  %v1408_v6 = vunpack.i.l.bf16 %v1407_v2 }
  0x97   :  { %v421_v3 = vsel %vm417_vm2, %v1409_v5, %v1414_v0  ;;  %v423_v4 = vsel %vm417_vm2, %v1404_v61, %v1409_v5  ;;  %v420_v7 = vsel %vm417_vm2, %v1408_v6, %v1413_v1  ;;  %v422_v8 = vsel %vm417_vm2, %v1403_v62, %v1408_v6 }
  0x98   :  { %v434_v9 = vpack.c.bf16 %v421_v3, %v423_v4  ;;  %v431_v10 = vpack.c.bf16 %v420_v7, %v422_v8 }
  0x9a   :  { %440 = vst [vmem:[#allocation2 + $0x170] sm:$0xff] %v434_v9 }
  0x9b   :  { %v1848_v11 = vpop.permute.xlu2 %1476  ;;  %437 = vst [vmem:[#allocation2 + $0x158] sm:$0xff] %v431_v10 }
  0x9c   :  { %v1852_v16 = vpop.permute.xlu1 %1426  ;;  %v1422_v20 = vpop.permute.xlu0 %1421 }
  0x9d   :  { %v1429_v18 = vunpack.i.h.bf16 %v1852_v16  ;;  %v1428_v19 = vunpack.i.l.bf16 %v1852_v16  ;;  %v1424_v21 = vunpack.i.h.bf16 %v1422_v20  ;;  %v1423_v23 = vunpack.i.l.bf16 %v1422_v20 }
  0x9f   :  { %v372_v24 = vsel %vm368_vm3, %v1424_v21, %v1429_v18  ;;  %v374_v25 = vsel %vm368_vm3, %v1419_v13, %v1424_v21  ;;  %v371_v26 = vsel %vm368_vm3, %v1423_v23, %v1428_v19  ;;  %v373_v27 = vsel %vm368_vm3, %v1418_v15, %v1423_v23 }
  0xa0   :  { %v385_v28 = vpack.c.bf16 %v372_v24, %v374_v25  ;;  %v382_v29 = vpack.c.bf16 %v371_v26, %v373_v27  ;;  %v1479_v25 = vunpack.i.h.bf16 %v1848_v11  ;;  %v1478_v26 = vunpack.i.l.bf16 %v1848_v11 }
  0xa1   :  { %v1343_v20 = vld [vmem:[#allocation2 + $0x16c] sm:$0xf0] }
  0xa2   :  { %391 = vst [vmem:[#allocation2 + $0x140] sm:$0xff] %v385_v28  ;;  %v1251_v24 = vld [vmem:[#allocation2 + $0x158] sm:$0xf] }
  0xa3   :  { %v1873_v30 = vpop.permute.xlu2 %1491  ;;  %388 = vst [vmem:[#allocation2 + $0x128] sm:$0xff] %v382_v29  ;;  %v1252_v11 = vor.u32 %v1343_v20, %v1251_v24 }
  0xa4   :  { %v1877_v33 = vpop.permute.xlu1 %1441  ;;  %v1437_v36 = vpop.permute.xlu0 %1436 }
  0xa5   :  { %v1444_v34 = vunpack.i.h.bf16 %v1877_v33  ;;  %v1443_v35 = vunpack.i.l.bf16 %v1877_v33  ;;  %v1439_v37 = vunpack.i.h.bf16 %v1437_v36  ;;  %v1438_v38 = vunpack.i.l.bf16 %v1437_v36 }
  0xa6   :  { %v1464_v36 = vunpack.i.h.bf16 %v1823_v60 }
  0xa7   :  { %v474_v39 = vsel %vm466_vm4, %v1439_v37, %v1444_v34  ;;  %v476_v40 = vsel %vm466_vm4, %v1434_v31, %v1439_v37  ;;  %v473_v41 = vsel %vm466_vm4, %v1438_v38, %v1443_v35  ;;  %v475_v42 = vsel %vm466_vm4, %v1433_v32, %v1438_v38 }
  0xa8   :  { %v482_v43 = vpack.c.bf16 %v474_v39, %v476_v40  ;;  %v479_v44 = vpack.c.bf16 %v473_v41, %v475_v42  ;;  %v1463_v40 = vunpack.i.l.bf16 %v1823_v60 }
  0xaa   :  { %488 = vst [vmem:[#allocation2 + $0x198] sm:$0xff] %v482_v43 }
  0xab   :  { %v1898_v45 = vpop.permute.xlu2 %1506  ;;  %485 = vst [vmem:[#allocation2 + $0x180] sm:$0xff] %v479_v44 }
  0xac   :  { %v1902_v48 = vpop.permute.xlu1 %1456  ;;  %v1452_v2 = vpop.permute.xlu0 %1451 }
  0xad   :  { %v1459_v49 = vunpack.i.h.bf16 %v1902_v48  ;;  %v1458_v50 = vunpack.i.l.bf16 %v1902_v48  ;;  %v1454_v5 = vunpack.i.h.bf16 %v1452_v2  ;;  %v1453_v6 = vunpack.i.l.bf16 %v1452_v2 }
  0xaf   :  { %v323_v3 = vsel %vm319_vm5, %v1454_v5, %v1459_v49  ;;  %v325_v4 = vsel %vm319_vm5, %v1449_v46, %v1454_v5  ;;  %v322_v7 = vsel %vm319_vm5, %v1453_v6, %v1458_v50  ;;  %v324_v8 = vsel %vm319_vm5, %v1448_v47, %v1453_v6  ;;  %v1227_v5 = vld [vmem:[#allocation2 + $0x128] sm:$0xf]  ;;  %v1337_v6 = vld [vmem:[#allocation2 + $0x13c] sm:$0xf0] }
  0xb0   :  { %v336_v9 = vpack.c.bf16 %v323_v3, %v325_v4  ;;  %v333_v10 = vpack.c.bf16 %v322_v7, %v324_v8  ;;  %v376_v3 = vsel %vm368_vm3, %v1479_v25, %v1419_v13  ;;  %v375_v4 = vsel %vm368_vm3, %v1478_v26, %v1418_v15 }
  0xb1   :  { %v1348_v21 = vld [vmem:[#allocation2 + $0x194] sm:$0xf0]  ;;  %v1269_v23 = vld [vmem:[#allocation2 + $0x198] sm:$0xf0] }
  0xb2   :  { %342 = vst [vmem:[#allocation2 + $0x110] sm:$0xff] %v336_v9  ;;  %v1267_v28 = vld [vmem:[#allocation2 + $0x180] sm:$0xf]  ;;  %v1345_v29 = vld [vmem:[#allocation2 + $0x184] sm:$0xf] }
  0xb3   :  { %v1925_v27 = vpop.permute.xlu2 %1521  ;;  %339 = vst [vmem:[#allocation2 + $0xf8] sm:$0xff] %v333_v10  ;;  %v1268_v38 = vor.u32 %v1348_v21, %v1267_v28  ;;  %v1272_v39 = vor.u32 %v1345_v29, %v1269_v23  ;;  %v1228_v23 = vor.u32 %v1337_v6, %v1227_v5 }
  0xb4   :  { %v1928_v37 = vpop.permute.xlu1 %1471  ;;  %v1467_v43 = vpop.permute.xlu0 %1466 }
  0xb5   :  { %v1474_v41 = vunpack.i.h.bf16 %v1928_v37  ;;  %v1473_v42 = vunpack.i.l.bf16 %v1928_v37  ;;  %v1469_v44 = vunpack.i.h.bf16 %v1467_v43  ;;  %v1468_v2 = vunpack.i.l.bf16 %v1467_v43  ;;  %863 = vmatpush.bf16.msra.mxu1 %v1268_v38  ;;  %891 = vmatpush.bf16.msra.mxu3 %v1272_v39  ;;  %v1179_v38 = vld [vmem:[#allocation2 + $0xc8] sm:$0xf]  ;;  %v1325_v39 = vld [vmem:[#allocation2 + $0xdc] sm:$0xf0] }
  0xb7   :  { %v378_v7 = vsel %vm368_vm3, %v1474_v41, %v1479_v25  ;;  %v377_v8 = vsel %vm368_vm3, %v1473_v42, %v1478_v26  ;;  %v425_v14 = vsel %vm417_vm2, %v1469_v44, %v1404_v61  ;;  %v427_v13 = vsel %vm417_vm2, %v1464_v36, %v1469_v44 }
  0xb8   :  { %v384_v9 = vpack.c.bf16 %v376_v3, %v378_v7  ;;  %v381_v10 = vpack.c.bf16 %v375_v4, %v377_v8  ;;  %v433_v15 = vpack.c.bf16 %v425_v14, %v427_v13  ;;  %v424_v20 = vsel %vm417_vm2, %v1468_v2, %v1403_v62 }
  0xb9   :  { %898 = vmatpush.bf16.msrb.mxu1 %v1252_v11  ;;  %v426_v21 = vsel %vm417_vm2, %v1463_v40, %v1468_v2  ;;  %v1331_v61 = vld [vmem:[#allocation2 + $0x10c] sm:$0xf0]  ;;  %v1494_v25 = vunpack.i.h.bf16 %v1873_v30  ;;  %v1493_v26 = vunpack.i.l.bf16 %v1873_v30  ;;  %v1180_v4 = vor.u32 %v1325_v39, %v1179_v38 }
  0xba   :  { %390 = vst [vmem:[#allocation2 + $0x138] sm:$0xff] %v384_v9  ;;  %v430_v24 = vpack.c.bf16 %v424_v20, %v426_v21  ;;  %v1203_v12 = vld [vmem:[#allocation2 + $0xf8] sm:$0xf] }
  0xbb   :  { %387 = vst [vmem:[#allocation2 + $0x120] sm:$0xff] %v381_v10  ;;  %v1967_v28 = vpop.permute.xlu2 %1536  ;;  %v1204_v29 = vor.u32 %v1331_v61, %v1203_v12 }
  0xbc   :  { %439 = vst [vmem:[#allocation2 + $0x168] sm:$0xff] %v433_v15  ;;  %v1487_v62 = vpop.permute.xlu1 %1486  ;;  %v1970_v44 = vpop.permute.xlu0 %1481 }
  0xbd   :  { %899 = vmatpush.bf16.msrb.mxu1 %v1228_v23  ;;  %436 = vst [vmem:[#allocation2 + $0x150] sm:$0xff] %v430_v24  ;;  %v1489_v43 = vunpack.i.h.bf16 %v1487_v62  ;;  %v1488_v11 = vunpack.i.l.bf16 %v1487_v62  ;;  %v1484_v2 = vunpack.i.h.bf16 %v1970_v44  ;;  %v1483_v5 = vunpack.i.l.bf16 %v1970_v44  ;;  %v1067_v44 = vld [vmem:[%s2306_s1] sm:$0xf] }
  0xbf   :  { %v270_v6 = vsel %vm264_vm6, %v1489_v43, %v1494_v25  ;;  %v269_v3 = vsel %vm264_vm6, %v1488_v11, %v1493_v26  ;;  %v272_v7 = vsel %vm264_vm6, %v1484_v2, %v1489_v43  ;;  %v271_v8 = vsel %vm264_vm6, %v1483_v5, %v1488_v11 }
  0xc0   :  { %v281_v9 = vpack.c.bf16 %v270_v6, %v272_v7  ;;  %v278_v10 = vpack.c.bf16 %v269_v3, %v271_v8 }
  0xc1   :  { %900 = vmatpush.bf16.msrb.mxu1 %v1204_v29  ;;  %v1336_v7 = vld [vmem:[#allocation2 + $0x134] sm:$0xf0]  ;;  %v1221_v63 = vld [vmem:[#allocation2 + $0x138] sm:$0xf0] }
  0xc2   :  { %287 = vst [vmem:[#allocation2 + $0xb0] sm:$0xff] %v281_v9 }
  0xc3   :  { %v1552_v14 = vpop.permute.xlu2 %1551  ;;  %v1342_v13 = vld [vmem:[#allocation2 + $0x164] sm:$0xf0]  ;;  %v1245_v15 = vld [vmem:[#allocation2 + $0x168] sm:$0xf0]  ;;  %284 = vst [vmem:[#allocation2 + $0x98] sm:$0xff] %v278_v10 }
  0xc4   :  { %v1554_v20 = vunpack.i.h.bf16 %v1552_v14  ;;  %v1553_v21 = vunpack.i.l.bf16 %v1552_v14  ;;  %v1502_v23 = vpop.permute.xlu1 %1501  ;;  %v1243_v24 = vld [vmem:[#allocation2 + $0x150] sm:$0xf]  ;;  %v1339_v61 = vld [vmem:[#allocation2 + $0x154] sm:$0xf]  ;;  %v1990_v29 = vpop.permute.xlu0 %1496  ;;  %v1295_v10 = vld [vmem:[%s2306_s1 + $0x4] sm:$0xf] }
  0xc5   :  { %901 = vmatpush.bf16.msrb.mxu1 %v1180_v4  ;;  %v1504_v12 = vunpack.i.h.bf16 %v1502_v23  ;;  %v1503_v62 = vunpack.i.l.bf16 %v1502_v23  ;;  %v1244_v38 = vor.u32 %v1342_v13, %v1243_v24  ;;  %v1248_v39 = vor.u32 %v1339_v61, %v1245_v15  ;;  %v1219_v4 = vld [vmem:[#allocation2 + $0x120] sm:$0xf]  ;;  %v1069_v14 = vld [vmem:[%s2306_s1 + $0x8] sm:$0xf0] }
  0xc6   :  { %v419_v43 = vsel %vm417_vm2, %v1414_v0, %v1554_v20  ;;  %v418_v11 = vsel %vm417_vm2, %v1413_v1, %v1553_v21  ;;  %v428_v6 = vsel %vm417_vm2, %v1553_v21, %v1463_v40  ;;  %v429_v3 = vsel %vm417_vm2, %v1554_v20, %v1464_v36  ;;  %v1333_v0 = vld [vmem:[#allocation2 + $0x124] sm:$0xf] }
  0xc7   :  { %v432_v8 = vpack.c.bf16 %v428_v6, %v418_v11  ;;  %v435_v9 = vpack.c.bf16 %v429_v3, %v419_v43  ;;  %842 = vmatpush.bf16.msra.mxu0 %v1244_v38  ;;  %v327_v1 = vsel %vm319_vm5, %v1504_v12, %v1449_v46  ;;  %v326_v60 = vsel %vm319_vm5, %v1503_v62, %v1448_v47 }
  0xc8   :  { %v1499_v40 = vunpack.i.h.bf16 %v1990_v29  ;;  %v1498_v36 = vunpack.i.l.bf16 %v1990_v29  ;;  %870 = vmatpush.bf16.msra.mxu2 %v1248_v39  ;;  %v1220_v46 = vor.u32 %v1336_v7, %v1219_v4  ;;  %v2024_v13 = vor.u32 %v1295_v10, %v1069_v14 }
  0xc9   :  { %438 = vst [vmem:[#allocation2 + $0x160] sm:$0xff] %v432_v8  ;;  %v1224_v15 = vor.u32 %v1333_v0, %v1221_v63  ;;  %v1319_v20 = vld [vmem:[#allocation2 + $0xac] sm:$0xf0]  ;;  %v1509_v38 = vunpack.i.h.bf16 %v1898_v45 }
  0xca   :  { %441 = vst [vmem:[#allocation2 + $0x178] sm:$0xff] %v435_v9  ;;  %v329_v51 = vsel %vm319_vm5, %v1499_v40, %v1504_v12  ;;  %v328_v47 = vsel %vm319_vm5, %v1498_v36, %v1503_v62  ;;  %v1155_v61 = vld [vmem:[#allocation2 + $0x98] sm:$0xf]  ;;  %1290 = vmatmul.msk.bf16.vlgmr.msra.gmra.mxu3 %vm838_vm7, %v2024_v13  ;;  %1289 = vmatmul.msk.bf16.vlgmr.msra.gmra.mxu1 %vm838_vm7, %v2024_v13  ;;  %v1508_v62 = vunpack.i.l.bf16 %v1898_v45 }
  0xcb   :  { %v335_v21 = vpack.c.bf16 %v327_v1, %v329_v51  ;;  %v332_v23 = vpack.c.bf16 %v326_v60, %v328_v47  ;;  %843 = vmatpush.bf16.msra.mxu0 %v1220_v46  ;;  %v1567_v24 = vpop.permute.xlu2 %1566  ;;  %v1156_v11 = vor.u32 %v1319_v20, %v1155_v61  ;;  %v1539_v51 = vunpack.i.h.bf16 %v1967_v28 }
  0xcc   :  { %871 = vmatpush.bf16.msra.mxu2 %v1224_v15  ;;  %v1569_v12 = vunpack.i.h.bf16 %v1567_v24  ;;  %v1568_v39 = vunpack.i.l.bf16 %v1567_v24  ;;  %v2037_v43 = vpop.permute.xlu1 %1516  ;;  %v1512_v4 = vpop.permute.xlu0 %1511  ;;  %v1538_v47 = vunpack.i.l.bf16 %v1967_v28 }
  0xcd   :  { %341 = vst [vmem:[#allocation2 + $0x108] sm:$0xff] %v335_v21  ;;  %v1519_v6 = vunpack.i.h.bf16 %v2037_v43  ;;  %v1518_v3 = vunpack.i.l.bf16 %v2037_v43  ;;  %v1514_v60 = vunpack.i.h.bf16 %v1512_v4  ;;  %v1513_v10 = vunpack.i.l.bf16 %v1512_v4  ;;  %902 = vmatpush.bf16.msrb.mxu1 %v1156_v11 }
  0xce   :  { %338 = vst [vmem:[#allocation2 + $0xf0] sm:$0xff] %v332_v23  ;;  %v370_v7 = vsel %vm368_vm3, %v1429_v18, %v1569_v12  ;;  %v369_v8 = vsel %vm368_vm3, %v1428_v19, %v1568_v39  ;;  %v379_v9 = vsel %vm368_vm3, %v1568_v39, %v1473_v42  ;;  %v380_v0 = vsel %vm368_vm3, %v1569_v12, %v1474_v41 }
  0xcf   :  { %v383_v63 = vpack.c.bf16 %v379_v9, %v369_v8  ;;  %v386_v1 = vpack.c.bf16 %v380_v0, %v370_v7  ;;  %v221_v16 = vsel %vm215_vm8, %v1514_v60, %v1519_v6  ;;  %v223_v18 = vsel %vm215_vm8, %v1509_v38, %v1514_v60  ;;  %v1171_v60 = vld [vmem:[#allocation2 + $0xc0] sm:$0xf] }
  0xd0   :  { %v220_v19 = vsel %vm215_vm8, %v1513_v10, %v1518_v3  ;;  %v222_v37 = vsel %vm215_vm8, %v1508_v62, %v1513_v10  ;;  %v1524_v41 = vunpack.i.h.bf16 %v1925_v27  ;;  %v1523_v42 = vunpack.i.l.bf16 %v1925_v27  ;;  %v1324_v10 = vld [vmem:[#allocation2 + $0xd4] sm:$0xf0] }
  0xd1   :  { %389 = vst [vmem:[#allocation2 + $0x130] sm:$0xff] %v383_v63  ;;  %v232_v14 = vpack.c.bf16 %v221_v16, %v223_v18  ;;  %v229_v46 = vpack.c.bf16 %v220_v19, %v222_v37  ;;  %v1321_v37 = vld [vmem:[#allocation2 + $0xc4] sm:$0xf] }
  0xd2   :  { %392 = vst [vmem:[#allocation2 + $0x148] sm:$0xff] %v386_v1  ;;  %v472_v27 = vsel %vm466_vm4, %v1444_v34, %v1524_v41  ;;  %v471_v61 = vsel %vm466_vm4, %v1443_v35, %v1523_v42 }
  0xd3   :  { %238 = vst [vmem:[#allocation2 + $0x80] sm:$0xff] %v232_v14  ;;  %v1582_v8 = vpop.permute.xlu2 %1581 }
  0xd4   :  { %v1532_v15 = vpop.permute.xlu1 %1531  ;;  %235 = vst [vmem:[#allocation2 + $0x68] sm:$0xff] %v229_v46  ;;  %v2081_v23 = vpop.permute.xlu0 %1526  ;;  %v1330_v24 = vld [vmem:[#allocation2 + $0x104] sm:$0xf0]  ;;  %v1197_v7 = vld [vmem:[#allocation2 + $0x108] sm:$0xf0]  ;;  %v1583_v14 = vunpack.i.l.bf16 %v1582_v8  ;;  %v1584_v46 = vunpack.i.h.bf16 %v1582_v8 }
  0xd5   :  { %v1534_v20 = vunpack.i.h.bf16 %v1532_v15  ;;  %v1533_v21 = vunpack.i.l.bf16 %v1532_v15  ;;  %v1529_v12 = vunpack.i.h.bf16 %v2081_v23  ;;  %v1528_v39 = vunpack.i.l.bf16 %v2081_v23  ;;  %v1195_v11 = vld [vmem:[#allocation2 + $0xf0] sm:$0xf]  ;;  %v1327_v4 = vld [vmem:[#allocation2 + $0xf4] sm:$0xf] }
  0xd6   :  { %v1196_v52 = vor.u32 %v1330_v24, %v1195_v11  ;;  %v1200_v19 = vor.u32 %v1327_v4, %v1197_v7  ;;  %v1172_v15 = vor.u32 %v1324_v10, %v1171_v60  ;;  %v267_v11 = vsel %vm264_vm6, %v1493_v26, %v1583_v14 }
  0xd7   :  { %v172_v9 = vsel %vm166_vm1, %v1534_v20, %v1539_v51  ;;  %v174_v33 = vsel %vm166_vm1, %v1399_v53, %v1534_v20  ;;  %v171_v34 = vsel %vm166_vm1, %v1533_v21, %v1538_v47  ;;  %v173_v35 = vsel %vm166_vm1, %v1398_v54, %v1533_v21  ;;  %v1173_v54 = vld [vmem:[#allocation2 + $0xd8] sm:$0xf0] }
  0xd8   :  { %v183_v0 = vpack.c.bf16 %v172_v9, %v174_v33  ;;  %v180_v63 = vpack.c.bf16 %v171_v34, %v173_v35  ;;  %v470_v1 = vsel %vm466_vm4, %v1524_v41, %v1529_v12  ;;  %v469_v53 = vsel %vm466_vm4, %v1523_v42, %v1528_v39  ;;  %844 = vmatpush.bf16.msra.mxu0 %v1196_v52  ;;  %v1083_v52 = vld [vmem:[#allocation2 + $0x8] sm:$0xf] }
  0xd9   :  { %v483_v16 = vpack.c.bf16 %v470_v1, %v472_v27  ;;  %v480_v18 = vpack.c.bf16 %v469_v53, %v471_v61  ;;  %872 = vmatpush.bf16.msra.mxu2 %v1200_v19  ;;  %v1176_v42 = vor.u32 %v1321_v37, %v1173_v54  ;;  %v268_v8 = vsel %vm264_vm6, %v1494_v25, %v1584_v46  ;;  %v1253_v53 = vld [vmem:[#allocation2 + $0x170] sm:$0xf0]  ;;  %v1301_v19 = vld [vmem:[#allocation2 + $0x1c] sm:$0xf0] }
  0xda   :  { %189 = vst [vmem:[#allocation2 + $0x50] sm:$0xff] %v183_v0  ;;  %v1313_v41 = vld [vmem:[#allocation2 + $0x7c] sm:$0xf0] }
  0xdb   :  { %186 = vst [vmem:[#allocation2 + $0x38] sm:$0xff] %v180_v63  ;;  %v1131_v21 = vld [vmem:[#allocation2 + $0x68] sm:$0xf] }
  0xdc   :  { %489 = vst [vmem:[#allocation2 + $0x1a0] sm:$0xff] %v483_v16  ;;  %v1547_v20 = vpop.permute.xlu1 %1546  ;;  %v1542_v61 = vpop.permute.xlu0 %1541  ;;  %v1132_v24 = vor.u32 %v1313_v41, %v1131_v21  ;;  %845 = vmatpush.bf16.msra.mxu0 %v1172_v15 }
  0xdd   :  { %486 = vst [vmem:[#allocation2 + $0x188] sm:$0xff] %v480_v18  ;;  %v1549_v9 = vunpack.i.h.bf16 %v1547_v20  ;;  %v1548_v27 = vunpack.i.l.bf16 %v1547_v20  ;;  %v1544_v4 = vunpack.i.h.bf16 %v1542_v61  ;;  %v1543_v7 = vunpack.i.l.bf16 %v1542_v61  ;;  %873 = vmatpush.bf16.msra.mxu2 %v1176_v42  ;;  %v1340_v18 = vld [vmem:[#allocation2 + $0x15c] sm:$0xf] }
  0xde   :  { %903 = vmatpush.bf16.msrb.mxu1 %v1132_v24  ;;  %v1084_v61 = vor.u32 %v1301_v19, %v1083_v52  ;;  %v1334_v24 = vld [vmem:[#allocation2 + $0x12c] sm:$0xf] }
  0xdf   :  { %v266_v33 = vsel %vm264_vm6, %v1584_v46, %v1549_v9  ;;  %v265_v34 = vsel %vm264_vm6, %v1583_v14, %v1548_v27  ;;  %v276_v26 = vsel %vm264_vm6, %v1549_v9, %v1544_v4  ;;  %v273_v30 = vsel %vm264_vm6, %v1543_v7, %v1483_v5  ;;  %v1296_v14 = vld [vmem:[%s2306_s1 + $0x4] sm:$0xf0] }
  0xe0   :  { %v282_v35 = vpack.c.bf16 %v266_v33, %v268_v8  ;;  %v279_v0 = vpack.c.bf16 %v265_v34, %v267_v11  ;;  %v274_v25 = vsel %vm264_vm6, %v1544_v4, %v1484_v2  ;;  %v275_v63 = vsel %vm264_vm6, %v1548_v27, %v1543_v7  ;;  %v1597_v27 = vpop.permute.xlu2 %1596  ;;  %v1229_v11 = vld [vmem:[#allocation2 + $0x140] sm:$0xf0] }
  0xe1   :  { %v1307_v1 = vld [vmem:[#allocation2 + $0x4c] sm:$0xf0]  ;;  %v277_v60 = vpack.c.bf16 %v273_v30, %v275_v63  ;;  %v280_v10 = vpack.c.bf16 %v274_v25, %v276_v26  ;;  %v1256_v9 = vor.u32 %v1340_v18, %v1253_v53  ;;  %v2151_v4 = vor.u32 %v1296_v14, %v1067_v44  ;;  %v1205_v26 = vld [vmem:[#allocation2 + $0x110] sm:$0xf0]  ;;  %v1322_v63 = vld [vmem:[#allocation2 + $0xcc] sm:$0xf] }
  0xe2   :  { %288 = vst [vmem:[#allocation2 + $0xb8] sm:$0xff] %v282_v35  ;;  %v1107_v16 = vld [vmem:[#allocation2 + $0x38] sm:$0xf]  ;;  %v1599_v30 = vunpack.i.h.bf16 %v1597_v27  ;;  %v1232_v25 = vor.u32 %v1334_v24, %v1229_v11  ;;  %v1598_v53 = vunpack.i.l.bf16 %v1597_v27  ;;  %v1316_v24 = vld [vmem:[#allocation2 + $0x9c] sm:$0xf] }
  0xe3   :  { %285 = vst [vmem:[#allocation2 + $0xa0] sm:$0xff] %v279_v0  ;;  %v1108_v5 = vor.u32 %v1307_v1, %v1107_v16  ;;  %v1349_v37 = vld [vmem:[#allocation2 + $0x19c] sm:$0xf0]  ;;  %v1181_v1 = vld [vmem:[#allocation2 + $0xe0] sm:$0xf0] }
  0xe4   :  { %283 = vst [vmem:[#allocation2 + $0x90] sm:$0xff] %v277_v60  ;;  %v2144_v2 = vpop.permute.xlu1 %1561  ;;  %v1275_v54 = vld [vmem:[#allocation2 + $0x188] sm:$0xf]  ;;  %v1557_v15 = vpop.permute.xlu0 %1556  ;;  %v1157_v11 = vld [vmem:[#allocation2 + $0xb0] sm:$0xf0] }
  0xe5   :  { %286 = vst [vmem:[#allocation2 + $0xa8] sm:$0xff] %v280_v10  ;;  %v1564_v46 = vunpack.i.h.bf16 %v2144_v2  ;;  %v1563_v41 = vunpack.i.l.bf16 %v2144_v2  ;;  %904 = vmatpush.bf16.msrb.mxu1 %v1108_v5  ;;  %v1276_v20 = vor.u32 %v1349_v37, %v1275_v54  ;;  %v1559_v21 = vunpack.i.h.bf16 %v1557_v15  ;;  %v1109_v2 = vld [vmem:[#allocation2 + $0x50] sm:$0xf0] }
  0xe6   :  { %v1558_v42 = vunpack.i.l.bf16 %v1557_v15  ;;  %v170_v54 = vsel %vm166_vm1, %v1539_v51, %v1599_v30 }
  0xe7   :  { %919 = vmatpush.bf16.msrb.mxu3 %v1276_v20  ;;  %v225_v7 = vsel %vm215_vm8, %v1559_v21, %v1509_v38  ;;  %v227_v8 = vsel %vm215_vm8, %v1564_v46, %v1559_v21  ;;  %v1328_v38 = vld [vmem:[#allocation2 + $0xfc] sm:$0xf]  ;;  %v1184_v20 = vor.u32 %v1322_v63, %v1181_v1  ;;  %v1160_v1 = vor.u32 %v1316_v24, %v1157_v11 }
  0xe8   :  { %v224_v33 = vsel %vm215_vm8, %v1558_v42, %v1508_v62  ;;  %v226_v34 = vsel %vm215_vm8, %v1563_v41, %v1558_v42  ;;  %v231_v35 = vpack.c.bf16 %v225_v7, %v227_v8  ;;  %v1208_v18 = vor.u32 %v1328_v38, %v1205_v26 }
  0xe9   :  { %v228_v0 = vpack.c.bf16 %v224_v33, %v226_v34  ;;  %905 = vmatpush.bf16.msrb.mxu1 %v1084_v61 }
  0xea   :  { %1291 = vmatmul.msk.bf16.vlgmr.msrb.gmra.mxu3 %vm838_vm7, %v2024_v13  ;;  %237 = vst [vmem:[#allocation2 + $0x78] sm:$0xff] %v231_v35 }
  0xeb   :  { %926 = vmatpush.bf16.msra.mxu3 %v1256_v9  ;;  %v1147_v45 = vld [vmem:[#allocation2 + $0x90] sm:$0xf]  ;;  %v1315_v62 = vld [vmem:[#allocation2 + $0x94] sm:$0xf]  ;;  %234 = vst [vmem:[#allocation2 + $0x60] sm:$0xff] %v228_v0 }
  0xec   :  { %v1577_v60 = vpop.permute.xlu1 %1576  ;;  %v1318_v10 = vld [vmem:[#allocation2 + $0xa4] sm:$0xf0]  ;;  %v1149_v16 = vld [vmem:[#allocation2 + $0xa8] sm:$0xf0]  ;;  %906 = vmatmul.bf16.vlgmr.msrb.gmra.mxu1 %v2151_v4  ;;  %v1572_v5 = vpop.permute.xlu0 %1571 }
  0xed   :  { %v1579_v52 = vunpack.i.h.bf16 %v1577_v60  ;;  %v1578_v19 = vunpack.i.l.bf16 %v1577_v60  ;;  %v1148_v37 = vor.u32 %v1318_v10, %v1147_v45  ;;  %v1152_v44 = vor.u32 %v1315_v62, %v1149_v16 }
  0xee   :  { %v1574_v14 = vunpack.i.h.bf16 %v1572_v5  ;;  %v1573_v15 = vunpack.i.l.bf16 %v1572_v5  ;;  %v1304_v5 = vld [vmem:[#allocation2 + $0x3c] sm:$0xf] }
  0xef   :  { %927 = vmatpush.bf16.msra.mxu3 %v1232_v25  ;;  %v321_v21 = vsel %vm319_vm5, %v1459_v49, %v1579_v52  ;;  %v320_v42 = vsel %vm319_vm5, %v1458_v50, %v1578_v19  ;;  %v330_v9 = vsel %vm319_vm5, %v1578_v19, %v1498_v36  ;;  %v331_v51 = vsel %vm319_vm5, %v1579_v52, %v1499_v40 }
  0xf0   :  { %846 = vmatpush.bf16.msra.mxu0 %v1148_v37  ;;  %v334_v27 = vpack.c.bf16 %v330_v9, %v320_v42  ;;  %v337_v61 = vpack.c.bf16 %v331_v51, %v321_v21  ;;  %v168_v49 = vsel %vm166_vm1, %v1599_v30, %v1574_v14  ;;  %v167_v48 = vsel %vm166_vm1, %v1598_v53, %v1573_v15  ;;  %v1077_v21 = vld [vmem:[#allocation2 + $0x18] sm:$0xf0]  ;;  %v1259_v42 = vld [vmem:[#allocation2 + $0x160] sm:$0xf]  ;;  %v1341_v9 = vld [vmem:[#allocation2 + $0x164] sm:$0xf] }
  0xf1   :  { %874 = vmatpush.bf16.msra.mxu2 %v1152_v44  ;;  %v169_v50 = vsel %vm166_vm1, %v1538_v47, %v1598_v53  ;;  %v184_v36 = vpack.c.bf16 %v168_v49, %v170_v54  ;;  %v177_v29 = vsel %vm166_vm1, %v1573_v15, %v1393_v57  ;;  %v178_v40 = vsel %vm166_vm1, %v1574_v14, %v1394_v56  ;;  %v1312_v8 = vld [vmem:[#allocation2 + $0x74] sm:$0xf0]  ;;  %v1125_v33 = vld [vmem:[#allocation2 + $0x78] sm:$0xf0]  ;;  %v1085_v15 = vld [vmem:[#allocation2 + $0x20] sm:$0xf0] }
  0xf2   :  { %340 = vst [vmem:[#allocation2 + $0x100] sm:$0xff] %v334_v27  ;;  %v179_v28 = vpack.c.bf16 %v1821_v59, %v177_v29  ;;  %v181_v7 = vpack.c.bf16 %v167_v48, %v169_v50  ;;  %v182_v47 = vpack.c.bf16 %v1813_v58, %v178_v40  ;;  %v1123_v34 = vld [vmem:[#allocation2 + $0x60] sm:$0xf]  ;;  %v1309_v35 = vld [vmem:[#allocation2 + $0x64] sm:$0xf]  ;;  %v1610_v57 = vmov 0  }
  0xf3   :  { %928 = vmatpush.bf16.msra.mxu3 %v1208_v18  ;;  %343 = vst [vmem:[#allocation2 + $0x118] sm:$0xff] %v337_v61  ;;  %1600 = vset.pattern.permute.xlu0 %v1610_v57  ;;  %v1124_v0 = vor.u32 %v1312_v8, %v1123_v34  ;;  %v1128_v38 = vor.u32 %v1309_v35, %v1125_v33  ;;  %v548_v58 = vld [vmem:[%s2307_s2 + $0x8] sm:$0xff]  ;;  %v1133_v18 = vld [vmem:[#allocation2 + $0x80] sm:$0xf0]  ;;  %v1300_v14 = vld [vmem:[#allocation2 + $0x14] sm:$0xf0] }
  0xf4   :  { %1601 = vset.pattern.permute.xlu1 %v1610_v57  ;;  %190 = vst [vmem:[#allocation2 + $0x58] sm:$0xff] %v184_v36  ;;  %v1592_v56 = vpop.permute.xlu1 %1591  ;;  %551 = vperm.xlu0 %1600, %v547_v55   ;;  %v1587_v30 = vpop.permute.xlu0 %1586  ;;  %v1344_v51 = vld [vmem:[#allocation2 + $0x174] sm:$0xf0]  ;;  %v1261_v27 = vld [vmem:[#allocation2 + $0x178] sm:$0xf0]  ;;  %v1080_v29 = vor.u32 %v1297_v17, %v1077_v21 }
  0xf5   :  { %185 = vst [vmem:[#allocation2 + $0x30] sm:$0xff] %v179_v28  ;;  %v1594_v59 = vunpack.i.h.bf16 %v1592_v56  ;;  %v1593_v26 = vunpack.i.l.bf16 %v1592_v56  ;;  %556 = vperm.xlu1 %1601, %v548_v58   ;;  %v1589_v25 = vunpack.i.h.bf16 %v1587_v30  ;;  %v1588_v63 = vunpack.i.l.bf16 %v1587_v30  ;;  %847 = vmatpush.bf16.msra.mxu0 %v1124_v0  ;;  %v1346_v61 = vld [vmem:[#allocation2 + $0x18c] sm:$0xf]  ;;  %v1277_v49 = vld [vmem:[#allocation2 + $0x1a0] sm:$0xf0] }
  0xf6   :  { %187 = vst [vmem:[#allocation2 + $0x40] sm:$0xff] %v181_v7  ;;  %875 = vmatpush.bf16.msra.mxu2 %v1128_v38  ;;  %v1260_v28 = vor.u32 %v1344_v51, %v1259_v42  ;;  %v1264_v7 = vor.u32 %v1341_v9, %v1261_v27  ;;  %v1235_v33 = vld [vmem:[#allocation2 + $0x130] sm:$0xf]  ;;  %v1338_v34 = vld [vmem:[#allocation2 + $0x144] sm:$0xf0] }
  0xf7   :  { %929 = vmatpush.bf16.msra.mxu3 %v1184_v20  ;;  %188 = vst [vmem:[#allocation2 + $0x48] sm:$0xff] %v182_v47  ;;  %v478_v45 = vsel %vm466_vm4, %v1594_v59, %v1434_v31  ;;  %v467_v62 = vsel %vm466_vm4, %v1528_v39, %v1593_v26  ;;  %v468_v53 = vsel %vm466_vm4, %v1529_v12, %v1594_v59  ;;  %v1310_v39 = vld [vmem:[#allocation2 + $0x6c] sm:$0xf]  ;;  %v1335_v35 = vld [vmem:[#allocation2 + $0x134] sm:$0xf] }
  0xf8   :  { %v477_v60 = vsel %vm466_vm4, %v1593_v26, %v1433_v32  ;;  %v484_v16 = vpack.c.bf16 %v478_v45, %v468_v53  ;;  %v217_v31 = vsel %vm215_vm8, %v1589_v25, %v1564_v46  ;;  %v219_v23 = vsel %vm215_vm8, %v1519_v6, %v1589_v25  ;;  %v1237_v57 = vld [vmem:[#allocation2 + $0x148] sm:$0xf0]  ;;  %v1187_v30 = vld [vmem:[#allocation2 + $0xd0] sm:$0xf]  ;;  %v1326_v25 = vld [vmem:[#allocation2 + $0xe4] sm:$0xf0] }
  0xf9   :  { %v481_v10 = vpack.c.bf16 %v477_v60, %v467_v62  ;;  %v233_v12 = vpack.c.bf16 %v217_v31, %v219_v23  ;;  %v216_v22 = vsel %vm215_vm8, %v1588_v63, %v1563_v41  ;;  %v218_v32 = vsel %vm215_vm8, %v1518_v3, %v1588_v63  ;;  %v1075_v41 = vld [vmem:[#allocation2] sm:$0xf]  ;;  %v1298_v3 = vld [vmem:[#allocation2 + $0xc] sm:$0xf]  ;;  %v1329_v59 = vld [vmem:[#allocation2 + $0x104] sm:$0xf] }
  0xfa   :  { %v230_v46 = vpack.c.bf16 %v216_v22, %v218_v32  ;;  %490 = vst [vmem:[#allocation2 + $0x1a8] sm:$0xff] %v484_v16  ;;  %v1136_v52 = vor.u32 %v1310_v39, %v1133_v18  ;;  %v1112_v20 = vor.u32 %v1304_v5, %v1109_v2  ;;  %v1076_v36 = vor.u32 %v1300_v14, %v1075_v41  ;;  %v1211_v38 = vld [vmem:[#allocation2 + $0x100] sm:$0xf]  ;;  %v1332_v58 = vld [vmem:[#allocation2 + $0x114] sm:$0xf0] }
  0xfb   :  { %930 = vmatpush.bf16.msra.mxu3 %v1160_v1  ;;  %487 = vst [vmem:[#allocation2 + $0x190] sm:$0xff] %v481_v10  ;;  %v1088_v11 = vor.u32 %v1298_v3, %v1085_v15  ;;  %v1280_v47 = vor.u32 %v1346_v61, %v1277_v49  ;;  %v1236_v56 = vor.u32 %v1338_v34, %v1235_v33  ;;  %v1213_v26 = vld [vmem:[#allocation2 + $0x118] sm:$0xf0]  ;;  %v1323_v1 = vld [vmem:[#allocation2 + $0xd4] sm:$0xf] }
  0xfc   :  { %239 = vst [vmem:[#allocation2 + $0x88] sm:$0xff] %v233_v12  ;;  %v1099_v6 = vld [vmem:[#allocation2 + $0x30] sm:$0xf]  ;;  %v1303_v19 = vld [vmem:[#allocation2 + $0x34] sm:$0xf]  ;;  %v1240_v0 = vor.u32 %v1335_v35, %v1237_v57  ;;  %v1212_v63 = vor.u32 %v1332_v58, %v1211_v38  ;;  %v1216_v62 = vor.u32 %v1329_v59, %v1213_v26  ;;  %v1188_v53 = vor.u32 %v1326_v25, %v1187_v30 }
  0xfd   :  { %236 = vst [vmem:[#allocation2 + $0x70] sm:$0xff] %v230_v46  ;;  %v1189_v45 = vld [vmem:[#allocation2 + $0xe8] sm:$0xf0]  ;;  %v1163_v10 = vld [vmem:[#allocation2 + $0xa0] sm:$0xf] }
  0xfe   :  { %v1306_v37 = vld [vmem:[#allocation2 + $0x44] sm:$0xf0]  ;;  %v1101_v44 = vld [vmem:[#allocation2 + $0x48] sm:$0xf0]  ;;  %v1192_v60 = vor.u32 %v1323_v1, %v1189_v45  ;;  %v1320_v16 = vld [vmem:[#allocation2 + $0xb4] sm:$0xf0] }
  0xff   :  { %931 = vmatpush.bf16.msra.mxu3 %v1136_v52  ;;  %v1100_v54 = vor.u32 %v1306_v37, %v1099_v6  ;;  %v1104_v43 = vor.u32 %v1303_v19, %v1101_v44  ;;  %v1317_v31 = vld [vmem:[#allocation2 + $0xa4] sm:$0xf]  ;;  %v1165_v23 = vld [vmem:[#allocation2 + $0xb8] sm:$0xf0]  ;;  %v1164_v39 = vor.u32 %v1320_v16, %v1163_v10  ;;  %v1115_v19 = vld [vmem:[#allocation2 + $0x40] sm:$0xf] }
 0x100   :  { %v1168_v18 = vor.u32 %v1317_v31, %v1165_v23  ;;  %v1308_v5 = vld [vmem:[#allocation2 + $0x54] sm:$0xf0]  ;;  %v1305_v2 = vld [vmem:[#allocation2 + $0x44] sm:$0xf]  ;;  %v1117_v37 = vld [vmem:[#allocation2 + $0x58] sm:$0xf0] }
 0x101   :  { %848 = vmatpush.bf16.msra.mxu0 %v1100_v54  ;;  %876 = vmatpush.bf16.msra.mxu2 %v1104_v43  ;;  %v1350_v50 = vld [vmem:[#allocation2 + $0x1a4] sm:$0xf0]  ;;  %v1285_v24 = vld [vmem:[#allocation2 + $0x1a8] sm:$0xf0]  ;;  %v1116_v44 = vor.u32 %v1308_v5, %v1115_v19  ;;  %v1120_v41 = vor.u32 %v1305_v2, %v1117_v37  ;;  %v1091_v54 = vld [vmem:[#allocation2 + $0x10] sm:$0xf] }
 0x102   :  { %v1283_v48 = vld [vmem:[#allocation2 + $0x190] sm:$0xf]  ;;  %v1347_v40 = vld [vmem:[#allocation2 + $0x194] sm:$0xf]  ;;  %v1302_v43 = vld [vmem:[#allocation2 + $0x24] sm:$0xf0] }
 0x103   :  { %932 = vmatpush.bf16.msra.mxu3 %v1112_v20  ;;  %v1284_v8 = vor.u32 %v1350_v50, %v1283_v48  ;;  %v1288_v55 = vor.u32 %v1347_v40, %v1285_v24  ;;  %v1314_v22 = vld [vmem:[#allocation2 + $0x84] sm:$0xf0]  ;;  %v1141_v46 = vld [vmem:[#allocation2 + $0x88] sm:$0xf0]  ;;  %v1299_v14 = vld [vmem:[#allocation2 + $0x14] sm:$0xf]  ;;  %v1092_v3 = vor.u32 %v1302_v43, %v1091_v54 }
 0x104   :  { %v1139_v12 = vld [vmem:[#allocation2 + $0x70] sm:$0xf]  ;;  %v1311_v32 = vld [vmem:[#allocation2 + $0x74] sm:$0xf]  ;;  %v1093_v17 = vld [vmem:[#allocation2 + $0x28] sm:$0xf0] }
 0x105   :  { %849 = vmatpush.bf16.msra.mxu0 %v1076_v36  ;;  %877 = vmatpush.bf16.msra.mxu2 %v1080_v29  ;;  %v1140_v52 = vor.u32 %v1314_v22, %v1139_v12  ;;  %v1144_v6 = vor.u32 %v1311_v32, %v1141_v46  ;;  %v1096_v15 = vor.u32 %v1299_v14, %v1093_v17  ;;  %v2265_v36 = vld [vmem:[%s2305_s3 + $0x2] ss:$4 sm:$0x3f] }
 0x106   :  { %975 = vmatpush.bf16.msra.mxu1 %v1284_v8  ;;  %v1024_v33 = vperm.slane %v2265_v36, 1  ;;  %v1026_v22 = vperm.slane %v2265_v36, 3 }
 0x107   :  { %933 = vmatpush.bf16.msra.mxu3 %v1088_v11  ;;  %v1023_v11 = vperm.slane %v2265_v36, 0 }
 0x108   :  { %850 = vmatmul.bf16.vlgmr.msra.gmra.mxu0 %v2151_v4  ;;  %878 = vmatmul.bf16.vlgmr.msra.gmra.mxu2 %v2151_v4 }
 0x109   :  { %954 = vmatpush.bf16.msrb.mxu2 %v1260_v28  ;;  %982 = vmatpush.bf16.msrb.mxu0 %v1264_v7 }
 0x10a   :  { %934 = vmatmul.bf16.vlgmr.msra.gmra.mxu3 %v2151_v4  ;;  %1003 = vmatpush.bf16.msrb.mxu1 %v1288_v55 }
 0x10b   :  { %947 = vmatpush.bf16.msrb.mxu3 %v1280_v47  ;;  %1293 = vmatmul.msk.bf16.vlgmr.msra.gmra.mxu1 %vm838_vm7, %v2024_v13 }
 0x10d   :  { %955 = vmatpush.bf16.msrb.mxu2 %v1236_v56  ;;  %983 = vmatpush.bf16.msrb.mxu0 %v1240_v0 }
 0x111   :  { %956 = vmatpush.bf16.msrb.mxu2 %v1212_v63  ;;  %984 = vmatpush.bf16.msrb.mxu0 %v1216_v62 }
 0x115   :  { %957 = vmatpush.bf16.msrb.mxu2 %v1188_v53  ;;  %985 = vmatpush.bf16.msrb.mxu0 %v1192_v60 }
 0x119   :  { %958 = vmatpush.bf16.msrb.mxu2 %v1164_v39  ;;  %986 = vmatpush.bf16.msrb.mxu0 %v1168_v18  ;;  %v1025_v39 = vperm.slane %v2265_v36, 2 }
 0x11a   :  { %1292 = vmatmul.msk.bf16.vlgmr.msrb.gmra.mxu3 %vm838_vm7, %v2024_v13 }
 0x11b   :  { %1294 = vmatmul.msk.bf16.vlgmr.msrb.gmra.mxu1 %vm838_vm7, %v2024_v13 }
 0x11d   :  { %959 = vmatpush.bf16.msrb.mxu2 %v1140_v52  ;;  %987 = vmatpush.bf16.msrb.mxu0 %v1144_v6 }
 0x121   :  { %960 = vmatpush.bf16.msrb.mxu2 %v1116_v44  ;;  %988 = vmatpush.bf16.msrb.mxu0 %v1120_v41 }
 0x125   :  { %961 = vmatpush.bf16.msrb.mxu2 %v1092_v3  ;;  %989 = vmatpush.bf16.msrb.mxu0 %v1096_v15 }
 0x128   :  { %962 = vmatmul.bf16.vlgmr.msrb.gmra.mxu2 %v2151_v4  ;;  %990 = vmatmul.bf16.vlgmr.msrb.gmra.mxu0 %v2151_v4 }
 0x147   :  { %v865_v21 = vpop.f32.mrf.mxu1 }
 0x14d   :  { %v893_v20 = vpop.f32.mrf.mxu3 }
 0x14f   :  { %v867_v9 = vpop.f32.mrf.mxu1 }
 0x155   :  { %v895_v42 = vpop.f32.mrf.mxu3 }
 0x166   :  { %v2259_v61 = vpop.permute.xlu0 %551 }
 0x167   :  { %v2269_v28 = vpop.permute.xlu1 %556 }
 0x169   :  { %v907_v51 = vpop.f32.mrf.mxu1 }
 0x16a   :  { %v908_v30 = vadd.f32 %v907_v51, %v2259_v61 }
 0x16d   :  { %v921_v13 = vpop.f32.mrf.mxu3 }
 0x16e   :  { %v922_v62 = vadd.f32 %v921_v13, %v908_v30 }
 0x170   :  { %v1012_v12 = vmax.f32 %v922_v62, 0.0 }
 0x171   :  { %v909_v50 = vpop.f32.mrf.mxu1 }
 0x172   :  { %v910_v16 = vadd.f32 %v909_v50, %v2269_v28  ;;  %v1037_v52 = vmul.f32 %v1025_v39, %v1012_v12 }
 0x175   :  { %v923_v27 = vpop.f32.mrf.mxu3 }
 0x176   :  { %v924_v46 = vadd.f32 %v923_v27, %v910_v16  ;;  %v1027_v27 = vperm.slane %v2265_v36, 4 }
 0x178   :  { %v1018_v37 = vmax.f32 %v924_v46, 0.0 }
 0x17a   :  { %v1043_v3 = vmul.f32 %v1025_v39, %v1018_v37 }
 0x185   :  { %v851_v49 = vpop.f32.mrf.mxu0 }
 0x186   :  { %v852_v48 = vadd.f32 %v851_v49, %v2259_v61 }
 0x188   :  { %v866_v29 = vadd.f32 %v865_v21, %v852_v48  ;;  %v977_v57 = vpop.f32.mrf.mxu1  ;;  %v1028_v21 = vperm.slane %v2265_v36, 5 }
 0x18a   :  { %v1010_v47 = vmax.f32 %v866_v29, 0.0 }
 0x18b   :  { %v879_v4 = vpop.f32.mrf.mxu2 }
 0x18c   :  { %v880_v40 = vadd.f32 %v879_v4, %v2259_v61  ;;  %v1035_v55 = vmul.f32 %v1023_v11, %v1010_v47 }
 0x18d   :  { %v935_v24 = vpop.f32.mrf.mxu3  ;;  %v853_v7 = vpop.f32.mrf.mxu0 }
 0x18e   :  { %v894_v8 = vadd.f32 %v893_v20, %v880_v40  ;;  %v854_v34 = vadd.f32 %v853_v7, %v2269_v28  ;;  %v936_v45 = vadd.f32 %v935_v24, %v2259_v61 }
 0x190   :  { %v1011_v35 = vmax.f32 %v894_v8, 0.0  ;;  %v868_v0 = vadd.f32 %v867_v9, %v854_v34  ;;  %v979_v10 = vpop.f32.mrf.mxu1 }
 0x192   :  { %v1036_v56 = vmul.f32 %v1024_v33, %v1011_v35  ;;  %v1016_v25 = vmax.f32 %v868_v0, 0.0 }
 0x193   :  { %v881_v38 = vpop.f32.mrf.mxu2 }
 0x194   :  { %v1047_v58 = vpack.c.bf16 %v1036_v56, %v1035_v55  ;;  %v882_v59 = vadd.f32 %v881_v38, %v2269_v28  ;;  %v1041_v53 = vmul.f32 %v1023_v11, %v1016_v25 }
 0x195   :  { %v937_v26 = vpop.f32.mrf.mxu3 }
 0x196   :  { %1053 = vst [vmem:[%s2308_s4] sm:$0xff] %v1047_v58  ;;  %v896_v63 = vadd.f32 %v895_v42, %v882_v59  ;;  %v938_v19 = vadd.f32 %v937_v26, %v2269_v28 }
 0x198   :  { %v1017_v1 = vmax.f32 %v896_v63, 0.0  ;;  %v1005_v41 = vpop.f32.mrf.mxu1 }
 0x19a   :  { %v1042_v60 = vmul.f32 %v1024_v33, %v1017_v1 }
 0x19c   :  { %v1050_v31 = vpack.c.bf16 %v1042_v60, %v1041_v53 }
 0x19d   :  { %v949_v23 = vpop.f32.mrf.mxu3 }
 0x19e   :  { %v950_v18 = vadd.f32 %v949_v23, %v936_v45  ;;  %1056 = vst [vmem:[%s2308_s4 + $0x18] sm:$0xff] %v1050_v31 }
 0x1a0   :  { %v1013_v32 = vmax.f32 %v950_v18, 0.0  ;;  %v1007_v4 = vpop.f32.mrf.mxu1 }
 0x1a2   :  { %v1038_v6 = vmul.f32 %v1026_v22, %v1013_v32 }
 0x1a4   :  { %v1048_v5 = vpack.c.bf16 %v1038_v6, %v1037_v52 }
 0x1a5   :  { %v991_v2 = vpop.f32.mrf.mxu0  ;;  %v951_v54 = vpop.f32.mrf.mxu3 }
 0x1a6   :  { %v992_v44 = vadd.f32 %v991_v2, %v2259_v61  ;;  %1054 = vst [vmem:[%s2308_s4 + $0x8] sm:$0xff] %v1048_v5  ;;  %v952_v43 = vadd.f32 %v951_v54, %v938_v19 }
 0x1a8   :  { %v1006_v14 = vadd.f32 %v1005_v41, %v992_v44  ;;  %v1019_v17 = vmax.f32 %v952_v43, 0.0 }
 0x1aa   :  { %v1015_v20 = vmax.f32 %v1006_v14, 0.0  ;;  %v1044_v42 = vmul.f32 %v1026_v22, %v1019_v17 }
 0x1ab   :  { %v963_v15 = vpop.f32.mrf.mxu2 }
 0x1ac   :  { %v964_v9 = vadd.f32 %v963_v15, %v2259_v61  ;;  %v1051_v13 = vpack.c.bf16 %v1044_v42, %v1043_v3  ;;  %v1040_v50 = vmul.f32 %v1028_v21, %v1015_v20 }
 0x1ad   :  { %v993_v49 = vpop.f32.mrf.mxu0 }
 0x1ae   :  { %v978_v51 = vadd.f32 %v977_v57, %v964_v9  ;;  %v994_v48 = vadd.f32 %v993_v49, %v2269_v28  ;;  %1057 = vst [vmem:[%s2308_s4 + $0x20] sm:$0xff] %v1051_v13 }
 0x1b0   :  { %v1014_v29 = vmax.f32 %v978_v51, 0.0  ;;  %v1008_v24 = vadd.f32 %v1007_v4, %v994_v48 }
 0x1b2   :  { %v1039_v40 = vmul.f32 %v1027_v27, %v1014_v29  ;;  %v1021_v36 = vmax.f32 %v1008_v24, 0.0 }
 0x1b3   :  { %v965_v11 = vpop.f32.mrf.mxu2 }
 0x1b4   :  { %v1049_v7 = vpack.c.bf16 %v1040_v50, %v1039_v40  ;;  %v966_v61 = vadd.f32 %v965_v11, %v2269_v28  ;;  %v1046_v33 = vmul.f32 %v1028_v21, %v1021_v36 }
 0x1b6   :  { %1055 = vst [vmem:[%s2308_s4 + $0x10] sm:$0xff] %v1049_v7  ;;  %v980_v47 = vadd.f32 %v979_v10, %v966_v61 }
 0x1b8   :  { %v1020_v8 = vmax.f32 %v980_v47, 0.0 }
 0x1ba   :  { %v1045_v34 = vmul.f32 %v1027_v27, %v1020_v8 }
 0x1bc   :  { %v1052_v35 = vpack.c.bf16 %v1046_v33, %v1045_v34 }
 0x1be   :  { %1058 = vst [vmem:[%s2308_s4 + $0x28] sm:$0xff] %v1052_v35 }

// kernel: _lambda_.8
= control target key start
LH: loop header
LB: loop body
LE: loop exit
PB: predicated region body
PF: predicated region fallthrough
CT: control target
= control target key end

     0   :  { %s666_s23 = smov 121   ;;  %s667_s24 = smov 127   ;;  %v55_v27 = vlaneseq  ;;  %vm341_vm8 = vcmask 130048   ;;  %s796_s0 = inlined_call_operand.vmem [shape: bf16[16,256], index: 0, kind: input, shape index: {}]   ;;  %s797_s3 = inlined_call_operand.vmem [shape: f32[3,256], index: 3, kind: input, shape index: {}]   ;;  %s798_s2 = inlined_call_operand.vmem [shape: f32[32,1], index: 2, kind: input, shape index: {}]   ;;  %s799_s1 = inlined_call_operand.vmem [shape: bf16[32,144], index: 1, kind: input, shape index: {}]   ;;  %s800_s4 = inlined_call_operand.vmem [shape: bf16[32,256], index: 4, kind: output, shape index: {}]  }
   0x1   :  { %v18_v0 = vld [vmem:[%s796_s0] sm:$0xff]  ;;  %v19_v1 = vld [vmem:[%s796_s0 + $0x8] sm:$0xff]  ;;  %s665_s0 = smov 120   ;;  %s668_s25 = smov 1  }
   0x2   :  { %v24_v2 = vld [vmem:[%s797_s3] ss:$4 sm:$0x3]  ;;  %v20_v3 = vunpack.c.l.bf16 %v18_v0  ;;  %v22_v4 = vunpack.c.l.bf16 %v19_v1  ;;  %117 = vst [vmem:[#allocation2 + $0x40] sm:$0xff] %v18_v0  ;;  %v21_v7 = vunpack.c.h.bf16 %v18_v0  ;;  %v23_v8 = vunpack.c.h.bf16 %v19_v1  ;;  %s669_s26 = smov 7   ;;  %s670_s27 = smov 8  }
   0x3   :  { %v30_v5 = vperm.slane %v24_v2, 0  ;;  %118 = vst [vmem:[#allocation2 + $0x48] sm:$0xff] %v19_v1  ;;  %v31_v6 = vperm.slane %v24_v2, 1  ;;  %v457_v9 = vld [vmem:[%s797_s3 + $0x1] ss:$4 sm:$0x3] }
   0x4   :  { %v582_v10 = vpack.i.bf16 %v22_v4, %v20_v3  ;;  %v39_v13 = vperm.slane %v457_v9, 0  ;;  %v40_v19 = vperm.slane %v457_v9, 1  ;;  %v587_v21 = vpack.i.bf16 %v23_v8, %v21_v7  ;;  %s671_s28 = smov 9   ;;  %s672_s29 = smov 119  }
   0x5   :  { %v34_v11 = vmul.f32 %v30_v5, %v20_v3  ;;  %v36_v12 = vmul.f32 %v30_v5, %v22_v4  ;;  %v35_v17 = vmul.f32 %v31_v6, %v21_v7  ;;  %v37_v18 = vmul.f32 %v31_v6, %v23_v8 }
   0x6   :  { %583 = vrot.lane.b32.xlu0 %v582_v10, %s665_s0  ;;  %v43_v15 = vmul.f32 %v39_v13, %v20_v3  ;;  %v45_v16 = vmul.f32 %v39_v13, %v22_v4  ;;  %v44_v23 = vmul.f32 %v40_v19, %v21_v7  ;;  %v46_v24 = vmul.f32 %v40_v19, %v23_v8 }
   0x7   :  { %v592_v14 = vpack.i.bf16 %v36_v12, %v34_v11  ;;  %v597_v22 = vpack.i.bf16 %v37_v18, %v35_v17  ;;  %v711_v28 = vand.u32 127, %v55_v27 }
   0x8   :  { %v602_v20 = vpack.i.bf16 %v45_v16, %v43_v15  ;;  %v607_v25 = vpack.i.bf16 %v46_v24, %v44_v23 }
   0x9   :  { %593 = vrot.lane.b32.xlu1 %v592_v14, %s666_s23  ;;  %vm127_vm0 = vcmp.lt.s32.totalorder %v711_v28, 127  ;;  %vm161_vm1 = vcmp.lt.s32.totalorder %v711_v28, 120  ;;  %vm144_vm2 = vcmp.lt.s32.totalorder %v711_v28, 121  ;;  %vm108_vm3 = vcmp.lt.s32.totalorder %v711_v28, 1 }
   0xa   :  { %603 = vrot.lane.b32.xlu2 %v602_v20, %s667_s24  ;;  %vm91_vm4 = vcmp.lt.s32.totalorder %v711_v28, 7  ;;  %vm74_vm5 = vcmp.lt.s32.totalorder %v711_v28, 8  ;;  %vm57_vm6 = vcmp.lt.s32.totalorder %v711_v28, 9  ;;  %vm178_vm7 = vcmp.lt.s32.totalorder %v711_v28, 119  ;;  %v210_v28 = vld [vmem:[%s798_s2 + $0x8] sm:$0xff] }
   0xe   :  { %588 = vrot.lane.b32.xlu0 %v587_v21, %s665_s0 }
  0x11   :  { %598 = vrot.lane.b32.xlu1 %v597_v22, %s666_s23 }
  0x12   :  { %608 = vrot.lane.b32.xlu2 %v607_v25, %s667_s24 }
  0x16   :  { %613 = vrot.lane.b32.xlu0 %v592_v14, %s668_s25 }
  0x19   :  { %618 = vrot.lane.b32.xlu1 %v597_v22, %s668_s25 }
  0x1a   :  { %623 = vrot.lane.b32.xlu2 %v602_v20, %s669_s26 }
  0x1e   :  { %628 = vrot.lane.b32.xlu0 %v607_v25, %s669_s26 }
  0x21   :  { %633 = vrot.lane.b32.xlu1 %v582_v10, %s670_s27 }
  0x22   :  { %638 = vrot.lane.b32.xlu2 %v587_v21, %s670_s27 }
  0x26   :  { %643 = vrot.lane.b32.xlu0 %v592_v14, %s671_s28 }
  0x29   :  { %648 = vrot.lane.b32.xlu1 %v597_v22, %s671_s28 }
  0x2a   :  { %653 = vrot.lane.b32.xlu2 %v602_v20, %s672_s29 }
  0x2e   :  { %658 = vrot.lane.b32.xlu0 %v607_v25, %s672_s29 }
  0x64   :  { %v604_v26 = vpop.permute.xlu2 %603 }
  0x65   :  { %v606_v29 = vunpack.i.h.bf16 %v604_v26  ;;  %v605_v30 = vunpack.i.l.bf16 %v604_v26 }
  0x6c   :  { %v609_v31 = vpop.permute.xlu2 %608 }
  0x6d   :  { %v611_v32 = vunpack.i.h.bf16 %v609_v31  ;;  %v610_v33 = vunpack.i.l.bf16 %v609_v31 }
  0x6f   :  { %v128_v34 = vsel %vm127_vm0, %v605_v30, %v610_v33  ;;  %v129_v35 = vsel %vm127_vm0, %v606_v29, %v611_v32  ;;  %v130_v36 = vsel %vm127_vm0, %v610_v33, %v605_v30  ;;  %v131_v37 = vsel %vm127_vm0, %v611_v32, %v606_v29 }
  0x70   :  { %v132_v38 = vpack.c.bf16 %v130_v36, %v128_v34  ;;  %v133_v39 = vpack.c.bf16 %v131_v37, %v129_v35 }
  0x72   :  { %134 = vst [vmem:[#allocation2 + $0x50] sm:$0xff] %v132_v38 }
  0x73   :  { %135 = vst [vmem:[#allocation2 + $0x58] sm:$0xff] %v133_v39 }
  0x74   :  { %v624_v58 = vpop.permute.xlu2 %623 }
  0x75   :  { %v626_v17 = vunpack.i.h.bf16 %v624_v58  ;;  %v625_v18 = vunpack.i.l.bf16 %v624_v58  ;;  %v511_v58 = vld [vmem:[#allocation2 + $0x48] sm:$0xf0] }
  0x78   :  { %v584_v40 = vpop.permute.xlu0 %583 }
  0x79   :  { %v586_v43 = vunpack.i.h.bf16 %v584_v40  ;;  %v585_v44 = vunpack.i.l.bf16 %v584_v40  ;;  %v517_v39 = vld [vmem:[#allocation2 + $0x50] sm:$0xf] }
  0x7b   :  { %v594_v41 = vpop.permute.xlu1 %593 }
  0x7c   :  { %v596_v47 = vunpack.i.h.bf16 %v594_v41  ;;  %v595_v48 = vunpack.i.l.bf16 %v594_v41  ;;  %v639_v21 = vpop.permute.xlu2 %638 }
  0x7d   :  { %v641_v33 = vunpack.i.h.bf16 %v639_v21  ;;  %v640_v34 = vunpack.i.l.bf16 %v639_v21 }
  0x80   :  { %v589_v42 = vpop.permute.xlu0 %588 }
  0x81   :  { %v591_v45 = vunpack.i.h.bf16 %v589_v42  ;;  %v590_v46 = vunpack.i.l.bf16 %v589_v42 }
  0x83   :  { %v599_v49 = vpop.permute.xlu1 %598  ;;  %v162_v50 = vsel %vm161_vm1, %v585_v44, %v590_v46  ;;  %v163_v51 = vsel %vm161_vm1, %v586_v43, %v591_v45  ;;  %v164_v52 = vsel %vm161_vm1, %v590_v46, %v585_v44  ;;  %v165_v53 = vsel %vm161_vm1, %v591_v45, %v586_v43  ;;  %v566_v44 = vld [vmem:[#allocation2 + $0x54] sm:$0xf0]  ;;  %v565_v45 = vld [vmem:[#allocation2 + $0x54] sm:$0xf]  ;;  %v519_v46 = vld [vmem:[#allocation2 + $0x58] sm:$0xf0] }
  0x84   :  { %v166_v54 = vpack.c.bf16 %v164_v52, %v162_v50  ;;  %v167_v55 = vpack.c.bf16 %v165_v53, %v163_v51  ;;  %v601_v56 = vunpack.i.h.bf16 %v599_v49  ;;  %v600_v57 = vunpack.i.l.bf16 %v599_v49  ;;  %v509_v51 = vld [vmem:[#allocation2 + $0x40] sm:$0xf]  ;;  %v564_v52 = vld [vmem:[#allocation2 + $0x44] sm:$0xf0] }
  0x86   :  { %168 = vst [vmem:[#allocation2 + $0x70] sm:$0xff] %v166_v54  ;;  %v145_v59 = vsel %vm144_vm2, %v595_v48, %v600_v57  ;;  %v146_v60 = vsel %vm144_vm2, %v596_v47, %v601_v56  ;;  %v147_v61 = vsel %vm144_vm2, %v600_v57, %v595_v48  ;;  %v148_v62 = vsel %vm144_vm2, %v601_v56, %v596_v47  ;;  %v563_v57 = vld [vmem:[#allocation2 + $0x44] sm:$0xf] }
  0x87   :  { %169 = vst [vmem:[#allocation2 + $0x78] sm:$0xff] %v167_v55  ;;  %v149_v63 = vpack.c.bf16 %v147_v61, %v145_v59  ;;  %v150_v0 = vpack.c.bf16 %v148_v62, %v146_v60  ;;  %v518_v55 = vor.u32 %v566_v44, %v517_v39  ;;  %v522_v56 = vor.u32 %v565_v45, %v519_v46  ;;  %v212_v46 = vld [vmem:[%s798_s2 + $0x18] sm:$0xff] }
  0x88   :  { %v614_v1 = vpop.permute.xlu0 %613  ;;  %v510_v60 = vor.u32 %v564_v52, %v509_v51  ;;  %v514_v62 = vor.u32 %v563_v57, %v511_v58 }
  0x89   :  { %151 = vst [vmem:[#allocation2 + $0x60] sm:$0xff] %v149_v63  ;;  %v616_v3 = vunpack.i.h.bf16 %v614_v1  ;;  %v615_v4 = vunpack.i.l.bf16 %v614_v1 }
  0x8a   :  { %152 = vst [vmem:[#allocation2 + $0x68] sm:$0xff] %v150_v0 }
  0x8b   :  { %v619_v2 = vpop.permute.xlu1 %618 }
  0x8c   :  { %v621_v5 = vunpack.i.h.bf16 %v619_v2  ;;  %v620_v6 = vunpack.i.l.bf16 %v619_v2 }
  0x8d   :  { %v533_v11 = vld [vmem:[#allocation2 + $0x70] sm:$0xf]  ;;  %v569_v12 = vld [vmem:[#allocation2 + $0x74] sm:$0xf] }
  0x8e   :  { %v110_v7 = vsel %vm108_vm3, %v616_v3, %v621_v5  ;;  %v112_v8 = vsel %vm108_vm3, %v621_v5, %v616_v3  ;;  %v109_v9 = vsel %vm108_vm3, %v615_v4, %v620_v6  ;;  %v111_v10 = vsel %vm108_vm3, %v620_v6, %v615_v4  ;;  %v570_v15 = vld [vmem:[#allocation2 + $0x74] sm:$0xf0]  ;;  %v535_v16 = vld [vmem:[#allocation2 + $0x78] sm:$0xf0]  ;;  %v654_v3 = vpop.permute.xlu2 %653 }
  0x8f   :  { %v114_v13 = vpack.c.bf16 %v110_v7, %v112_v8  ;;  %v113_v14 = vpack.c.bf16 %v109_v9, %v111_v10  ;;  %v534_v19 = vor.u32 %v570_v15, %v533_v11  ;;  %v538_v20 = vor.u32 %v569_v12, %v535_v16 }
  0x90   :  { %v629_v22 = vpop.permute.xlu0 %628  ;;  %v525_v23 = vld [vmem:[#allocation2 + $0x60] sm:$0xf]  ;;  %v567_v24 = vld [vmem:[#allocation2 + $0x64] sm:$0xf]  ;;  %v655_v15 = vunpack.i.l.bf16 %v654_v3 }
  0x91   :  { %116 = vst [vmem:[#allocation2 + $0x38] sm:$0xff] %v114_v13  ;;  %348 = vmatpush.bf16.msra.mxu0 %v534_v19  ;;  %386 = vmatpush.bf16.msra.mxu2 %v538_v20  ;;  %v631_v25 = vunpack.i.h.bf16 %v629_v22  ;;  %v630_v26 = vunpack.i.l.bf16 %v629_v22  ;;  %v568_v27 = vld [vmem:[#allocation2 + $0x64] sm:$0xf0]  ;;  %v527_v29 = vld [vmem:[#allocation2 + $0x68] sm:$0xf0] }
  0x92   :  { %115 = vst [vmem:[#allocation2 + $0x30] sm:$0xff] %v113_v14  ;;  %v526_v31 = vor.u32 %v568_v27, %v525_v23  ;;  %v530_v32 = vor.u32 %v567_v24, %v527_v29  ;;  %v656_v14 = vunpack.i.h.bf16 %v654_v3  ;;  %v209_v27 = vld [vmem:[%s798_s2] sm:$0xff] }
  0x93   :  { %v634_v30 = vpop.permute.xlu1 %633  ;;  %v93_v35 = vsel %vm91_vm4, %v626_v17, %v631_v25  ;;  %v95_v36 = vsel %vm91_vm4, %v631_v25, %v626_v17  ;;  %v92_v37 = vsel %vm91_vm4, %v625_v18, %v630_v26  ;;  %v94_v38 = vsel %vm91_vm4, %v630_v26, %v625_v18 }
  0x94   :  { %v97_v40 = vpack.c.bf16 %v93_v35, %v95_v36  ;;  %v96_v41 = vpack.c.bf16 %v92_v37, %v94_v38  ;;  %v636_v42 = vunpack.i.h.bf16 %v634_v30  ;;  %v635_v43 = vunpack.i.l.bf16 %v634_v30 }
  0x95   :  { %349 = vmatpush.bf16.msra.mxu0 %v526_v31  ;;  %387 = vmatpush.bf16.msra.mxu2 %v530_v32  ;;  %v673_v26 = vmov 0  }
  0x96   :  { %99 = vst [vmem:[#allocation2 + $0x28] sm:$0xff] %v97_v40  ;;  %v75_v47 = vsel %vm74_vm5, %v635_v43, %v640_v34  ;;  %v76_v48 = vsel %vm74_vm5, %v636_v42, %v641_v33  ;;  %v77_v49 = vsel %vm74_vm5, %v640_v34, %v635_v43  ;;  %v78_v50 = vsel %vm74_vm5, %v641_v33, %v636_v42  ;;  %v211_v40 = vld [vmem:[%s798_s2 + $0x10] sm:$0xff]  ;;  %v461_v42 = vld [vmem:[%s799_s1] sm:$0xf] }
  0x97   :  { %98 = vst [vmem:[#allocation2 + $0x20] sm:$0xff] %v96_v41  ;;  %v79_v53 = vpack.c.bf16 %v75_v47, %v77_v49  ;;  %v80_v54 = vpack.c.bf16 %v76_v48, %v78_v50  ;;  %662 = vset.pattern.permute.xlu1 %v673_v26  ;;  %664 = vset.pattern.permute.xlu0 %v673_v26  ;;  %v552_v49 = vld [vmem:[%s799_s1 + $0x4] sm:$0xf0] }
  0x98   :  { %v644_v59 = vpop.permute.xlu0 %643  ;;  %v562_v5 = vld [vmem:[#allocation2 + $0x34] sm:$0xf0]  ;;  %v503_v11 = vld [vmem:[#allocation2 + $0x38] sm:$0xf0]  ;;  %215 = vperm.xlu1 %662, %v209_v27   ;;  %663 = vset.pattern.permute.xlu2 %v673_v26  ;;  %v462_v52 = vor.u32 %v552_v49, %v461_v42 }
  0x99   :  { %81 = vst [vmem:[#allocation2 + $0x10] sm:$0xff] %v79_v53  ;;  %350 = vmatpush.bf16.msra.mxu0 %v518_v55  ;;  %388 = vmatpush.bf16.msra.mxu2 %v522_v56  ;;  %v646_v63 = vunpack.i.h.bf16 %v644_v59  ;;  %v645_v0 = vunpack.i.l.bf16 %v644_v59  ;;  %v501_v4 = vld [vmem:[#allocation2 + $0x30] sm:$0xf]  ;;  %v561_v10 = vld [vmem:[#allocation2 + $0x34] sm:$0xf] }
  0x9a   :  { %82 = vst [vmem:[#allocation2 + $0x18] sm:$0xff] %v80_v54  ;;  %v502_v16 = vor.u32 %v562_v5, %v501_v4  ;;  %v506_v20 = vor.u32 %v561_v10, %v503_v11  ;;  %225 = vperm.xlu0 %664, %v211_v40   ;;  %220 = vperm.xlu2 %663, %v210_v28   ;;  %v551_v53 = vld [vmem:[%s799_s1 + $0x4] sm:$0xf]  ;;  %v463_v56 = vld [vmem:[%s799_s1 + $0x8] sm:$0xf0] }
  0x9b   :  { %v649_v61 = vpop.permute.xlu1 %648 }
  0x9c   :  { %v651_v1 = vunpack.i.h.bf16 %v649_v61  ;;  %v650_v2 = vunpack.i.l.bf16 %v649_v61  ;;  %v466_v61 = vor.u32 %v551_v53, %v463_v56 }
  0x9d   :  { %351 = vmatpush.bf16.msra.mxu0 %v510_v60  ;;  %389 = vmatpush.bf16.msra.mxu2 %v514_v62  ;;  %v560_v18 = vld [vmem:[#allocation2 + $0x24] sm:$0xf0]  ;;  %v495_v24 = vld [vmem:[#allocation2 + $0x28] sm:$0xf0]  ;;  %v469_v62 = vld [vmem:[%s799_s1 + $0x10] sm:$0xf] }
  0x9e   :  { %v59_v6 = vsel %vm57_vm6, %v646_v63, %v651_v1  ;;  %v61_v7 = vsel %vm57_vm6, %v651_v1, %v646_v63  ;;  %v58_v8 = vsel %vm57_vm6, %v645_v0, %v650_v2  ;;  %v60_v9 = vsel %vm57_vm6, %v650_v2, %v645_v0  ;;  %v493_v17 = vld [vmem:[#allocation2 + $0x20] sm:$0xf]  ;;  %v559_v23 = vld [vmem:[#allocation2 + $0x24] sm:$0xf]  ;;  %v554_v63 = vld [vmem:[%s799_s1 + $0x14] sm:$0xf0] }
  0x9f   :  { %v63_v12 = vpack.c.bf16 %v59_v6, %v61_v7  ;;  %v62_v13 = vpack.c.bf16 %v58_v8, %v60_v9  ;;  %v494_v25 = vor.u32 %v560_v18, %v493_v17  ;;  %v498_v35 = vor.u32 %v559_v23, %v495_v24  ;;  %v553_v1 = vld [vmem:[%s799_s1 + $0x14] sm:$0xf]  ;;  %v471_v2 = vld [vmem:[%s799_s1 + $0x18] sm:$0xf0] }
  0xa0   :  { %v659_v19 = vpop.permute.xlu0 %658  ;;  %v485_v36 = vld [vmem:[#allocation2 + $0x10] sm:$0xf]  ;;  %v557_v38 = vld [vmem:[#allocation2 + $0x14] sm:$0xf]  ;;  %230 = vperm.xlu1 %662, %v212_v46   ;;  %v470_v0 = vor.u32 %v554_v63, %v469_v62  ;;  %v474_v3 = vor.u32 %v553_v1, %v471_v2 }
  0xa1   :  { %65 = vst [vmem:[#allocation2 + $0x8] sm:$0xff] %v63_v12  ;;  %v661_v21 = vunpack.i.h.bf16 %v659_v19  ;;  %v660_v22 = vunpack.i.l.bf16 %v659_v19  ;;  %352 = vmatpush.bf16.msra.mxu0 %v502_v16  ;;  %390 = vmatpush.bf16.msra.mxu2 %v506_v20  ;;  %v558_v37 = vld [vmem:[#allocation2 + $0x14] sm:$0xf0]  ;;  %v487_v39 = vld [vmem:[#allocation2 + $0x18] sm:$0xf0] }
  0xa2   :  { %64 = vst [vmem:[#allocation2] sm:$0xff] %v62_v13  ;;  %v486_v41 = vor.u32 %v558_v37, %v485_v36  ;;  %v490_v43 = vor.u32 %v557_v38, %v487_v39  ;;  %v458_v9 = vld [vmem:[%s797_s3 + $0x2] ss:$4 sm:$0x3] }
  0xa3   :  { %v180_v29 = vsel %vm178_vm7, %v656_v14, %v661_v21  ;;  %v182_v30 = vsel %vm178_vm7, %v661_v21, %v656_v14  ;;  %v179_v31 = vsel %vm178_vm7, %v655_v15, %v660_v22  ;;  %v181_v32 = vsel %vm178_vm7, %v660_v22, %v655_v15 }
  0xa4   :  { %v184_v33 = vpack.c.bf16 %v182_v30, %v180_v29  ;;  %v183_v34 = vpack.c.bf16 %v181_v32, %v179_v31  ;;  %v433_v13 = vperm.slane %v458_v9, 0  ;;  %v434_v18 = vperm.slane %v458_v9, 1 }
  0xa5   :  { %353 = vmatpush.bf16.msra.mxu0 %v494_v25  ;;  %391 = vmatpush.bf16.msra.mxu2 %v498_v35 }
  0xa6   :  { %186 = vst [vmem:[#allocation2 + $0x88] sm:$0xff] %v184_v33 }
  0xa7   :  { %185 = vst [vmem:[#allocation2 + $0x80] sm:$0xff] %v183_v34 }
  0xa8   :  { %v556_v45 = vld [vmem:[#allocation2 + $0x4] sm:$0xf0]  ;;  %v479_v48 = vld [vmem:[#allocation2 + $0x8] sm:$0xf0] }
  0xa9   :  { %v477_v44 = vld [vmem:[#allocation2] sm:$0xf]  ;;  %354 = vmatpush.bf16.msra.mxu0 %v486_v41  ;;  %v555_v47 = vld [vmem:[#allocation2 + $0x4] sm:$0xf]  ;;  %392 = vmatpush.bf16.msra.mxu2 %v490_v43 }
  0xaa   :  { %v478_v50 = vor.u32 %v556_v45, %v477_v44  ;;  %v482_v51 = vor.u32 %v555_v47, %v479_v48 }
  0xad   :  { %355 = vmatpush.bf16.msra.mxu0 %v478_v50  ;;  %v572_v54 = vld [vmem:[#allocation2 + $0x84] sm:$0xf0]  ;;  %v543_v55 = vld [vmem:[#allocation2 + $0x88] sm:$0xf0]  ;;  %393 = vmatpush.bf16.msra.mxu2 %v482_v51 }
  0xae   :  { %v541_v57 = vld [vmem:[#allocation2 + $0x80] sm:$0xf]  ;;  %v571_v58 = vld [vmem:[#allocation2 + $0x84] sm:$0xf] }
  0xaf   :  { %v542_v59 = vor.u32 %v572_v54, %v541_v57  ;;  %v546_v60 = vor.u32 %v571_v58, %v543_v55 }
  0xb0   :  { %356 = vmatmul.bf16.vlgmr.msra.gmra.mxu0 %v462_v52  ;;  %394 = vmatmul.bf16.vlgmr.msra.gmra.mxu2 %v462_v52 }
  0xb1   :  { %374 = vmatpush.bf16.msra.mxu1 %v542_v59  ;;  %412 = vmatpush.bf16.msra.mxu3 %v546_v60 }
  0xb4   :  { %547 = vmatmul.msk.bf16.vlgmr.msra.gmra.mxu1 %vm341_vm8, %v466_v61  ;;  %549 = vmatmul.msk.bf16.vlgmr.msra.gmra.mxu3 %vm341_vm8, %v466_v61 }
  0xc0   :  { %361 = vmatmul.bf16.gmra.mxu0 %v470_v0  ;;  %399 = vmatmul.bf16.gmra.mxu2 %v470_v0 }
  0xc4   :  { %548 = vmatmul.msk.bf16.gmra.mxu1 %vm341_vm8, %v474_v3  ;;  %550 = vmatmul.msk.bf16.gmra.mxu3 %vm341_vm8, %v474_v3 }
  0xf4   :  { %v221_v15 = vpop.permute.xlu2 %220 }
 0x10a   :  { %v216_v4 = vpop.permute.xlu1 %215 }
 0x10c   :  { %v226_v24 = vpop.permute.xlu0 %225 }
 0x112   :  { %v231_v43 = vpop.permute.xlu1 %230 }
 0x12d   :  { %v357_v5 = vpop.f32.mrf.mxu0 }
 0x12e   :  { %v358_v6 = vadd.f32 %v357_v5, %v216_v4 }
 0x131   :  { %v376_v7 = vpop.f32.mrf.mxu1 }
 0x132   :  { %v377_v8 = vadd.f32 %v376_v7, %v358_v6 }
 0x133   :  { %v395_v10 = vpop.f32.mrf.mxu2 }
 0x134   :  { %v396_v11 = vadd.f32 %v395_v10, %v216_v4  ;;  %v424_v14 = vmax.f32 %v377_v8, 0.0 }
 0x135   :  { %v359_v12 = vpop.f32.mrf.mxu0 }
 0x136   :  { %v437_v20 = vmul.f32 %v433_v13, %v424_v14  ;;  %v360_v21 = vadd.f32 %v359_v12, %v221_v15 }
 0x137   :  { %v414_v16 = vpop.f32.mrf.mxu3 }
 0x138   :  { %v415_v17 = vadd.f32 %v414_v16, %v396_v11 }
 0x139   :  { %v378_v19 = vpop.f32.mrf.mxu1 }
 0x13a   :  { %v425_v22 = vmax.f32 %v415_v17, 0.0  ;;  %v379_v26 = vadd.f32 %v378_v19, %v360_v21 }
 0x13b   :  { %v397_v23 = vpop.f32.mrf.mxu2 }
 0x13c   :  { %v438_v25 = vmul.f32 %v434_v18, %v425_v22  ;;  %v398_v30 = vadd.f32 %v397_v23, %v221_v15  ;;  %v426_v33 = vmax.f32 %v379_v26, 0.0 }
 0x13d   :  { %v362_v27 = vpop.f32.mrf.mxu0 }
 0x13e   :  { %v445_v29 = vpack.c.bf16 %v438_v25, %v437_v20  ;;  %v363_v31 = vadd.f32 %v362_v27, %v226_v24  ;;  %v439_v39 = vmul.f32 %v433_v13, %v426_v33 }
 0x13f   :  { %v416_v32 = vpop.f32.mrf.mxu3 }
 0x140   :  { %449 = vst [vmem:[%s800_s4] sm:$0xff] %v445_v29  ;;  %v417_v34 = vadd.f32 %v416_v32, %v398_v30 }
 0x141   :  { %v381_v35 = vpop.f32.mrf.mxu1 }
 0x142   :  { %v427_v36 = vmax.f32 %v417_v34, 0.0  ;;  %v382_v37 = vadd.f32 %v381_v35, %v363_v31 }
 0x143   :  { %v400_v38 = vpop.f32.mrf.mxu2 }
 0x144   :  { %v440_v40 = vmul.f32 %v434_v18, %v427_v36  ;;  %v401_v28 = vadd.f32 %v400_v38, %v226_v24  ;;  %v428_v42 = vmax.f32 %v382_v37, 0.0 }
 0x145   :  { %v364_v44 = vpop.f32.mrf.mxu0 }
 0x146   :  { %v446_v41 = vpack.c.bf16 %v440_v40, %v439_v39  ;;  %v441_v48 = vmul.f32 %v433_v13, %v428_v42  ;;  %v365_v49 = vadd.f32 %v364_v44, %v231_v43 }
 0x147   :  { %v419_v45 = vpop.f32.mrf.mxu3 }
 0x148   :  { %450 = vst [vmem:[%s800_s4 + $0x8] sm:$0xff] %v446_v41  ;;  %v420_v46 = vadd.f32 %v419_v45, %v401_v28 }
 0x149   :  { %v383_v47 = vpop.f32.mrf.mxu1 }
 0x14a   :  { %v429_v50 = vmax.f32 %v420_v46, 0.0  ;;  %v384_v53 = vadd.f32 %v383_v47, %v365_v49 }
 0x14b   :  { %v402_v51 = vpop.f32.mrf.mxu2 }
 0x14c   :  { %v442_v52 = vmul.f32 %v434_v18, %v429_v50  ;;  %v403_v55 = vadd.f32 %v402_v51, %v231_v43  ;;  %v430_v57 = vmax.f32 %v384_v53, 0.0 }
 0x14e   :  { %v447_v54 = vpack.c.bf16 %v442_v52, %v441_v48  ;;  %v443_v60 = vmul.f32 %v433_v13, %v430_v57 }
 0x14f   :  { %v421_v56 = vpop.f32.mrf.mxu3 }
 0x150   :  { %451 = vst [vmem:[%s800_s4 + $0x10] sm:$0xff] %v447_v54  ;;  %v422_v58 = vadd.f32 %v421_v56, %v403_v55 }
 0x152   :  { %v431_v59 = vmax.f32 %v422_v58, 0.0 }
 0x154   :  { %v444_v61 = vmul.f32 %v434_v18, %v431_v59 }
 0x156   :  { %v448_v62 = vpack.c.bf16 %v444_v61, %v443_v60 }
 0x158   :  { %452 = vst [vmem:[%s800_s4 + $0x18] sm:$0xff] %v448_v62 }

// kernel: _lambda_.9
= control target key start
LH: loop header
LB: loop body
LE: loop exit
PB: predicated region body
PF: predicated region fallthrough
CT: control target
= control target key end

     0   :  { %s1517_s5 = smov 8   ;;  %s1518_s6 = smov 120   ;;  %vm834_vm8 = vcmask 392192   ;;  %s1957_s0 = inlined_call_operand.vmem [shape: bf16[48,256], index: 0, kind: input, shape index: {}]   ;;  %s1958_s3 = inlined_call_operand.vmem [shape: f32[3,256], index: 3, kind: input, shape index: {}]   ;;  %s1959_s1 = inlined_call_operand.vmem [shape: bf16[16,432], index: 1, kind: input, shape index: {}]   ;;  %s1960_s2 = inlined_call_operand.vmem [shape: f32[16,1], index: 2, kind: input, shape index: {}]   ;;  %s1961_s4 = inlined_call_operand.vmem [shape: bf16[16,256], index: 4, kind: output, shape index: {}]  }
   0x1   :  { %v22_v0 = vld [vmem:[%s1957_s0 + $0x20] sm:$0xff]  ;;  %v23_v1 = vld [vmem:[%s1957_s0 + $0x28] sm:$0xff]  ;;  %v20_v6 = vld [vmem:[%s1957_s0 + $0x10] sm:$0xff]  ;;  %s1519_s7 = smov 7   ;;  %s1520_s8 = smov 127  }
   0x2   :  { %v36_v2 = vld [vmem:[%s1958_s3] ss:$4 sm:$0x3]  ;;  %v1559_v3 = vunpack.c.l.bf16 %v22_v0  ;;  %v1561_v4 = vunpack.c.l.bf16 %v23_v1  ;;  %277 = vst [vmem:[#allocation2 + $0xe0] sm:$0xff] %v22_v0  ;;  %v21_v7 = vld [vmem:[%s1957_s0 + $0x18] sm:$0xff]  ;;  %v1572_v10 = vunpack.c.h.bf16 %v20_v6  ;;  %v19_v12 = vld [vmem:[%s1957_s0 + $0x8] sm:$0xff]  ;;  %v1581_v17 = vunpack.c.h.bf16 %v22_v0 }
   0x3   :  { %v42_v5 = vperm.slane %v36_v2, 0  ;;  %v43_v8 = vperm.slane %v36_v2, 1  ;;  %v18_v9 = vld [vmem:[%s1957_s0] sm:$0xff]  ;;  %278 = vst [vmem:[#allocation2 + $0xe8] sm:$0xff] %v23_v1  ;;  %v1574_v11 = vunpack.c.h.bf16 %v21_v7  ;;  %v26_v16 = vunpack.c.l.bf16 %v19_v12  ;;  %s1516_s0 = smov 9   ;;  %s1521_s9 = smov 121  }
   0x4   :  { %v24_v13 = vunpack.c.l.bf16 %v18_v9  ;;  %275 = vst [vmem:[#allocation2 + $0xd0] sm:$0xff] %v20_v6  ;;  %v1585_v21 = vunpack.c.h.bf16 %v23_v1  ;;  %v25_v24 = vunpack.c.h.bf16 %v18_v9  ;;  %v27_v26 = vunpack.c.h.bf16 %v19_v12  ;;  %v971_v39 = vld [vmem:[%s1958_s3 + $0x1] ss:$4 sm:$0x3]  ;;  %s1522_s10 = smov 119   ;;  %s1523_s11 = smov 1  }
   0x5   :  { %v54_v14 = vmul.f32 %v42_v5, %v1559_v3  ;;  %v56_v15 = vmul.f32 %v42_v5, %v1561_v4  ;;  %v51_v18 = vmul.f32 %v43_v8, %v1572_v10  ;;  %v53_v19 = vmul.f32 %v43_v8, %v1574_v11  ;;  %276 = vst [vmem:[#allocation2 + $0xd8] sm:$0xff] %v21_v7 }
   0x6   :  { %v46_v20 = vmul.f32 %v42_v5, %v24_v13  ;;  %v48_v23 = vmul.f32 %v42_v5, %v26_v16  ;;  %273 = vst [vmem:[#allocation2 + $0xc0] sm:$0xff] %v18_v9  ;;  %v28_v27 = vunpack.c.l.bf16 %v20_v6  ;;  %v30_v28 = vunpack.c.l.bf16 %v21_v7 }
   0x7   :  { %v1587_v22 = vpack.i.bf16 %v56_v15, %v54_v14  ;;  %v1589_v25 = vpack.i.bf16 %v53_v19, %v51_v18  ;;  %274 = vst [vmem:[#allocation2 + $0xc8] sm:$0xff] %v19_v12  ;;  %v47_v30 = vmul.f32 %v43_v8, %v25_v24  ;;  %v55_v31 = vmul.f32 %v43_v8, %v1581_v17 }
   0x8   :  { %v1592_v29 = vpack.i.bf16 %v48_v23, %v46_v20  ;;  %v57_v32 = vmul.f32 %v43_v8, %v1585_v21  ;;  %v49_v33 = vmul.f32 %v43_v8, %v27_v26  ;;  %v50_v34 = vmul.f32 %v42_v5, %v28_v27 }
   0x9   :  { %1285 = vrot.lane.b32.xlu1 %v1587_v22, %s1516_s0  ;;  %1295 = vrot.lane.b32.xlu2 %v1589_v25, %s1516_s0  ;;  %v52_v35 = vmul.f32 %v42_v5, %v30_v28  ;;  %v1309_v40 = vpack.i.bf16 %v30_v28, %v28_v27  ;;  %v1314_v41 = vpack.i.bf16 %v1561_v4, %v1559_v3  ;;  %v59_v42 = vperm.slane %v971_v39, 0 }
   0xa   :  { %1275 = vrot.lane.b32.xlu0 %v1592_v29, %s1516_s0  ;;  %v1598_v36 = vpack.i.bf16 %v49_v33, %v47_v30  ;;  %v1600_v37 = vpack.i.bf16 %v57_v32, %v55_v31  ;;  %v1304_v43 = vpack.i.bf16 %v26_v16, %v24_v13  ;;  %v1324_v46 = vpack.i.bf16 %v1585_v21, %v1581_v17 }
   0xb   :  { %v1602_v38 = vpack.i.bf16 %v52_v35, %v50_v34  ;;  %v67_v44 = vmul.f32 %v59_v42, %v28_v27  ;;  %v69_v45 = vmul.f32 %v59_v42, %v30_v28  ;;  %v60_v48 = vperm.slane %v971_v39, 1 }
   0xc   :  { %v63_v49 = vmul.f32 %v59_v42, %v24_v13  ;;  %v65_v50 = vmul.f32 %v59_v42, %v26_v16  ;;  %v71_v58 = vmul.f32 %v59_v42, %v1559_v3  ;;  %v73_v59 = vmul.f32 %v59_v42, %v1561_v4 }
   0xd   :  { %v1617_v47 = vpack.i.bf16 %v69_v45, %v67_v44  ;;  %v64_v51 = vmul.f32 %v60_v48, %v25_v24  ;;  %v66_v52 = vmul.f32 %v60_v48, %v27_v26  ;;  %v68_v53 = vmul.f32 %v60_v48, %v1572_v10 }
   0xe   :  { %v70_v54 = vmul.f32 %v60_v48, %v1574_v11  ;;  %v1339_v55 = vpack.i.bf16 %v65_v50, %v63_v49  ;;  %v1399_v60 = vpack.i.bf16 %v73_v59, %v71_v58  ;;  %v1394_v61 = vpack.i.bf16 %v1574_v11, %v1572_v10 }
   0xf   :  { %v1344_v56 = vpack.i.bf16 %v66_v52, %v64_v51  ;;  %v1419_v62 = vpack.i.bf16 %v27_v26, %v25_v24  ;;  %v72_v63 = vmul.f32 %v60_v48, %v1581_v17  ;;  %v74_v0 = vmul.f32 %v60_v48, %v1585_v21 }
  0x10   :  { %v1623_v57 = vpack.i.bf16 %v70_v54, %v68_v53  ;;  %v99_v4 = vlaneseq }
  0x11   :  { %1290 = vrot.lane.b32.xlu1 %v1598_v36, %s1516_s0  ;;  %1300 = vrot.lane.b32.xlu2 %v1600_v37, %s1516_s0  ;;  %v1404_v1 = vpack.i.bf16 %v74_v0, %v72_v63 }
  0x12   :  { %1280 = vrot.lane.b32.xlu0 %v1602_v38, %s1516_s0  ;;  %v1656_v6 = vand.u32 127, %v99_v4 }
  0x14   :  { %vm101_vm0 = vcmp.lt.s32.totalorder %v1656_v6, 9  ;;  %vm401_vm1 = vcmp.lt.s32.totalorder %v1656_v6, 120  ;;  %vm303_vm2 = vcmp.lt.s32.totalorder %v1656_v6, 127  ;;  %vm199_vm3 = vcmp.lt.s32.totalorder %v1656_v6, 7 }
  0x15   :  { %vm150_vm4 = vcmp.lt.s32.totalorder %v1656_v6, 8  ;;  %vm352_vm5 = vcmp.lt.s32.totalorder %v1656_v6, 121  ;;  %vm450_vm6 = vcmp.lt.s32.totalorder %v1656_v6, 119  ;;  %vm248_vm7 = vcmp.lt.s32.totalorder %v1656_v6, 1 }
  0x19   :  { %1310 = vrot.lane.b32.xlu1 %v1309_v40, %s1517_s5  ;;  %1315 = vrot.lane.b32.xlu2 %v1314_v41, %s1517_s5 }
  0x1a   :  { %1305 = vrot.lane.b32.xlu0 %v1304_v43, %s1517_s5 }
  0x21   :  { %1325 = vrot.lane.b32.xlu1 %v1324_v46, %s1518_s6  ;;  %1330 = vrot.lane.b32.xlu2 %v1617_v47, %s1519_s7 }
  0x22   :  { %1320 = vrot.lane.b32.xlu0 %v1314_v41, %s1518_s6 }
  0x29   :  { %1340 = vrot.lane.b32.xlu1 %v1339_v55, %s1520_s8  ;;  %1345 = vrot.lane.b32.xlu2 %v1344_v56, %s1520_s8 }
  0x2a   :  { %1335 = vrot.lane.b32.xlu0 %v1623_v57, %s1519_s7 }
  0x31   :  { %1355 = vrot.lane.b32.xlu1 %v1394_v61, %s1518_s6  ;;  %1360 = vrot.lane.b32.xlu2 %v1339_v55, %s1519_s7 }
  0x32   :  { %1350 = vrot.lane.b32.xlu0 %v1309_v40, %s1518_s6 }
  0x39   :  { %1370 = vrot.lane.b32.xlu1 %v1304_v43, %s1518_s6  ;;  %1375 = vrot.lane.b32.xlu2 %v1419_v62, %s1518_s6 }
  0x3a   :  { %1365 = vrot.lane.b32.xlu0 %v1344_v56, %s1519_s7 }
  0x41   :  { %1385 = vrot.lane.b32.xlu1 %v1587_v22, %s1521_s9  ;;  %1390 = vrot.lane.b32.xlu2 %v1600_v37, %s1521_s9 }
  0x42   :  { %1380 = vrot.lane.b32.xlu0 %v1324_v46, %s1517_s5 }
  0x49   :  { %1400 = vrot.lane.b32.xlu1 %v1399_v60, %s1522_s10  ;;  %1405 = vrot.lane.b32.xlu2 %v1404_v1, %s1522_s10 }
  0x4a   :  { %1395 = vrot.lane.b32.xlu0 %v1394_v61, %s1517_s5 }
  0x51   :  { %1415 = vrot.lane.b32.xlu1 %v1589_v25, %s1521_s9  ;;  %1420 = vrot.lane.b32.xlu2 %v1419_v62, %s1517_s5 }
  0x52   :  { %1410 = vrot.lane.b32.xlu0 %v1602_v38, %s1521_s9 }
  0x59   :  { %1430 = vrot.lane.b32.xlu1 %v1623_v57, %s1522_s10  ;;  %1435 = vrot.lane.b32.xlu2 %v1587_v22, %s1523_s11 }
  0x5a   :  { %1425 = vrot.lane.b32.xlu0 %v1617_v47, %s1522_s10 }
  0x61   :  { %1445 = vrot.lane.b32.xlu1 %v1592_v29, %s1521_s9  ;;  %1450 = vrot.lane.b32.xlu2 %v1598_v36, %s1521_s9 }
  0x62   :  { %1440 = vrot.lane.b32.xlu0 %v1600_v37, %s1523_s11 }
  0x63   :  { %v1296_v2 = vpop.permute.xlu2 %1295 }
  0x64   :  { %v1298_v26 = vunpack.i.h.bf16 %v1296_v2  ;;  %v1297_v27 = vunpack.i.l.bf16 %v1296_v2 }
  0x69   :  { %1460 = vrot.lane.b32.xlu1 %v1344_v56, %s1522_s10  ;;  %1465 = vrot.lane.b32.xlu2 %v1602_v38, %s1523_s11 }
  0x6a   :  { %1455 = vrot.lane.b32.xlu0 %v1339_v55, %s1522_s10 }
  0x6b   :  { %v1301_v3 = vpop.permute.xlu2 %1300 }
  0x6c   :  { %v1303_v7 = vunpack.i.h.bf16 %v1301_v3  ;;  %v1302_v8 = vunpack.i.l.bf16 %v1301_v3 }
  0x71   :  { %1475 = vrot.lane.b32.xlu1 %v1399_v60, %s1520_s8  ;;  %1480 = vrot.lane.b32.xlu2 %v1404_v1, %s1520_s8 }
  0x72   :  { %1470 = vrot.lane.b32.xlu0 %v1589_v25, %s1523_s11 }
  0x73   :  { %v1654_v5 = vpop.permute.xlu2 %1315 }
  0x79   :  { %1490 = vrot.lane.b32.xlu1 %v1598_v36, %s1523_s11  ;;  %1495 = vrot.lane.b32.xlu2 %v1617_v47, %s1520_s8 }
  0x7a   :  { %1485 = vrot.lane.b32.xlu0 %v1592_v29, %s1523_s11 }
  0x7b   :  { %v1286_v9 = vpop.permute.xlu1 %1285  ;;  %v1663_v12 = vpop.permute.xlu2 %1330 }
  0x7c   :  { %v1288_v10 = vunpack.i.h.bf16 %v1286_v9  ;;  %v1287_v11 = vunpack.i.l.bf16 %v1286_v9  ;;  %v1276_v13 = vpop.permute.xlu0 %1275  ;;  %v1332_v2 = vunpack.i.l.bf16 %v1663_v12 }
  0x7d   :  { %v1278_v21 = vunpack.i.h.bf16 %v1276_v13  ;;  %v1277_v22 = vunpack.i.l.bf16 %v1276_v13 }
  0x7e   :  { %v106_v14 = vsel %vm101_vm0, %v1287_v11, %v1302_v8  ;;  %v107_v15 = vsel %vm101_vm0, %v1288_v10, %v1303_v7  ;;  %v112_v16 = vsel %vm101_vm0, %v1302_v8, %v1287_v11  ;;  %v113_v17 = vsel %vm101_vm0, %v1303_v7, %v1288_v10 }
  0x7f   :  { %v118_v18 = vpack.c.bf16 %v106_v14, %v112_v16  ;;  %v119_v19 = vpack.c.bf16 %v107_v15, %v113_v17 }
  0x81   :  { %124 = vst [vmem:[#allocation2 + $0x20] sm:$0xff] %v118_v18  ;;  %1505 = vrot.lane.b32.xlu1 %v1399_v60, %s1519_s7  ;;  %1510 = vrot.lane.b32.xlu2 %v1404_v1, %s1519_s7  ;;  %v1333_v1 = vunpack.i.h.bf16 %v1663_v12 }
  0x82   :  { %125 = vst [vmem:[#allocation2 + $0x28] sm:$0xff] %v119_v19  ;;  %1500 = vrot.lane.b32.xlu0 %v1623_v57, %s1520_s8 }
  0x83   :  { %v1291_v20 = vpop.permute.xlu1 %1290  ;;  %v1346_v23 = vpop.permute.xlu2 %1345 }
  0x84   :  { %v1293_v24 = vunpack.i.h.bf16 %v1291_v20  ;;  %v1292_v25 = vunpack.i.l.bf16 %v1291_v20  ;;  %v1281_v28 = vpop.permute.xlu0 %1280  ;;  %v1348_v59 = vunpack.i.h.bf16 %v1346_v23  ;;  %v1347_v60 = vunpack.i.l.bf16 %v1346_v23 }
  0x85   :  { %v1283_v35 = vunpack.i.h.bf16 %v1281_v28  ;;  %v1282_v36 = vunpack.i.l.bf16 %v1281_v28 }
  0x86   :  { %v102_v29 = vsel %vm101_vm0, %v1277_v22, %v1292_v25  ;;  %v103_v30 = vsel %vm101_vm0, %v1278_v21, %v1293_v24  ;;  %v108_v31 = vsel %vm101_vm0, %v1292_v25, %v1277_v22  ;;  %v109_v32 = vsel %vm101_vm0, %v1293_v24, %v1278_v21 }
  0x87   :  { %v114_v33 = vpack.c.bf16 %v102_v29, %v108_v31  ;;  %v115_v34 = vpack.c.bf16 %v103_v30, %v109_v32  ;;  %v105_v37 = vsel %vm101_vm0, %v1283_v35, %v1298_v26  ;;  %v111_v38 = vsel %vm101_vm0, %v1298_v26, %v1283_v35 }
  0x88   :  { %v104_v39 = vsel %vm101_vm0, %v1282_v36, %v1297_v27  ;;  %v110_v40 = vsel %vm101_vm0, %v1297_v27, %v1282_v36  ;;  %v117_v41 = vpack.c.bf16 %v105_v37, %v111_v38 }
  0x89   :  { %120 = vst [vmem:[#allocation2] sm:$0xff] %v114_v33  ;;  %v116_v42 = vpack.c.bf16 %v104_v39, %v110_v40 }
  0x8a   :  { %121 = vst [vmem:[#allocation2 + $0x8] sm:$0xff] %v115_v34 }
  0x8b   :  { %v1693_v43 = vpop.permute.xlu1 %1310  ;;  %123 = vst [vmem:[#allocation2 + $0x18] sm:$0xff] %v117_v41  ;;  %v1695_v44 = vpop.permute.xlu2 %1360 }
  0x8c   :  { %122 = vst [vmem:[#allocation2 + $0x10] sm:$0xff] %v116_v42  ;;  %v1697_v45 = vpop.permute.xlu0 %1305 }
  0x93   :  { %v1326_v46 = vpop.permute.xlu1 %1325  ;;  %v1699_v49 = vpop.permute.xlu2 %1375 }
  0x94   :  { %v1328_v47 = vunpack.i.h.bf16 %v1326_v46  ;;  %v1327_v48 = vunpack.i.l.bf16 %v1326_v46  ;;  %v1321_v50 = vpop.permute.xlu0 %1320  ;;  %v1378_v38 = vunpack.i.h.bf16 %v1699_v49  ;;  %v1377_v39 = vunpack.i.l.bf16 %v1699_v49 }
  0x95   :  { %v1323_v51 = vunpack.i.h.bf16 %v1321_v50  ;;  %v1322_v52 = vunpack.i.l.bf16 %v1321_v50  ;;  %v1308_v46 = vunpack.i.h.bf16 %v1697_v45 }
  0x97   :  { %v407_v53 = vsel %vm401_vm1, %v1323_v51, %v1328_v47  ;;  %v413_v54 = vsel %vm401_vm1, %v1328_v47, %v1323_v51  ;;  %v406_v55 = vsel %vm401_vm1, %v1322_v52, %v1327_v48  ;;  %v412_v56 = vsel %vm401_vm1, %v1327_v48, %v1322_v52 }
  0x98   :  { %v419_v57 = vpack.c.bf16 %v413_v54, %v407_v53  ;;  %v418_v58 = vpack.c.bf16 %v412_v56, %v406_v55  ;;  %v1307_v52 = vunpack.i.l.bf16 %v1697_v45 }
  0x9a   :  { %425 = vst [vmem:[#allocation2 + $0x178] sm:$0xff] %v419_v57 }
  0x9b   :  { %v1341_v61 = vpop.permute.xlu1 %1340  ;;  %424 = vst [vmem:[#allocation2 + $0x170] sm:$0xff] %v418_v58  ;;  %v1711_v62 = vpop.permute.xlu2 %1390 }
  0x9c   :  { %v1343_v63 = vunpack.i.h.bf16 %v1341_v61  ;;  %v1342_v0 = vunpack.i.l.bf16 %v1341_v61  ;;  %v1336_v3 = vpop.permute.xlu0 %1335 }
  0x9d   :  { %v1338_v13 = vunpack.i.h.bf16 %v1336_v3  ;;  %v1337_v14 = vunpack.i.l.bf16 %v1336_v3 }
  0x9e   :  { %v305_v4 = vsel %vm303_vm2, %v1343_v63, %v1348_v59  ;;  %v311_v7 = vsel %vm303_vm2, %v1348_v59, %v1343_v63  ;;  %v304_v8 = vsel %vm303_vm2, %v1342_v0, %v1347_v60  ;;  %v310_v9 = vsel %vm303_vm2, %v1347_v60, %v1342_v0 }
  0x9f   :  { %v317_v10 = vpack.c.bf16 %v311_v7, %v305_v4  ;;  %v316_v11 = vpack.c.bf16 %v310_v9, %v304_v8  ;;  %v203_v12 = vsel %vm199_vm3, %v1333_v1, %v1338_v13  ;;  %v209_v15 = vsel %vm199_vm3, %v1338_v13, %v1333_v1 }
  0xa0   :  { %v202_v16 = vsel %vm199_vm3, %v1332_v2, %v1337_v14  ;;  %v208_v17 = vsel %vm199_vm3, %v1337_v14, %v1332_v2  ;;  %v215_v18 = vpack.c.bf16 %v203_v12, %v209_v15  ;;  %v1363_v0 = vunpack.i.h.bf16 %v1695_v44 }
  0xa1   :  { %323 = vst [vmem:[#allocation2 + $0xf8] sm:$0xff] %v317_v10  ;;  %v214_v19 = vpack.c.bf16 %v202_v16, %v208_v17  ;;  %v1258_v20 = vld [vmem:[#allocation2 + $0x174] sm:$0xf0]  ;;  %v1362_v4 = vunpack.i.l.bf16 %v1695_v44  ;;  %v1393_v10 = vunpack.i.h.bf16 %v1711_v62 }
  0xa2   :  { %322 = vst [vmem:[#allocation2 + $0xf0] sm:$0xff] %v316_v11  ;;  %v1175_v22 = vld [vmem:[#allocation2 + $0x170] sm:$0xf]  ;;  %v1392_v11 = vunpack.i.l.bf16 %v1711_v62 }
  0xa3   :  { %v1356_v21 = vpop.permute.xlu1 %1355  ;;  %221 = vst [vmem:[#allocation2 + $0x78] sm:$0xff] %v215_v18  ;;  %v1732_v23 = vpop.permute.xlu2 %1405  ;;  %v1176_v26 = vor.u32 %v1258_v20, %v1175_v22  ;;  %v1317_v22 = vunpack.i.l.bf16 %v1654_v5 }
  0xa4   :  { %v1358_v24 = vunpack.i.h.bf16 %v1356_v21  ;;  %v1357_v25 = vunpack.i.l.bf16 %v1356_v21  ;;  %220 = vst [vmem:[#allocation2 + $0x70] sm:$0xff] %v214_v19  ;;  %v1351_v27 = vpop.permute.xlu0 %1350  ;;  %v1318_v21 = vunpack.i.h.bf16 %v1654_v5 }
  0xa5   :  { %v1353_v28 = vunpack.i.h.bf16 %v1351_v27  ;;  %v1352_v29 = vunpack.i.l.bf16 %v1351_v27  ;;  %866 = vmatpush.bf16.msra.mxu2 %v1176_v26 }
  0xa7   :  { %v405_v30 = vsel %vm401_vm1, %v1353_v28, %v1358_v24  ;;  %v411_v31 = vsel %vm401_vm1, %v1358_v24, %v1353_v28  ;;  %v404_v32 = vsel %vm401_vm1, %v1352_v29, %v1357_v25  ;;  %v410_v33 = vsel %vm401_vm1, %v1357_v25, %v1352_v29 }
  0xa8   :  { %v1242_v34 = vld [vmem:[#allocation2 + $0xf4] sm:$0xf0]  ;;  %v417_v35 = vpack.c.bf16 %v411_v31, %v405_v30  ;;  %v416_v36 = vpack.c.bf16 %v410_v33, %v404_v32 }
  0xa9   :  { %v1111_v37 = vld [vmem:[#allocation2 + $0xf0] sm:$0xf] }
  0xaa   :  { %v1112_v40 = vor.u32 %v1242_v34, %v1111_v37  ;;  %423 = vst [vmem:[#allocation2 + $0x168] sm:$0xff] %v417_v35  ;;  %v1226_v42 = vld [vmem:[#allocation2 + $0x74] sm:$0xf0]  ;;  %v1408_v37 = vunpack.i.h.bf16 %v1732_v23 }
  0xab   :  { %v1371_v41 = vpop.permute.xlu1 %1370  ;;  %422 = vst [vmem:[#allocation2 + $0x160] sm:$0xff] %v416_v36  ;;  %v1421_v47 = vpop.permute.xlu2 %1420  ;;  %v1047_v51 = vld [vmem:[#allocation2 + $0x70] sm:$0xf] }
  0xac   :  { %v1373_v48 = vunpack.i.h.bf16 %v1371_v41  ;;  %v1372_v50 = vunpack.i.l.bf16 %v1371_v41  ;;  %852 = vmatpush.bf16.msra.mxu1 %v1112_v40  ;;  %v1423_v53 = vunpack.i.h.bf16 %v1421_v47  ;;  %v1422_v54 = vunpack.i.l.bf16 %v1421_v47  ;;  %v1366_v55 = vpop.permute.xlu0 %1365  ;;  %v1240_v47 = vld [vmem:[#allocation2 + $0xe4] sm:$0xf0] }
  0xad   :  { %v1048_v49 = vor.u32 %v1226_v42, %v1047_v51  ;;  %v1368_v8 = vunpack.i.h.bf16 %v1366_v55  ;;  %v1367_v9 = vunpack.i.l.bf16 %v1366_v55 }
  0xae   :  { %v403_v56 = vsel %vm401_vm1, %v1373_v48, %v1378_v38  ;;  %v409_v57 = vsel %vm401_vm1, %v1378_v38, %v1373_v48  ;;  %v402_v58 = vsel %vm401_vm1, %v1372_v50, %v1377_v39  ;;  %v408_v59 = vsel %vm401_vm1, %v1377_v39, %v1372_v50 }
  0xaf   :  { %v151_v60 = vsel %vm150_vm4, %v1307_v52, %v1422_v54  ;;  %v152_v45 = vsel %vm150_vm4, %v1308_v46, %v1423_v53  ;;  %v157_v61 = vsel %vm150_vm4, %v1422_v54, %v1307_v52  ;;  %v158_v63 = vsel %vm150_vm4, %v1423_v53, %v1308_v46  ;;  %838 = vmatpush.bf16.msra.mxu0 %v1048_v49  ;;  %v1103_v46 = vld [vmem:[#allocation2 + $0xe0] sm:$0xf] }
  0xb0   :  { %v163_v1 = vpack.c.bf16 %v151_v60, %v157_v61  ;;  %v164_v2 = vpack.c.bf16 %v152_v45, %v158_v63  ;;  %v415_v3 = vpack.c.bf16 %v409_v57, %v403_v56  ;;  %v414_v7 = vpack.c.bf16 %v408_v59, %v402_v58  ;;  %v1095_v57 = vld [vmem:[#allocation2 + $0xd0] sm:$0xf]  ;;  %v1238_v61 = vld [vmem:[#allocation2 + $0xd4] sm:$0xf0] }
  0xb1   :  { %v1256_v13 = vld [vmem:[#allocation2 + $0x164] sm:$0xf0]  ;;  %v201_v14 = vsel %vm199_vm3, %v1363_v0, %v1368_v8  ;;  %v207_v12 = vsel %vm199_vm3, %v1368_v8, %v1363_v0  ;;  %v200_v44 = vsel %vm199_vm3, %v1362_v4, %v1367_v9  ;;  %v206_v15 = vsel %vm199_vm3, %v1367_v9, %v1362_v4 }
  0xb2   :  { %169 = vst [vmem:[#allocation2 + $0x30] sm:$0xff] %v163_v1  ;;  %v1167_v17 = vld [vmem:[#allocation2 + $0x160] sm:$0xf]  ;;  %v213_v62 = vpack.c.bf16 %v201_v14, %v207_v12  ;;  %v212_v18 = vpack.c.bf16 %v200_v44, %v206_v15  ;;  %v1407_v38 = vunpack.i.l.bf16 %v1732_v23  ;;  %v1104_v52 = vor.u32 %v1240_v47, %v1103_v46 }
  0xb3   :  { %170 = vst [vmem:[#allocation2 + $0x38] sm:$0xff] %v164_v2  ;;  %v1386_v16 = vpop.permute.xlu1 %1385  ;;  %v1168_v25 = vor.u32 %v1256_v13, %v1167_v17  ;;  %v1313_v53 = vunpack.i.h.bf16 %v1693_v43  ;;  %v1312_v54 = vunpack.i.l.bf16 %v1693_v43  ;;  %v1799_v56 = vpop.permute.xlu2 %1435  ;;  %v1087_v17 = vld [vmem:[#allocation2 + $0xc0] sm:$0xf] }
  0xb4   :  { %421 = vst [vmem:[#allocation2 + $0x158] sm:$0xff] %v415_v3  ;;  %v1388_v19 = vunpack.i.h.bf16 %v1386_v16  ;;  %v1387_v20 = vunpack.i.l.bf16 %v1386_v16  ;;  %v1381_v24 = vpop.permute.xlu0 %1380  ;;  %853 = vmatpush.bf16.msra.mxu1 %v1104_v52 }
  0xb5   :  { %420 = vst [vmem:[#allocation2 + $0x150] sm:$0xff] %v414_v7  ;;  %v1383_v5 = vunpack.i.h.bf16 %v1381_v24  ;;  %v1382_v32 = vunpack.i.l.bf16 %v1381_v24  ;;  %867 = vmatpush.bf16.msra.mxu2 %v1168_v25  ;;  %v1096_v7 = vor.u32 %v1238_v61, %v1095_v57 }
  0xb6   :  { %219 = vst [vmem:[#allocation2 + $0x68] sm:$0xff] %v213_v62  ;;  %v358_v26 = vsel %vm352_vm5, %v1388_v19, %v1393_v10  ;;  %v364_v27 = vsel %vm352_vm5, %v1393_v10, %v1388_v19  ;;  %v357_v28 = vsel %vm352_vm5, %v1387_v20, %v1392_v11  ;;  %v363_v29 = vsel %vm352_vm5, %v1392_v11, %v1387_v20  ;;  %v1236_v62 = vld [vmem:[#allocation2 + $0xc4] sm:$0xf0] }
  0xb7   :  { %218 = vst [vmem:[#allocation2 + $0x60] sm:$0xff] %v212_v18  ;;  %v370_v30 = vpack.c.bf16 %v364_v27, %v358_v26  ;;  %v369_v31 = vpack.c.bf16 %v363_v29, %v357_v28  ;;  %v156_v33 = vsel %vm150_vm4, %v1318_v21, %v1383_v5  ;;  %v162_v34 = vsel %vm150_vm4, %v1383_v5, %v1318_v21 }
  0xb8   :  { %v155_v35 = vsel %vm150_vm4, %v1317_v22, %v1382_v32  ;;  %v161_v36 = vsel %vm150_vm4, %v1382_v32, %v1317_v22  ;;  %v168_v39 = vpack.c.bf16 %v156_v33, %v162_v34  ;;  %854 = vmatpush.bf16.msra.mxu1 %v1096_v7  ;;  %v1088_v21 = vor.u32 %v1236_v62, %v1087_v17 }
  0xb9   :  { %376 = vst [vmem:[#allocation2 + $0x148] sm:$0xff] %v370_v30  ;;  %v167_v40 = vpack.c.bf16 %v155_v35, %v161_v36 }
  0xba   :  { %375 = vst [vmem:[#allocation2 + $0x140] sm:$0xff] %v369_v31 }
  0xbb   :  { %v1401_v41 = vpop.permute.xlu1 %1400  ;;  %v1254_v42 = vld [vmem:[#allocation2 + $0x154] sm:$0xf0]  ;;  %174 = vst [vmem:[#allocation2 + $0x58] sm:$0xff] %v168_v39  ;;  %v1451_v27 = vpop.permute.xlu2 %1450 }
  0xbc   :  { %v1403_v48 = vunpack.i.h.bf16 %v1401_v41  ;;  %v1402_v50 = vunpack.i.l.bf16 %v1401_v41  ;;  %v1159_v51 = vld [vmem:[#allocation2 + $0x150] sm:$0xf]  ;;  %173 = vst [vmem:[#allocation2 + $0x50] sm:$0xff] %v167_v40  ;;  %v1396_v55 = vpop.permute.xlu0 %1395  ;;  %855 = vmatpush.bf16.msra.mxu1 %v1088_v21  ;;  %v991_v21 = vld [vmem:[#allocation2] sm:$0xf] }
  0xbd   :  { %v1224_v49 = vld [vmem:[#allocation2 + $0x64] sm:$0xf0]  ;;  %v1160_v23 = vor.u32 %v1254_v42, %v1159_v51  ;;  %v1398_v1 = vunpack.i.h.bf16 %v1396_v55  ;;  %v1397_v2 = vunpack.i.l.bf16 %v1396_v55 }
  0xbe   :  { %v456_v58 = vsel %vm450_vm6, %v1403_v48, %v1408_v37  ;;  %v462_v59 = vsel %vm450_vm6, %v1408_v37, %v1403_v48  ;;  %v455_v60 = vsel %vm450_vm6, %v1402_v50, %v1407_v38  ;;  %v461_v45 = vsel %vm450_vm6, %v1407_v38, %v1402_v50  ;;  %v1039_v43 = vld [vmem:[#allocation2 + $0x60] sm:$0xf]  ;;  %v1015_v48 = vld [vmem:[#allocation2 + $0x30] sm:$0xf]  ;;  %v1218_v50 = vld [vmem:[#allocation2 + $0x34] sm:$0xf0] }
  0xbf   :  { %v468_v63 = vpack.c.bf16 %v462_v59, %v456_v58  ;;  %v467_v0 = vpack.c.bf16 %v461_v45, %v455_v60  ;;  %868 = vmatpush.bf16.msra.mxu2 %v1160_v23  ;;  %v1040_v3 = vor.u32 %v1224_v49, %v1039_v43  ;;  %v154_v8 = vsel %vm150_vm4, %v1313_v53, %v1398_v1  ;;  %v1007_v60 = vld [vmem:[#allocation2 + $0x20] sm:$0xf]  ;;  %v1216_v45 = vld [vmem:[#allocation2 + $0x24] sm:$0xf0] }
  0xc0   :  { %v1252_v4 = vld [vmem:[#allocation2 + $0x144] sm:$0xf0]  ;;  %v160_v9 = vsel %vm150_vm4, %v1398_v1, %v1313_v53  ;;  %v153_v10 = vsel %vm150_vm4, %v1312_v54, %v1397_v2  ;;  %v159_v11 = vsel %vm150_vm4, %v1397_v2, %v1312_v54  ;;  %v1016_v23 = vor.u32 %v1218_v50, %v1015_v48 }
  0xc1   :  { %474 = vst [vmem:[#allocation2 + $0x1a8] sm:$0xff] %v468_v63  ;;  %v1151_v13 = vld [vmem:[#allocation2 + $0x140] sm:$0xf]  ;;  %v166_v14 = vpack.c.bf16 %v154_v8, %v160_v9  ;;  %v165_v12 = vpack.c.bf16 %v153_v10, %v159_v11  ;;  %839 = vmatpush.bf16.msra.mxu0 %v1040_v3  ;;  %v1453_v58 = vunpack.i.h.bf16 %v1451_v27  ;;  %v1452_v59 = vunpack.i.l.bf16 %v1451_v27  ;;  %v999_v9 = vld [vmem:[#allocation2 + $0x10] sm:$0xf] }
  0xc2   :  { %473 = vst [vmem:[#allocation2 + $0x1a0] sm:$0xff] %v467_v0  ;;  %v1152_v44 = vor.u32 %v1252_v4, %v1151_v13  ;;  %v1222_v16 = vld [vmem:[#allocation2 + $0x54] sm:$0xf0]  ;;  %v1438_v3 = vunpack.i.h.bf16 %v1799_v56  ;;  %v1437_v4 = vunpack.i.l.bf16 %v1799_v56  ;;  %v1008_v8 = vor.u32 %v1216_v45, %v1007_v60 }
  0xc3   :  { %v1416_v15 = vpop.permute.xlu1 %1415  ;;  %172 = vst [vmem:[#allocation2 + $0x48] sm:$0xff] %v166_v14  ;;  %v1031_v20 = vld [vmem:[#allocation2 + $0x50] sm:$0xf]  ;;  %v1833_v57 = vpop.permute.xlu2 %1465  ;;  %v1214_v10 = vld [vmem:[#allocation2 + $0x14] sm:$0xf0] }
  0xc4   :  { %v1418_v18 = vunpack.i.h.bf16 %v1416_v15  ;;  %v1417_v19 = vunpack.i.l.bf16 %v1416_v15  ;;  %869 = vmatpush.bf16.msra.mxu2 %v1152_v44  ;;  %171 = vst [vmem:[#allocation2 + $0x40] sm:$0xff] %v165_v12  ;;  %v1411_v22 = vpop.permute.xlu0 %1410  ;;  %v1032_v24 = vor.u32 %v1222_v16, %v1031_v20  ;;  %v1000_v17 = vor.u32 %v1214_v10, %v999_v9 }
  0xc5   :  { %v1413_v25 = vunpack.i.h.bf16 %v1411_v22  ;;  %v1412_v26 = vunpack.i.l.bf16 %v1411_v22 }
  0xc6   :  { %840 = vmatpush.bf16.msra.mxu0 %v1032_v24 }
  0xc7   :  { %v356_v28 = vsel %vm352_vm5, %v1413_v25, %v1418_v18  ;;  %v362_v29 = vsel %vm352_vm5, %v1418_v18, %v1413_v25  ;;  %v355_v30 = vsel %vm352_vm5, %v1412_v26, %v1417_v19  ;;  %v361_v31 = vsel %vm352_vm5, %v1417_v19, %v1412_v26  ;;  %v1212_v25 = vld [vmem:[#allocation2 + $0x4] sm:$0xf0] }
  0xc8   :  { %v1264_v5 = vld [vmem:[#allocation2 + $0x1a4] sm:$0xf0]  ;;  %v368_v32 = vpack.c.bf16 %v362_v29, %v356_v28  ;;  %v367_v33 = vpack.c.bf16 %v361_v31, %v355_v30  ;;  %v1241_v29 = vld [vmem:[#allocation2 + $0xf4] sm:$0xf]  ;;  %v1113_v30 = vld [vmem:[#allocation2 + $0xf8] sm:$0xf0] }
  0xc9   :  { %v1199_v34 = vld [vmem:[#allocation2 + $0x1a0] sm:$0xf] }
  0xca   :  { %v1200_v35 = vor.u32 %v1264_v5, %v1199_v34  ;;  %374 = vst [vmem:[#allocation2 + $0x138] sm:$0xff] %v368_v32  ;;  %v1220_v37 = vld [vmem:[#allocation2 + $0x44] sm:$0xf0]  ;;  %v1239_v34 = vld [vmem:[#allocation2 + $0xe4] sm:$0xf] }
  0xcb   :  { %v1431_v36 = vpop.permute.xlu1 %1430  ;;  %373 = vst [vmem:[#allocation2 + $0x130] sm:$0xff] %v367_v33  ;;  %v1023_v40 = vld [vmem:[#allocation2 + $0x40] sm:$0xf]  ;;  %v1481_v31 = vpop.permute.xlu2 %1480 }
  0xcc   :  { %v1433_v38 = vunpack.i.h.bf16 %v1431_v36  ;;  %v1432_v39 = vunpack.i.l.bf16 %v1431_v36  ;;  %885 = vmatpush.bf16.msra.mxu3 %v1200_v35  ;;  %v1426_v41 = vpop.permute.xlu0 %1425  ;;  %v1024_v42 = vor.u32 %v1220_v37, %v1023_v40  ;;  %v1105_v35 = vld [vmem:[#allocation2 + $0xe8] sm:$0xf0]  ;;  %v992_v37 = vor.u32 %v1212_v25, %v991_v21 }
  0xcd   :  { %v1428_v46 = vunpack.i.h.bf16 %v1426_v41  ;;  %v1427_v47 = vunpack.i.l.bf16 %v1426_v41  ;;  %v1116_v40 = vor.u32 %v1241_v29, %v1113_v30  ;;  %v1108_v41 = vor.u32 %v1239_v34, %v1105_v35  ;;  %v1208_v21 = vld [vmem:[%s1959_s1 + $0xc] sm:$0xf] }
  0xce   :  { %841 = vmatpush.bf16.msra.mxu0 %v1024_v42 }
  0xcf   :  { %v454_v51 = vsel %vm450_vm6, %v1428_v46, %v1433_v38  ;;  %v460_v52 = vsel %vm450_vm6, %v1433_v38, %v1428_v46  ;;  %v453_v53 = vsel %vm450_vm6, %v1427_v47, %v1432_v39  ;;  %v459_v54 = vsel %vm450_vm6, %v1432_v39, %v1427_v47 }
  0xd0   :  { %v466_v55 = vpack.c.bf16 %v460_v52, %v454_v51  ;;  %v465_v49 = vpack.c.bf16 %v459_v54, %v453_v53  ;;  %v1237_v54 = vld [vmem:[#allocation2 + $0xd4] sm:$0xf] }
  0xd1   :  { %v1250_v43 = vld [vmem:[#allocation2 + $0x134] sm:$0xf0] }
  0xd2   :  { %472 = vst [vmem:[#allocation2 + $0x198] sm:$0xff] %v466_v55  ;;  %842 = vmatpush.bf16.msra.mxu0 %v1016_v23  ;;  %v1143_v63 = vld [vmem:[#allocation2 + $0x130] sm:$0xf]  ;;  %v1097_v55 = vld [vmem:[#allocation2 + $0xd8] sm:$0xf0]  ;;  %v1482_v23 = vunpack.i.l.bf16 %v1481_v31 }
  0xd3   :  { %v1446_v61 = vpop.permute.xlu1 %1445  ;;  %471 = vst [vmem:[#allocation2 + $0x190] sm:$0xff] %v465_v49  ;;  %v1144_v2 = vor.u32 %v1250_v43, %v1143_v63  ;;  %v1483_v49 = vunpack.i.h.bf16 %v1481_v31  ;;  %v1100_v63 = vor.u32 %v1237_v54, %v1097_v55  ;;  %v1209_v31 = vld [vmem:[%s1959_s1 + $0xc] sm:$0xf0] }
  0xd4   :  { %v1448_v0 = vunpack.i.h.bf16 %v1446_v61  ;;  %v1447_v1 = vunpack.i.l.bf16 %v1446_v61  ;;  %v1441_v7 = vpop.permute.xlu0 %1440 }
  0xd5   :  { %870 = vmatpush.bf16.msra.mxu2 %v1144_v2  ;;  %v1443_v15 = vunpack.i.h.bf16 %v1441_v7  ;;  %v1442_v16 = vunpack.i.l.bf16 %v1441_v7  ;;  %v1089_v7 = vld [vmem:[#allocation2 + $0xc8] sm:$0xf0] }
  0xd6   :  { %v354_v11 = vsel %vm352_vm5, %v1448_v0, %v1453_v58  ;;  %v360_v13 = vsel %vm352_vm5, %v1453_v58, %v1448_v0  ;;  %v353_v14 = vsel %vm352_vm5, %v1447_v1, %v1452_v59  ;;  %v359_v12 = vsel %vm352_vm5, %v1452_v59, %v1447_v1  ;;  %843 = vmatpush.bf16.msra.mxu0 %v1008_v8  ;;  %v1864_v8 = vpop.permute.xlu2 %1495 }
  0xd7   :  { %v366_v56 = vpack.c.bf16 %v360_v13, %v354_v11  ;;  %v365_v44 = vpack.c.bf16 %v359_v12, %v353_v14  ;;  %v254_v62 = vsel %vm248_vm7, %v1438_v3, %v1443_v15  ;;  %v260_v18 = vsel %vm248_vm7, %v1443_v15, %v1438_v3  ;;  %v1225_v15 = vld [vmem:[#allocation2 + $0x74] sm:$0xf] }
  0xd8   :  { %v253_v19 = vsel %vm248_vm7, %v1437_v4, %v1442_v16  ;;  %v259_v20 = vsel %vm248_vm7, %v1442_v16, %v1437_v4  ;;  %v266_v22 = vpack.c.bf16 %v254_v62, %v260_v18  ;;  %v1468_v0 = vunpack.i.h.bf16 %v1833_v57  ;;  %v1235_v4 = vld [vmem:[#allocation2 + $0xc4] sm:$0xf]  ;;  %v1049_v16 = vld [vmem:[#allocation2 + $0x78] sm:$0xf0] }
  0xd9   :  { %372 = vst [vmem:[#allocation2 + $0x128] sm:$0xff] %v366_v56  ;;  %v265_v24 = vpack.c.bf16 %v253_v19, %v259_v20  ;;  %v1262_v26 = vld [vmem:[#allocation2 + $0x194] sm:$0xf0]  ;;  %v1467_v1 = vunpack.i.l.bf16 %v1833_v57 }
  0xda   :  { %371 = vst [vmem:[#allocation2 + $0x120] sm:$0xff] %v365_v44  ;;  %844 = vmatpush.bf16.msra.mxu0 %v1000_v17  ;;  %v1191_v28 = vld [vmem:[#allocation2 + $0x190] sm:$0xf]  ;;  %v1092_v44 = vor.u32 %v1235_v4, %v1089_v7 }
  0xdb   :  { %v1461_v27 = vpop.permute.xlu1 %1460  ;;  %272 = vst [vmem:[#allocation2 + $0xb8] sm:$0xff] %v266_v22  ;;  %v1192_v33 = vor.u32 %v1262_v26, %v1191_v28  ;;  %v985_v22 = vld [vmem:[%s1959_s1 + $0x18] sm:$0xf0] }
  0xdc   :  { %v1463_v5 = vunpack.i.h.bf16 %v1461_v27  ;;  %v1462_v32 = vunpack.i.l.bf16 %v1461_v27  ;;  %271 = vst [vmem:[#allocation2 + $0xb0] sm:$0xff] %v265_v24  ;;  %v1456_v36 = vpop.permute.xlu0 %1455  ;;  %v975_v27 = vld [vmem:[%s1959_s1] sm:$0xf] }
  0xdd   :  { %v1458_v38 = vunpack.i.h.bf16 %v1456_v36  ;;  %v1457_v39 = vunpack.i.l.bf16 %v1456_v36  ;;  %886 = vmatpush.bf16.msra.mxu3 %v1192_v33  ;;  %v1894_v34 = vor.u32 %v1209_v31, %v975_v27  ;;  %v1052_v36 = vor.u32 %v1225_v15, %v1049_v16  ;;  %v534_v31 = vld [vmem:[%s1960_s2 + $0x8] sm:$0xff] }
  0xde   :  { %845 = vmatpush.bf16.msra.mxu0 %v992_v37  ;;  %v1896_v37 = vor.u32 %v1208_v21, %v985_v22 }
  0xdf   :  { %v452_v42 = vsel %vm450_vm6, %v1458_v38, %v1463_v5  ;;  %v458_v46 = vsel %vm450_vm6, %v1463_v5, %v1458_v38  ;;  %v451_v47 = vsel %vm450_vm6, %v1457_v39, %v1462_v32  ;;  %v457_v48 = vsel %vm450_vm6, %v1462_v32, %v1457_v39 }
  0xe0   :  { %v1248_v50 = vld [vmem:[#allocation2 + $0x124] sm:$0xf0]  ;;  %v464_v51 = vpack.c.bf16 %v458_v46, %v452_v42  ;;  %v463_v52 = vpack.c.bf16 %v457_v48, %v451_v47  ;;  %v1041_v42 = vld [vmem:[#allocation2 + $0x68] sm:$0xf0]  ;;  %v1511_v46 = vpop.permute.xlu2 %1510 }
  0xe1   :  { %v1135_v53 = vld [vmem:[#allocation2 + $0x120] sm:$0xf]  ;;  %846 = vmatmul.bf16.vlgmr.msra.gmra.mxu0 %v1894_v34 }
  0xe2   :  { %908 = vmatpush.bf16.msrb.mxu0 %v1116_v40  ;;  %v1136_v58 = vor.u32 %v1248_v50, %v1135_v53  ;;  %470 = vst [vmem:[#allocation2 + $0x188] sm:$0xff] %v464_v51  ;;  %v1234_v60 = vld [vmem:[#allocation2 + $0xb4] sm:$0xf0]  ;;  %v1081_v20 = vld [vmem:[#allocation2 + $0xb8] sm:$0xf0] }
  0xe3   :  { %v1476_v59 = vpop.permute.xlu1 %1475  ;;  %469 = vst [vmem:[#allocation2 + $0x180] sm:$0xff] %v463_v52  ;;  %v1079_v61 = vld [vmem:[#allocation2 + $0xb0] sm:$0xf]  ;;  %v1233_v30 = vld [vmem:[#allocation2 + $0xb4] sm:$0xf] }
  0xe4   :  { %v1478_v45 = vunpack.i.h.bf16 %v1476_v59  ;;  %v1477_v43 = vunpack.i.l.bf16 %v1476_v59  ;;  %871 = vmatpush.bf16.msra.mxu2 %v1136_v58  ;;  %v1471_v2 = vpop.permute.xlu0 %1470  ;;  %v1080_v3 = vor.u32 %v1234_v60, %v1079_v61  ;;  %v1084_v40 = vor.u32 %v1233_v30, %v1081_v20  ;;  %v1221_v53 = vld [vmem:[#allocation2 + $0x54] sm:$0xf]  ;;  %v1033_v58 = vld [vmem:[#allocation2 + $0x58] sm:$0xf0]  ;;  %v533_v59 = vld [vmem:[%s1960_s2] sm:$0xff] }
  0xe5   :  { %v1473_v12 = vunpack.i.h.bf16 %v1471_v2  ;;  %v1472_v56 = vunpack.i.l.bf16 %v1471_v2  ;;  %v1513_v60 = vunpack.i.h.bf16 %v1511_v46  ;;  %v1524_v61 = vmov 0  }
  0xe6   :  { %909 = vmatpush.bf16.msrb.mxu0 %v1108_v41  ;;  %v309_v9 = vsel %vm303_vm2, %v1478_v45, %v1483_v49  ;;  %v315_v10 = vsel %vm303_vm2, %v1483_v49, %v1478_v45  ;;  %v308_v11 = vsel %vm303_vm2, %v1477_v43, %v1482_v23  ;;  %v314_v13 = vsel %vm303_vm2, %v1482_v23, %v1477_v43  ;;  %v1223_v41 = vld [vmem:[#allocation2 + $0x64] sm:$0xf] }
  0xe7   :  { %v321_v14 = vpack.c.bf16 %v315_v10, %v309_v9  ;;  %v320_v57 = vpack.c.bf16 %v314_v13, %v308_v11  ;;  %856 = vmatpush.bf16.msra.mxu1 %v1080_v3  ;;  %v252_v17 = vsel %vm248_vm7, %v1468_v0, %v1473_v12  ;;  %v258_v62 = vsel %vm248_vm7, %v1473_v12, %v1468_v0 }
  0xe8   :  { %v251_v18 = vsel %vm248_vm7, %v1467_v1, %v1472_v56  ;;  %v257_v19 = vsel %vm248_vm7, %v1472_v56, %v1467_v1  ;;  %v264_v24 = vpack.c.bf16 %v252_v17, %v258_v62  ;;  %v1044_v49 = vor.u32 %v1223_v41, %v1041_v42  ;;  %1514 = vset.pattern.permute.xlu0 %v1524_v61  ;;  %v1177_v41 = vld [vmem:[#allocation2 + $0x178] sm:$0xf0]  ;;  %v1207_v42 = vld [vmem:[%s1959_s1 + $0x4] sm:$0xf] }
  0xe9   :  { %327 = vst [vmem:[#allocation2 + $0x118] sm:$0xff] %v321_v14  ;;  %v263_v25 = vpack.c.bf16 %v251_v18, %v257_v19  ;;  %v1260_v26 = vld [vmem:[#allocation2 + $0x184] sm:$0xf0]  ;;  %v1512_v45 = vunpack.i.l.bf16 %v1511_v46  ;;  %1515 = vset.pattern.permute.xlu1 %v1524_v61  ;;  %537 = vperm.xlu0 %1514, %v533_v59   ;;  %v1036_v9 = vor.u32 %v1221_v53, %v1033_v58  ;;  %v1498_v10 = vunpack.i.h.bf16 %v1864_v8  ;;  %v1025_v19 = vld [vmem:[#allocation2 + $0x48] sm:$0xf0] }
  0xea   :  { %910 = vmatpush.bf16.msrb.mxu0 %v1100_v63  ;;  %326 = vst [vmem:[#allocation2 + $0x110] sm:$0xff] %v320_v57  ;;  %v1183_v29 = vld [vmem:[#allocation2 + $0x180] sm:$0xf]  ;;  %v1497_v11 = vunpack.i.l.bf16 %v1864_v8  ;;  %v1219_v8 = vld [vmem:[#allocation2 + $0x44] sm:$0xf]  ;;  %542 = vperm.xlu1 %1515, %v534_v31  }
  0xeb   :  { %v1491_v28 = vpop.permute.xlu1 %1490  ;;  %270 = vst [vmem:[#allocation2 + $0xa8] sm:$0xff] %v264_v24  ;;  %v1184_v33 = vor.u32 %v1260_v26, %v1183_v29  ;;  %v1201_v58 = vld [vmem:[#allocation2 + $0x1a8] sm:$0xf0] }
  0xec   :  { %v1493_v5 = vunpack.i.h.bf16 %v1491_v28  ;;  %v1492_v32 = vunpack.i.l.bf16 %v1491_v28  ;;  %269 = vst [vmem:[#allocation2 + $0xa0] sm:$0xff] %v263_v25  ;;  %v1486_v35 = vpop.permute.xlu0 %1485  ;;  %v1217_v25 = vld [vmem:[#allocation2 + $0x34] sm:$0xf]  ;;  %v1028_v28 = vor.u32 %v1219_v8, %v1025_v19 }
  0xed   :  { %v1488_v38 = vunpack.i.h.bf16 %v1486_v35  ;;  %v1487_v39 = vunpack.i.l.bf16 %v1486_v35  ;;  %887 = vmatpush.bf16.msra.mxu3 %v1184_v33  ;;  %v1017_v33 = vld [vmem:[#allocation2 + $0x38] sm:$0xf0] }
  0xee   :  { %911 = vmatpush.bf16.msrb.mxu0 %v1092_v44 }
  0xef   :  { %v250_v47 = vsel %vm248_vm7, %v1488_v38, %v1493_v5  ;;  %v256_v48 = vsel %vm248_vm7, %v1493_v5, %v1488_v38  ;;  %v249_v50 = vsel %vm248_vm7, %v1487_v39, %v1492_v32  ;;  %v255_v51 = vsel %vm248_vm7, %v1492_v32, %v1487_v39  ;;  %v1215_v38 = vld [vmem:[#allocation2 + $0x24] sm:$0xf]  ;;  %v1009_v39 = vld [vmem:[#allocation2 + $0x28] sm:$0xf0] }
  0xf0   :  { %v1246_v52 = vld [vmem:[#allocation2 + $0x114] sm:$0xf0]  ;;  %v262_v54 = vpack.c.bf16 %v250_v47, %v256_v48  ;;  %v261_v55 = vpack.c.bf16 %v249_v50, %v255_v51  ;;  %1205 = vmatmul.msk.bf16.vlgmr.msra.gmra.mxu3 %vm834_vm8, %v1896_v37  ;;  %v977_v48 = vld [vmem:[%s1959_s1 + $0x10] sm:$0xf0]  ;;  %v1012_v53 = vor.u32 %v1215_v38, %v1009_v39 }
  0xf1   :  { %894 = vmatpush.bf16.msrb.mxu3 %v1052_v36  ;;  %v1127_v23 = vld [vmem:[#allocation2 + $0x110] sm:$0xf]  ;;  %v1020_v36 = vor.u32 %v1217_v25, %v1017_v33  ;;  %v980_v61 = vor.u32 %v1207_v42, %v977_v48  ;;  %v1137_v25 = vld [vmem:[#allocation2 + $0x128] sm:$0xf0] }
  0xf2   :  { %912 = vmatpush.bf16.msrb.mxu0 %v1084_v40  ;;  %v1128_v43 = vor.u32 %v1246_v52, %v1127_v23  ;;  %268 = vst [vmem:[#allocation2 + $0x98] sm:$0xff] %v262_v54  ;;  %v1232_v0 = vld [vmem:[#allocation2 + $0xa4] sm:$0xf0]  ;;  %v1073_v1 = vld [vmem:[#allocation2 + $0xa8] sm:$0xf0] }
  0xf3   :  { %v1506_v63 = vpop.permute.xlu1 %1505  ;;  %267 = vst [vmem:[#allocation2 + $0x90] sm:$0xff] %v261_v55  ;;  %v1071_v4 = vld [vmem:[#allocation2 + $0xa0] sm:$0xf]  ;;  %v1231_v7 = vld [vmem:[#allocation2 + $0xa4] sm:$0xf] }
  0xf4   :  { %v1508_v2 = vunpack.i.h.bf16 %v1506_v63  ;;  %v1507_v3 = vunpack.i.l.bf16 %v1506_v63  ;;  %872 = vmatpush.bf16.msra.mxu2 %v1128_v43  ;;  %v1501_v13 = vpop.permute.xlu0 %1500  ;;  %v1072_v14 = vor.u32 %v1232_v0, %v1071_v4  ;;  %v1076_v57 = vor.u32 %v1231_v7, %v1073_v1  ;;  %v1257_v40 = vld [vmem:[#allocation2 + $0x174] sm:$0xf]  ;;  %v1001_v52 = vld [vmem:[#allocation2 + $0x18] sm:$0xf0]  ;;  %v1263_v23 = vld [vmem:[#allocation2 + $0x1a4] sm:$0xf] }
  0xf5   :  { %895 = vmatpush.bf16.msrb.mxu3 %v1044_v49  ;;  %v1503_v62 = vunpack.i.h.bf16 %v1501_v13  ;;  %v1502_v18 = vunpack.i.l.bf16 %v1501_v13  ;;  %v1213_v49 = vld [vmem:[#allocation2 + $0x14] sm:$0xf]  ;;  %v1210_v43 = vld [vmem:[%s1959_s1 + $0x14] sm:$0xf0]  ;;  %v1255_v0 = vld [vmem:[#allocation2 + $0x164] sm:$0xf]  ;;  %v1204_v4 = vor.u32 %v1263_v23, %v1201_v58 }
  0xf6   :  { %v205_v12 = vsel %vm199_vm3, %v1508_v2, %v1513_v60  ;;  %v211_v56 = vsel %vm199_vm3, %v1513_v60, %v1508_v2  ;;  %v204_v44 = vsel %vm199_vm3, %v1507_v3, %v1512_v45  ;;  %v210_v15 = vsel %vm199_vm3, %v1512_v45, %v1507_v3  ;;  %857 = vmatpush.bf16.msra.mxu1 %v1072_v14  ;;  %v983_v45 = vld [vmem:[%s1959_s1 + $0x8] sm:$0xf]  ;;  %v1169_v1 = vld [vmem:[#allocation2 + $0x168] sm:$0xf0]  ;;  %v1261_v13 = vld [vmem:[#allocation2 + $0x194] sm:$0xf] }
  0xf7   :  { %v217_v16 = vpack.c.bf16 %v205_v12, %v211_v56  ;;  %v216_v17 = vpack.c.bf16 %v204_v44, %v210_v15  ;;  %913 = vmatpush.bf16.msrb.mxu0 %v1076_v57  ;;  %v307_v20 = vsel %vm303_vm2, %v1498_v10, %v1503_v62  ;;  %v313_v21 = vsel %vm303_vm2, %v1503_v62, %v1498_v10  ;;  %v993_v10 = vld [vmem:[#allocation2 + $0x8] sm:$0xf0]  ;;  %v1193_v14 = vld [vmem:[#allocation2 + $0x198] sm:$0xf0]  ;;  %v1253_v57 = vld [vmem:[#allocation2 + $0x154] sm:$0xf] }
  0xf8   :  { %v306_v22 = vsel %vm303_vm2, %v1497_v11, %v1502_v18  ;;  %v312_v24 = vsel %vm303_vm2, %v1502_v18, %v1497_v11  ;;  %v319_v26 = vpack.c.bf16 %v313_v21, %v307_v20  ;;  %v1180_v60 = vor.u32 %v1257_v40, %v1177_v41  ;;  %v1161_v12 = vld [vmem:[#allocation2 + $0x158] sm:$0xf0]  ;;  %v1251_v62 = vld [vmem:[#allocation2 + $0x144] sm:$0xf]  ;;  %v1153_v18 = vld [vmem:[#allocation2 + $0x148] sm:$0xf0] }
  0xf9   :  { %896 = vmatpush.bf16.msrb.mxu3 %v1036_v9  ;;  %223 = vst [vmem:[#allocation2 + $0x88] sm:$0xff] %v217_v16  ;;  %v318_v27 = vpack.c.bf16 %v312_v24, %v306_v22  ;;  %v1230_v29 = vld [vmem:[#allocation2 + $0x94] sm:$0xf0]  ;;  %v1065_v30 = vld [vmem:[#allocation2 + $0x98] sm:$0xf0]  ;;  %v1004_v3 = vor.u32 %v1213_v49, %v1001_v52  ;;  %v984_v7 = vor.u32 %v1210_v43, %v983_v45 }
  0xfa   :  { %222 = vst [vmem:[#allocation2 + $0x80] sm:$0xff] %v216_v17  ;;  %v1063_v5 = vld [vmem:[#allocation2 + $0x90] sm:$0xf]  ;;  %v1229_v32 = vld [vmem:[#allocation2 + $0x94] sm:$0xf]  ;;  %v1172_v11 = vor.u32 %v1255_v0, %v1169_v1  ;;  %v1196_v44 = vor.u32 %v1261_v13, %v1193_v14  ;;  %v1164_v15 = vor.u32 %v1253_v57, %v1161_v12  ;;  %v1156_v19 = vor.u32 %v1251_v62, %v1153_v18 }
  0xfb   :  { %325 = vst [vmem:[#allocation2 + $0x108] sm:$0xff] %v319_v26  ;;  %v1064_v35 = vor.u32 %v1230_v29, %v1063_v5  ;;  %v1068_v6 = vor.u32 %v1229_v32, %v1065_v30  ;;  %v1211_v9 = vld [vmem:[#allocation2 + $0x4] sm:$0xf]  ;;  %v1185_v17 = vld [vmem:[#allocation2 + $0x188] sm:$0xf0] }
  0xfc   :  { %324 = vst [vmem:[#allocation2 + $0x100] sm:$0xff] %v318_v27  ;;  %v996_v56 = vor.u32 %v1211_v9, %v993_v10  ;;  %v1259_v16 = vld [vmem:[#allocation2 + $0x184] sm:$0xf]  ;;  %v1249_v20 = vld [vmem:[#allocation2 + $0x134] sm:$0xf] }
  0xfd   :  { %897 = vmatpush.bf16.msrb.mxu3 %v1028_v28  ;;  %858 = vmatpush.bf16.msra.mxu1 %v1064_v35  ;;  %v1188_v8 = vor.u32 %v1259_v16, %v1185_v17  ;;  %v1145_v21 = vld [vmem:[#allocation2 + $0x138] sm:$0xf0]  ;;  %v1247_v24 = vld [vmem:[#allocation2 + $0x124] sm:$0xf]  ;;  %v1245_v27 = vld [vmem:[#allocation2 + $0x114] sm:$0xf] }
  0xfe   :  { %914 = vmatpush.bf16.msrb.mxu0 %v1068_v6  ;;  %v1148_v22 = vor.u32 %v1249_v20, %v1145_v21  ;;  %v1140_v26 = vor.u32 %v1247_v24, %v1137_v25  ;;  %v1129_v28 = vld [vmem:[#allocation2 + $0x118] sm:$0xf0] }
  0xff   :  { %v1132_v29 = vor.u32 %v1245_v27, %v1129_v28 }
 0x100   :  { %v1228_v46 = vld [vmem:[#allocation2 + $0x84] sm:$0xf0]  ;;  %v1057_v47 = vld [vmem:[#allocation2 + $0x88] sm:$0xf0] }
 0x101   :  { %898 = vmatpush.bf16.msrb.mxu3 %v1020_v36  ;;  %v1055_v50 = vld [vmem:[#allocation2 + $0x80] sm:$0xf]  ;;  %v1227_v51 = vld [vmem:[#allocation2 + $0x84] sm:$0xf] }
 0x102   :  { %v1056_v54 = vor.u32 %v1228_v46, %v1055_v50  ;;  %v1060_v55 = vor.u32 %v1227_v51, %v1057_v47  ;;  %v1244_v59 = vld [vmem:[#allocation2 + $0x104] sm:$0xf0]  ;;  %v1121_v31 = vld [vmem:[#allocation2 + $0x108] sm:$0xf0] }
 0x103   :  { %v1119_v63 = vld [vmem:[#allocation2 + $0x100] sm:$0xf]  ;;  %v1243_v30 = vld [vmem:[#allocation2 + $0x104] sm:$0xf] }
 0x104   :  { %859 = vmatpush.bf16.msra.mxu1 %v1056_v54  ;;  %v1120_v2 = vor.u32 %v1244_v59, %v1119_v63  ;;  %915 = vmatpush.bf16.msrb.mxu0 %v1060_v55 }
 0x105   :  { %899 = vmatpush.bf16.msrb.mxu3 %v1012_v53  ;;  %v972_v53 = vld [vmem:[%s1958_s3 + $0x2] ss:$4 sm:$0x3] }
 0x106   :  { %873 = vmatpush.bf16.msra.mxu2 %v1120_v2  ;;  %v956_v45 = vperm.slane %v972_v53, 1 }
 0x107   :  { %860 = vmatmul.bf16.vlgmr.msra.gmra.mxu1 %v980_v61  ;;  %916 = vmatmul.bf16.vlgmr.msrb.gmra.mxu0 %v980_v61 }
 0x108   :  { %922 = vmatpush.bf16.msrb.mxu1 %v1180_v60  ;;  %v955_v60 = vperm.slane %v972_v53, 0 }
 0x109   :  { %900 = vmatpush.bf16.msrb.mxu3 %v1004_v3  ;;  %874 = vmatmul.bf16.vlgmr.msra.gmra.mxu2 %v984_v7 }
 0x10a   :  { %941 = vmatpush.bf16.msrb.mxu2 %v1204_v4 }
 0x10c   :  { %923 = vmatpush.bf16.msrb.mxu1 %v1172_v11 }
 0x10d   :  { %901 = vmatpush.bf16.msrb.mxu3 %v996_v56 }
 0x10e   :  { %942 = vmatpush.bf16.msrb.mxu2 %v1196_v44 }
 0x110   :  { %924 = vmatpush.bf16.msrb.mxu1 %v1164_v15  ;;  %902 = vmatmul.bf16.vlgmr.msrb.gmra.mxu3 %v1894_v34  ;;  %v1124_v34 = vor.u32 %v1243_v30, %v1121_v31 }
 0x112   :  { %943 = vmatpush.bf16.msrb.mxu2 %v1188_v8 }
 0x114   :  { %925 = vmatpush.bf16.msrb.mxu1 %v1156_v19 }
 0x118   :  { %926 = vmatpush.bf16.msrb.mxu1 %v1148_v22 }
 0x119   :  { %1206 = vmatmul.msk.bf16.vlgmr.msrb.gmra.mxu2 %vm834_vm8, %v1896_v37 }
 0x11c   :  { %927 = vmatpush.bf16.msrb.mxu1 %v1140_v26 }
 0x120   :  { %928 = vmatpush.bf16.msrb.mxu1 %v1132_v29 }
 0x124   :  { %929 = vmatpush.bf16.msrb.mxu1 %v1124_v34 }
 0x127   :  { %930 = vmatmul.bf16.vlgmr.msrb.gmra.mxu1 %v984_v7 }
 0x15b   :  { %v538_v36 = vpop.permute.xlu0 %537 }
 0x15c   :  { %v543_v46 = vpop.permute.xlu1 %542 }
 0x15e   :  { %v847_v32 = vpop.f32.mrf.mxu0 }
 0x15f   :  { %v848_v39 = vadd.f32 %v847_v32, %v538_v36 }
 0x166   :  { %v849_v38 = vpop.f32.mrf.mxu0 }
 0x167   :  { %v850_v51 = vadd.f32 %v849_v38, %v543_v46 }
 0x173   :  { %v889_v5 = vpop.f32.mrf.mxu3 }
 0x17b   :  { %v891_v33 = vpop.f32.mrf.mxu3 }
 0x184   :  { %v861_v6 = vpop.f32.mrf.mxu1  ;;  %v917_v48 = vpop.f32.mrf.mxu0 }
 0x185   :  { %v862_v42 = vadd.f32 %v861_v6, %v848_v39 }
 0x18c   :  { %v875_v35 = vpop.f32.mrf.mxu2  ;;  %v863_v37 = vpop.f32.mrf.mxu1 }
 0x18d   :  { %v876_v50 = vadd.f32 %v875_v35, %v862_v42  ;;  %v864_v55 = vadd.f32 %v863_v37, %v850_v51  ;;  %v919_v1 = vpop.f32.mrf.mxu0 }
 0x18f   :  { %v890_v54 = vadd.f32 %v889_v5, %v876_v50 }
 0x191   :  { %v950_v43 = vmax.f32 %v890_v54, 0.0 }
 0x193   :  { %v903_v40 = vpop.f32.mrf.mxu3  ;;  %v959_v3 = vmul.f32 %v955_v60, %v950_v43 }
 0x194   :  { %v877_v41 = vpop.f32.mrf.mxu2  ;;  %v904_v47 = vadd.f32 %v903_v40, %v538_v36 }
 0x195   :  { %v878_v61 = vadd.f32 %v877_v41, %v864_v55 }
 0x196   :  { %v918_v52 = vadd.f32 %v917_v48, %v904_v47 }
 0x197   :  { %v892_v4 = vadd.f32 %v891_v33, %v878_v61 }
 0x199   :  { %v952_v57 = vmax.f32 %v892_v4, 0.0 }
 0x19b   :  { %v905_v49 = vpop.f32.mrf.mxu3  ;;  %v961_v44 = vmul.f32 %v955_v60, %v952_v57 }
 0x19c   :  { %v945_v23 = vpop.f32.mrf.mxu2  ;;  %v906_v63 = vadd.f32 %v905_v49, %v543_v46 }
 0x19e   :  { %v920_v7 = vadd.f32 %v919_v1, %v906_v63 }
 0x1a4   :  { %v931_v58 = vpop.f32.mrf.mxu1  ;;  %v947_v14 = vpop.f32.mrf.mxu2 }
 0x1a5   :  { %v932_v59 = vadd.f32 %v931_v58, %v918_v52 }
 0x1a7   :  { %v946_v0 = vadd.f32 %v945_v23, %v932_v59 }
 0x1a9   :  { %v951_v2 = vmax.f32 %v946_v0, 0.0 }
 0x1ab   :  { %v960_v9 = vmul.f32 %v956_v45, %v951_v2 }
 0x1ac   :  { %v933_v10 = vpop.f32.mrf.mxu1 }
 0x1ad   :  { %v963_v11 = vpack.c.bf16 %v960_v9, %v959_v3  ;;  %v934_v13 = vadd.f32 %v933_v10, %v920_v7 }
 0x1af   :  { %965 = vst [vmem:[%s1961_s4] sm:$0xff] %v963_v11  ;;  %v948_v12 = vadd.f32 %v947_v14, %v934_v13 }
 0x1b1   :  { %v953_v56 = vmax.f32 %v948_v12, 0.0 }
 0x1b3   :  { %v962_v15 = vmul.f32 %v956_v45, %v953_v56 }
 0x1b5   :  { %v964_v16 = vpack.c.bf16 %v962_v15, %v961_v44 }
 0x1b7   :  { %966 = vst [vmem:[%s1961_s4 + $0x8] sm:$0xff] %v964_v16 }

// kernel: _lambda_.11
= control target key start
LH: loop header
LB: loop body
LE: loop exit
PB: predicated region body
PF: predicated region fallthrough
CT: control target
= control target key end

     0   :  { %s1400_s18 = smov 0   ;;  %s1402_s19 = smov 0   ;;  %s1615_s0 = inlined_call_operand.vmem [shape: bf16[16,768], index: 0, kind: input, shape index: {}]   ;;  %s1616_s1 = inlined_call_operand.vmem [shape: bf16[8,144], index: 1, kind: input, shape index: {}]   ;;  %s1617_s2 = inlined_call_operand.vmem [shape: f32[3,384], index: 2, kind: input, shape index: {}]   ;;  %s1618_s3 = inlined_call_operand.vmem [shape: f32[2,384], index: 3, kind: input, shape index: {}]   ;;  %s1619_s4 = inlined_call_operand.vmem [shape: f32[2,8,384], index: 4, kind: output, shape index: {0}]   ;;  %s1620_s5 = inlined_call_operand.vmem [shape: f32[2,8,2], index: 5, kind: output, shape index: {1}]  }
   0x1   :  { %s1404_s20 = smov 0  }
   0x2 LB: > { %s1013_s21 = sadd.s32 4294967295, %s1360_s20   ;;  %s1417_s22 = sadd.s32 1, %s1360_s20   ;;  %s1360_s20 = sphi %s1404_s20, %s1625_s20   ;;  %s1356_s19 = sphi %s1402_s19, %s1624_s19   ;;  %s1352_s18 = sphi %s1400_s18, %s1623_s18  }
   0x3   : > { %s20_s23 = ssub.s32 %s1360_s20, %s1417_s22  ;;  %s23_s24 = sadd.s32 1, %s1356_s19 }
   0x4   : > { %p21_p0 = scmp.eq.s32.totalorder %s20_s23, 0  ;;  %p30_p1 = scmp.ne.s32.totalorder %s1356_s19, %s1352_s18 }
   0x5   : > { %p31_p2 = scmp.eq.s32.totalorder %s1360_s20, 0  ;;  %p1016_p4 = scmp.ge.s32.totalorder %s1360_s20, 2 }
   0x6   : > { %s1426_s25 = scalar_select %p21_p0, %s1356_s19, %s23_s24  }
   0x7   : > { %p32_p3 = por %p31_p2, %p30_p1  ;;  %180 = sbr.rel (%p1016_p4) target bundleno = 21 (0x15), region = 28 }
   0xc   : > { %183 = sbr.rel (!%p32_p3) target bundleno = 21 (0x15), region = 32  ;;  %s185_s26 = sand.u32 (%p32_p3), 1, %s1356_s19  }
   0xd   : > { %s1141_s27 = smul.u32 (%p32_p3), 12, %s1360_s20 }
   0xe   : > { %s1169_s28 = smul.u32 (%p32_p3), 24, %s185_s26 }
   0xf   : > { %s190_s6 = scalar_lea.vmem (%p32_p3), %s1615_s0, %s1141_s27 }
  0x10   : > { %v205_v0 = vld [vmem:[%s190_s6] sm:$0xff] (%p32_p3)  ;;  %v207_v1 = vld [vmem:[%s190_s6 + $0x18] sm:$0xff] (%p32_p3)  ;;  %v1018_v2 = vld [vmem:[%s190_s6 + $0x8] sm:$0xf] (%p32_p3)  ;;  %s187_s7 = scalar_lea.vmem (%p32_p3), [#allocation3], %s1169_s28 }
  0x11   : > { %206 = vst [vmem:[%s187_s7] sm:$0xff] %v205_v0  ;;  %v1020_v3 = vld [vmem:[%s190_s6 + $0x20] sm:$0xf] }
  0x12   : > { %208 = vst [vmem:[%s187_s7 + $0xc] sm:$0xff] %v207_v1 }
  0x13   : > { %1019 = vst [vmem:[%s187_s7 + $0x8] sm:$0xf] %v1018_v2 }
  0x14   : > { %1021 = vst [vmem:[%s187_s7 + $0x14] sm:$0xf] %v1020_v3 }
  0x15 PF: > { %p1022_p5 = scmp.ge.s32.totalorder %s1360_s20, 1  ;;  %p225_p6 = scmp.lt.s32.totalorder %s1360_s20, 3 }
  0x17   : > { %p226_p7 = pnand %p1022_p5, %p225_p6 }
  0x18   : > { %s232_s8 = sand.u32 (!%p226_p7), 1, %s1352_s18   ;;  %s1362_s13 = smov (!%p226_p7), 112  }
  0x19   : > { %229 = sbr.rel (%p226_p7) target bundleno = 650 (0x28a), region = 58  ;;  %s1363_s16 = smov (!%p226_p7), 113  }
  0x1a   : > { %s1170_s9 = smul.u32 (!%p226_p7), 24, %s232_s8  ;;  %s1364_s17 = smov (!%p226_p7), 127  }
  0x1b   : > { %s1365_s18 = smov (!%p226_p7), 111   ;;  %s1366_s23 = smov (!%p226_p7), 1  }
  0x1c   : > { %s234_s12 = scalar_lea.vmem (!%p226_p7), [#allocation3], %s1170_s9  ;;  %s1367_s24 = smov (!%p226_p7), 15  }
  0x1d   : > { %s1368_s26 = smov (!%p226_p7), 16   ;;  %s1369_s27 = smov (!%p226_p7), 17  }
  0x1e   : > { %v284_v4 = vld [vmem:[%s1617_s2] ss:$4 sm:$0x7]  ;;  %v274_v8 = vld [vmem:[%s234_s12] sm:$0xff]  ;;  %v327_v44 = vlaneseq  ;;  %vm724_vm6 = vcmask 130048   ;;  %p264_p8 = scmp.lt.s32.totalorder %s1013_s21, 1 }
  0x1f   : > { %v291_v5 = vperm.slane %v284_v4, 1  ;;  %v275_v6 = vld [vmem:[%s234_s12 + $0x8] sm:$0xf]  ;;  %v277_v7 = vld [vmem:[%s234_s12 + $0x14] sm:$0xf]  ;;  %v290_v9 = vperm.slane %v284_v4, 0  ;;  %v278_v13 = vunpack.c.l.bf16 %v274_v8  ;;  %v279_v14 = vunpack.c.h.bf16 %v274_v8 }
  0x20   : > { %v280_v10 = vunpack.c.l.bf16 %v275_v6  ;;  %v283_v11 = vunpack.c.l.bf16 %v277_v7  ;;  %426 = vst [vmem:[#allocation2 + $0x68] sm:$0xf] %v275_v6  ;;  %v276_v12 = vld [vmem:[%s234_s12 + $0xc] sm:$0xff]  ;;  %v292_v21 = vperm.slane %v284_v4, 2  ;;  %v1443_v46 = vand.u32 127, %v327_v44  ;;  %s1627_s21 = smov (!%p264_p8, %s1013_s21), 1 }
  0x21   : > { %428 = vst [vmem:[#allocation2 + $0x74] sm:$0xf] %v277_v7  ;;  %v281_v15 = vunpack.c.l.bf16 %v276_v12  ;;  %v282_v16 = vunpack.c.h.bf16 %v276_v12  ;;  %v297_v18 = vmul.f32 %v291_v5, %v279_v14  ;;  %v296_v22 = vmul.f32 %v290_v9, %v278_v13  ;;  %v1025_v25 = vld [vmem:[%s1617_s2 + $0x1] ss:$4 sm:$0x7]  ;;  %s1171_s11 = smul.u32 24, %s1627_s21 }
  0x22   : > { %v1214_v17 = vpack.i.bf16 %v283_v11, %v280_v10  ;;  %425 = vst [vmem:[#allocation2 + $0x60] sm:$0xff] %v274_v8  ;;  %v298_v26 = vmul.f32 %v292_v21, %v280_v10  ;;  %v301_v27 = vmul.f32 %v292_v21, %v283_v11  ;;  %v304_v29 = vperm.slane %v1025_v25, 1  ;;  %s1024_s14 = sshll.u32 %s1627_s21, 3 }
  0x23   : > { %427 = vst [vmem:[#allocation2 + $0x6c] sm:$0xff] %v276_v12  ;;  %v1204_v19 = vpack.i.bf16 %v281_v15, %v278_v13  ;;  %v300_v20 = vmul.f32 %v291_v5, %v282_v16  ;;  %v299_v23 = vmul.f32 %v290_v9, %v281_v15  ;;  %v1209_v30 = vpack.i.bf16 %v282_v16, %v279_v14 }
  0x24   : > { %1215 = vrot.lane.b32.xlu1 %v1214_v17, %s1362_s13  ;;  %v303_v31 = vperm.slane %v1025_v25, 0  ;;  %v1229_v32 = vpack.i.bf16 %v301_v27, %v298_v26  ;;  %v305_v33 = vperm.slane %v1025_v25, 2  ;;  %v310_v34 = vmul.f32 %v304_v29, %v279_v14 }
  0x25   : > { %1205 = vrot.lane.b32.xlu0 %v1204_v19, %s1362_s13  ;;  %v1224_v24 = vpack.i.bf16 %v300_v20, %v297_v18  ;;  %v1219_v28 = vpack.i.bf16 %v299_v23, %v296_v22  ;;  %v313_v35 = vmul.f32 %v304_v29, %v282_v16  ;;  %vm495_vm0 = vcmp.lt.s32.totalorder %v1443_v46, 112 }
  0x26   : > { %v309_v36 = vmul.f32 %v303_v31, %v278_v13  ;;  %v312_v37 = vmul.f32 %v303_v31, %v281_v15  ;;  %v311_v38 = vmul.f32 %v305_v33, %v280_v10  ;;  %v314_v39 = vmul.f32 %v305_v33, %v283_v11 }
  0x27   : > { %1225 = vrot.lane.b32.xlu2 %v1224_v24, %s1363_s16  ;;  %v1239_v40 = vpack.i.bf16 %v313_v35, %v310_v34  ;;  %vm468_vm1 = vcmp.lt.s32.totalorder %v1443_v46, 113  ;;  %vm441_vm2 = vcmp.lt.s32.totalorder %v1443_v46, 127  ;;  %vm522_vm3 = vcmp.lt.s32.totalorder %v1443_v46, 111 }
  0x28   : > { %v1234_v41 = vpack.i.bf16 %v312_v37, %v309_v36  ;;  %v1244_v42 = vpack.i.bf16 %v314_v39, %v311_v38  ;;  %vm410_vm4 = vcmp.lt.s32.totalorder %v1443_v46, 1  ;;  %vm383_vm5 = vcmp.lt.s32.totalorder %v1443_v46, 15 }
  0x29   : > { %vm356_vm7 = vcmp.lt.s32.totalorder %v1443_v46, 16  ;;  %vm329_vm8 = vcmp.lt.s32.totalorder %v1443_v46, 17 }
  0x2c   : > { %1220 = vrot.lane.b32.xlu1 %v1219_v28, %s1363_s16 }
  0x2d   : > { %1210 = vrot.lane.b32.xlu0 %v1209_v30, %s1362_s13  ;;  %s268_s13 = scalar_lea.vmem %s1619_s4, %s1171_s11 }
  0x2f   : > { %1230 = vrot.lane.b32.xlu2 %v1229_v32, %s1363_s16 }
  0x34   : > { %1240 = vrot.lane.b32.xlu1 %v1239_v40, %s1364_s17 }
  0x35   : > { %1235 = vrot.lane.b32.xlu0 %v1234_v41, %s1364_s17 }
  0x37   : > { %1245 = vrot.lane.b32.xlu2 %v1244_v42, %s1364_s17  ;;  %s272_s17 = scalar_lea.vmem %s1620_s5, %s1024_s14 }
  0x3c   : > { %1255 = vrot.lane.b32.xlu1 %v1239_v40, %s1365_s18 }
  0x3d   : > { %1250 = vrot.lane.b32.xlu0 %v1234_v41, %s1365_s18 }
  0x3f   : > { %1260 = vrot.lane.b32.xlu2 %v1244_v42, %s1365_s18 }
  0x44   : > { %1270 = vrot.lane.b32.xlu1 %v1224_v24, %s1366_s23 }
  0x45   : > { %1265 = vrot.lane.b32.xlu0 %v1219_v28, %s1366_s23 }
  0x47   : > { %1275 = vrot.lane.b32.xlu2 %v1229_v32, %s1366_s23 }
  0x4c   : > { %1285 = vrot.lane.b32.xlu1 %v1239_v40, %s1367_s24 }
  0x4d   : > { %1280 = vrot.lane.b32.xlu0 %v1234_v41, %s1367_s24 }
  0x4f   : > { %1290 = vrot.lane.b32.xlu2 %v1244_v42, %s1367_s24 }
  0x54   : > { %1300 = vrot.lane.b32.xlu1 %v1209_v30, %s1368_s26 }
  0x55   : > { %1295 = vrot.lane.b32.xlu0 %v1204_v19, %s1368_s26 }
  0x57   : > { %1305 = vrot.lane.b32.xlu2 %v1214_v17, %s1368_s26 }
  0x5c   : > { %1315 = vrot.lane.b32.xlu1 %v1224_v24, %s1369_s27 }
  0x5d   : > { %1310 = vrot.lane.b32.xlu0 %v1219_v28, %s1369_s27 }
  0x5f   : > { %1320 = vrot.lane.b32.xlu2 %v1229_v32, %s1369_s27 }
  0x81   : > { %v1226_v43 = vpop.permute.xlu2 %1225 }
  0x82   : > { %v1228_v58 = vunpack.i.h.bf16 %v1226_v43  ;;  %v1227_v61 = vunpack.i.l.bf16 %v1226_v43 }
  0x89   : > { %v1231_v45 = vpop.permute.xlu2 %1230 }
  0x8a   : > { %v1233_v59 = vunpack.i.h.bf16 %v1231_v45  ;;  %v1232_v1 = vunpack.i.l.bf16 %v1231_v45 }
  0x8c   : > { %v470_v4 = vsel %vm468_vm1, %v1228_v58, %v1233_v59  ;;  %v469_v17 = vsel %vm468_vm1, %v1227_v61, %v1232_v1 }
  0x91   : > { %v1246_v53 = vpop.permute.xlu2 %1245 }
  0x92   : > { %v1248_v20 = vunpack.i.h.bf16 %v1246_v53  ;;  %v1247_v21 = vunpack.i.l.bf16 %v1246_v53 }
  0x96   : > { %v1216_v47 = vpop.permute.xlu1 %1215 }
  0x97   : > { %v1218_v48 = vunpack.i.h.bf16 %v1216_v47  ;;  %v1217_v49 = vunpack.i.l.bf16 %v1216_v47  ;;  %v1206_v50 = vpop.permute.xlu0 %1205 }
  0x98   : > { %v1208_v51 = vunpack.i.h.bf16 %v1206_v50  ;;  %v1207_v52 = vunpack.i.l.bf16 %v1206_v50 }
  0x99   : > { %v1467_v12 = vpop.permute.xlu2 %1260 }
  0x9a   : > { %v501_v54 = vsel %vm495_vm0, %v1218_v48, %v1208_v51  ;;  %v500_v55 = vsel %vm495_vm0, %v1217_v49, %v1207_v52  ;;  %v1263_v42 = vunpack.i.h.bf16 %v1467_v12  ;;  %v1262_v43 = vunpack.i.l.bf16 %v1467_v12 }
  0x9b   : > { %v505_v56 = vpack.c.bf16 %v501_v54, %v501_v54  ;;  %v503_v57 = vpack.c.bf16 %v500_v55, %v500_v55 }
  0x9d   : > { %509 = vst [vmem:[#allocation2 + $0xbc] sm:$0xf] %v505_v56 }
  0x9e   : > { %507 = vst [vmem:[#allocation2 + $0xb0] sm:$0xf] %v503_v57  ;;  %v1221_v60 = vpop.permute.xlu1 %1220 }
  0x9f   : > { %v1211_v62 = vpop.permute.xlu0 %1210  ;;  %v1223_v63 = vunpack.i.h.bf16 %v1221_v60  ;;  %v1222_v0 = vunpack.i.l.bf16 %v1221_v60 }
  0xa0   : > { %v1213_v2 = vunpack.i.h.bf16 %v1211_v62  ;;  %v1212_v3 = vunpack.i.l.bf16 %v1211_v62 }
  0xa1   : > { %v472_v5 = vsel %vm468_vm1, %v1223_v63, %v1228_v58  ;;  %v474_v6 = vsel %vm468_vm1, %v1233_v59, %v1223_v63  ;;  %v471_v7 = vsel %vm468_vm1, %v1222_v0, %v1227_v61  ;;  %v473_v16 = vsel %vm468_vm1, %v1232_v1, %v1222_v0  ;;  %v1487_v41 = vpop.permute.xlu2 %1275 }
  0xa2   : > { %v497_v8 = vsel %vm495_vm0, %v1213_v2, %v1218_v48  ;;  %v496_v9 = vsel %vm495_vm0, %v1212_v3, %v1217_v49  ;;  %v498_v10 = vsel %vm495_vm0, %v1207_v52, %v1212_v3  ;;  %v499_v11 = vsel %vm495_vm0, %v1208_v51, %v1213_v2 }
  0xa3   : > { %v502_v13 = vpack.c.bf16 %v496_v9, %v498_v10  ;;  %v504_v14 = vpack.c.bf16 %v497_v8, %v499_v11  ;;  %v477_v15 = vpack.c.bf16 %v470_v4, %v472_v5  ;;  %v478_v18 = vpack.c.bf16 %v474_v6, %v474_v6  ;;  %v1077_v9 = vld [vmem:[#allocation2 + $0x60] sm:$0xf]  ;;  %v1155_v10 = vld [vmem:[#allocation2 + $0x68] sm:$0xf0] }
  0xa4   : > { %v475_v19 = vpack.c.bf16 %v469_v17, %v471_v7  ;;  %v476_v22 = vpack.c.bf16 %v473_v16, %v473_v16  ;;  %v1278_v7 = vunpack.i.h.bf16 %v1487_v41  ;;  %v1277_v8 = vunpack.i.l.bf16 %v1487_v41 }
  0xa5   : > { %506 = vst [vmem:[#allocation2 + $0xa8] sm:$0xff] %v502_v13 }
  0xa6   : > { %508 = vst [vmem:[#allocation2 + $0xb4] sm:$0xff] %v504_v14  ;;  %v1241_v23 = vpop.permute.xlu1 %1240 }
  0xa7   : > { %481 = vst [vmem:[#allocation2 + $0x9c] sm:$0xff] %v477_v15  ;;  %v1236_v24 = vpop.permute.xlu0 %1235  ;;  %v1243_v25 = vunpack.i.h.bf16 %v1241_v23  ;;  %v1242_v26 = vunpack.i.l.bf16 %v1241_v23 }
  0xa8   : > { %482 = vst [vmem:[#allocation2 + $0xa4] sm:$0xf] %v478_v18  ;;  %v1238_v27 = vunpack.i.h.bf16 %v1236_v24  ;;  %v1237_v28 = vunpack.i.l.bf16 %v1236_v24  ;;  %v1154_v24 = vld [vmem:[#allocation2 + $0x64] sm:$0xf] }
  0xa9   : > { %479 = vst [vmem:[#allocation2 + $0x90] sm:$0xff] %v475_v19  ;;  %v443_v29 = vsel %vm441_vm2, %v1243_v25, %v1248_v20  ;;  %v442_v30 = vsel %vm441_vm2, %v1242_v26, %v1247_v21  ;;  %v1506_v14 = vpop.permute.xlu2 %1290 }
  0xaa   : > { %480 = vst [vmem:[#allocation2 + $0x98] sm:$0xf] %v476_v22  ;;  %v447_v31 = vsel %vm441_vm2, %v1248_v20, %v1238_v27  ;;  %v446_v32 = vsel %vm441_vm2, %v1247_v21, %v1237_v28  ;;  %v445_v33 = vsel %vm441_vm2, %v1238_v27, %v1243_v25  ;;  %v444_v34 = vsel %vm441_vm2, %v1237_v28, %v1242_v26  ;;  %v1079_v25 = vld [vmem:[#allocation2 + $0x6c] sm:$0xf0] }
  0xab   : > { %v451_v35 = vpack.c.bf16 %v447_v31, %v447_v31  ;;  %v449_v36 = vpack.c.bf16 %v446_v32, %v446_v32  ;;  %v450_v37 = vpack.c.bf16 %v443_v29, %v445_v33  ;;  %v448_v38 = vpack.c.bf16 %v442_v30, %v444_v34  ;;  %v1521_v33 = vld [vmem:[%s1616_s1] sm:$0xff] }
  0xac   : > { %v1113_v39 = vld [vmem:[#allocation2 + $0xa8] sm:$0xf]  ;;  %v1163_v40 = vld [vmem:[#allocation2 + $0xac] sm:$0xf]  ;;  %v1078_v28 = vor.u32 %v1155_v10, %v1077_v9  ;;  %v1293_v41 = vunpack.i.h.bf16 %v1506_v14 }
  0xad   : > { %455 = vst [vmem:[#allocation2 + $0x8c] sm:$0xf] %v451_v35  ;;  %v1164_v44 = vld [vmem:[#allocation2 + $0xb0] sm:$0xf0]  ;;  %v1115_v45 = vld [vmem:[#allocation2 + $0xb4] sm:$0xf0] }
  0xae   : > { %453 = vst [vmem:[#allocation2 + $0x80] sm:$0xf] %v449_v36  ;;  %v1114_v47 = vor.u32 %v1164_v44, %v1113_v39  ;;  %v1118_v48 = vor.u32 %v1163_v40, %v1115_v45  ;;  %v1256_v49 = vpop.permute.xlu1 %1255  ;;  %v1161_v50 = vld [vmem:[#allocation2 + $0x98] sm:$0xf0]  ;;  %v1103_v51 = vld [vmem:[#allocation2 + $0x9c] sm:$0xf0]  ;;  %v576_v45 = vunpack.c.h.b16 %v1521_v33 }
  0xaf   : > { %454 = vst [vmem:[#allocation2 + $0x84] sm:$0xff] %v450_v37  ;;  %v1251_v52 = vpop.permute.xlu0 %1250  ;;  %v1258_v53 = vunpack.i.h.bf16 %v1256_v49  ;;  %v1257_v54 = vunpack.i.l.bf16 %v1256_v49  ;;  %v1082_v37 = vor.u32 %v1154_v24, %v1079_v25  ;;  %v1165_v39 = vld [vmem:[#allocation2 + $0xb8] sm:$0xf0] }
  0xb0   : > { %452 = vst [vmem:[#allocation2 + $0x78] sm:$0xff] %v448_v38  ;;  %728 = vmatpush.bf16.msra.mxu0 %v1114_v47  ;;  %754 = vmatpush.bf16.msra.mxu2 %v1118_v48  ;;  %v1253_v55 = vunpack.i.h.bf16 %v1251_v52  ;;  %v1252_v56 = vunpack.i.l.bf16 %v1251_v52  ;;  %v1101_v57 = vld [vmem:[#allocation2 + $0x90] sm:$0xf]  ;;  %v1160_v58 = vld [vmem:[#allocation2 + $0x94] sm:$0xf] }
  0xb1   : > { %v524_v59 = vsel %vm522_vm3, %v1258_v53, %v1263_v42  ;;  %v523_v60 = vsel %vm522_vm3, %v1257_v54, %v1262_v43  ;;  %v1102_v61 = vor.u32 %v1161_v50, %v1101_v57  ;;  %v1106_v62 = vor.u32 %v1160_v58, %v1103_v51 }
  0xb2   : > { %v528_v63 = vsel %vm522_vm3, %v1263_v42, %v1253_v55  ;;  %v527_v0 = vsel %vm522_vm3, %v1262_v43, %v1252_v56  ;;  %v526_v1 = vsel %vm522_vm3, %v1253_v55, %v1258_v53  ;;  %v525_v2 = vsel %vm522_vm3, %v1252_v56, %v1257_v54  ;;  %v1121_v43 = vld [vmem:[#allocation2 + $0xb0] sm:$0xf] }
  0xb3   : > { %v532_v3 = vpack.c.bf16 %v528_v63, %v528_v63  ;;  %v530_v4 = vpack.c.bf16 %v527_v0, %v527_v0  ;;  %v531_v5 = vpack.c.bf16 %v524_v59, %v526_v1  ;;  %v529_v6 = vpack.c.bf16 %v523_v60, %v525_v2  ;;  %v1306_v60 = vpop.permute.xlu2 %1305 }
  0xb4   : > { %729 = vmatpush.bf16.msra.mxu0 %v1102_v61  ;;  %755 = vmatpush.bf16.msra.mxu2 %v1106_v62  ;;  %v1292_v42 = vunpack.i.l.bf16 %v1506_v14  ;;  %v1122_v63 = vor.u32 %v1165_v39, %v1121_v43  ;;  %v1533_v0 = vpack.c.b16 %v576_v45, %v576_v45  ;;  %v1308_v14 = vunpack.i.h.bf16 %v1306_v60 }
  0xb5   : > { %536 = vst [vmem:[#allocation2 + $0xd4] sm:$0xf] %v532_v3  ;;  %vm913_vm3 = vcmask 7168  }
  0xb6   : > { %534 = vst [vmem:[#allocation2 + $0xc8] sm:$0xf] %v530_v4  ;;  %v1271_v11 = vpop.permute.xlu1 %1270  ;;  %v1158_v12 = vld [vmem:[#allocation2 + $0x80] sm:$0xf0]  ;;  %v1091_v13 = vld [vmem:[#allocation2 + $0x84] sm:$0xf0] }
  0xb7   : > { %535 = vst [vmem:[#allocation2 + $0xcc] sm:$0xff] %v531_v5  ;;  %v1266_v15 = vpop.permute.xlu0 %1265  ;;  %v1273_v16 = vunpack.i.h.bf16 %v1271_v11  ;;  %v1272_v17 = vunpack.i.l.bf16 %v1271_v11  ;;  %v1089_v18 = vld [vmem:[#allocation2 + $0x78] sm:$0xf]  ;;  %v1157_v19 = vld [vmem:[#allocation2 + $0x7c] sm:$0xf] }
  0xb8   : > { %533 = vst [vmem:[#allocation2 + $0xc0] sm:$0xff] %v529_v6  ;;  %v1268_v20 = vunpack.i.h.bf16 %v1266_v15  ;;  %v1267_v21 = vunpack.i.l.bf16 %v1266_v15  ;;  %v1090_v22 = vor.u32 %v1158_v12, %v1089_v18  ;;  %v1094_v23 = vor.u32 %v1157_v19, %v1091_v13  ;;  %v1109_v5 = vld [vmem:[#allocation2 + $0x98] sm:$0xf]  ;;  %v1162_v6 = vld [vmem:[#allocation2 + $0xa0] sm:$0xf0] }
  0xb9   : > { %v412_v26 = vsel %vm410_vm4, %v1273_v16, %v1278_v7  ;;  %v411_v27 = vsel %vm410_vm4, %v1272_v17, %v1277_v8  ;;  %v1110_v13 = vor.u32 %v1162_v6, %v1109_v5  ;;  %v1307_v15 = vunpack.i.l.bf16 %v1306_v60 }
  0xba   : > { %v416_v29 = vsel %vm410_vm4, %v1278_v7, %v1268_v20  ;;  %v415_v30 = vsel %vm410_vm4, %v1277_v8, %v1267_v21  ;;  %v414_v31 = vsel %vm410_vm4, %v1268_v20, %v1273_v16  ;;  %v420_v32 = vpack.c.bf16 %v412_v26, %v412_v26  ;;  %730 = vmatpush.bf16.msra.mxu0 %v1090_v22  ;;  %v1159_v22 = vld [vmem:[#allocation2 + $0x88] sm:$0xf0] }
  0xbb   : > { %v419_v34 = vpack.c.bf16 %v414_v31, %v416_v29  ;;  %v413_v35 = vsel %vm410_vm4, %v1267_v21, %v1272_v17  ;;  %v418_v36 = vpack.c.bf16 %v411_v27, %v411_v27  ;;  %756 = vmatpush.bf16.msra.mxu2 %v1094_v23  ;;  %v1097_v21 = vld [vmem:[#allocation2 + $0x80] sm:$0xf]  ;;  %v1156_v29 = vld [vmem:[#allocation2 + $0x70] sm:$0xf0]  ;;  %vm915_vm4 = vcmask 15360  }
  0xbc   : > { %424 = vst [vmem:[#allocation2 + $0x5c] sm:$0xf] %v420_v32  ;;  %v417_v38 = vpack.c.bf16 %v413_v35, %v415_v30  ;;  %v1168_v40 = vld [vmem:[#allocation2 + $0xd0] sm:$0xf0]  ;;  %v1098_v32 = vor.u32 %v1159_v22, %v1097_v21 }
  0xbd   : > { %423 = vst [vmem:[#allocation2 + $0x54] sm:$0xff] %v419_v34  ;;  %v1133_v44 = vld [vmem:[#allocation2 + $0xc8] sm:$0xf] }
  0xbe   : > { %421 = vst [vmem:[#allocation2 + $0x48] sm:$0xff] %v417_v38  ;;  %v1286_v47 = vpop.permute.xlu1 %1285  ;;  %v1167_v48 = vld [vmem:[#allocation2 + $0xc8] sm:$0xf0]  ;;  %v1127_v49 = vld [vmem:[#allocation2 + $0xcc] sm:$0xf0]  ;;  %731 = vmatpush.bf16.msra.mxu0 %v1078_v28  ;;  %v1134_v55 = vor.u32 %v1168_v40, %v1133_v44  ;;  %v1321_v38 = vpop.permute.xlu2 %1320 }
  0xbf   : > { %422 = vst [vmem:[#allocation2 + $0x50] sm:$0xf] %v418_v36  ;;  %v1281_v50 = vpop.permute.xlu0 %1280  ;;  %v1288_v51 = vunpack.i.h.bf16 %v1286_v47  ;;  %v1287_v52 = vunpack.i.l.bf16 %v1286_v47  ;;  %v1125_v53 = vld [vmem:[#allocation2 + $0xc0] sm:$0xf]  ;;  %v1166_v54 = vld [vmem:[#allocation2 + $0xc4] sm:$0xf]  ;;  %757 = vmatpush.bf16.msra.mxu2 %v1082_v37  ;;  %v1323_v47 = vunpack.i.h.bf16 %v1321_v38 }
  0xc0   : > { %v1283_v56 = vunpack.i.h.bf16 %v1281_v50  ;;  %v1282_v57 = vunpack.i.l.bf16 %v1281_v50  ;;  %v1126_v58 = vor.u32 %v1167_v48, %v1125_v53  ;;  %v1130_v59 = vor.u32 %v1166_v54, %v1127_v49  ;;  %v1085_v28 = vld [vmem:[#allocation2 + $0x68] sm:$0xf] }
  0xc1   : > { %v385_v61 = vsel %vm383_vm5, %v1288_v51, %v1293_v41  ;;  %v384_v62 = vsel %vm383_vm5, %v1287_v52, %v1292_v42  ;;  %v1322_v48 = vunpack.i.l.bf16 %v1321_v38 }
  0xc2   : > { %v389_v1 = vsel %vm383_vm5, %v1293_v41, %v1283_v56  ;;  %v388_v2 = vsel %vm383_vm5, %v1292_v42, %v1282_v57  ;;  %v387_v3 = vsel %vm383_vm5, %v1283_v56, %v1288_v51  ;;  %v393_v4 = vpack.c.bf16 %v385_v61, %v385_v61  ;;  %748 = vmatpush.bf16.msra.mxu1 %v1126_v58 }
  0xc3   : > { %v392_v7 = vpack.c.bf16 %v387_v3, %v389_v1  ;;  %v386_v8 = vsel %vm383_vm5, %v1282_v57, %v1287_v52  ;;  %v391_v9 = vpack.c.bf16 %v384_v62, %v384_v62  ;;  %774 = vmatpush.bf16.msra.mxu3 %v1130_v59  ;;  %v1086_v42 = vor.u32 %v1156_v29, %v1085_v28 }
  0xc4   : > { %397 = vst [vmem:[#allocation2 + $0x44] sm:$0xf] %v393_v4  ;;  %v390_v10 = vpack.c.bf16 %v386_v8, %v388_v2  ;;  %v1152_v11 = vld [vmem:[#allocation2 + $0x50] sm:$0xf0]  ;;  %v1067_v12 = vld [vmem:[#allocation2 + $0x54] sm:$0xf0] }
  0xc5   : > { %396 = vst [vmem:[#allocation2 + $0x3c] sm:$0xff] %v392_v7  ;;  %v1065_v16 = vld [vmem:[#allocation2 + $0x48] sm:$0xf]  ;;  %v1151_v17 = vld [vmem:[#allocation2 + $0x4c] sm:$0xf]  ;;  %1135 = vmatmul.msk.bf16.vlgmr.msra.gmra.mxu1 %vm724_vm6, %v1533_v0 }
  0xc6   : > { %780 = vmatpush.bf16.msrb.mxu1 %v1122_v63  ;;  %394 = vst [vmem:[#allocation2 + $0x30] sm:$0xff] %v390_v10  ;;  %v1301_v18 = vpop.permute.xlu1 %1300  ;;  %v1066_v19 = vor.u32 %v1152_v11, %v1065_v16  ;;  %v1070_v20 = vor.u32 %v1151_v17, %v1067_v12  ;;  %1136 = vmatmul.msk.bf16.vlgmr.msra.gmra.mxu3 %vm724_vm6, %v1533_v0  ;;  %v1073_v54 = vld [vmem:[#allocation2 + $0x50] sm:$0xf] }
  0xc7   : > { %800 = vmatpush.bf16.msrb.mxu3 %v1134_v55  ;;  %395 = vst [vmem:[#allocation2 + $0x38] sm:$0xf] %v391_v9  ;;  %v1296_v23 = vpop.permute.xlu0 %1295  ;;  %v1303_v24 = vunpack.i.h.bf16 %v1301_v18  ;;  %v1302_v25 = vunpack.i.l.bf16 %v1301_v18  ;;  %v1153_v55 = vld [vmem:[#allocation2 + $0x58] sm:$0xf0] }
  0xc8   : > { %v1298_v26 = vunpack.i.h.bf16 %v1296_v23  ;;  %v1297_v27 = vunpack.i.l.bf16 %v1296_v23  ;;  %732 = vmatpush.bf16.msra.mxu0 %v1066_v19  ;;  %758 = vmatpush.bf16.msra.mxu2 %v1070_v20  ;;  %v1074_v63 = vor.u32 %v1153_v55, %v1073_v54  ;;  %v575_v20 = vunpack.c.l.b16 %v1521_v33 }
  0xc9   : > { %v358_v30 = vsel %vm356_vm7, %v1303_v24, %v1308_v14  ;;  %v357_v31 = vsel %vm356_vm7, %v1302_v25, %v1307_v15 }
  0xca   : > { %781 = vmatpush.bf16.msrb.mxu1 %v1110_v13  ;;  %v362_v34 = vsel %vm356_vm7, %v1308_v14, %v1298_v26  ;;  %v361_v35 = vsel %vm356_vm7, %v1307_v15, %v1297_v27  ;;  %v360_v36 = vsel %vm356_vm7, %v1298_v26, %v1303_v24  ;;  %v366_v37 = vpack.c.bf16 %v358_v30, %v358_v30 }
  0xcb   : > { %v365_v39 = vpack.c.bf16 %v360_v36, %v362_v34  ;;  %v359_v40 = vsel %vm356_vm7, %v1297_v27, %v1302_v25  ;;  %v364_v41 = vpack.c.bf16 %v357_v31, %v357_v31  ;;  %v1150_v6 = vld [vmem:[#allocation2 + $0x40] sm:$0xf0]  ;;  %v577_v30 = vpack.c.b16 %v575_v20, %v575_v20 }
  0xcc   : > { %370 = vst [vmem:[#allocation2 + $0x2c] sm:$0xf] %v366_v37  ;;  %v363_v43 = vpack.c.bf16 %v359_v40, %v361_v35  ;;  %v1149_v44 = vld [vmem:[#allocation2 + $0x38] sm:$0xf0]  ;;  %v1055_v45 = vld [vmem:[#allocation2 + $0x3c] sm:$0xf0] }
  0xcd   : > { %369 = vst [vmem:[#allocation2 + $0x24] sm:$0xff] %v365_v39  ;;  %v1053_v49 = vld [vmem:[#allocation2 + $0x30] sm:$0xf]  ;;  %v1148_v50 = vld [vmem:[#allocation2 + $0x34] sm:$0xf] }
  0xce   : > { %782 = vmatpush.bf16.msrb.mxu1 %v1098_v32  ;;  %367 = vst [vmem:[#allocation2 + $0x18] sm:$0xff] %v363_v43  ;;  %v1316_v51 = vpop.permute.xlu1 %1315  ;;  %v1054_v52 = vor.u32 %v1149_v44, %v1053_v49  ;;  %v1058_v53 = vor.u32 %v1148_v50, %v1055_v45  ;;  %v1061_v5 = vld [vmem:[#allocation2 + $0x38] sm:$0xf] }
  0xcf   : > { %368 = vst [vmem:[#allocation2 + $0x20] sm:$0xf] %v364_v41  ;;  %v1311_v56 = vpop.permute.xlu0 %1310  ;;  %v1318_v57 = vunpack.i.h.bf16 %v1316_v51  ;;  %v1317_v58 = vunpack.i.l.bf16 %v1316_v51  ;;  %v1062_v14 = vor.u32 %v1150_v6, %v1061_v5 }
  0xd0   : > { %v1313_v59 = vunpack.i.h.bf16 %v1311_v56  ;;  %v1312_v60 = vunpack.i.l.bf16 %v1311_v56  ;;  %733 = vmatpush.bf16.msra.mxu0 %v1054_v52  ;;  %759 = vmatpush.bf16.msra.mxu2 %v1058_v53 }
  0xd1   : > { %v331_v61 = vsel %vm329_vm8, %v1318_v57, %v1323_v47  ;;  %v330_v62 = vsel %vm329_vm8, %v1317_v58, %v1322_v48 }
  0xd2   : > { %783 = vmatpush.bf16.msrb.mxu1 %v1086_v42  ;;  %v335_v1 = vsel %vm329_vm8, %v1323_v47, %v1313_v59  ;;  %v334_v2 = vsel %vm329_vm8, %v1322_v48, %v1312_v60  ;;  %v333_v3 = vsel %vm329_vm8, %v1313_v59, %v1318_v57  ;;  %v339_v4 = vpack.c.bf16 %v331_v61, %v331_v61 }
  0xd3   : > { %v338_v7 = vpack.c.bf16 %v333_v3, %v335_v1  ;;  %v332_v8 = vsel %vm329_vm8, %v1312_v60, %v1317_v58  ;;  %v337_v9 = vpack.c.bf16 %v330_v62, %v330_v62  ;;  %v1147_v10 = vld [vmem:[#allocation2 + $0x28] sm:$0xf0] }
  0xd4   : > { %343 = vst [vmem:[#allocation2 + $0x14] sm:$0xf] %v339_v4  ;;  %v336_v11 = vpack.c.bf16 %v332_v8, %v334_v2  ;;  %v1146_v12 = vld [vmem:[#allocation2 + $0x20] sm:$0xf0]  ;;  %v1043_v13 = vld [vmem:[#allocation2 + $0x24] sm:$0xf0] }
  0xd5   : > { %342 = vst [vmem:[#allocation2 + $0xc] sm:$0xff] %v338_v7  ;;  %v1041_v15 = vld [vmem:[#allocation2 + $0x18] sm:$0xf]  ;;  %v1145_v16 = vld [vmem:[#allocation2 + $0x1c] sm:$0xf] }
  0xd6   : > { %784 = vmatpush.bf16.msrb.mxu1 %v1074_v63  ;;  %340 = vst [vmem:[#allocation2] sm:$0xff] %v336_v11  ;;  %v1042_v17 = vor.u32 %v1146_v12, %v1041_v15  ;;  %v1046_v18 = vor.u32 %v1145_v16, %v1043_v13  ;;  %v1049_v19 = vld [vmem:[#allocation2 + $0x20] sm:$0xf]  ;;  %1137 = vmatmul.msk.bf16.vlgmr.msrb.gmra.mxu3 %vm724_vm6, %v1533_v0 }
  0xd7   : > { %341 = vst [vmem:[#allocation2 + $0x8] sm:$0xf] %v337_v9  ;;  %v1050_v46 = vor.u32 %v1147_v10, %v1049_v19  ;;  %v1026_v7 = vld [vmem:[%s1617_s2 + $0x2] ss:$4 sm:$0x7] }
  0xd8   : > { %734 = vmatpush.bf16.msra.mxu0 %v1042_v17  ;;  %760 = vmatpush.bf16.msra.mxu2 %v1046_v18  ;;  %v850_v15 = vperm.slane %v1026_v7, 1  ;;  %v851_v20 = vperm.slane %v1026_v7, 2 }
  0xda   : > { %785 = vmatpush.bf16.msrb.mxu1 %v1062_v14  ;;  %v849_v14 = vperm.slane %v1026_v7, 0 }
  0xdb   : > { %v1144_v23 = vld [vmem:[#allocation2 + $0x10] sm:$0xf0] }
  0xdc   : > { %v1143_v21 = vld [vmem:[#allocation2 + $0x8] sm:$0xf0]  ;;  %v1031_v22 = vld [vmem:[#allocation2 + $0xc] sm:$0xf0] }
  0xdd   : > { %v1029_v24 = vld [vmem:[#allocation2] sm:$0xf]  ;;  %v1142_v25 = vld [vmem:[#allocation2 + $0x4] sm:$0xf] }
  0xde   : > { %786 = vmatpush.bf16.msrb.mxu1 %v1050_v46  ;;  %v1030_v26 = vor.u32 %v1143_v21, %v1029_v24  ;;  %v1034_v27 = vor.u32 %v1142_v25, %v1031_v22  ;;  %v1037_v28 = vld [vmem:[#allocation2 + $0x8] sm:$0xf] }
  0xdf   : > { %v1038_v29 = vor.u32 %v1144_v23, %v1037_v28 }
  0xe0   : > { %735 = vmatpush.bf16.msra.mxu0 %v1030_v26  ;;  %761 = vmatpush.bf16.msra.mxu2 %v1034_v27 }
  0xe2   : > { %787 = vmatpush.bf16.msrb.mxu1 %v1038_v29 }
  0xe3   : > { %736 = vmatmul.bf16.vlgmr.msra.gmra.mxu0 %v577_v30  ;;  %762 = vmatmul.bf16.vlgmr.msra.gmra.mxu2 %v577_v30 }
  0xe5   : > { %788 = vmatmul.bf16.vlgmr.msrb.gmra.mxu1 %v577_v30 }
 0x142   : > { %v750_v0 = vpop.f32.mrf.mxu1 }
 0x149   : > { %v776_v31 = vpop.f32.mrf.mxu3 }
 0x14a   : > { %v752_v32 = vpop.f32.mrf.mxu1 }
 0x151   : > { %v778_v33 = vpop.f32.mrf.mxu3 }
 0x159   : > { %v802_v34 = vpop.f32.mrf.mxu3 }
 0x160   : > { %v737_v35 = vpop.f32.mrf.mxu0 }
 0x161   : > { %v751_v36 = vadd.f32 %v750_v0, %v737_v35  ;;  %v804_v38 = vpop.f32.mrf.mxu3  ;;  %v882_v35 = vld [vmem:[%s1618_s3] ss:$2 sm:$0x7] }
 0x162   : > { %v789_v37 = vpop.f32.mrf.mxu1 }
 0x163   : > { %v803_v39 = vadd.f32 %v802_v34, %v789_v37  ;;  %v809_v40 = vmin.f32 %v751_v36, 20.0  ;;  %vm806_vm11 = vcmp.gt.f32.partialorder %v751_v36, 20.0  ;;  %v1138_v34 = vld [vmem:[%s1618_s3 + $0x1] ss:$2 sm:$0x7] }
 0x164   : > { %v900_v38 = vperm.slane %v1138_v34, 0 }
 0x165   : > { %v811_v41 = vmin.f32 %v803_v39, 20.0  ;;  %v812_v42 = vmul.f32 1.442695, %v809_v40  ;;  %vm808_vm13 = vcmp.gt.f32.partialorder %v803_v39, 20.0  ;;  %v901_v40 = vperm.slane %v1138_v34, 1 }
 0x166   : > { %v763_v44 = vpop.f32.mrf.mxu2 }
 0x167   : > { %v816_v43 = vmul.f32 1.442695, %v811_v41  ;;  %1324 = vpow2.f32 %v812_v42  ;;  %v777_v45 = vadd.f32 %v776_v31, %v763_v44  ;;  %v886_v41 = vperm.slane %v882_v35, 0 }
 0x168   : > { %v739_v47 = vpop.f32.mrf.mxu0 }
 0x169   : > { %1326 = vpow2.f32 %v816_v43  ;;  %v810_v48 = vmin.f32 %v777_v45, 20.0  ;;  %vm807_vm14 = vcmp.gt.f32.partialorder %v777_v45, 20.0  ;;  %v887_v43 = vperm.slane %v882_v35, 1 }
 0x16a   : > { %v791_v49 = vpop.f32.mrf.mxu1 }
 0x16b   : > { %v814_v50 = vmul.f32 1.442695, %v810_v48  ;;  %v902_v48 = vperm.slane %v1138_v34, 2  ;;  %v888_v49 = vperm.slane %v882_v35, 2 }
 0x16d   : > { %v1325_v51 = vpop.eup %1324  ;;  %1328 = vpow2.f32 %v814_v50 }
 0x16e   : > { %v818_v53 = vadd.f32 1.0, %v1325_v51  ;;  %v765_v54 = vpop.f32.mrf.mxu2  ;;  %v821_v56 = vmul.f32 -0.5, %v1325_v51  ;;  %v824_v1 = vand.u32 2147483647, %v1325_v51 }
 0x16f   : > { %v1327_v52 = vpop.eup %1326 }
 0x170   : > { %v836_v55 = vadd.f32 1.0, %v1327_v52  ;;  %1330 = vlog2.f32 %v818_v53  ;;  %v839_v57 = vmul.f32 -0.5, %v1327_v52  ;;  %v822_v60 = vadd.f32 1.0, %v821_v56 }
 0x171   : > { %v842_v2 = vand.u32 2147483647, %v1327_v52  ;;  %vm825_vm9 = vcmp.lt.f32.partialorder %v824_v1, 0.0004427343 }
 0x172   : > { %1332 = vlog2.f32 %v836_v55  ;;  %v840_v62 = vadd.f32 1.0, %v839_v57  ;;  %v823_v5 = vmul.f32 %v1325_v51, %v822_v60 }
 0x173   : > { %v1329_v58 = vpop.eup %1328  ;;  %vm1579_vm10 = vcmp.lt.f32.partialorder %v842_v2, 0.0004427343 }
 0x174   : > { %v827_v59 = vadd.f32 1.0, %v1329_v58  ;;  %v830_v61 = vmul.f32 -0.5, %v1329_v58  ;;  %v841_v9 = vmul.f32 %v1327_v52, %v840_v62  ;;  %v833_v10 = vand.u32 2147483647, %v1329_v58 }
 0x176   : > { %v1331_v63 = vpop.eup %1330  ;;  %1334 = vlog2.f32 %v827_v59  ;;  %v831_v6 = vadd.f32 1.0, %v830_v61  ;;  %vm834_vm12 = vcmp.lt.f32.partialorder %v833_v10, 0.0004427343 }
 0x177   : > { %v820_v4 = vmul.f32 0.6931472, %v1331_v63 }
 0x178   : > { %v1333_v3 = vpop.eup %1332  ;;  %v832_v17 = vmul.f32 %v1329_v58, %v831_v6 }
 0x179   : > { %v838_v8 = vmul.f32 0.6931472, %v1333_v3  ;;  %v826_v12 = vsel %vm825_vm9, %v823_v5, %v820_v4 }
 0x17a   : > { %v845_v19 = vsel %vm806_vm11, %v751_v36, %v826_v12 }
 0x17b   : > { %v844_v18 = vsel %vm1579_vm10, %v841_v9, %v838_v8  ;;  %v855_v23 = vmul.f32 %v849_v14, %v845_v19 }
 0x17c   : > { %v1335_v13 = vpop.eup %1334  ;;  %v847_v22 = vsel %vm808_vm13, %v803_v39, %v844_v18 }
 0x17d   : > { %v829_v16 = vmul.f32 0.6931472, %v1335_v13  ;;  %v857_v25 = vmul.f32 %v851_v20, %v847_v22 }
 0x17f   : > { %v835_v46 = vsel %vm834_vm12, %v832_v17, %v829_v16 }
 0x180   : > { %v846_v21 = vsel %vm807_vm14, %v777_v45, %v835_v46 }
 0x181   : > { %v856_v24 = vmul.f32 %v850_v15, %v846_v21 }
 0x183   : > { %v858_v26 = vadd.f32 %v856_v24, %v855_v23 }
 0x185   : > { %v859_v27 = vadd.f32 %v858_v26, %v857_v25 }
 0x187   : > { %860 = vadd.xlane.f32.xlu0 %v859_v27 }
 0x1fa   : > { %v861_v28 = vpop.xlane.xlu0 %860 }
 0x1fb   : > { %1336 = vrcp.f32 %v861_v28  ;;  %v873_v31 = vand.u32 2147483648, %v861_v28  ;;  %v871_v33 = vand.u32 2147483647, %v861_v28  ;;  %vm867_vm0 = vweird.f32 %v861_v28 }
 0x1fd   : > { %v874_v37 = vor.u32 1.1754944e-38, %v873_v31  ;;  %vm872_vm2 = vcmp.eq.f32.partialorder %v871_v33, 8.507059e+37 }
 0x201   : > { %v1337_v29 = vpop.eup %1336 }
 0x202   : > { %v863_v30 = vmul.f32 %v1337_v29, %v861_v28  ;;  %vm868_vm15 = vweird.f32 %v1337_v29 }
 0x203   : > { %vm869_vm1 = vmor %vm867_vm0, %vm868_vm15 }
 0x204   : > { %v864_v0 = vsub.f32 1.0, %v863_v30 }
 0x206   : > { %v865_v32 = vmul.f32 %v1337_v29, %v864_v0 }
 0x208   : > { %v866_v36 = vadd.f32 %v1337_v29, %v865_v32 }
 0x20a   : > { %v870_v39 = vsel %vm869_vm1, %v1337_v29, %v866_v36 }
 0x20b   : > { %v875_v42 = vsel %vm872_vm2, %v874_v37, %v870_v39 }
 0x20c   : > { %v876_v44 = vmul.f32 %v875_v42, %v855_v23  ;;  %v877_v45 = vmul.f32 %v875_v42, %v856_v24  ;;  %v878_v47 = vmul.f32 %v875_v42, %v857_v25 }
 0x20e   : > { %v906_v50 = vmul.f32 %v900_v38, %v876_v44  ;;  %v907_v51 = vmul.f32 %v901_v40, %v877_v45  ;;  %v892_v52 = vmul.f32 %v886_v41, %v876_v44  ;;  %880 = vst [vmem:[%s268_s13 + $0x8] sm:$0xff] %v877_v45  ;;  %v893_v53 = vmul.f32 %v887_v43, %v877_v45 }
 0x20f   : > { %881 = vst [vmem:[%s268_s13 + $0x10] sm:$0xff] %v878_v47  ;;  %v908_v54 = vmul.f32 %v902_v48, %v878_v47  ;;  %v894_v56 = vmul.f32 %v888_v49, %v878_v47 }
 0x210   : > { %v909_v55 = vadd.f32 %v907_v51, %v906_v50  ;;  %879 = vst [vmem:[%s268_s13] sm:$0xff] %v876_v44  ;;  %v895_v57 = vadd.f32 %v893_v53, %v892_v52 }
 0x212   : > { %v910_v58 = vadd.f32 %v909_v55, %v908_v54  ;;  %v896_v59 = vadd.f32 %v895_v57, %v894_v56 }
 0x214   : > { %911 = vadd.xlane.f32.xlu2 %v910_v58  ;;  %897 = vadd.xlane.f32.xlu1 %v896_v59 }
 0x287   : > { %v912_v60 = vpop.xlane.xlu2 %911  ;;  %v898_v61 = vpop.xlane.xlu1 %897 }
 0x288   : > { %v914_v62 = vsel %vm913_vm3, %v898_v61, %v912_v60 }
 0x289   : > { %916 = vst.msk [vmem:[%s272_s17] sm:$0xff] %vm915_vm4, %v914_v62 }
 0x28a PF: > { %p13_p9 = scmp.ge.s32.totalorder %s1417_s22, 4   ;;  %s1623_s18 = smov %s1356_s19 }
 0x28b   : > { %s1624_s19 = smov %s1426_s25  ;;  %s1625_s20 = smov %s1417_s22 }
 0x28c   :  { %15 = sbr.rel (!%p13_p9) target bundleno = 2 (0x2), region = 118 }

// kernel: _lambda_.10
= control target key start
LH: loop header
LB: loop body
LE: loop exit
PB: predicated region body
PF: predicated region fallthrough
CT: control target
= control target key end

     0   :  { %s2900_s7 = smov 17   ;;  %s2902_s18 = smov 15   ;;  %vm1589_vm8 = vcmask 261120   ;;  %s4265_s0 = inlined_call_operand.vmem [shape: bf16[32,768], index: 0, kind: input, shape index: {}]   ;;  %s4266_s3 = inlined_call_operand.vmem [shape: f32[3,768], index: 3, kind: input, shape index: {}]   ;;  %s4267_s1 = inlined_call_operand.vmem [shape: bf16[8,288], index: 1, kind: input, shape index: {}]   ;;  %s4268_s2 = inlined_call_operand.vmem [shape: f32[8,1], index: 2, kind: input, shape index: {}]   ;;  %s4269_s4 = inlined_call_operand.vmem [shape: bf16[8,768], index: 4, kind: output, shape index: {}]  }
   0x1   :  { %v2937_v0 = vld [vmem:[%s4265_s0 + $0x8] sm:$0xff]  ;;  %v2942_v1 = vld [vmem:[%s4265_s0 + $0x20] sm:$0xff]  ;;  %v21_v7 = vld [vmem:[%s4265_s0 + $0x18] sm:$0xff]  ;;  %s2903_s19 = smov 1   ;;  %s2904_s20 = smov 112  }
   0x2   :  { %v2947_v2 = vld [vmem:[%s4266_s3] ss:$4 sm:$0x3f]  ;;  %v2950_v3 = vunpack.c.l.bf16 %v2937_v0  ;;  %v2953_v4 = vunpack.c.l.bf16 %v2942_v1  ;;  %524 = vst [vmem:[#allocation2 + $0x188] sm:$0xff] %v2937_v0  ;;  %v25_v9 = vld [vmem:[%s4265_s0 + $0x38] sm:$0xff]  ;;  %v2970_v11 = vunpack.c.h.bf16 %v21_v7  ;;  %v2974_v13 = vunpack.c.l.bf16 %v21_v7  ;;  %s2905_s21 = smov 127  }
   0x3   :  { %v62_v5 = vperm.slane %v2947_v2, 2  ;;  %v18_v6 = vld [vmem:[%s4265_s0] sm:$0xff]  ;;  %v61_v8 = vperm.slane %v2947_v2, 1  ;;  %527 = vst [vmem:[#allocation2 + $0x1a0] sm:$0xff] %v2942_v1  ;;  %v28_v14 = vld [vmem:[%s4265_s0 + $0x50] sm:$0xff]  ;;  %v60_v18 = vperm.slane %v2947_v2, 0  ;;  %v2985_v19 = vunpack.c.l.bf16 %v25_v9 }
   0x4   :  { %v2968_v10 = vunpack.c.h.bf16 %v18_v6  ;;  %v2972_v12 = vunpack.c.l.bf16 %v18_v6  ;;  %v24_v15 = vld [vmem:[%s4265_s0 + $0x30] sm:$0xff]  ;;  %523 = vst [vmem:[#allocation2 + $0x180] sm:$0xff] %v18_v6  ;;  %v27_v20 = vld [vmem:[%s4265_s0 + $0x48] sm:$0xff]  ;;  %v2992_v23 = vunpack.c.l.bf16 %v28_v14  ;;  %v26_v41 = vld [vmem:[%s4265_s0 + $0x40] sm:$0xff]  ;;  %v64_v45 = vperm.slane %v2947_v2, 4  ;;  %s2906_s22 = smov 113  }
   0x5   :  { %v74_v16 = vmul.f32 %v62_v5, %v2950_v3  ;;  %v80_v17 = vmul.f32 %v62_v5, %v2953_v4  ;;  %v79_v22 = vmul.f32 %v61_v8, %v2970_v11  ;;  %526 = vst [vmem:[#allocation2 + $0x198] sm:$0xff] %v21_v7  ;;  %v2994_v24 = vunpack.c.h.bf16 %v24_v15  ;;  %v20_v37 = vld [vmem:[%s4265_s0 + $0x10] sm:$0xff]  ;;  %v23_v38 = vld [vmem:[%s4265_s0 + $0x28] sm:$0xff]  ;;  %v29_v46 = vld [vmem:[%s4265_s0 + $0x58] sm:$0xff]  ;;  %s2901_s0 = smov 16   ;;  %s2907_s23 = smov 111  }
   0x6   :  { %v73_v21 = vmul.f32 %v61_v8, %v2968_v10  ;;  %v72_v26 = vmul.f32 %v60_v18, %v2972_v12  ;;  %v78_v27 = vmul.f32 %v60_v18, %v2974_v13  ;;  %530 = vst [vmem:[#allocation2 + $0x1b8] sm:$0xff] %v25_v9  ;;  %v86_v29 = vmul.f32 %v62_v5, %v2985_v19 }
   0x7   :  { %v2996_v25 = vpack.i.bf16 %v80_v17, %v74_v16  ;;  %533 = vst [vmem:[#allocation2 + $0x1d0] sm:$0xff] %v28_v14  ;;  %v3003_v30 = vunpack.c.h.bf16 %v27_v20  ;;  %v92_v32 = vmul.f32 %v62_v5, %v2992_v23  ;;  %v3010_v33 = vunpack.c.l.bf16 %v24_v15 }
   0x8   :  { %v3000_v28 = vpack.i.bf16 %v79_v22, %v73_v21  ;;  %v3007_v31 = vpack.i.bf16 %v78_v27, %v72_v26  ;;  %529 = vst [vmem:[#allocation2 + $0x1b0] sm:$0xff] %v24_v15  ;;  %v3012_v34 = vunpack.c.l.bf16 %v27_v20  ;;  %v85_v35 = vmul.f32 %v61_v8, %v2994_v24 }
   0x9   :  { %2440 = vrot.lane.b32.xlu2 %v2996_v25, %s2900_s7  ;;  %v91_v36 = vmul.f32 %v61_v8, %v3003_v30  ;;  %532 = vst [vmem:[#allocation2 + $0x1c8] sm:$0xff] %v27_v20  ;;  %v84_v39 = vmul.f32 %v60_v18, %v3010_v33  ;;  %v3031_v42 = vpack.i.bf16 %v92_v32, %v86_v29  ;;  %v3033_v43 = vunpack.c.l.bf16 %v20_v37 }
   0xa   :  { %2430 = vrot.lane.b32.xlu1 %v3000_v28, %s2900_s7  ;;  %2420 = vrot.lane.b32.xlu0 %v3007_v31, %s2900_s7  ;;  %v90_v40 = vmul.f32 %v60_v18, %v3012_v34  ;;  %525 = vst [vmem:[#allocation2 + $0x190] sm:$0xff] %v20_v37  ;;  %v3035_v44 = vunpack.c.l.bf16 %v23_v38  ;;  %v3043_v48 = vunpack.c.h.bf16 %v25_v9  ;;  %v3045_v49 = vunpack.c.h.bf16 %v28_v14 }
   0xb   :  { %528 = vst [vmem:[#allocation2 + $0x1a8] sm:$0xff] %v23_v38  ;;  %v3041_v47 = vpack.i.bf16 %v91_v36, %v85_v35  ;;  %v63_v50 = vperm.slane %v2947_v2, 3  ;;  %v3051_v52 = vunpack.c.h.bf16 %v2937_v0  ;;  %v3054_v53 = vunpack.c.h.bf16 %v2942_v1 }
   0xc   :  { %531 = vst [vmem:[#allocation2 + $0x1c0] sm:$0xff] %v26_v41  ;;  %v3048_v51 = vpack.i.bf16 %v90_v40, %v84_v39  ;;  %v76_v54 = vmul.f32 %v64_v45, %v3033_v43  ;;  %v82_v55 = vmul.f32 %v64_v45, %v3035_v44  ;;  %v3070_v61 = vunpack.c.h.bf16 %v26_v41  ;;  %v1862_v39 = vld [vmem:[%s4266_s3 + $0x1] ss:$4 sm:$0x3f] }
   0xd   :  { %534 = vst [vmem:[#allocation2 + $0x1d8] sm:$0xff] %v29_v46  ;;  %v87_v56 = vmul.f32 %v63_v50, %v3043_v48  ;;  %v93_v57 = vmul.f32 %v63_v50, %v3045_v49  ;;  %v75_v58 = vmul.f32 %v63_v50, %v3051_v52  ;;  %v81_v59 = vmul.f32 %v63_v50, %v3054_v53 }
   0xe   :  { %v3068_v60 = vpack.i.bf16 %v82_v55, %v76_v54  ;;  %v3072_v62 = vunpack.c.h.bf16 %v29_v46  ;;  %v65_v63 = vperm.slane %v2947_v2, 5  ;;  %v3077_v1 = vunpack.c.h.bf16 %v20_v37 }
   0xf   :  { %v3075_v0 = vpack.i.bf16 %v93_v57, %v87_v56  ;;  %v3079_v5 = vunpack.c.h.bf16 %v23_v38  ;;  %v3081_v6 = vpack.i.bf16 %v81_v59, %v75_v58  ;;  %v3083_v7 = vunpack.c.l.bf16 %v26_v41 }
  0x10   :  { %v3085_v8 = vunpack.c.l.bf16 %v29_v46  ;;  %v89_v9 = vmul.f32 %v65_v63, %v3070_v61  ;;  %v95_v14 = vmul.f32 %v65_v63, %v3072_v62  ;;  %v77_v2 = vmul.f32 %v65_v63, %v3077_v1 }
  0x11   :  { %2445 = vrot.lane.b32.xlu2 %v3031_v42, %s2900_s7  ;;  %v83_v15 = vmul.f32 %v65_v63, %v3079_v5  ;;  %v88_v16 = vmul.f32 %v64_v45, %v3083_v7  ;;  %v3113_v22 = vpack.i.bf16 %v2970_v11, %v2968_v10  ;;  %v3117_v26 = vpack.i.bf16 %v3012_v34, %v3010_v33 }
  0x12   :  { %2435 = vrot.lane.b32.xlu1 %v3041_v47, %s2900_s7  ;;  %2425 = vrot.lane.b32.xlu0 %v3048_v51, %s2900_s7  ;;  %v94_v17 = vmul.f32 %v64_v45, %v3085_v8  ;;  %v3099_v18 = vpack.i.bf16 %v95_v14, %v89_v9  ;;  %v3121_v27 = vpack.i.bf16 %v2974_v13, %v2972_v12  ;;  %v98_v41 = vperm.slane %v1862_v39, 1 }
  0x13   :  { %v3101_v20 = vpack.i.bf16 %v83_v15, %v77_v2  ;;  %v3128_v29 = vpack.i.bf16 %v2992_v23, %v2985_v19  ;;  %v3132_v32 = vpack.i.bf16 %v2953_v4, %v2950_v3  ;;  %v3136_v35 = vpack.i.bf16 %v3003_v30, %v2994_v24 }
  0x14   :  { %v3103_v21 = vpack.i.bf16 %v94_v17, %v88_v16  ;;  %v3143_v36 = vpack.i.bf16 %v3035_v44, %v3033_v43  ;;  %v3147_v37 = vpack.i.bf16 %v3045_v49, %v3043_v48  ;;  %v3151_v38 = vpack.i.bf16 %v3054_v53, %v3051_v52 }
  0x15   :  { %v3161_v40 = vpack.i.bf16 %v3072_v62, %v3070_v61  ;;  %v3165_v45 = vpack.i.bf16 %v3079_v5, %v3077_v1  ;;  %v97_v46 = vperm.slane %v1862_v39, 0  ;;  %v3169_v50 = vpack.i.bf16 %v3085_v8, %v3083_v7 }
  0x16   :  { %v110_v54 = vmul.f32 %v98_v41, %v2968_v10  ;;  %v116_v55 = vmul.f32 %v98_v41, %v2970_v11  ;;  %v99_v9 = vperm.slane %v1862_v39, 2  ;;  %v128_v2 = vmul.f32 %v98_v41, %v3003_v30 }
  0x17   :  { %v121_v56 = vmul.f32 %v97_v46, %v3010_v33  ;;  %v127_v57 = vmul.f32 %v97_v46, %v3012_v34  ;;  %v109_v58 = vmul.f32 %v97_v46, %v2972_v12  ;;  %v115_v59 = vmul.f32 %v97_v46, %v2974_v13 }
  0x18   :  { %v3180_v63 = vpack.i.bf16 %v116_v55, %v110_v54  ;;  %v123_v11 = vmul.f32 %v99_v9, %v2985_v19  ;;  %v129_v33 = vmul.f32 %v99_v9, %v2992_v23  ;;  %v111_v12 = vmul.f32 %v99_v9, %v2950_v3 }
  0x19   :  { %2460 = vrot.lane.b32.xlu2 %v3068_v60, %s2900_s7  ;;  %v3182_v14 = vpack.i.bf16 %v127_v57, %v121_v56  ;;  %v3184_v10 = vpack.i.bf16 %v115_v59, %v109_v58  ;;  %v117_v13 = vmul.f32 %v99_v9, %v2953_v4  ;;  %v122_v34 = vmul.f32 %v98_v41, %v2994_v24 }
  0x1a   :  { %2455 = vrot.lane.b32.xlu1 %v3075_v0, %s2900_s7  ;;  %2450 = vrot.lane.b32.xlu0 %v3081_v6, %s2900_s7  ;;  %v3198_v15 = vpack.i.bf16 %v129_v33, %v123_v11  ;;  %v101_v16 = vperm.slane %v1862_v39, 4  ;;  %v100_v23 = vperm.slane %v1862_v39, 3  ;;  %v102_v55 = vperm.slane %v1862_v39, 5 }
  0x1b   :  { %v3200_v19 = vpack.i.bf16 %v117_v13, %v111_v12  ;;  %v3202_v17 = vpack.i.bf16 %v128_v2, %v122_v34  ;;  %v181_v9 = vlaneseq }
  0x1c   :  { %v113_v3 = vmul.f32 %v101_v16, %v3033_v43  ;;  %v119_v4 = vmul.f32 %v101_v16, %v3035_v44  ;;  %v124_v24 = vmul.f32 %v100_v23, %v3043_v48  ;;  %v130_v30 = vmul.f32 %v100_v23, %v3045_v49 }
  0x1d   :  { %v112_v41 = vmul.f32 %v100_v23, %v3051_v52  ;;  %v118_v46 = vmul.f32 %v100_v23, %v3054_v53  ;;  %v126_v48 = vmul.f32 %v102_v55, %v3070_v61  ;;  %v132_v49 = vmul.f32 %v102_v55, %v3072_v62 }
  0x1e   :  { %v3216_v54 = vpack.i.bf16 %v119_v4, %v113_v3  ;;  %v3218_v43 = vpack.i.bf16 %v130_v30, %v124_v24  ;;  %v114_v52 = vmul.f32 %v102_v55, %v3077_v1  ;;  %v120_v53 = vmul.f32 %v102_v55, %v3079_v5 }
  0x1f   :  { %v3220_v44 = vpack.i.bf16 %v118_v46, %v112_v41  ;;  %v125_v39 = vmul.f32 %v101_v16, %v3083_v7  ;;  %v131_v56 = vmul.f32 %v101_v16, %v3085_v8  ;;  %v3234_v57 = vpack.i.bf16 %v132_v49, %v126_v48 }
  0x20   :  { %v3236_v58 = vpack.i.bf16 %v120_v53, %v114_v52  ;;  %v3267_v11 = vand.u32 127, %v181_v9 }
  0x21   :  { %2475 = vrot.lane.b32.xlu2 %v3099_v18, %s2900_s7  ;;  %v3238_v61 = vpack.i.bf16 %v131_v56, %v125_v39 }
  0x22   :  { %2470 = vrot.lane.b32.xlu1 %v3101_v20, %s2900_s7  ;;  %2465 = vrot.lane.b32.xlu0 %v3103_v21, %s2900_s7  ;;  %vm183_vm0 = vcmp.lt.s32.totalorder %v3267_v11, 17  ;;  %vm280_vm1 = vcmp.lt.s32.totalorder %v3267_v11, 16  ;;  %vm377_vm2 = vcmp.lt.s32.totalorder %v3267_v11, 15  ;;  %vm474_vm3 = vcmp.lt.s32.totalorder %v3267_v11, 1 }
  0x23   :  { %vm777_vm4 = vcmp.lt.s32.totalorder %v3267_v11, 112  ;;  %vm680_vm5 = vcmp.lt.s32.totalorder %v3267_v11, 113  ;;  %vm583_vm6 = vcmp.lt.s32.totalorder %v3267_v11, 127  ;;  %vm874_vm7 = vcmp.lt.s32.totalorder %v3267_v11, 111 }
  0x29   :  { %2490 = vrot.lane.b32.xlu2 %v3113_v22, %s2901_s0 }
  0x2a   :  { %2485 = vrot.lane.b32.xlu1 %v3117_v26, %s2901_s0  ;;  %2480 = vrot.lane.b32.xlu0 %v3121_v27, %s2901_s0 }
  0x31   :  { %2505 = vrot.lane.b32.xlu2 %v3128_v29, %s2901_s0 }
  0x32   :  { %2500 = vrot.lane.b32.xlu1 %v3132_v32, %s2901_s0  ;;  %2495 = vrot.lane.b32.xlu0 %v3136_v35, %s2901_s0 }
  0x39   :  { %2520 = vrot.lane.b32.xlu2 %v3143_v36, %s2901_s0 }
  0x3a   :  { %2515 = vrot.lane.b32.xlu1 %v3147_v37, %s2901_s0  ;;  %2510 = vrot.lane.b32.xlu0 %v3151_v38, %s2901_s0 }
  0x41   :  { %2535 = vrot.lane.b32.xlu2 %v3161_v40, %s2901_s0 }
  0x42   :  { %2530 = vrot.lane.b32.xlu1 %v3165_v45, %s2901_s0  ;;  %2525 = vrot.lane.b32.xlu0 %v3169_v50, %s2901_s0 }
  0x49   :  { %2550 = vrot.lane.b32.xlu2 %v3180_v63, %s2902_s18 }
  0x4a   :  { %2545 = vrot.lane.b32.xlu1 %v3182_v14, %s2902_s18  ;;  %2540 = vrot.lane.b32.xlu0 %v3184_v10, %s2902_s18 }
  0x51   :  { %2565 = vrot.lane.b32.xlu2 %v3198_v15, %s2902_s18 }
  0x52   :  { %2560 = vrot.lane.b32.xlu1 %v3200_v19, %s2902_s18  ;;  %2555 = vrot.lane.b32.xlu0 %v3202_v17, %s2902_s18 }
  0x59   :  { %2580 = vrot.lane.b32.xlu2 %v3216_v54, %s2902_s18 }
  0x5a   :  { %2575 = vrot.lane.b32.xlu1 %v3218_v43, %s2902_s18  ;;  %2570 = vrot.lane.b32.xlu0 %v3220_v44, %s2902_s18 }
  0x61   :  { %2595 = vrot.lane.b32.xlu2 %v3234_v57, %s2902_s18 }
  0x62   :  { %2590 = vrot.lane.b32.xlu1 %v3236_v58, %s2902_s18  ;;  %2585 = vrot.lane.b32.xlu0 %v3238_v61, %s2902_s18 }
  0x63   :  { %v3246_v62 = vpop.permute.xlu2 %2440 }
  0x64   :  { %v2443_v39 = vunpack.i.h.bf16 %v3246_v62  ;;  %v2442_v56 = vunpack.i.l.bf16 %v3246_v62 }
  0x69   :  { %2610 = vrot.lane.b32.xlu2 %v3000_v28, %s2903_s19 }
  0x6a   :  { %2605 = vrot.lane.b32.xlu1 %v3048_v51, %s2903_s19  ;;  %2600 = vrot.lane.b32.xlu0 %v3007_v31, %s2903_s19 }
  0x6b   :  { %v2446_v1 = vpop.permute.xlu2 %2445 }
  0x6c   :  { %v2448_v49 = vunpack.i.h.bf16 %v2446_v1  ;;  %v2447_v52 = vunpack.i.l.bf16 %v2446_v1 }
  0x71   :  { %2625 = vrot.lane.b32.xlu2 %v3031_v42, %s2903_s19 }
  0x72   :  { %2620 = vrot.lane.b32.xlu1 %v2996_v25, %s2903_s19  ;;  %2615 = vrot.lane.b32.xlu0 %v3041_v47, %s2903_s19 }
  0x73   :  { %v3254_v5 = vpop.permute.xlu2 %2460 }
  0x79   :  { %2640 = vrot.lane.b32.xlu2 %v3068_v60, %s2903_s19 }
  0x7a   :  { %2635 = vrot.lane.b32.xlu1 %v3075_v0, %s2903_s19  ;;  %2630 = vrot.lane.b32.xlu0 %v3081_v6, %s2903_s19 }
  0x7b   :  { %v3259_v7 = vpop.permute.xlu2 %2475 }
  0x7c   :  { %v3261_v8 = vpop.permute.xlu1 %2430  ;;  %v3263_v59 = vpop.permute.xlu0 %2420  ;;  %v2478_v12 = vunpack.i.h.bf16 %v3259_v7  ;;  %v4270_v13 = vunpack.i.l.bf16 %v3259_v7 }
  0x7d   :  { %v2423_v1 = vunpack.i.h.bf16 %v3263_v59 }
  0x81   :  { %2655 = vrot.lane.b32.xlu2 %v3099_v18, %s2903_s19 }
  0x82   :  { %2650 = vrot.lane.b32.xlu1 %v3101_v20, %s2903_s19  ;;  %2645 = vrot.lane.b32.xlu0 %v3103_v21, %s2903_s19 }
  0x83   :  { %v3270_v33 = vpop.permute.xlu2 %2490 }
  0x84   :  { %v2436_v34 = vpop.permute.xlu1 %2435  ;;  %v2426_v23 = vpop.permute.xlu0 %2425 }
  0x85   :  { %v2438_v2 = vunpack.i.h.bf16 %v2436_v34  ;;  %v2437_v16 = vunpack.i.l.bf16 %v2436_v34  ;;  %v2428_v3 = vunpack.i.h.bf16 %v2426_v23  ;;  %v2427_v4 = vunpack.i.l.bf16 %v2426_v23 }
  0x87   :  { %v203_v24 = vsel %vm183_vm0, %v2428_v3, %v2438_v2  ;;  %v207_v30 = vsel %vm183_vm0, %v2478_v12, %v2428_v3  ;;  %v202_v41 = vsel %vm183_vm0, %v2427_v4, %v2437_v16  ;;  %v206_v46 = vsel %vm183_vm0, %v4270_v13, %v2427_v4 }
  0x88   :  { %v217_v55 = vpack.c.bf16 %v203_v24, %v207_v30  ;;  %v214_v48 = vpack.c.bf16 %v202_v41, %v206_v46  ;;  %v2432_v4 = vunpack.i.l.bf16 %v3261_v8  ;;  %v199_v41 = vsel %vm183_vm0, %v2438_v2, %v2448_v49 }
  0x89   :  { %2670 = vrot.lane.b32.xlu2 %v3117_v26, %s2904_s20  ;;  %v2433_v26 = vunpack.i.h.bf16 %v3261_v8  ;;  %v198_v46 = vsel %vm183_vm0, %v2437_v16, %v2447_v52  ;;  %v2422_v13 = vunpack.i.l.bf16 %v3263_v59 }
  0x8a   :  { %2665 = vrot.lane.b32.xlu1 %v3182_v14, %s2905_s21  ;;  %229 = vst [vmem:[#allocation2 + $0x48] sm:$0xff] %v217_v55  ;;  %2660 = vrot.lane.b32.xlu0 %v3184_v10, %s2905_s21  ;;  %v196_v2 = vsel %vm183_vm0, %v2432_v4, %v2442_v56 }
  0x8b   :  { %v3293_v53 = vpop.permute.xlu2 %2505  ;;  %226 = vst [vmem:[#allocation2 + $0x30] sm:$0xff] %v214_v48  ;;  %v197_v48 = vsel %vm183_vm0, %v2433_v26, %v2443_v39 }
  0x8c   :  { %v2456_v9 = vpop.permute.xlu1 %2455  ;;  %v2451_v3 = vpop.permute.xlu0 %2450 }
  0x8d   :  { %v2458_v34 = vunpack.i.h.bf16 %v2456_v9  ;;  %v2457_v23 = vunpack.i.l.bf16 %v2456_v9  ;;  %v2453_v24 = vunpack.i.h.bf16 %v2451_v3  ;;  %v2452_v30 = vunpack.i.l.bf16 %v2451_v3 }
  0x8f   :  { %v195_v62 = vsel %vm183_vm0, %v2448_v49, %v2458_v34  ;;  %v194_v55 = vsel %vm183_vm0, %v2447_v52, %v2457_v23  ;;  %v193_v3 = vsel %vm183_vm0, %v2443_v39, %v2453_v24  ;;  %v192_v49 = vsel %vm183_vm0, %v2442_v56, %v2452_v30 }
  0x90   :  { %v215_v8 = vpack.c.bf16 %v194_v55, %v198_v46  ;;  %v218_v9 = vpack.c.bf16 %v195_v62, %v199_v41  ;;  %v212_v16 = vpack.c.bf16 %v193_v3, %v197_v48  ;;  %v2463_v52 = vunpack.i.h.bf16 %v3254_v5 }
  0x91   :  { %2685 = vrot.lane.b32.xlu2 %v3121_v27, %s2904_s20  ;;  %v2462_v46 = vunpack.i.l.bf16 %v3254_v5  ;;  %v209_v41 = vpack.c.bf16 %v192_v49, %v196_v2  ;;  %v201_v27 = vsel %vm183_vm0, %v2423_v1, %v2433_v26  ;;  %v200_v56 = vsel %vm183_vm0, %v2422_v13, %v2432_v4 }
  0x92   :  { %227 = vst [vmem:[#allocation2 + $0x38] sm:$0xff] %v215_v8  ;;  %2680 = vrot.lane.b32.xlu1 %v3128_v29, %s2904_s20  ;;  %2675 = vrot.lane.b32.xlu0 %v3136_v35, %s2904_s20  ;;  %v189_v29 = vsel %vm183_vm0, %v2453_v24, %v2463_v52 }
  0x93   :  { %230 = vst [vmem:[#allocation2 + $0x50] sm:$0xff] %v218_v9  ;;  %v3325_v59 = vpop.permute.xlu2 %2520  ;;  %v188_v35 = vsel %vm183_vm0, %v2452_v30, %v2462_v46 }
  0x94   :  { %224 = vst [vmem:[#allocation2 + $0x20] sm:$0xff] %v212_v16  ;;  %v2471_v39 = vpop.permute.xlu1 %2470  ;;  %v2466_v55 = vpop.permute.xlu0 %2465 }
  0x95   :  { %221 = vst [vmem:[#allocation2 + $0x8] sm:$0xff] %v209_v41  ;;  %v2473_v5 = vunpack.i.h.bf16 %v2471_v39  ;;  %v2472_v62 = vunpack.i.l.bf16 %v2471_v39  ;;  %v2468_v48 = vunpack.i.h.bf16 %v2466_v55  ;;  %v2467_v8 = vunpack.i.l.bf16 %v2466_v55 }
  0x97   :  { %v185_v9 = vsel %vm183_vm0, %v2463_v52, %v2473_v5  ;;  %v184_v26 = vsel %vm183_vm0, %v2462_v46, %v2472_v62  ;;  %v204_v4 = vsel %vm183_vm0, %v2472_v62, %v2422_v13  ;;  %v205_v3 = vsel %vm183_vm0, %v2473_v5, %v2423_v1 }
  0x98   :  { %v208_v2 = vpack.c.bf16 %v200_v56, %v204_v4  ;;  %v210_v16 = vpack.c.bf16 %v184_v26, %v188_v35  ;;  %v211_v24 = vpack.c.bf16 %v201_v27, %v205_v3  ;;  %v213_v49 = vpack.c.bf16 %v185_v9, %v189_v29 }
  0x99   :  { %v187_v30 = vsel %vm183_vm0, %v2468_v48, %v2478_v12  ;;  %v191_v52 = vsel %vm183_vm0, %v2458_v34, %v2468_v48  ;;  %v4293_v46 = vunpack.i.l.bf16 %v3259_v7  ;;  %v190_v1 = vsel %vm183_vm0, %v2457_v23, %v2467_v8  ;;  %2700 = vrot.lane.b32.xlu2 %v3048_v51, %s2906_s22 }
  0x9a   :  { %220 = vst [vmem:[#allocation2] sm:$0xff] %v208_v2  ;;  %v219_v41 = vpack.c.bf16 %v187_v30, %v191_v52  ;;  %2695 = vrot.lane.b32.xlu1 %v3132_v32, %s2904_s20  ;;  %2690 = vrot.lane.b32.xlu0 %v3113_v22, %s2904_s20  ;;  %v2507_v9 = vunpack.i.l.bf16 %v3293_v53  ;;  %v2493_v4 = vunpack.i.h.bf16 %v3270_v33  ;;  %v2492_v3 = vunpack.i.l.bf16 %v3270_v33 }
  0x9b   :  { %v186_v13 = vsel %vm183_vm0, %v2467_v8, %v4293_v46  ;;  %222 = vst [vmem:[#allocation2 + $0x10] sm:$0xff] %v210_v16  ;;  %v3361_v7 = vpop.permute.xlu2 %2535  ;;  %v2508_v8 = vunpack.i.h.bf16 %v3293_v53 }
  0x9c   :  { %v216_v12 = vpack.c.bf16 %v186_v13, %v190_v1  ;;  %223 = vst [vmem:[#allocation2 + $0x18] sm:$0xff] %v211_v24  ;;  %v2486_v34 = vpop.permute.xlu1 %2485  ;;  %v3363_v23 = vpop.permute.xlu0 %2480  ;;  %v2538_v22 = vunpack.i.h.bf16 %v3361_v7  ;;  %v2537_v32 = vunpack.i.l.bf16 %v3361_v7 }
  0x9d   :  { %225 = vst [vmem:[#allocation2 + $0x28] sm:$0xff] %v213_v49  ;;  %v2488_v39 = vunpack.i.h.bf16 %v2486_v34  ;;  %v2487_v27 = vunpack.i.l.bf16 %v2486_v34  ;;  %v2483_v52 = vunpack.i.h.bf16 %v3363_v23 }
  0x9e   :  { %231 = vst [vmem:[#allocation2 + $0x58] sm:$0xff] %v219_v41 }
  0x9f   :  { %228 = vst [vmem:[#allocation2 + $0x40] sm:$0xff] %v216_v12 }
  0xa1   :  { %2715 = vrot.lane.b32.xlu2 %v3007_v31, %s2906_s22  ;;  %v304_v31 = vsel %vm280_vm1, %v2538_v22, %v2488_v39 }
  0xa2   :  { %2710 = vrot.lane.b32.xlu1 %v3031_v42, %s2906_s22  ;;  %2705 = vrot.lane.b32.xlu0 %v3041_v47, %s2906_s22  ;;  %v303_v42 = vsel %vm280_vm1, %v2537_v32, %v2487_v27 }
  0xa3   :  { %v3371_v51 = vpop.permute.xlu2 %2550 }
  0xa4   :  { %v2501_v56 = vpop.permute.xlu1 %2500  ;;  %v2496_v5 = vpop.permute.xlu0 %2495 }
  0xa5   :  { %v2498_v62 = vunpack.i.h.bf16 %v2496_v5  ;;  %v2497_v55 = vunpack.i.l.bf16 %v2496_v5  ;;  %v2503_v2 = vunpack.i.h.bf16 %v2501_v56  ;;  %v2502_v24 = vunpack.i.l.bf16 %v2501_v56 }
  0xa7   :  { %v300_v47 = vsel %vm280_vm1, %v2488_v39, %v2498_v62  ;;  %v299_v29 = vsel %vm280_vm1, %v2487_v27, %v2497_v55  ;;  %v295_v13 = vsel %vm280_vm1, %v2497_v55, %v2507_v9  ;;  %v294_v41 = vsel %vm280_vm1, %v2493_v4, %v2503_v2 }
  0xa8   :  { %v314_v35 = vpack.c.bf16 %v300_v47, %v304_v31  ;;  %v311_v48 = vpack.c.bf16 %v299_v29, %v303_v42  ;;  %v2482_v27 = vunpack.i.l.bf16 %v3363_v23  ;;  %v293_v56 = vsel %vm280_vm1, %v2492_v3, %v2502_v24 }
  0xa9   :  { %2730 = vrot.lane.b32.xlu2 %v3202_v17, %s2905_s21  ;;  %v2523_v55 = vunpack.i.h.bf16 %v3325_v59  ;;  %v2522_v31 = vunpack.i.l.bf16 %v3325_v59 }
  0xaa   :  { %2725 = vrot.lane.b32.xlu1 %v2996_v25, %s2906_s22  ;;  %326 = vst [vmem:[#allocation2 + $0xa8] sm:$0xff] %v314_v35  ;;  %2720 = vrot.lane.b32.xlu0 %v3000_v28, %s2906_s22  ;;  %v296_v28 = vsel %vm280_vm1, %v2498_v62, %v2508_v8  ;;  %v297_v29 = vsel %vm280_vm1, %v2482_v27, %v2492_v3 }
  0xab   :  { %v3396_v26 = vpop.permute.xlu2 %2565  ;;  %323 = vst [vmem:[#allocation2 + $0x90] sm:$0xff] %v311_v48 }
  0xac   :  { %v2516_v16 = vpop.permute.xlu1 %2515  ;;  %v2511_v30 = vpop.permute.xlu0 %2510 }
  0xad   :  { %v2518_v49 = vunpack.i.h.bf16 %v2516_v16  ;;  %v2517_v25 = vunpack.i.l.bf16 %v2516_v16  ;;  %v2513_v53 = vunpack.i.h.bf16 %v2511_v30  ;;  %v2512_v46 = vunpack.i.l.bf16 %v2511_v30 }
  0xaf   :  { %v292_v33 = vsel %vm280_vm1, %v2508_v8, %v2518_v49  ;;  %v291_v1 = vsel %vm280_vm1, %v2507_v9, %v2517_v25  ;;  %v290_v39 = vsel %vm280_vm1, %v2503_v2, %v2513_v53  ;;  %v289_v62 = vsel %vm280_vm1, %v2502_v24, %v2512_v46 }
  0xb0   :  { %v312_v12 = vpack.c.bf16 %v291_v1, %v295_v13  ;;  %v315_v34 = vpack.c.bf16 %v292_v33, %v296_v28  ;;  %v309_v5 = vpack.c.bf16 %v290_v39, %v294_v41  ;;  %v306_v42 = vpack.c.bf16 %v289_v62, %v293_v56 }
  0xb1   :  { %2745 = vrot.lane.b32.xlu2 %v3202_v17, %s2907_s23  ;;  %v298_v17 = vsel %vm280_vm1, %v2483_v52, %v2493_v4  ;;  %v285_v8 = vsel %vm280_vm1, %v2512_v46, %v2522_v31 }
  0xb2   :  { %324 = vst [vmem:[#allocation2 + $0x98] sm:$0xff] %v312_v12  ;;  %2740 = vrot.lane.b32.xlu1 %v3182_v14, %s2907_s23  ;;  %2735 = vrot.lane.b32.xlu0 %v3198_v15, %s2905_s21  ;;  %v286_v14 = vsel %vm280_vm1, %v2513_v53, %v2523_v55 }
  0xb3   :  { %327 = vst [vmem:[#allocation2 + $0xb0] sm:$0xff] %v315_v34  ;;  %v3426_v23 = vpop.permute.xlu2 %2580 }
  0xb4   :  { %321 = vst [vmem:[#allocation2 + $0x80] sm:$0xff] %v309_v5  ;;  %v2531_v47 = vpop.permute.xlu1 %2530  ;;  %v2526_v48 = vpop.permute.xlu0 %2525 }
  0xb5   :  { %318 = vst [vmem:[#allocation2 + $0x68] sm:$0xff] %v306_v42  ;;  %v2533_v59 = vunpack.i.h.bf16 %v2531_v47  ;;  %v2532_v35 = vunpack.i.l.bf16 %v2531_v47  ;;  %v2528_v9 = vunpack.i.h.bf16 %v2526_v48  ;;  %v2527_v2 = vunpack.i.l.bf16 %v2526_v48 }
  0xb6   :  { %v2568_v47 = vunpack.i.h.bf16 %v3396_v26 }
  0xb7   :  { %v282_v16 = vsel %vm280_vm1, %v2523_v55, %v2533_v59  ;;  %v281_v4 = vsel %vm280_vm1, %v2522_v31, %v2532_v35  ;;  %v301_v3 = vsel %vm280_vm1, %v2532_v35, %v2482_v27  ;;  %v302_v24 = vsel %vm280_vm1, %v2533_v59, %v2483_v52 }
  0xb8   :  { %v305_v30 = vpack.c.bf16 %v297_v29, %v301_v3  ;;  %v307_v28 = vpack.c.bf16 %v281_v4, %v285_v8  ;;  %v308_v53 = vpack.c.bf16 %v298_v17, %v302_v24  ;;  %v310_v13 = vpack.c.bf16 %v282_v16, %v286_v14 }
  0xb9   :  { %v284_v46 = vsel %vm280_vm1, %v2528_v9, %v2538_v22  ;;  %v288_v33 = vsel %vm280_vm1, %v2518_v49, %v2528_v9  ;;  %v283_v1 = vsel %vm280_vm1, %v2527_v2, %v2537_v32  ;;  %v287_v52 = vsel %vm280_vm1, %v2517_v25, %v2527_v2  ;;  %2760 = vrot.lane.b32.xlu2 %v3200_v19, %s2905_s21 }
  0xba   :  { %317 = vst [vmem:[#allocation2 + $0x60] sm:$0xff] %v305_v30  ;;  %v316_v41 = vpack.c.bf16 %v284_v46, %v288_v33  ;;  %2755 = vrot.lane.b32.xlu1 %v3180_v63, %s2905_s21  ;;  %v313_v22 = vpack.c.bf16 %v283_v1, %v287_v52  ;;  %2750 = vrot.lane.b32.xlu0 %v3198_v15, %s2907_s23  ;;  %v2567_v17 = vunpack.i.l.bf16 %v3396_v26  ;;  %v2553_v59 = vunpack.i.h.bf16 %v3371_v51 }
  0xbb   :  { %319 = vst [vmem:[#allocation2 + $0x70] sm:$0xff] %v307_v28  ;;  %v3462_v7 = vpop.permute.xlu2 %2595  ;;  %v2552_v35 = vunpack.i.l.bf16 %v3371_v51  ;;  %v2583_v52 = vunpack.i.h.bf16 %v3426_v23 }
  0xbc   :  { %320 = vst [vmem:[#allocation2 + $0x78] sm:$0xff] %v308_v53  ;;  %v2546_v32 = vpop.permute.xlu1 %2545  ;;  %v3464_v49 = vpop.permute.xlu0 %2540  ;;  %v2598_v15 = vunpack.i.h.bf16 %v3462_v7  ;;  %v2597_v12 = vunpack.i.l.bf16 %v3462_v7 }
  0xbd   :  { %322 = vst [vmem:[#allocation2 + $0x88] sm:$0xff] %v310_v13  ;;  %v2548_v34 = vunpack.i.h.bf16 %v2546_v32  ;;  %v2547_v39 = vunpack.i.l.bf16 %v2546_v32  ;;  %v2543_v2 = vunpack.i.h.bf16 %v3464_v49  ;;  %v2542_v13 = vunpack.i.l.bf16 %v3464_v49 }
  0xbe   :  { %328 = vst [vmem:[#allocation2 + $0xb8] sm:$0xff] %v316_v41  ;;  %v2582_v41 = vunpack.i.l.bf16 %v3426_v23 }
  0xbf   :  { %325 = vst [vmem:[#allocation2 + $0xa0] sm:$0xff] %v313_v22 }
  0xc1   :  { %2775 = vrot.lane.b32.xlu2 %v3200_v19, %s2907_s23 }
  0xc2   :  { %2770 = vrot.lane.b32.xlu1 %v3180_v63, %s2907_s23  ;;  %2765 = vrot.lane.b32.xlu0 %v3184_v10, %s2907_s23  ;;  %v401_v63 = vsel %vm377_vm2, %v2598_v15, %v2548_v34  ;;  %v400_v10 = vsel %vm377_vm2, %v2597_v12, %v2547_v39 }
  0xc3   :  { %v3472_v25 = vpop.permute.xlu2 %2610 }
  0xc4   :  { %v2561_v27 = vpop.permute.xlu1 %2560  ;;  %v2556_v56 = vpop.permute.xlu0 %2555 }
  0xc5   :  { %v2558_v5 = vunpack.i.h.bf16 %v2556_v56  ;;  %v2557_v62 = vunpack.i.l.bf16 %v2556_v56  ;;  %v2563_v48 = vunpack.i.h.bf16 %v2561_v27  ;;  %v2562_v14 = vunpack.i.l.bf16 %v2561_v27 }
  0xc7   :  { %v397_v19 = vsel %vm377_vm2, %v2548_v34, %v2558_v5  ;;  %v396_v55 = vsel %vm377_vm2, %v2547_v39, %v2557_v62  ;;  %v392_v4 = vsel %vm377_vm2, %v2557_v62, %v2567_v17  ;;  %v391_v24 = vsel %vm377_vm2, %v2553_v59, %v2563_v48 }
  0xc8   :  { %v411_v31 = vpack.c.bf16 %v397_v19, %v401_v63  ;;  %v408_v42 = vpack.c.bf16 %v396_v55, %v400_v10  ;;  %v390_v46 = vsel %vm377_vm2, %v2552_v35, %v2562_v14  ;;  %v394_v34 = vsel %vm377_vm2, %v2542_v13, %v2552_v35 }
  0xc9   :  { %2790 = vrot.lane.b32.xlu2 %v3151_v38, %s2904_s20 }
  0xca   :  { %2785 = vrot.lane.b32.xlu1 %v3169_v50, %s2904_s20  ;;  %423 = vst [vmem:[#allocation2 + $0x108] sm:$0xff] %v411_v31  ;;  %2780 = vrot.lane.b32.xlu0 %v3147_v37, %s2904_s20  ;;  %v393_v37 = vsel %vm377_vm2, %v2558_v5, %v2568_v47 }
  0xcb   :  { %v3497_v29 = vpop.permute.xlu2 %2625  ;;  %420 = vst [vmem:[#allocation2 + $0xf0] sm:$0xff] %v408_v42 }
  0xcc   :  { %v2576_v38 = vpop.permute.xlu1 %2575  ;;  %v2571_v9 = vpop.permute.xlu0 %2570 }
  0xcd   :  { %v2578_v8 = vunpack.i.h.bf16 %v2576_v38  ;;  %v2577_v50 = vunpack.i.l.bf16 %v2576_v38  ;;  %v2573_v26 = vunpack.i.h.bf16 %v2571_v9  ;;  %v2572_v16 = vunpack.i.l.bf16 %v2571_v9 }
  0xcf   :  { %v389_v51 = vsel %vm377_vm2, %v2568_v47, %v2578_v8  ;;  %v388_v3 = vsel %vm377_vm2, %v2567_v17, %v2577_v50  ;;  %v387_v53 = vsel %vm377_vm2, %v2563_v48, %v2573_v26  ;;  %v386_v1 = vsel %vm377_vm2, %v2562_v14, %v2572_v16 }
  0xd0   :  { %v409_v30 = vpack.c.bf16 %v388_v3, %v392_v4  ;;  %v412_v28 = vpack.c.bf16 %v389_v51, %v393_v37  ;;  %v406_v33 = vpack.c.bf16 %v387_v53, %v391_v24  ;;  %v403_v22 = vpack.c.bf16 %v386_v1, %v390_v46 }
  0xd1   :  { %2805 = vrot.lane.b32.xlu2 %v3103_v21, %s2906_s22  ;;  %v395_v21 = vsel %vm377_vm2, %v2543_v2, %v2553_v59  ;;  %v2628_v53 = vunpack.i.h.bf16 %v3497_v29  ;;  %v2612_v1 = vunpack.i.l.bf16 %v3472_v25 }
  0xd2   :  { %421 = vst [vmem:[#allocation2 + $0xf8] sm:$0xff] %v409_v30  ;;  %2800 = vrot.lane.b32.xlu1 %v3075_v0, %s2906_s22  ;;  %2795 = vrot.lane.b32.xlu0 %v3143_v36, %s2904_s20  ;;  %v383_v0 = vsel %vm377_vm2, %v2573_v26, %v2583_v52  ;;  %v382_v36 = vsel %vm377_vm2, %v2572_v16, %v2582_v41 }
  0xd3   :  { %424 = vst [vmem:[#allocation2 + $0x110] sm:$0xff] %v412_v28  ;;  %v3527_v32 = vpop.permute.xlu2 %2640 }
  0xd4   :  { %418 = vst [vmem:[#allocation2 + $0xe0] sm:$0xff] %v406_v33  ;;  %v2591_v49 = vpop.permute.xlu1 %2590  ;;  %v2586_v27 = vpop.permute.xlu0 %2585  ;;  %v2613_v33 = vunpack.i.h.bf16 %v3472_v25 }
  0xd5   :  { %415 = vst [vmem:[#allocation2 + $0xc8] sm:$0xff] %v403_v22  ;;  %v2593_v23 = vunpack.i.h.bf16 %v2591_v49  ;;  %v2592_v39 = vunpack.i.l.bf16 %v2591_v49  ;;  %v2588_v56 = vunpack.i.h.bf16 %v2586_v27  ;;  %v2587_v5 = vunpack.i.l.bf16 %v2586_v27 }
  0xd7   :  { %v379_v62 = vsel %vm377_vm2, %v2583_v52, %v2593_v23  ;;  %v378_v63 = vsel %vm377_vm2, %v2582_v41, %v2592_v39  ;;  %v398_v10 = vsel %vm377_vm2, %v2592_v39, %v2542_v13  ;;  %v399_v19 = vsel %vm377_vm2, %v2593_v23, %v2543_v2 }
  0xd8   :  { %v402_v55 = vpack.c.bf16 %v394_v34, %v398_v10  ;;  %v404_v31 = vpack.c.bf16 %v378_v63, %v382_v36  ;;  %v405_v42 = vpack.c.bf16 %v395_v21, %v399_v19  ;;  %v407_v47 = vpack.c.bf16 %v379_v62, %v383_v0 }
  0xd9   :  { %v381_v17 = vsel %vm377_vm2, %v2588_v56, %v2598_v15  ;;  %v385_v59 = vsel %vm377_vm2, %v2578_v8, %v2588_v56  ;;  %v380_v35 = vsel %vm377_vm2, %v2587_v5, %v2597_v12  ;;  %v384_v48 = vsel %vm377_vm2, %v2577_v50, %v2587_v5  ;;  %2820 = vrot.lane.b32.xlu2 %v3218_v43, %s2905_s21 }
  0xda   :  { %414 = vst [vmem:[#allocation2 + $0xc0] sm:$0xff] %v402_v55  ;;  %v413_v38 = vpack.c.bf16 %v381_v17, %v385_v59  ;;  %2815 = vrot.lane.b32.xlu1 %v3068_v60, %s2906_s22  ;;  %v410_v15 = vpack.c.bf16 %v380_v35, %v384_v48  ;;  %2810 = vrot.lane.b32.xlu0 %v3081_v6, %s2906_s22  ;;  %v2627_v13 = vunpack.i.l.bf16 %v3497_v29  ;;  %v2643_v19 = vunpack.i.h.bf16 %v3527_v32 }
  0xdb   :  { %416 = vst [vmem:[#allocation2 + $0xd0] sm:$0xff] %v404_v31  ;;  %v3563_v7 = vpop.permute.xlu2 %2655  ;;  %v2642_v55 = vunpack.i.l.bf16 %v3527_v32 }
  0xdc   :  { %417 = vst [vmem:[#allocation2 + $0xd8] sm:$0xff] %v405_v42  ;;  %v2606_v12 = vpop.permute.xlu1 %2605  ;;  %v3565_v14 = vpop.permute.xlu0 %2600  ;;  %v2658_v6 = vunpack.i.h.bf16 %v3563_v7  ;;  %v2657_v8 = vunpack.i.l.bf16 %v3563_v7 }
  0xdd   :  { %419 = vst [vmem:[#allocation2 + $0xe8] sm:$0xff] %v407_v47  ;;  %v2608_v50 = vunpack.i.h.bf16 %v2606_v12  ;;  %v2607_v9 = vunpack.i.l.bf16 %v2606_v12  ;;  %v2603_v21 = vunpack.i.h.bf16 %v3565_v14  ;;  %v2602_v5 = vunpack.i.l.bf16 %v3565_v14 }
  0xde   :  { %425 = vst [vmem:[#allocation2 + $0x118] sm:$0xff] %v413_v38 }
  0xdf   :  { %422 = vst [vmem:[#allocation2 + $0x100] sm:$0xff] %v410_v15  ;;  %v498_v4 = vsel %vm474_vm3, %v2658_v6, %v2608_v50  ;;  %v497_v51 = vsel %vm474_vm3, %v2657_v8, %v2607_v9  ;;  %v492_v32 = vsel %vm474_vm3, %v2603_v21, %v2613_v33 }
  0xe1   :  { %2835 = vrot.lane.b32.xlu2 %v3216_v54, %s2905_s21 }
  0xe2   :  { %2830 = vrot.lane.b32.xlu1 %v3220_v44, %s2905_s21  ;;  %2825 = vrot.lane.b32.xlu0 %v3238_v61, %s2905_s21 }
  0xe3   :  { %v3573_v60 = vpop.permute.xlu2 %2670 }
  0xe4   :  { %v2621_v2 = vpop.permute.xlu1 %2620  ;;  %v2616_v26 = vpop.permute.xlu0 %2615 }
  0xe5   :  { %v2618_v16 = vunpack.i.h.bf16 %v2616_v26  ;;  %v2617_v37 = vunpack.i.l.bf16 %v2616_v26  ;;  %v2623_v52 = vunpack.i.h.bf16 %v2621_v2  ;;  %v2622_v41 = vunpack.i.l.bf16 %v2621_v2 }
  0xe7   :  { %v494_v3 = vsel %vm474_vm3, %v2608_v50, %v2618_v16  ;;  %v493_v24 = vsel %vm474_vm3, %v2607_v9, %v2617_v37  ;;  %v489_v23 = vsel %vm474_vm3, %v2617_v37, %v2627_v13  ;;  %v488_v27 = vsel %vm474_vm3, %v2613_v33, %v2623_v52 }
  0xe8   :  { %v508_v30 = vpack.c.bf16 %v494_v3, %v498_v4  ;;  %v505_v28 = vpack.c.bf16 %v493_v24, %v497_v51  ;;  %v487_v62 = vsel %vm474_vm3, %v2612_v1, %v2622_v41 }
  0xe9   :  { %2850 = vrot.lane.b32.xlu2 %v3220_v44, %s2907_s23 }
  0xea   :  { %2845 = vrot.lane.b32.xlu1 %v3238_v61, %s2907_s23  ;;  %520 = vst [vmem:[#allocation2 + $0x168] sm:$0xff] %v508_v30  ;;  %2840 = vrot.lane.b32.xlu0 %v3218_v43, %s2907_s23  ;;  %v490_v43 = vsel %vm474_vm3, %v2618_v16, %v2628_v53 }
  0xeb   :  { %v3598_v46 = vpop.permute.xlu2 %2685  ;;  %517 = vst [vmem:[#allocation2 + $0x150] sm:$0xff] %v505_v28 }
  0xec   :  { %v2636_v44 = vpop.permute.xlu1 %2635  ;;  %v2631_v49 = vpop.permute.xlu0 %2630 }
  0xed   :  { %v2638_v22 = vunpack.i.h.bf16 %v2636_v44  ;;  %v2637_v61 = vunpack.i.l.bf16 %v2636_v44  ;;  %v2633_v29 = vunpack.i.h.bf16 %v2631_v49  ;;  %v2632_v34 = vunpack.i.l.bf16 %v2631_v49 }
  0xee   :  { %v4279_v49 = vunpack.i.h.bf16 %v3573_v60 }
  0xef   :  { %v486_v25 = vsel %vm474_vm3, %v2628_v53, %v2638_v22  ;;  %v485_v39 = vsel %vm474_vm3, %v2627_v13, %v2637_v61  ;;  %v484_v56 = vsel %vm474_vm3, %v2623_v52, %v2633_v29  ;;  %v483_v10 = vsel %vm474_vm3, %v2622_v41, %v2632_v34 }
  0xf0   :  { %v506_v0 = vpack.c.bf16 %v485_v39, %v489_v23  ;;  %v509_v36 = vpack.c.bf16 %v486_v25, %v490_v43  ;;  %v503_v63 = vpack.c.bf16 %v484_v56, %v488_v27  ;;  %v500_v31 = vpack.c.bf16 %v483_v10, %v487_v62  ;;  %v1986_v23 = vld [vmem:[#allocation2 + $0xf0] sm:$0xf]  ;;  %v2332_v25 = vld [vmem:[#allocation2 + $0xf4] sm:$0xf]  ;;  %v1988_v39 = vld [vmem:[#allocation2 + $0x108] sm:$0xf0] }
  0xf1   :  { %2865 = vrot.lane.b32.xlu2 %v3165_v45, %s2904_s20  ;;  %v2347_v42 = vld [vmem:[#allocation2 + $0x164] sm:$0xf0]  ;;  %v2036_v47 = vld [vmem:[#allocation2 + $0x168] sm:$0xf0]  ;;  %v479_v50 = vsel %vm474_vm3, %v2632_v34, %v2642_v55 }
  0xf2   :  { %518 = vst [vmem:[#allocation2 + $0x158] sm:$0xff] %v506_v0  ;;  %2860 = vrot.lane.b32.xlu1 %v3161_v40, %s2904_s20  ;;  %2855 = vrot.lane.b32.xlu0 %v3216_v54, %s2907_s23  ;;  %v2034_v59 = vld [vmem:[#allocation2 + $0x150] sm:$0xf]  ;;  %v2344_v35 = vld [vmem:[#allocation2 + $0x154] sm:$0xf]  ;;  %v491_v40 = vsel %vm474_vm3, %v2602_v5, %v2612_v1  ;;  %v480_v54 = vsel %vm474_vm3, %v2633_v29, %v2643_v19 }
  0xf3   :  { %521 = vst [vmem:[#allocation2 + $0x170] sm:$0xff] %v509_v36  ;;  %v3628_v17 = vpop.permute.xlu2 %2700  ;;  %v2035_v48 = vor.u32 %v2347_v42, %v2034_v59  ;;  %v2039_v38 = vor.u32 %v2344_v35, %v2036_v47  ;;  %v2329_v47 = vld [vmem:[#allocation2 + $0xd4] sm:$0xf0]  ;;  %v2326_v59 = vld [vmem:[#allocation2 + $0xc4] sm:$0xf] }
  0xf4   :  { %515 = vst [vmem:[#allocation2 + $0x140] sm:$0xff] %v503_v63  ;;  %v2651_v45 = vpop.permute.xlu1 %2650  ;;  %v2646_v14 = vpop.permute.xlu0 %2645  ;;  %v1964_v35 = vld [vmem:[#allocation2 + $0xd8] sm:$0xf0] }
  0xf5   :  { %512 = vst [vmem:[#allocation2 + $0x128] sm:$0xff] %v500_v31  ;;  %v2653_v15 = vunpack.i.h.bf16 %v2651_v45  ;;  %v2652_v12 = vunpack.i.l.bf16 %v2651_v45  ;;  %v2648_v9 = vunpack.i.h.bf16 %v2646_v14  ;;  %v2647_v2 = vunpack.i.l.bf16 %v2646_v14  ;;  %1593 = vmatpush.bf16.msra.mxu0 %v2035_v48  ;;  %1632 = vmatpush.bf16.msra.mxu3 %v2039_v38  ;;  %v2323_v48 = vld [vmem:[#allocation2 + $0xa4] sm:$0xf0]  ;;  %v1940_v38 = vld [vmem:[#allocation2 + $0xa8] sm:$0xf0] }
  0xf6   :  { %v1967_v14 = vor.u32 %v2326_v59, %v1964_v35 }
  0xf7   :  { %v476_v26 = vsel %vm474_vm3, %v2643_v19, %v2653_v15  ;;  %v475_v16 = vsel %vm474_vm3, %v2642_v55, %v2652_v12  ;;  %v495_v37 = vsel %vm474_vm3, %v2652_v12, %v2602_v5  ;;  %v496_v4 = vsel %vm474_vm3, %v2653_v15, %v2603_v21  ;;  %v1962_v55 = vld [vmem:[#allocation2 + $0xc0] sm:$0xf] }
  0xf8   :  { %v499_v51 = vpack.c.bf16 %v491_v40, %v495_v37  ;;  %v501_v3 = vpack.c.bf16 %v475_v16, %v479_v50  ;;  %v502_v24 = vpack.c.bf16 %v492_v32, %v496_v4  ;;  %v504_v30 = vpack.c.bf16 %v476_v26, %v480_v54  ;;  %v1938_v54 = vld [vmem:[#allocation2 + $0x90] sm:$0xf]  ;;  %v2320_v50 = vld [vmem:[#allocation2 + $0x94] sm:$0xf] }
  0xf9   :  { %v478_v28 = vsel %vm474_vm3, %v2648_v9, %v2658_v6  ;;  %v482_v53 = vsel %vm474_vm3, %v2638_v22, %v2648_v9  ;;  %v477_v13 = vsel %vm474_vm3, %v2647_v2, %v2657_v8  ;;  %v481_v33 = vsel %vm474_vm3, %v2637_v61, %v2647_v2  ;;  %2880 = vrot.lane.b32.xlu2 %v3101_v20, %s2906_s22  ;;  %v2335_v61 = vld [vmem:[#allocation2 + $0x104] sm:$0xf0] }
  0xfa   :  { %511 = vst [vmem:[#allocation2 + $0x120] sm:$0xff] %v499_v51  ;;  %v510_v1 = vpack.c.bf16 %v478_v28, %v482_v53  ;;  %2875 = vrot.lane.b32.xlu1 %v3234_v57, %s2907_s23  ;;  %v507_v6 = vpack.c.bf16 %v477_v13, %v481_v33  ;;  %2870 = vrot.lane.b32.xlu0 %v3099_v18, %s2906_s22  ;;  %v4277_v21 = vunpack.i.l.bf16 %v3573_v60  ;;  %v2688_v32 = vunpack.i.h.bf16 %v3598_v46  ;;  %v1914_v33 = vld [vmem:[#allocation2 + $0x60] sm:$0xf] }
  0xfb   :  { %513 = vst [vmem:[#allocation2 + $0x130] sm:$0xff] %v501_v3  ;;  %v3664_v7 = vpop.permute.xlu2 %2715  ;;  %v1987_v56 = vor.u32 %v2335_v61, %v1986_v23  ;;  %v1991_v5 = vor.u32 %v2332_v25, %v1988_v39  ;;  %v2687_v40 = vunpack.i.l.bf16 %v3598_v46  ;;  %v1963_v12 = vor.u32 %v2329_v47, %v1962_v55  ;;  %v1890_v39 = vld [vmem:[#allocation2 + $0x30] sm:$0xf] }
  0xfc   :  { %514 = vst [vmem:[#allocation2 + $0x138] sm:$0xff] %v502_v24  ;;  %v3666_v8 = vpop.permute.xlu1 %2665  ;;  %v3668_v52 = vpop.permute.xlu0 %2660  ;;  %v1939_v4 = vor.u32 %v2323_v48, %v1938_v54  ;;  %v1943_v51 = vor.u32 %v2320_v50, %v1940_v38  ;;  %v4274_v61 = vunpack.i.h.bf16 %v3628_v17  ;;  %v2302_v50 = vld [vmem:[#allocation2 + $0x4] sm:$0xf] }
  0xfd   :  { %516 = vst [vmem:[#allocation2 + $0x148] sm:$0xff] %v504_v30 }
  0xfe   :  { %522 = vst [vmem:[#allocation2 + $0x178] sm:$0xff] %v510_v1  ;;  %v2317_v1 = vld [vmem:[#allocation2 + $0x74] sm:$0xf0] }
  0xff   :  { %519 = vst [vmem:[#allocation2 + $0x160] sm:$0xff] %v507_v6  ;;  %v1915_v23 = vor.u32 %v2317_v1, %v1914_v33 }
 0x101   :  { %2895 = vrot.lane.b32.xlu2 %v3236_v58, %s2905_s21  ;;  %v2010_v20 = vld [vmem:[#allocation2 + $0x120] sm:$0xf]  ;;  %v2338_v44 = vld [vmem:[#allocation2 + $0x124] sm:$0xf] }
 0x102   :  { %2890 = vrot.lane.b32.xlu1 %v3234_v57, %s2905_s21  ;;  %2885 = vrot.lane.b32.xlu0 %v3236_v58, %s2907_s23 }
 0x103   :  { %v3676_v18 = vpop.permute.xlu2 %2730  ;;  %v2341_v41 = vld [vmem:[#allocation2 + $0x134] sm:$0xf0]  ;;  %v2012_v22 = vld [vmem:[#allocation2 + $0x138] sm:$0xf0] }
 0x104   :  { %v3680_v29 = vpop.permute.xlu1 %2680  ;;  %v2011_v34 = vor.u32 %v2341_v41, %v2010_v20  ;;  %v2015_v43 = vor.u32 %v2338_v44, %v2012_v22  ;;  %v2676_v27 = vpop.permute.xlu0 %2675  ;;  %v2314_v20 = vld [vmem:[#allocation2 + $0x64] sm:$0xf]  ;;  %v1916_v44 = vld [vmem:[#allocation2 + $0x78] sm:$0xf0] }
 0x105   :  { %v2683_v57 = vunpack.i.h.bf16 %v3680_v29  ;;  %v2682_v58 = vunpack.i.l.bf16 %v3680_v29  ;;  %v2678_v0 = vunpack.i.h.bf16 %v2676_v27  ;;  %v2677_v36 = vunpack.i.l.bf16 %v2676_v27  ;;  %v2311_v27 = vld [vmem:[#allocation2 + $0x44] sm:$0xf0] }
 0x106   :  { %1594 = vmatpush.bf16.msra.mxu0 %v2011_v34  ;;  %1633 = vmatpush.bf16.msra.mxu3 %v2015_v43  ;;  %v4273_v34 = vunpack.i.l.bf16 %v3628_v17  ;;  %v1891_v55 = vor.u32 %v2311_v27, %v1890_v39 }
 0x107   :  { %v793_v62 = vsel %vm777_vm4, %v2678_v0, %v2683_v57  ;;  %v797_v63 = vsel %vm777_vm4, %v4279_v49, %v2678_v0  ;;  %v792_v10 = vsel %vm777_vm4, %v2677_v36, %v2682_v58  ;;  %v796_v19 = vsel %vm777_vm4, %v4277_v21, %v2677_v36 }
 0x108   :  { %v811_v31 = vpack.c.bf16 %v793_v62, %v797_v63  ;;  %v808_v42 = vpack.c.bf16 %v792_v10, %v796_v19  ;;  %v2308_v10 = vld [vmem:[#allocation2 + $0x34] sm:$0xf]  ;;  %v1892_v19 = vld [vmem:[#allocation2 + $0x48] sm:$0xf0] }
 0x109   :  { %v1895_v38 = vor.u32 %v2308_v10, %v1892_v19 }
 0x10a   :  { %1595 = vmatpush.bf16.msra.mxu0 %v1987_v56  ;;  %1634 = vmatpush.bf16.msra.mxu3 %v1991_v5  ;;  %823 = vst [vmem:[#allocation2 + $0x2e8] sm:$0xff] %v811_v31  ;;  %v1919_v5 = vor.u32 %v2314_v20, %v1916_v44 }
 0x10b   :  { %v3701_v45 = vpop.permute.xlu2 %2745  ;;  %820 = vst [vmem:[#allocation2 + $0x2d0] sm:$0xff] %v808_v42 }
 0x10c   :  { %v3705_v15 = vpop.permute.xlu1 %2695  ;;  %v2691_v26 = vpop.permute.xlu0 %2690 }
 0x10d   :  { %v2698_v9 = vunpack.i.h.bf16 %v3705_v15  ;;  %v2697_v2 = vunpack.i.l.bf16 %v3705_v15  ;;  %v2693_v16 = vunpack.i.h.bf16 %v2691_v26  ;;  %v2692_v37 = vunpack.i.l.bf16 %v2691_v26  ;;  %v1868_v26 = vld [vmem:[#allocation2 + $0x18] sm:$0xf0] }
 0x10e   :  { %1596 = vmatpush.bf16.msra.mxu0 %v1963_v12  ;;  %1635 = vmatpush.bf16.msra.mxu3 %v1967_v14  ;;  %v1866_v12 = vld [vmem:[#allocation2] sm:$0xf]  ;;  %v2305_v14 = vld [vmem:[#allocation2 + $0x14] sm:$0xf0]  ;;  %v1871_v33 = vor.u32 %v2302_v50, %v1868_v26 }
 0x10f   :  { %v791_v3 = vsel %vm777_vm4, %v2693_v16, %v2698_v9  ;;  %v795_v24 = vsel %vm777_vm4, %v2688_v32, %v2693_v16  ;;  %v790_v30 = vsel %vm777_vm4, %v2692_v37, %v2697_v2  ;;  %v794_v28 = vsel %vm777_vm4, %v2687_v40, %v2692_v37 }
 0x110   :  { %v805_v53 = vpack.c.bf16 %v791_v3, %v795_v24  ;;  %v802_v13 = vpack.c.bf16 %v790_v30, %v794_v28  ;;  %v1867_v24 = vor.u32 %v2305_v14, %v1866_v12 }
 0x111   :  { %v2395_v6 = vld [vmem:[#allocation2 + $0x2e4] sm:$0xf0] }
 0x112   :  { %1597 = vmatpush.bf16.msra.mxu0 %v1939_v4  ;;  %1636 = vmatpush.bf16.msra.mxu3 %v1943_v51  ;;  %817 = vst [vmem:[#allocation2 + $0x2b8] sm:$0xff] %v805_v53  ;;  %v2226_v22 = vld [vmem:[#allocation2 + $0x2d0] sm:$0xf]  ;;  %v2718_v4 = vunpack.i.h.bf16 %v3664_v7  ;;  %v2717_v51 = vunpack.i.l.bf16 %v3664_v7 }
 0x113   :  { %v3725_v41 = vpop.permute.xlu2 %2760  ;;  %814 = vst [vmem:[#allocation2 + $0x2a0] sm:$0xff] %v802_v13  ;;  %v2227_v25 = vor.u32 %v2395_v6, %v2226_v22 }
 0x114   :  { %v3729_v43 = vpop.permute.xlu1 %2710  ;;  %v2706_v56 = vpop.permute.xlu0 %2705 }
 0x115   :  { %v2713_v0 = vunpack.i.h.bf16 %v3729_v43  ;;  %v2712_v36 = vunpack.i.l.bf16 %v3729_v43  ;;  %v2708_v62 = vunpack.i.h.bf16 %v2706_v56  ;;  %v2707_v63 = vunpack.i.l.bf16 %v2706_v56  ;;  %1606 = vmatpush.bf16.msra.mxu1 %v2227_v25 }
 0x116   :  { %1598 = vmatpush.bf16.msra.mxu0 %v1915_v23  ;;  %1637 = vmatpush.bf16.msra.mxu3 %v1919_v5 }
 0x117   :  { %v696_v31 = vsel %vm680_vm5, %v2708_v62, %v2713_v0  ;;  %v700_v42 = vsel %vm680_vm5, %v4274_v61, %v2708_v62  ;;  %v695_v47 = vsel %vm680_vm5, %v2707_v63, %v2712_v36  ;;  %v699_v59 = vsel %vm680_vm5, %v4273_v34, %v2707_v63 }
 0x118   :  { %v714_v35 = vpack.c.bf16 %v696_v31, %v700_v42  ;;  %v711_v48 = vpack.c.bf16 %v695_v47, %v699_v59  ;;  %v2733_v62 = vunpack.i.h.bf16 %v3676_v18  ;;  %v2732_v63 = vunpack.i.l.bf16 %v3676_v18  ;;  %v3786_v31 = vld [vmem:[%s4267_s1] sm:$0xff] }
 0x119   :  { %v2389_v54 = vld [vmem:[#allocation2 + $0x2b4] sm:$0xf0]  ;;  %v4271_v42 = vunpack.i.h.bf16 %v3666_v8  ;;  %v4272_v47 = vunpack.i.l.bf16 %v3666_v8 }
 0x11a   :  { %1599 = vmatpush.bf16.msra.mxu0 %v1891_v55  ;;  %726 = vst [vmem:[#allocation2 + $0x288] sm:$0xff] %v714_v35  ;;  %1638 = vmatpush.bf16.msra.mxu3 %v1895_v38  ;;  %v2202_v37 = vld [vmem:[#allocation2 + $0x2a0] sm:$0xf]  ;;  %v1041_v35 = vunpack.c.l.b16 %v3786_v31 }
 0x11b   :  { %v3750_v16 = vpop.permute.xlu2 %2775  ;;  %723 = vst [vmem:[#allocation2 + $0x270] sm:$0xff] %v711_v48  ;;  %v2203_v30 = vor.u32 %v2389_v54, %v2202_v37  ;;  %v603_v48 = vsel %vm583_vm6, %v4271_v42, %v2733_v62  ;;  %v602_v38 = vsel %vm583_vm6, %v4272_v47, %v2732_v63  ;;  %v2748_v37 = vunpack.i.h.bf16 %v3701_v45 }
 0x11c   :  { %v3754_v3 = vpop.permute.xlu1 %2725  ;;  %v2721_v13 = vpop.permute.xlu0 %2720  ;;  %v3809_v26 = vpack.c.b16 %v1041_v35, %v1041_v35  ;;  %v4281_v42 = vunpack.i.h.bf16 %v3750_v16 }
 0x11d   :  { %v2728_v28 = vunpack.i.h.bf16 %v3754_v3  ;;  %v2727_v53 = vunpack.i.l.bf16 %v3754_v3  ;;  %v2723_v1 = vunpack.i.h.bf16 %v2721_v13  ;;  %v2722_v6 = vunpack.i.l.bf16 %v2721_v13  ;;  %1607 = vmatpush.bf16.msra.mxu1 %v2203_v30 }
 0x11e   :  { %1600 = vmatpush.bf16.msra.mxu0 %v1867_v24  ;;  %1639 = vmatpush.bf16.msra.mxu3 %v1871_v33  ;;  %v2747_v24 = vunpack.i.l.bf16 %v3701_v45 }
 0x11f   :  { %v694_v20 = vsel %vm680_vm5, %v2723_v1, %v2728_v28  ;;  %v698_v44 = vsel %vm680_vm5, %v2718_v4, %v2723_v1  ;;  %v693_v22 = vsel %vm680_vm5, %v2722_v6, %v2727_v53  ;;  %v697_v23 = vsel %vm680_vm5, %v2717_v51, %v2722_v6 }
 0x120   :  { %v708_v25 = vpack.c.bf16 %v694_v20, %v698_v44  ;;  %v705_v39 = vpack.c.bf16 %v693_v22, %v697_v23  ;;  %v2763_v1 = vunpack.i.h.bf16 %v3725_v41  ;;  %v2762_v6 = vunpack.i.l.bf16 %v3725_v41 }
 0x121   :  { %v2383_v27 = vld [vmem:[#allocation2 + $0x284] sm:$0xf0]  ;;  %1601 = vmatmul.bf16.vlgmr.msra.gmra.mxu0 %v3809_v26  ;;  %1640 = vmatmul.bf16.vlgmr.msra.gmra.mxu3 %v3809_v26  ;;  %v4286_v23 = vunpack.i.h.bf16 %v3668_v52 }
 0x122   :  { %720 = vst [vmem:[#allocation2 + $0x258] sm:$0xff] %v708_v25  ;;  %v2178_v5 = vld [vmem:[#allocation2 + $0x270] sm:$0xf]  ;;  %v4287_v25 = vunpack.i.l.bf16 %v3668_v52 }
 0x123   :  { %v3774_v56 = vpop.permute.xlu2 %2790  ;;  %717 = vst [vmem:[#allocation2 + $0x240] sm:$0xff] %v705_v39  ;;  %v2179_v19 = vor.u32 %v2383_v27, %v2178_v5 }
 0x124   :  { %v3778_v10 = vpop.permute.xlu1 %2740  ;;  %v3781_v55 = vpop.permute.xlu0 %2735 }
 0x125   :  { %v4289_v59 = vunpack.i.h.bf16 %v3781_v55  ;;  %v4290_v18 = vunpack.i.l.bf16 %v3781_v55  ;;  %1608 = vmatpush.bf16.msra.mxu1 %v2179_v19  ;;  %v4275_v30 = vunpack.i.h.bf16 %v3778_v10  ;;  %v4276_v13 = vunpack.i.l.bf16 %v3778_v10 }
 0x127   :  { %v599_v12 = vsel %vm583_vm6, %v2733_v62, %v4289_v59  ;;  %v598_v14 = vsel %vm583_vm6, %v2732_v63, %v4290_v18  ;;  %v893_v62 = vsel %vm874_vm7, %v4276_v13, %v2747_v24  ;;  %v894_v63 = vsel %vm874_vm7, %v4275_v30, %v2748_v37 }
 0x128   :  { %v617_v54 = vpack.c.bf16 %v599_v12, %v603_v48  ;;  %v614_v50 = vpack.c.bf16 %v598_v14, %v602_v38 }
 0x129   :  { %v2377_v33 = vld [vmem:[#allocation2 + $0x254] sm:$0xf0] }
 0x12a   :  { %629 = vst [vmem:[#allocation2 + $0x228] sm:$0xff] %v617_v54  ;;  %v2154_v44 = vld [vmem:[#allocation2 + $0x240] sm:$0xf] }
 0x12b   :  { %v3818_v20 = vpop.permute.xlu2 %2805  ;;  %626 = vst [vmem:[#allocation2 + $0x210] sm:$0xff] %v614_v50  ;;  %v2155_v22 = vor.u32 %v2377_v33, %v2154_v44 }
 0x12c   :  { %v2756_v45 = vpop.permute.xlu1 %2755  ;;  %v3824_v5 = vpop.permute.xlu0 %2750  ;;  %v4292_v29 = vunpack.i.h.bf16 %v3818_v20 }
 0x12d   :  { %v2758_v39 = vunpack.i.h.bf16 %v2756_v45  ;;  %v2757_v27 = vunpack.i.l.bf16 %v2756_v45  ;;  %v4285_v19 = vunpack.i.h.bf16 %v3824_v5  ;;  %v4284_v35 = vunpack.i.l.bf16 %v3824_v5  ;;  %1609 = vmatpush.bf16.msra.mxu1 %v2155_v22 }
 0x12f   :  { %v596_v48 = vsel %vm583_vm6, %v2757_v27, %v2762_v6  ;;  %v597_v38 = vsel %vm583_vm6, %v2758_v39, %v2763_v1  ;;  %v600_v12 = vsel %vm583_vm6, %v4287_v25, %v2757_v27  ;;  %v601_v14 = vsel %vm583_vm6, %v4286_v23, %v2758_v39 }
 0x130   :  { %v608_v54 = vpack.c.bf16 %v596_v48, %v600_v12  ;;  %v611_v50 = vpack.c.bf16 %v597_v38, %v601_v14  ;;  %v890_v33 = vsel %vm874_vm7, %v2748_v37, %v4285_v19  ;;  %v889_v44 = vsel %vm874_vm7, %v2747_v24, %v4284_v35  ;;  %v3912_v19 = vld [vmem:[#allocation2 + $0x2a4] sm:$0xf] }
 0x131   :  { %v908_v45 = vpack.c.bf16 %v890_v33, %v894_v63  ;;  %v905_v22 = vpack.c.bf16 %v889_v44, %v893_v62  ;;  %v2371_v27 = vld [vmem:[#allocation2 + $0x224] sm:$0xf0]  ;;  %v4282_v39 = vunpack.i.l.bf16 %v3750_v16  ;;  %v2792_v23 = vunpack.i.l.bf16 %v3774_v56 }
 0x132   :  { %620 = vst [vmem:[#allocation2 + $0x1e0] sm:$0xff] %v608_v54  ;;  %v2130_v38 = vld [vmem:[#allocation2 + $0x210] sm:$0xf] }
 0x133   :  { %623 = vst [vmem:[#allocation2 + $0x1f8] sm:$0xff] %v611_v50  ;;  %v3862_v48 = vpop.permute.xlu2 %2820  ;;  %v2131_v37 = vor.u32 %v2371_v27, %v2130_v38  ;;  %v2082_v27 = vld [vmem:[#allocation2 + $0x1b0] sm:$0xf]  ;;  %v2359_v38 = vld [vmem:[#allocation2 + $0x1c4] sm:$0xf0] }
 0x134   :  { %920 = vst [vmem:[#allocation2 + $0x348] sm:$0xff] %v908_v45  ;;  %v2771_v12 = vpop.permute.xlu1 %2770  ;;  %v3864_v34 = vpop.permute.xlu0 %2765  ;;  %v2083_v49 = vor.u32 %v2359_v38, %v2082_v27  ;;  %v2042_v27 = vld [vmem:[#allocation2 + $0x158] sm:$0xf]  ;;  %v2348_v38 = vld [vmem:[#allocation2 + $0x16c] sm:$0xf0] }
 0x135   :  { %917 = vst [vmem:[#allocation2 + $0x330] sm:$0xff] %v905_v22  ;;  %v2773_v14 = vunpack.i.h.bf16 %v2771_v12  ;;  %v2772_v47 = vunpack.i.l.bf16 %v2771_v12  ;;  %v4278_v24 = vunpack.i.h.bf16 %v3864_v34  ;;  %v4280_v62 = vunpack.i.l.bf16 %v3864_v34  ;;  %1610 = vmatpush.bf16.msra.mxu1 %v2131_v37 }
 0x136   :  { %v2043_v59 = vor.u32 %v2348_v38, %v2042_v27 }
 0x137   :  { %v887_v63 = vsel %vm874_vm7, %v2772_v47, %v4282_v39  ;;  %v888_v54 = vsel %vm874_vm7, %v2773_v14, %v4281_v42  ;;  %v892_v50 = vsel %vm874_vm7, %v4278_v24, %v2773_v14  ;;  %v891_v33 = vsel %vm874_vm7, %v4280_v62, %v2772_v47  ;;  %v2058_v42 = vld [vmem:[#allocation2 + $0x180] sm:$0xf]  ;;  %v3894_v39 = vld [vmem:[#allocation2 + $0x15c] sm:$0xf] }
 0x138   :  { %v902_v44 = vpack.c.bf16 %v888_v54, %v892_v50  ;;  %v899_v45 = vpack.c.bf16 %v887_v63, %v891_v33 }
 0x139   :  { %v2106_v22 = vld [vmem:[#allocation2 + $0x1e0] sm:$0xf] }
 0x13a   :  { %v2365_v12 = vld [vmem:[#allocation2 + $0x1f4] sm:$0xf0]  ;;  %914 = vst [vmem:[#allocation2 + $0x318] sm:$0xff] %v902_v44 }
 0x13b   :  { %v3884_v37 = vpop.permute.xlu2 %2835  ;;  %v2107_v61 = vor.u32 %v2365_v12, %v2106_v22  ;;  %v2407_v30 = vld [vmem:[#allocation2 + $0x344] sm:$0xf0]  ;;  %v2276_v13 = vld [vmem:[#allocation2 + $0x348] sm:$0xf0]  ;;  %911 = vst [vmem:[#allocation2 + $0x300] sm:$0xff] %v899_v45  ;;  %v2793_v12 = vunpack.i.h.bf16 %v3774_v56 }
 0x13c   :  { %v3886_v21 = vpop.permute.xlu1 %2785  ;;  %v2274_v14 = vld [vmem:[#allocation2 + $0x330] sm:$0xf]  ;;  %v2404_v24 = vld [vmem:[#allocation2 + $0x334] sm:$0xf]  ;;  %v2781_v54 = vpop.permute.xlu0 %2780  ;;  %v2353_v22 = vld [vmem:[#allocation2 + $0x194] sm:$0xf0] }
 0x13d   :  { %v4283_v47 = vunpack.i.h.bf16 %v3886_v21  ;;  %v4288_v63 = vunpack.i.l.bf16 %v3886_v21  ;;  %1611 = vmatpush.bf16.msra.mxu1 %v2107_v61  ;;  %v2275_v50 = vor.u32 %v2407_v30, %v2274_v14  ;;  %v2279_v33 = vor.u32 %v2404_v24, %v2276_v13  ;;  %v924_v45 = vld [vmem:[%s4267_s1 + $0x8] sm:$0xf]  ;;  %v2392_v14 = vld [vmem:[#allocation2 + $0x2d4] sm:$0xf] }
 0x13e   :  { %v2783_v44 = vunpack.i.h.bf16 %v2781_v54  ;;  %v2782_v62 = vunpack.i.l.bf16 %v2781_v54  ;;  %v2228_v54 = vld [vmem:[#allocation2 + $0x2e8] sm:$0xf0]  ;;  %v2059_v35 = vor.u32 %v2353_v22, %v2058_v42  ;;  %v787_v56 = vsel %vm777_vm4, %v2698_v9, %v2793_v12 }
 0x13f   :  { %1625 = vmatpush.bf16.msra.mxu2 %v2275_v50  ;;  %1664 = vmatpush.bf16.msrb.mxu0 %v2279_v33  ;;  %v2044_v50 = vld [vmem:[#allocation2 + $0x170] sm:$0xf0]  ;;  %v786_v9 = vsel %vm777_vm4, %v2697_v2, %v2792_v23 }
 0x140   :  { %v785_v61 = vsel %vm777_vm4, %v2783_v44, %v4283_v47  ;;  %v789_v30 = vsel %vm777_vm4, %v2683_v57, %v2783_v44  ;;  %v784_v13 = vsel %vm777_vm4, %v2782_v62, %v4288_v63  ;;  %v788_v24 = vsel %vm777_vm4, %v2682_v58, %v2782_v62  ;;  %v2204_v57 = vld [vmem:[#allocation2 + $0x2b8] sm:$0xf0] }
 0x141   :  { %v812_v33 = vpack.c.bf16 %v785_v61, %v789_v30  ;;  %v809_v47 = vpack.c.bf16 %v784_v13, %v788_v24  ;;  %1612 = vmatpush.bf16.msra.mxu1 %v2083_v49  ;;  %v1043_v44 = vunpack.c.l.b16 %v924_v45  ;;  %v2401_v25 = vld [vmem:[#allocation2 + $0x314] sm:$0xf0]  ;;  %v2252_v63 = vld [vmem:[#allocation2 + $0x318] sm:$0xf0]  ;;  %v4291_v58 = vunpack.i.l.bf16 %v3818_v20 }
 0x142   :  { %v2250_v61 = vld [vmem:[#allocation2 + $0x300] sm:$0xf]  ;;  %v2398_v30 = vld [vmem:[#allocation2 + $0x304] sm:$0xf]  ;;  %v2231_v49 = vor.u32 %v2392_v14, %v2228_v54  ;;  %v2047_v42 = vor.u32 %v3894_v39, %v2044_v50  ;;  %v2207_v38 = vor.u32 %v3912_v19, %v2204_v57  ;;  %v1042_v39 = vunpack.c.h.b16 %v3786_v31  ;;  %v3952_v14 = vld [vmem:[#allocation2 + $0x98] sm:$0xf] }
 0x143   :  { %824 = vst [vmem:[#allocation2 + $0x2f0] sm:$0xff] %v812_v33  ;;  %v3917_v62 = vpop.permute.xlu2 %2850  ;;  %v2251_v45 = vor.u32 %v2401_v25, %v2250_v61  ;;  %v2255_v27 = vor.u32 %v2398_v30, %v2252_v63  ;;  %v3927_v18 = vpack.c.b16 %v1043_v44, %v1043_v44  ;;  %v2342_v63 = vld [vmem:[#allocation2 + $0x13c] sm:$0xf0]  ;;  %v3962_v44 = vld [vmem:[#allocation2 + $0xac] sm:$0xf0] }
 0x144   :  { %821 = vst [vmem:[#allocation2 + $0x2d8] sm:$0xff] %v809_v47  ;;  %v2801_v22 = vpop.permute.xlu1 %2800  ;;  %v3925_v33 = vpop.permute.xlu0 %2795 }
 0x145   :  { %v2803_v13 = vunpack.i.h.bf16 %v2801_v22  ;;  %v2802_v24 = vunpack.i.l.bf16 %v2801_v22  ;;  %1613 = vmatpush.bf16.msra.mxu1 %v2059_v35  ;;  %v2798_v47 = vunpack.i.h.bf16 %v3925_v33  ;;  %v2797_v25 = vunpack.i.l.bf16 %v3925_v33  ;;  %1626 = vmatpush.bf16.msra.mxu2 %v2251_v45  ;;  %v2018_v35 = vld [vmem:[#allocation2 + $0x128] sm:$0xf]  ;;  %v1994_v22 = vld [vmem:[#allocation2 + $0xf8] sm:$0xf]  ;;  %v2336_v45 = vld [vmem:[#allocation2 + $0x10c] sm:$0xf0] }
 0x146   :  { %1665 = vmatpush.bf16.msrb.mxu0 %v2255_v27  ;;  %v2019_v27 = vor.u32 %v2342_v63, %v2018_v35  ;;  %v2333_v35 = vld [vmem:[#allocation2 + $0xfc] sm:$0xf]  ;;  %v1996_v63 = vld [vmem:[#allocation2 + $0x110] sm:$0xf0] }
 0x147   :  { %v687_v19 = vsel %vm680_vm5, %v2802_v24, %v4291_v58  ;;  %v688_v15 = vsel %vm680_vm5, %v2803_v13, %v4292_v29  ;;  %v691_v2 = vsel %vm680_vm5, %v2712_v36, %v2802_v24  ;;  %v692_v31 = vsel %vm680_vm5, %v2713_v0, %v2803_v13  ;;  %v2339_v36 = vld [vmem:[#allocation2 + $0x12c] sm:$0xf]  ;;  %v2020_v0 = vld [vmem:[#allocation2 + $0x140] sm:$0xf0]  ;;  %v3970_v24 = vld [vmem:[#allocation2 + $0x9c] sm:$0xf] }
 0x148   :  { %v712_v54 = vpack.c.bf16 %v687_v19, %v691_v2  ;;  %v715_v50 = vpack.c.bf16 %v688_v15, %v692_v31  ;;  %v783_v57 = vsel %vm777_vm4, %v2793_v12, %v2798_v47  ;;  %v782_v43 = vsel %vm777_vm4, %v2792_v23, %v2797_v25  ;;  %2296 = vmatmul.msk.bf16.vlgmr.msra.gmra.mxu2 %vm1589_vm8, %v3927_v18  ;;  %v2180_v23 = vld [vmem:[#allocation2 + $0x288] sm:$0xf0]  ;;  %v3974_v19 = vld [vmem:[#allocation2 + $0x68] sm:$0xf]  ;;  %v4001_v58 = vld [vmem:[#allocation2 + $0x80] sm:$0xf0] }
 0x149   :  { %1645 = vmatpush.bf16.msrb.mxu2 %v2231_v49  ;;  %1671 = vmatpush.bf16.msrb.mxu1 %v2043_v59  ;;  %v806_v61 = vpack.c.bf16 %v783_v57, %v787_v56  ;;  %v803_v30 = vpack.c.bf16 %v782_v43, %v786_v9  ;;  %v2380_v49 = vld [vmem:[#allocation2 + $0x274] sm:$0xf]  ;;  %v3966_v12 = vpack.c.b16 %v1042_v39, %v1042_v39  ;;  %v3976_v39 = vld [vmem:[#allocation2 + $0x7c] sm:$0xf0]  ;;  %v2327_v29 = vld [vmem:[#allocation2 + $0xcc] sm:$0xf] }
 0x14a   :  { %1710 = vmatpush.bf16.msra.mxu0 %v2047_v42  ;;  %724 = vst [vmem:[#allocation2 + $0x278] sm:$0xff] %v712_v54  ;;  %v2396_v13 = vld [vmem:[#allocation2 + $0x2ec] sm:$0xf0]  ;;  %v2023_v59 = vor.u32 %v2339_v36, %v2020_v0  ;;  %v3972_v9 = vld [vmem:[#allocation2 + $0xb0] sm:$0xf0]  ;;  %v1947_v54 = vor.u32 %v3962_v44, %v3952_v14  ;;  %v2183_v36 = vor.u32 %v2380_v49, %v2180_v23  ;;  %v2908_v14 = vmov 0  }
 0x14b   :  { %2297 = vmatmul.msk.bf16.vlgmr.msrb.gmra.mxu0 %vm1589_vm8, %v3927_v18  ;;  %727 = vst [vmem:[#allocation2 + $0x290] sm:$0xff] %v715_v50  ;;  %v2866_v56 = vpop.permute.xlu2 %2865  ;;  %v2234_v42 = vld [vmem:[#allocation2 + $0x2d8] sm:$0xf]  ;;  %1614 = vmatmul.bf16.vlgmr.msra.gmra.mxu1 %v3966_v12  ;;  %v1995_v0 = vor.u32 %v2336_v45, %v1994_v22  ;;  %v1999_v33 = vor.u32 %v2333_v35, %v1996_v63 }
 0x14c   :  { %818 = vst [vmem:[#allocation2 + $0x2c0] sm:$0xff] %v806_v61  ;;  %v3979_v15 = vpop.permute.xlu1 %2815  ;;  %v2868_v2 = vunpack.i.h.bf16 %v2866_v56  ;;  %v2867_v31 = vunpack.i.l.bf16 %v2866_v56  ;;  %v2811_v43 = vpop.permute.xlu0 %2810  ;;  %v2374_v61 = vld [vmem:[#allocation2 + $0x244] sm:$0xf]  ;;  %v1970_v56 = vld [vmem:[#allocation2 + $0xc8] sm:$0xf]  ;;  %v1951_v46 = vor.u32 %v3970_v24, %v3972_v9  ;;  %2899 = vset.pattern.permute.xlu0 %v2908_v14 }
 0x14d   :  { %1646 = vmatpush.bf16.msrb.mxu2 %v2207_v38  ;;  %1672 = vmatpush.bf16.msrb.mxu1 %v2019_v27  ;;  %v2235_v38 = vor.u32 %v2396_v13, %v2234_v42  ;;  %815 = vst [vmem:[#allocation2 + $0x2a8] sm:$0xff] %v803_v30  ;;  %v2818_v50 = vunpack.i.h.bf16 %v3979_v15  ;;  %v2817_v57 = vunpack.i.l.bf16 %v3979_v15  ;;  %v2156_v27 = vld [vmem:[#allocation2 + $0x258] sm:$0xf0]  ;;  %v2813_v23 = vunpack.i.h.bf16 %v2811_v43  ;;  %v2330_v42 = vld [vmem:[#allocation2 + $0xdc] sm:$0xf0] }
 0x14e   :  { %1711 = vmatpush.bf16.msra.mxu0 %v2023_v59  ;;  %v799_v13 = vsel %vm777_vm4, %v2868_v2, %v2688_v32  ;;  %v778_v30 = vsel %vm777_vm4, %v2797_v25, %v2867_v31  ;;  %v779_v59 = vsel %vm777_vm4, %v2798_v47, %v2868_v2  ;;  %v798_v49 = vsel %vm777_vm4, %v2867_v31, %v2687_v40  ;;  %v1972_v47 = vld [vmem:[#allocation2 + $0xe0] sm:$0xf0]  ;;  %v4007_v2 = vld [vmem:[#allocation2 + $0x6c] sm:$0xf] }
 0x14f   :  { %1684 = vmatpush.bf16.msrb.mxu3 %v2235_v38  ;;  %v804_v22 = vpack.c.bf16 %v798_v49, %v778_v30  ;;  %v807_v45 = vpack.c.bf16 %v799_v13, %v779_v59  ;;  %v2812_v32 = vunpack.i.l.bf16 %v2811_v43  ;;  %v2159_v25 = vor.u32 %v2374_v61, %v2156_v27  ;;  %v2368_v61 = vld [vmem:[#allocation2 + $0x214] sm:$0xf]  ;;  %v2132_v27 = vld [vmem:[#allocation2 + $0x228] sm:$0xf0] }
 0x150   :  { %v1923_v40 = vor.u32 %v3976_v39, %v3974_v19  ;;  %v686_v31 = vsel %vm680_vm5, %v2813_v23, %v2818_v50  ;;  %v690_v38 = vsel %vm680_vm5, %v2728_v28, %v2813_v23  ;;  %v2838_v13 = vunpack.i.h.bf16 %v3884_v37 }
 0x151   :  { %1647 = vmatpush.bf16.msrb.mxu2 %v2183_v36  ;;  %1673 = vmatpush.bf16.msrb.mxu1 %v1995_v0  ;;  %816 = vst [vmem:[#allocation2 + $0x2b0] sm:$0xff] %v804_v22  ;;  %v685_v35 = vsel %vm680_vm5, %v2812_v32, %v2817_v57  ;;  %v689_v63 = vsel %vm680_vm5, %v2727_v53, %v2812_v32  ;;  %v2837_v28 = vunpack.i.l.bf16 %v3884_v37  ;;  %v2823_v53 = vunpack.i.h.bf16 %v3862_v48 }
 0x152   :  { %819 = vst [vmem:[#allocation2 + $0x2c8] sm:$0xff] %v807_v45  ;;  %v709_v43 = vpack.c.bf16 %v686_v31, %v690_v38  ;;  %v706_v36 = vpack.c.bf16 %v685_v35, %v689_v63  ;;  %1712 = vmatpush.bf16.msra.mxu0 %v1999_v33  ;;  %v1971_v0 = vor.u32 %v2330_v42, %v1970_v56  ;;  %v2822_v22 = vunpack.i.l.bf16 %v3862_v48  ;;  %v2186_v31 = vld [vmem:[#allocation2 + $0x278] sm:$0xf]  ;;  %v2384_v38 = vld [vmem:[#allocation2 + $0x28c] sm:$0xf0] }
 0x153   :  { %v1975_v30 = vor.u32 %v2327_v29, %v1972_v47  ;;  %v2881_v59 = vpop.permute.xlu2 %2880  ;;  %v2390_v49 = vld [vmem:[#allocation2 + $0x2bc] sm:$0xf0]  ;;  %v1927_v3 = vor.u32 %v4007_v2, %v4001_v58  ;;  %v2135_v47 = vor.u32 %v2368_v61, %v2132_v27  ;;  %v2187_v27 = vor.u32 %v2384_v38, %v2186_v31 }
 0x154   :  { %721 = vst [vmem:[#allocation2 + $0x260] sm:$0xff] %v709_v43  ;;  %v2831_v45 = vpop.permute.xlu1 %2830  ;;  %v2883_v23 = vunpack.i.h.bf16 %v2881_v59  ;;  %v2882_v32 = vunpack.i.l.bf16 %v2881_v59  ;;  %v2210_v56 = vld [vmem:[#allocation2 + $0x2a8] sm:$0xf]  ;;  %v2084_v59 = vld [vmem:[#allocation2 + $0x1c8] sm:$0xf0]  ;;  %v4297_v58 = vunpack.i.h.bf16 %v3668_v52 }
 0x155   :  { %1648 = vmatpush.bf16.msrb.mxu2 %v2159_v25  ;;  %1674 = vmatpush.bf16.msrb.mxu1 %v1971_v0  ;;  %718 = vst [vmem:[#allocation2 + $0x248] sm:$0xff] %v706_v36  ;;  %v2833_v42 = vunpack.i.h.bf16 %v2831_v45  ;;  %v2832_v33 = vunpack.i.l.bf16 %v2831_v45  ;;  %v4031_v25 = vpop.permute.xlu0 %2825  ;;  %v2211_v29 = vor.u32 %v2390_v49, %v2210_v56  ;;  %v1033_v49 = vld [vmem:[%s4268_s2] sm:$0xff] }
 0x156   :  { %1713 = vmatpush.bf16.msra.mxu0 %v1975_v30  ;;  %v682_v48 = vsel %vm680_vm5, %v2818_v50, %v2883_v23  ;;  %v681_v35 = vsel %vm680_vm5, %v2817_v57, %v2882_v32  ;;  %v701_v63 = vsel %vm680_vm5, %v2882_v32, %v2717_v51  ;;  %v702_v43 = vsel %vm680_vm5, %v2883_v23, %v2718_v4  ;;  %v2362_v4 = vld [vmem:[#allocation2 + $0x1e4] sm:$0xf]  ;;  %v2108_v57 = vld [vmem:[#allocation2 + $0x1f8] sm:$0xf0]  ;;  %v2356_v30 = vld [vmem:[#allocation2 + $0x1b4] sm:$0xf] }
 0x157   :  { %v588_v50 = vsel %vm583_vm6, %v2832_v33, %v2837_v28  ;;  %v589_v15 = vsel %vm583_vm6, %v2833_v42, %v2838_v13  ;;  %v592_v51 = vsel %vm583_vm6, %v2762_v6, %v2832_v33  ;;  %v593_v7 = vsel %vm583_vm6, %v2763_v1, %v2833_v42  ;;  %1685 = vmatpush.bf16.msrb.mxu3 %v2211_v29  ;;  %v1898_v33 = vld [vmem:[#allocation2 + $0x38] sm:$0xf]  ;;  %v2312_v29 = vld [vmem:[#allocation2 + $0x4c] sm:$0xf0] }
 0x158   :  { %v609_v36 = vpack.c.bf16 %v588_v50, %v592_v51  ;;  %v612_v0 = vpack.c.bf16 %v589_v15, %v593_v7  ;;  %v707_v61 = vpack.c.bf16 %v701_v63, %v681_v35  ;;  %v710_v6 = vpack.c.bf16 %v702_v43, %v682_v48  ;;  %1036 = vperm.xlu0 %2899, %v1033_v49   ;;  %v1900_v63 = vld [vmem:[#allocation2 + $0x50] sm:$0xf0]  ;;  %v2350_v7 = vld [vmem:[#allocation2 + $0x184] sm:$0xf] }
 0x159   :  { %1649 = vmatpush.bf16.msrb.mxu2 %v2135_v47  ;;  %v2828_v41 = vunpack.i.h.bf16 %v4031_v25  ;;  %v2827_v45 = vunpack.i.l.bf16 %v4031_v25  ;;  %1675 = vmatpush.bf16.msrb.mxu1 %v1947_v54  ;;  %v4294_v1 = vunpack.i.l.bf16 %v3781_v55  ;;  %v4295_v32 = vunpack.i.h.bf16 %v3781_v55 }
 0x15a   :  { %621 = vst [vmem:[#allocation2 + $0x1e8] sm:$0xff] %v609_v36  ;;  %1714 = vmatpush.bf16.msra.mxu0 %v1951_v46  ;;  %v2111_v42 = vor.u32 %v2362_v4, %v2108_v57  ;;  %v2087_v9 = vor.u32 %v2356_v30, %v2084_v59  ;;  %v2309_v46 = vld [vmem:[#allocation2 + $0x3c] sm:$0xf]  ;;  %v1899_v51 = vor.u32 %v2312_v29, %v1898_v33  ;;  %v1874_v30 = vld [vmem:[#allocation2 + $0x8] sm:$0xf]  ;;  %v2852_v33 = vunpack.i.l.bf16 %v3917_v62 }
 0x15b   :  { %v594_v23 = vsel %vm583_vm6, %v4294_v1, %v2822_v22  ;;  %v595_v56 = vsel %vm583_vm6, %v4295_v32, %v2823_v53  ;;  %624 = vst [vmem:[#allocation2 + $0x200] sm:$0xff] %v612_v0  ;;  %v591_v44 = vsel %vm583_vm6, %v2823_v53, %v2828_v41  ;;  %v590_v55 = vsel %vm583_vm6, %v2822_v22, %v2827_v45  ;;  %v2896_v54 = vpop.permute.xlu2 %2895  ;;  %v2378_v24 = vld [vmem:[#allocation2 + $0x25c] sm:$0xf0]  ;;  %v2060_v4 = vld [vmem:[#allocation2 + $0x198] sm:$0xf0] }
 0x15c   :  { %1686 = vmatpush.bf16.msrb.mxu3 %v2187_v27  ;;  %719 = vst [vmem:[#allocation2 + $0x250] sm:$0xff] %v707_v61  ;;  %v615_v47 = vpack.c.bf16 %v590_v55, %v594_v23  ;;  %v618_v31 = vpack.c.bf16 %v591_v44, %v595_v56  ;;  %v4092_v38 = vpop.permute.xlu1 %2845  ;;  %v2898_v48 = vunpack.i.h.bf16 %v2896_v54  ;;  %v2897_v35 = vunpack.i.l.bf16 %v2896_v54  ;;  %v2162_v53 = vld [vmem:[#allocation2 + $0x248] sm:$0xf]  ;;  %v2306_v59 = vld [vmem:[#allocation2 + $0x1c] sm:$0xf0] }
 0x15d   :  { %1650 = vmatpush.bf16.msrb.mxu2 %v2111_v42  ;;  %722 = vst [vmem:[#allocation2 + $0x268] sm:$0xff] %v710_v6  ;;  %1676 = vmatpush.bf16.msrb.mxu1 %v1923_v40  ;;  %v2848_v22 = vunpack.i.h.bf16 %v4092_v38  ;;  %v2847_v43 = vunpack.i.l.bf16 %v4092_v38  ;;  %v2841_v50 = vpop.permute.xlu0 %2840  ;;  %v2163_v15 = vor.u32 %v2378_v24, %v2162_v53  ;;  %v4296_v40 = vunpack.i.l.bf16 %v3668_v52  ;;  %v2303_v32 = vld [vmem:[#allocation2 + $0xc] sm:$0xf]  ;;  %v1876_v56 = vld [vmem:[#allocation2 + $0x20] sm:$0xf0] }
 0x15e   :  { %627 = vst [vmem:[#allocation2 + $0x218] sm:$0xff] %v615_v47  ;;  %1715 = vmatpush.bf16.msra.mxu0 %v1927_v3  ;;  %v584_v19 = vsel %vm583_vm6, %v2837_v28, %v2897_v35  ;;  %v585_v39 = vsel %vm583_vm6, %v2838_v13, %v2898_v48  ;;  %v2843_v36 = vunpack.i.h.bf16 %v2841_v50  ;;  %v605_v2 = vsel %vm583_vm6, %v2898_v48, %v4297_v58 }
 0x15f   :  { %v604_v57 = vsel %vm583_vm6, %v2897_v35, %v4296_v40  ;;  %630 = vst [vmem:[#allocation2 + $0x230] sm:$0xff] %v618_v31  ;;  %v2842_v0 = vunpack.i.l.bf16 %v2841_v50  ;;  %v1903_v28 = vor.u32 %v2309_v46, %v1900_v63  ;;  %v613_v37 = vpack.c.bf16 %v605_v2, %v585_v39 }
 0x160   :  { %v610_v3 = vpack.c.bf16 %v604_v57, %v584_v19  ;;  %1687 = vmatpush.bf16.msrb.mxu3 %v2163_v15  ;;  %v882_v13 = vsel %vm874_vm7, %v2843_v36, %v2848_v22  ;;  %v4298_v61 = vunpack.i.h.bf16 %v3824_v5  ;;  %v2063_v52 = vor.u32 %v2350_v7, %v2060_v4 }
 0x161   :  { %1651 = vmatpush.bf16.msrb.mxu2 %v2087_v9  ;;  %v881_v49 = vsel %vm874_vm7, %v2842_v0, %v2847_v43  ;;  %v4299_v6 = vunpack.i.l.bf16 %v3824_v5  ;;  %1677 = vmatpush.bf16.msrb.mxu1 %v1899_v51  ;;  %v2853_v42 = vunpack.i.h.bf16 %v3917_v62  ;;  %625 = vst [vmem:[#allocation2 + $0x208] sm:$0xff] %v613_v37  ;;  %v1875_v14 = vor.u32 %v2306_v59, %v1874_v30  ;;  %v2114_v2 = vld [vmem:[#allocation2 + $0x1e8] sm:$0xf] }
 0x162   :  { %v886_v27 = vsel %vm874_vm7, %v4298_v61, %v2843_v36  ;;  %622 = vst [vmem:[#allocation2 + $0x1f0] sm:$0xff] %v610_v3  ;;  %1716 = vmatpush.bf16.msra.mxu0 %v1903_v28  ;;  %v1879_v44 = vor.u32 %v2303_v32, %v1876_v56  ;;  %v4300_v9 = vunpack.i.l.bf16 %v3750_v16  ;;  %v4301_v62 = vunpack.i.h.bf16 %v3750_v16  ;;  %v2366_v3 = vld [vmem:[#allocation2 + $0x1fc] sm:$0xf0]  ;;  %v2360_v28 = vld [vmem:[#allocation2 + $0x1cc] sm:$0xf0] }
 0x163   :  { %v885_v1 = vsel %vm874_vm7, %v4299_v6, %v2842_v0  ;;  %v909_v23 = vpack.c.bf16 %v882_v13, %v886_v27  ;;  %v4302_v63 = vunpack.i.h.bf16 %v3573_v60  ;;  %v4303_v15 = vunpack.i.l.bf16 %v3886_v21  ;;  %v2090_v0 = vld [vmem:[#allocation2 + $0x1b8] sm:$0xf] }
 0x164   :  { %v906_v29 = vpack.c.bf16 %v881_v49, %v885_v1  ;;  %v2861_v5 = vpop.permute.xlu1 %2860  ;;  %v883_v46 = vsel %vm874_vm7, %v4300_v9, %v2852_v33  ;;  %v884_v47 = vsel %vm874_vm7, %v4301_v62, %v2853_v42  ;;  %v4304_v51 = vunpack.i.h.bf16 %v3886_v21 }
 0x165   :  { %921 = vst [vmem:[#allocation2 + $0x350] sm:$0xff] %v909_v23  ;;  %1652 = vmatpush.bf16.msrb.mxu2 %v2063_v52  ;;  %1678 = vmatpush.bf16.msrb.mxu1 %v1875_v14  ;;  %v2863_v55 = vunpack.i.h.bf16 %v2861_v5  ;;  %v2862_v54 = vunpack.i.l.bf16 %v2861_v5  ;;  %v4136_v24 = vpop.permute.xlu0 %2855  ;;  %v2138_v35 = vld [vmem:[#allocation2 + $0x218] sm:$0xf]  ;;  %v4305_v4 = vunpack.i.l.bf16 %v3573_v60  ;;  %v2115_v49 = vor.u32 %v2366_v3, %v2114_v2 }
 0x166   :  { %918 = vst [vmem:[#allocation2 + $0x338] sm:$0xff] %v906_v29  ;;  %1717 = vmatpush.bf16.msra.mxu0 %v1879_v44  ;;  %v2858_v31 = vunpack.i.h.bf16 %v4136_v24  ;;  %v2857_v48 = vunpack.i.l.bf16 %v4136_v24  ;;  %v2372_v53 = vld [vmem:[#allocation2 + $0x22c] sm:$0xf0]  ;;  %v4306_v14 = vunpack.i.l.bf16 %v3778_v10  ;;  %v4307_v5 = vunpack.i.h.bf16 %v3778_v10 }
 0x167   :  { %v801_v50 = vsel %vm777_vm4, %v2863_v55, %v4302_v63  ;;  %v780_v16 = vsel %vm777_vm4, %v4303_v15, %v2862_v54  ;;  %v781_v7 = vsel %vm777_vm4, %v4304_v51, %v2863_v55  ;;  %v800_v19 = vsel %vm777_vm4, %v2862_v54, %v4305_v4  ;;  %v2349_v54 = vld [vmem:[#allocation2 + $0x174] sm:$0xf0]  ;;  %v2236_v4 = vld [vmem:[#allocation2 + $0x2f0] sm:$0xf0] }
 0x168   :  { %1653 = vmatmul.bf16.vlgmr.msrb.gmra.mxu2 %v3966_v12  ;;  %v810_v39 = vpack.c.bf16 %v800_v19, %v780_v16  ;;  %v813_v40 = vpack.c.bf16 %v801_v50, %v781_v7  ;;  %v880_v57 = vsel %vm874_vm7, %v2853_v42, %v2858_v31  ;;  %v879_v21 = vsel %vm874_vm7, %v2852_v33, %v2857_v48  ;;  %v2393_v7 = vld [vmem:[#allocation2 + $0x2dc] sm:$0xf]  ;;  %v2218_v19 = vld [vmem:[#allocation2 + $0x2b0] sm:$0xf] }
 0x169   :  { %1679 = vmatmul.bf16.vlgmr.msrb.gmra.mxu1 %v3809_v26  ;;  %v903_v60 = vpack.c.bf16 %v880_v57, %v884_v47  ;;  %v900_v36 = vpack.c.bf16 %v879_v21, %v883_v46  ;;  %v2139_v58 = vor.u32 %v2372_v53, %v2138_v35  ;;  %1718 = vmatmul.bf16.vlgmr.msra.gmra.mxu0 %v3809_v26  ;;  %v2066_v47 = vld [vmem:[#allocation2 + $0x188] sm:$0xf]  ;;  %v2354_v35 = vld [vmem:[#allocation2 + $0x19c] sm:$0xf0]  ;;  %v4310_v63 = vunpack.i.l.bf16 %v3818_v20 }
 0x16a   :  { %822 = vst [vmem:[#allocation2 + $0x2e0] sm:$0xff] %v810_v39  ;;  %v2091_v42 = vor.u32 %v2360_v28, %v2090_v0  ;;  %v2050_v53 = vld [vmem:[#allocation2 + $0x160] sm:$0xf]  ;;  %v4311_v15 = vunpack.i.l.bf16 %v3628_v17  ;;  %v2391_v57 = vld [vmem:[#allocation2 + $0x2c4] sm:$0xf0]  ;;  %v2067_v21 = vor.u32 %v2354_v35, %v2066_v47 }
 0x16b   :  { %825 = vst [vmem:[#allocation2 + $0x2f8] sm:$0xff] %v813_v40  ;;  %1688 = vmatpush.bf16.msrb.mxu3 %v2139_v58  ;;  %v2051_v58 = vor.u32 %v2349_v54, %v2050_v53  ;;  %v2212_v54 = vld [vmem:[#allocation2 + $0x2c0] sm:$0xf0]  ;;  %v2381_v35 = vld [vmem:[#allocation2 + $0x27c] sm:$0xf] }
 0x16c   :  { %v2408_v37 = vld [vmem:[#allocation2 + $0x34c] sm:$0xf0]  ;;  %v2284_v13 = vld [vmem:[#allocation2 + $0x350] sm:$0xf0]  ;;  %915 = vst [vmem:[#allocation2 + $0x320] sm:$0xff] %v903_v60  ;;  %v2876_v52 = vpop.permute.xlu1 %2875 }
 0x16d   :  { %v2282_v61 = vld [vmem:[#allocation2 + $0x338] sm:$0xf]  ;;  %v2405_v27 = vld [vmem:[#allocation2 + $0x33c] sm:$0xf]  ;;  %912 = vst [vmem:[#allocation2 + $0x308] sm:$0xff] %v900_v36  ;;  %v2878_v6 = vunpack.i.h.bf16 %v2876_v52  ;;  %v2877_v1 = vunpack.i.l.bf16 %v2876_v52  ;;  %v2871_v23 = vpop.permute.xlu0 %2870 }
 0x16e   :  { %v2283_v30 = vor.u32 %v2408_v37, %v2282_v61  ;;  %v2287_v59 = vor.u32 %v2405_v27, %v2284_v13  ;;  %v2873_v32 = vunpack.i.h.bf16 %v2871_v23  ;;  %v2872_v56 = vunpack.i.l.bf16 %v2871_v23  ;;  %v2188_v53 = vld [vmem:[#allocation2 + $0x290] sm:$0xf0] }
 0x16f   :  { %1689 = vmatpush.bf16.msrb.mxu3 %v2115_v49  ;;  %v877_v33 = vsel %vm874_vm7, %v2847_v43, %v2877_v1  ;;  %v878_v29 = vsel %vm874_vm7, %v2848_v22, %v2878_v6  ;;  %v897_v44 = vsel %vm874_vm7, %v2877_v1, %v4306_v14  ;;  %v898_v55 = vsel %vm874_vm7, %v2878_v6, %v4307_v5 }
 0x170   :  { %1703 = vmatpush.bf16.msra.mxu2 %v2283_v30  ;;  %1742 = vmatpush.bf16.msra.mxu1 %v2287_v59  ;;  %v907_v9 = vpack.c.bf16 %v897_v44, %v877_v33  ;;  %v910_v46 = vpack.c.bf16 %v898_v55, %v878_v29  ;;  %v4308_v43 = vunpack.i.h.bf16 %v3818_v20  ;;  %v4309_v22 = vunpack.i.h.bf16 %v3628_v17  ;;  %v2343_v33 = vld [vmem:[#allocation2 + $0x144] sm:$0xf0]  ;;  %v2387_v55 = vld [vmem:[#allocation2 + $0x2ac] sm:$0xf] }
 0x171   :  { %v683_v50 = vsel %vm680_vm5, %v4310_v63, %v2872_v56  ;;  %v703_v16 = vsel %vm680_vm5, %v2872_v56, %v4311_v15  ;;  %v2242_v51 = vld [vmem:[#allocation2 + $0x2e0] sm:$0xf]  ;;  %v2239_v30 = vor.u32 %v2393_v7, %v2236_v4  ;;  %v2219_v59 = vor.u32 %v2391_v57, %v2218_v19  ;;  %v2170_v63 = vld [vmem:[#allocation2 + $0x250] sm:$0xf]  ;;  %v2375_v4 = vld [vmem:[#allocation2 + $0x24c] sm:$0xf] }
 0x172   :  { %v684_v38 = vsel %vm680_vm5, %v4308_v43, %v2873_v32  ;;  %v704_v62 = vsel %vm680_vm5, %v2873_v32, %v4309_v22  ;;  %919 = vst [vmem:[#allocation2 + $0x340] sm:$0xff] %v907_v9  ;;  %v713_v39 = vpack.c.bf16 %v703_v16, %v683_v50  ;;  %v2397_v40 = vld [vmem:[#allocation2 + $0x2f4] sm:$0xf0]  ;;  %v4312_v1 = vunpack.i.l.bf16 %v3666_v8  ;;  %v2379_v50 = vld [vmem:[#allocation2 + $0x264] sm:$0xf0] }
 0x173   :  { %v716_v10 = vpack.c.bf16 %v704_v62, %v684_v38  ;;  %922 = vst [vmem:[#allocation2 + $0x358] sm:$0xff] %v910_v46  ;;  %1690 = vmatpush.bf16.msrb.mxu3 %v2091_v42  ;;  %v2402_v20 = vld [vmem:[#allocation2 + $0x31c] sm:$0xf0]  ;;  %v2260_v60 = vld [vmem:[#allocation2 + $0x320] sm:$0xf0]  ;;  %v2243_v36 = vor.u32 %v2397_v40, %v2242_v51  ;;  %v4313_v32 = vunpack.i.h.bf16 %v3666_v8  ;;  %v4314_v8 = vunpack.i.l.bf16 %v3864_v34 }
 0x174   :  { %v2891_v17 = vpop.permute.xlu1 %2890  ;;  %v2258_v2 = vld [vmem:[#allocation2 + $0x308] sm:$0xf]  ;;  %v2399_v3 = vld [vmem:[#allocation2 + $0x30c] sm:$0xf]  ;;  %725 = vst [vmem:[#allocation2 + $0x280] sm:$0xff] %v713_v39  ;;  %v4315_v44 = vunpack.i.h.bf16 %v3864_v34  ;;  %v2215_v11 = vor.u32 %v2387_v55, %v2212_v54  ;;  %v2191_v51 = vor.u32 %v2381_v35, %v2188_v53  ;;  %v2171_v7 = vor.u32 %v2379_v50, %v2170_v63 }
 0x175   :  { %728 = vst [vmem:[#allocation2 + $0x298] sm:$0xff] %v716_v10  ;;  %v2893_v0 = vunpack.i.h.bf16 %v2891_v17  ;;  %v2892_v28 = vunpack.i.l.bf16 %v2891_v17  ;;  %v2886_v37 = vpop.permute.xlu0 %2885  ;;  %v2259_v13 = vor.u32 %v2402_v20, %v2258_v2  ;;  %v2263_v61 = vor.u32 %v2399_v3, %v2260_v60  ;;  %1762 = vmatpush.bf16.msrb.mxu0 %v2243_v36  ;;  %v2026_v42 = vld [vmem:[#allocation2 + $0x130] sm:$0xf]  ;;  %v2337_v46 = vld [vmem:[#allocation2 + $0x114] sm:$0xf0] }
 0x176   :  { %v2888_v27 = vunpack.i.h.bf16 %v2886_v37  ;;  %v2887_v52 = vunpack.i.l.bf16 %v2886_v37  ;;  %v2002_v38 = vld [vmem:[#allocation2 + $0x100] sm:$0xf]  ;;  %v1978_v15 = vld [vmem:[#allocation2 + $0xd0] sm:$0xf]  ;;  %v2331_v16 = vld [vmem:[#allocation2 + $0xe4] sm:$0xf0] }
 0x177   :  { %1691 = vmatpush.bf16.msrb.mxu3 %v2067_v21  ;;  %v586_v49 = vsel %vm583_vm6, %v2827_v45, %v2892_v28  ;;  %v587_v6 = vsel %vm583_vm6, %v2828_v41, %v2893_v0  ;;  %v606_v23 = vsel %vm583_vm6, %v2892_v28, %v4312_v1  ;;  %v607_v56 = vsel %vm583_vm6, %v2893_v0, %v4313_v32  ;;  %v2164_v19 = vld [vmem:[#allocation2 + $0x260] sm:$0xf0]  ;;  %v1954_v57 = vld [vmem:[#allocation2 + $0xa0] sm:$0xf]  ;;  %v2325_v21 = vld [vmem:[#allocation2 + $0xb4] sm:$0xf0] }
 0x178   :  { %v616_v29 = vpack.c.bf16 %v606_v23, %v586_v49  ;;  %v619_v45 = vpack.c.bf16 %v607_v56, %v587_v6  ;;  %v875_v25 = vsel %vm874_vm7, %v2857_v48, %v2887_v52  ;;  %v876_v41 = vsel %vm874_vm7, %v2858_v31, %v2888_v27  ;;  %1704 = vmatpush.bf16.msra.mxu2 %v2259_v13  ;;  %v2244_v17 = vld [vmem:[#allocation2 + $0x2f8] sm:$0xf0]  ;;  %v2140_v37 = vld [vmem:[#allocation2 + $0x230] sm:$0xf0]  ;;  %v2220_v6 = vld [vmem:[#allocation2 + $0x2c8] sm:$0xf0] }
 0x179   :  { %v895_v14 = vsel %vm874_vm7, %v2887_v52, %v4314_v8  ;;  %v896_v5 = vsel %vm874_vm7, %v2888_v27, %v4315_v44  ;;  %1743 = vmatpush.bf16.msra.mxu1 %v2263_v61  ;;  %v2290_v48 = vld [vmem:[#allocation2 + $0x340] sm:$0xf]  ;;  %v2027_v31 = vor.u32 %v2343_v33, %v2026_v42  ;;  %1763 = vmatpush.bf16.msrb.mxu0 %v2219_v59  ;;  %v2369_v28 = vld [vmem:[#allocation2 + $0x21c] sm:$0xf]  ;;  %v1930_v61 = vld [vmem:[#allocation2 + $0x70] sm:$0xf] }
 0x17a   :  { %628 = vst [vmem:[#allocation2 + $0x220] sm:$0xff] %v616_v29  ;;  %v901_v24 = vpack.c.bf16 %v895_v14, %v875_v25  ;;  %v904_v9 = vpack.c.bf16 %v896_v5, %v876_v41  ;;  %v2409_v43 = vld [vmem:[#allocation2 + $0x354] sm:$0xf0]  ;;  %1692 = vmatmul.bf16.vlgmr.msrb.gmra.mxu3 %v3966_v12  ;;  %v2003_v10 = vor.u32 %v2337_v46, %v2002_v38  ;;  %v2122_v52 = vld [vmem:[#allocation2 + $0x1f0] sm:$0xf] }
 0x17b   :  { %1749 = vmatpush.bf16.msra.mxu3 %v2051_v58  ;;  %631 = vst [vmem:[#allocation2 + $0x238] sm:$0xff] %v619_v45  ;;  %v2291_v34 = vor.u32 %v2409_v43, %v2290_v48  ;;  %v2194_v62 = vld [vmem:[#allocation2 + $0x280] sm:$0xf]  ;;  %2298 = vmatmul.msk.bf16.vlgmr.msra.gmra.mxu2 %vm1589_vm8, %v3927_v18  ;;  %v1979_v40 = vor.u32 %v2331_v16, %v1978_v15  ;;  %v2394_v58 = vld [vmem:[#allocation2 + $0x2e4] sm:$0xf] }
 0x17c   :  { %1723 = vmatpush.bf16.msrb.mxu2 %v2239_v30  ;;  %v2385_v22 = vld [vmem:[#allocation2 + $0x294] sm:$0xf0]  ;;  %913 = vst [vmem:[#allocation2 + $0x310] sm:$0xff] %v901_v24  ;;  %2299 = vmatmul.msk.bf16.vlgmr.msra.gmra.mxu1 %vm1589_vm8, %v3927_v18  ;;  %v2167_v2 = vor.u32 %v2375_v4, %v2164_v19  ;;  %v1955_v13 = vor.u32 %v2325_v21, %v1954_v57  ;;  %v2367_v30 = vld [vmem:[#allocation2 + $0x204] sm:$0xf0] }
 0x17d   :  { %916 = vst [vmem:[#allocation2 + $0x328] sm:$0xff] %v904_v9  ;;  %v2195_v47 = vor.u32 %v2385_v22, %v2194_v62  ;;  %1781 = vmatpush.bf16.msrb.mxu1 %v2291_v34  ;;  %v2247_v27 = vor.u32 %v2394_v58, %v2244_v17  ;;  %v2319_v59 = vld [vmem:[#allocation2 + $0x84] sm:$0xf0]  ;;  %v2388_v49 = vld [vmem:[#allocation2 + $0x2b4] sm:$0xf]  ;;  %v2143_v1 = vor.u32 %v2369_v28, %v2140_v37 }
 0x17e   :  { %v2098_v23 = vld [vmem:[#allocation2 + $0x1c0] sm:$0xf]  ;;  %v2361_v32 = vld [vmem:[#allocation2 + $0x1d4] sm:$0xf0]  ;;  %v2123_v56 = vor.u32 %v2367_v30, %v2122_v52  ;;  %v2363_v42 = vld [vmem:[#allocation2 + $0x1ec] sm:$0xf]  ;;  %v1931_v29 = vor.u32 %v2319_v59, %v1930_v61  ;;  %v2223_v41 = vor.u32 %v2388_v49, %v2220_v6 }
 0x17f   :  { %1750 = vmatpush.bf16.msra.mxu3 %v2027_v31  ;;  %1764 = vmatpush.bf16.msrb.mxu0 %v2195_v47  ;;  %v2116_v33 = vld [vmem:[#allocation2 + $0x200] sm:$0xf0]  ;;  %v1906_v45 = vld [vmem:[#allocation2 + $0x40] sm:$0xf]  ;;  %v2313_v25 = vld [vmem:[#allocation2 + $0x54] sm:$0xf0]  ;;  %v2099_v55 = vor.u32 %v2361_v32, %v2098_v23 }
 0x180   :  { %1724 = vmatpush.bf16.msrb.mxu2 %v2215_v11  ;;  %v2357_v8 = vld [vmem:[#allocation2 + $0x1bc] sm:$0xf]  ;;  %v2092_v14 = vld [vmem:[#allocation2 + $0x1d0] sm:$0xf0]  ;;  %v2382_v44 = vld [vmem:[#allocation2 + $0x284] sm:$0xf]  ;;  %v2119_v54 = vor.u32 %v2363_v42, %v2116_v33  ;;  %v1907_v9 = vor.u32 %v2313_v25, %v1906_v45 }
 0x181   :  { %v2146_v39 = vld [vmem:[#allocation2 + $0x220] sm:$0xf]  ;;  %v2196_v5 = vld [vmem:[#allocation2 + $0x298] sm:$0xf0]  ;;  %v2074_v48 = vld [vmem:[#allocation2 + $0x190] sm:$0xf]  ;;  %v2095_v31 = vor.u32 %v2357_v8, %v2092_v14 }
 0x182   :  { %v2373_v20 = vld [vmem:[#allocation2 + $0x234] sm:$0xf0]  ;;  %v2355_v24 = vld [vmem:[#allocation2 + $0x1a4] sm:$0xf0]  ;;  %v1882_v46 = vld [vmem:[#allocation2 + $0x10] sm:$0xf]  ;;  %v2199_v38 = vor.u32 %v2382_v44, %v2196_v5 }
 0x183   :  { %1751 = vmatpush.bf16.msra.mxu3 %v2003_v10  ;;  %1765 = vmatpush.bf16.msrb.mxu0 %v2171_v7  ;;  %v2147_v60 = vor.u32 %v2373_v20, %v2146_v39  ;;  %v2266_v36 = vld [vmem:[#allocation2 + $0x310] sm:$0xf]  ;;  %v2307_v43 = vld [vmem:[#allocation2 + $0x24] sm:$0xf0]  ;;  %v2376_v22 = vld [vmem:[#allocation2 + $0x254] sm:$0xf]  ;;  %v2075_v47 = vor.u32 %v2355_v24, %v2074_v48 }
 0x184   :  { %1725 = vmatpush.bf16.msrb.mxu2 %v2191_v51  ;;  %v2403_v3 = vld [vmem:[#allocation2 + $0x324] sm:$0xf0]  ;;  %v2351_v34 = vld [vmem:[#allocation2 + $0x18c] sm:$0xf]  ;;  %v2068_v11 = vld [vmem:[#allocation2 + $0x1a0] sm:$0xf0]  ;;  %v1883_v10 = vor.u32 %v2307_v43, %v1882_v46 }
 0x185   :  { %v2267_v0 = vor.u32 %v2403_v3, %v2266_v36  ;;  %v2172_v62 = vld [vmem:[#allocation2 + $0x268] sm:$0xf0]  ;;  %v2406_v35 = vld [vmem:[#allocation2 + $0x344] sm:$0xf]  ;;  %v2292_v53 = vld [vmem:[#allocation2 + $0x358] sm:$0xf0]  ;;  %v2071_v63 = vor.u32 %v2351_v34, %v2068_v11 }
 0x186   :  { %v2175_v50 = vor.u32 %v2376_v22, %v2172_v62  ;;  %v2346_v15 = vld [vmem:[#allocation2 + $0x164] sm:$0xf]  ;;  %v2052_v16 = vld [vmem:[#allocation2 + $0x178] sm:$0xf0]  ;;  %v2295_v51 = vor.u32 %v2406_v35, %v2292_v53  ;;  %v2400_v19 = vld [vmem:[#allocation2 + $0x314] sm:$0xf] }
 0x187   :  { %1752 = vmatpush.bf16.msra.mxu3 %v1979_v40  ;;  %1766 = vmatpush.bf16.msrb.mxu0 %v2147_v60  ;;  %v2370_v7 = vld [vmem:[#allocation2 + $0x224] sm:$0xf]  ;;  %v2148_v4 = vld [vmem:[#allocation2 + $0x238] sm:$0xf0]  ;;  %v2268_v39 = vld [vmem:[#allocation2 + $0x328] sm:$0xf0]  ;;  %v2055_v40 = vor.u32 %v2346_v15, %v2052_v16 }
 0x188   :  { %1726 = vmatpush.bf16.msrb.mxu2 %v2167_v2  ;;  %1782 = vmatpush.bf16.msrb.mxu1 %v2267_v0  ;;  %v2151_v57 = vor.u32 %v2370_v7, %v2148_v4  ;;  %v2340_v21 = vld [vmem:[#allocation2 + $0x134] sm:$0xf]  ;;  %v2028_v20 = vld [vmem:[#allocation2 + $0x148] sm:$0xf0]  ;;  %v2271_v60 = vor.u32 %v2400_v19, %v2268_v39  ;;  %v2358_v2 = vld [vmem:[#allocation2 + $0x1c4] sm:$0xf] }
 0x189   :  { %v2364_v36 = vld [vmem:[#allocation2 + $0x1f4] sm:$0xf]  ;;  %v2124_v58 = vld [vmem:[#allocation2 + $0x208] sm:$0xf0]  ;;  %v2031_v17 = vor.u32 %v2340_v21, %v2028_v20  ;;  %v2100_v3 = vld [vmem:[#allocation2 + $0x1d8] sm:$0xf0] }
 0x18a   :  { %v2127_v0 = vor.u32 %v2364_v36, %v2124_v58  ;;  %v2334_v28 = vld [vmem:[#allocation2 + $0x104] sm:$0xf]  ;;  %v2004_v37 = vld [vmem:[#allocation2 + $0x118] sm:$0xf0]  ;;  %v2076_v52 = vld [vmem:[#allocation2 + $0x1a8] sm:$0xf0] }
 0x18b   :  { %1753 = vmatpush.bf16.msra.mxu3 %v1955_v13  ;;  %1767 = vmatpush.bf16.msrb.mxu0 %v2123_v56  ;;  %v2103_v13 = vor.u32 %v2358_v2, %v2100_v3  ;;  %v2007_v61 = vor.u32 %v2334_v28, %v2004_v37  ;;  %v2328_v30 = vld [vmem:[#allocation2 + $0xd4] sm:$0xf]  ;;  %v1980_v59 = vld [vmem:[#allocation2 + $0xe8] sm:$0xf0]  ;;  %v1956_v23 = vld [vmem:[#allocation2 + $0xb8] sm:$0xf0] }
 0x18c   :  { %1801 = vmatpush.bf16.msra.mxu1 %v2247_v27  ;;  %1727 = vmatpush.bf16.msrb.mxu2 %v2143_v1  ;;  %v2352_v27 = vld [vmem:[#allocation2 + $0x194] sm:$0xf]  ;;  %v1983_v6 = vor.u32 %v2328_v30, %v1980_v59  ;;  %v2322_v1 = vld [vmem:[#allocation2 + $0xa4] sm:$0xf]  ;;  %v1932_v42 = vld [vmem:[#allocation2 + $0x88] sm:$0xf0] }
 0x18d   :  { %2300 = vmatmul.msk.bf16.vlgmr.msrb.gmra.mxu1 %vm1589_vm8, %v3927_v18  ;;  %v2079_v49 = vor.u32 %v2352_v27, %v2076_v52  ;;  %v1959_v32 = vor.u32 %v2322_v1, %v1956_v23  ;;  %v2316_v56 = vld [vmem:[#allocation2 + $0x74] sm:$0xf]  ;;  %v1908_v45 = vld [vmem:[#allocation2 + $0x58] sm:$0xf0]  ;;  %v1884_v14 = vld [vmem:[#allocation2 + $0x28] sm:$0xf0] }
 0x18e   :  { %v1935_v33 = vor.u32 %v2316_v56, %v1932_v42  ;;  %v2304_v8 = vld [vmem:[#allocation2 + $0x14] sm:$0xf] }
 0x18f   :  { %1754 = vmatpush.bf16.msra.mxu3 %v1931_v29  ;;  %1768 = vmatpush.bf16.msrb.mxu0 %v2099_v55  ;;  %v2310_v29 = vld [vmem:[#allocation2 + $0x44] sm:$0xf]  ;;  %v1887_v44 = vor.u32 %v2304_v8, %v1884_v14 }
 0x190   :  { %1802 = vmatpush.bf16.msra.mxu1 %v2223_v41  ;;  %1728 = vmatpush.bf16.msrb.mxu2 %v2119_v54  ;;  %v1911_v41 = vor.u32 %v2310_v29, %v1908_v45 }
 0x193   :  { %1755 = vmatpush.bf16.msra.mxu3 %v1907_v9  ;;  %1769 = vmatpush.bf16.msrb.mxu0 %v2075_v47  ;;  %v1863_v47 = vld [vmem:[%s4266_s3 + $0x2] ss:$4 sm:$0x3f] }
 0x194   :  { %1803 = vmatpush.bf16.msra.mxu1 %v2199_v38  ;;  %1729 = vmatpush.bf16.msrb.mxu2 %v2095_v31  ;;  %v1834_v53 = vperm.slane %v1863_v47, 0  ;;  %v1836_v59 = vperm.slane %v1863_v47, 2 }
 0x196   :  { %1770 = vmatmul.bf16.vlgmr.msrb.gmra.mxu0 %v3966_v12 }
 0x197   :  { %1756 = vmatpush.bf16.msra.mxu3 %v1883_v10 }
 0x198   :  { %1804 = vmatpush.bf16.msra.mxu1 %v2175_v50  ;;  %1730 = vmatpush.bf16.msrb.mxu2 %v2071_v63  ;;  %v1835_v50 = vperm.slane %v1863_v47, 1 }
 0x19a   :  { %1757 = vmatmul.bf16.vlgmr.msra.gmra.mxu3 %v3809_v26 }
 0x19b   :  { %1820 = vmatpush.bf16.msrb.mxu3 %v2295_v51  ;;  %1731 = vmatmul.bf16.vlgmr.msrb.gmra.mxu2 %v3966_v12 }
 0x19c   :  { %1788 = vmatpush.bf16.msra.mxu2 %v2055_v40  ;;  %1805 = vmatpush.bf16.msra.mxu1 %v2151_v57 }
 0x19e   :  { %v1602_v25 = vpop.f32.mrf.mxu0 }
 0x19f   :  { %1821 = vmatpush.bf16.msrb.mxu3 %v2271_v60 }
 0x1a0   :  { %1789 = vmatpush.bf16.msra.mxu2 %v2031_v17  ;;  %1806 = vmatpush.bf16.msra.mxu1 %v2127_v0 }
 0x1a4   :  { %1790 = vmatpush.bf16.msra.mxu2 %v2007_v61  ;;  %1807 = vmatpush.bf16.msra.mxu1 %v2103_v13  ;;  %v1641_v55 = vpop.f32.mrf.mxu3 }
 0x1a6   :  { %v1604_v5 = vpop.f32.mrf.mxu0 }
 0x1a8   :  { %1791 = vmatpush.bf16.msra.mxu2 %v1983_v6  ;;  %1808 = vmatpush.bf16.msra.mxu1 %v2079_v49  ;;  %v1837_v6 = vperm.slane %v1863_v47, 3 }
 0x1aa   :  { %2301 = vmatmul.msk.bf16.vlgmr.msrb.gmra.mxu3 %vm1589_vm8, %v3927_v18 }
 0x1ab   :  { %1809 = vmatmul.bf16.vlgmr.msra.gmra.mxu1 %v3966_v12 }
 0x1ac   :  { %1792 = vmatpush.bf16.msra.mxu2 %v1959_v32  ;;  %v1643_v54 = vpop.f32.mrf.mxu3 }
 0x1b0   :  { %1793 = vmatpush.bf16.msra.mxu2 %v1935_v33 }
 0x1b4   :  { %1794 = vmatpush.bf16.msra.mxu2 %v1911_v41 }
 0x1b8   :  { %1795 = vmatpush.bf16.msra.mxu2 %v1887_v44 }
 0x1bb   :  { %1796 = vmatmul.bf16.vlgmr.msra.gmra.mxu2 %v3809_v26 }
 0x1c8   :  { %v1615_v48 = vpop.f32.mrf.mxu1  ;;  %v1667_v18 = vpop.f32.mrf.mxu0 }
 0x1ca   :  { %v1037_v46 = vpop.permute.xlu0 %1036 }
 0x1cb   :  { %v1628_v24 = vpop.f32.mrf.mxu2  ;;  %v1603_v43 = vadd.f32 %v1602_v25, %v1037_v46  ;;  %v1642_v34 = vadd.f32 %v1641_v55, %v1037_v46 }
 0x1cd   :  { %v1616_v38 = vadd.f32 %v1615_v48, %v1603_v43 }
 0x1cf   :  { %v1629_v11 = vadd.f32 %v1628_v24, %v1616_v38 }
 0x1d0   :  { %v1617_v12 = vpop.f32.mrf.mxu1  ;;  %v1669_v9 = vpop.f32.mrf.mxu0 }
 0x1d1   :  { %v1827_v26 = vmax.f32 %v1629_v11, 0.0  ;;  %v1839_v12 = vperm.slane %v1863_v47, 5 }
 0x1d3   :  { %v1630_v31 = vpop.f32.mrf.mxu2  ;;  %v1846_v16 = vmul.f32 %v1834_v53, %v1827_v26 }
 0x1e6   :  { %v1680_v22 = vpop.f32.mrf.mxu1  ;;  %v1719_v62 = vpop.f32.mrf.mxu0 }
 0x1e7   :  { %v1681_v17 = vadd.f32 %v1680_v22, %v1037_v46  ;;  %v1720_v28 = vadd.f32 %v1719_v62, %v1037_v46 }
 0x1eb   :  { %v1654_v35 = vpop.f32.mrf.mxu2 }
 0x1ec   :  { %v1655_v10 = vadd.f32 %v1654_v35, %v1642_v34 }
 0x1ee   :  { %v1668_v63 = vadd.f32 %v1667_v18, %v1655_v10  ;;  %v1682_v15 = vpop.f32.mrf.mxu1  ;;  %v1721_v7 = vpop.f32.mrf.mxu0  ;;  %v1838_v18 = vperm.slane %v1863_v47, 4 }
 0x1f0   :  { %v1828_v51 = vmax.f32 %v1668_v63, 0.0 }
 0x1f2   :  { %v1847_v4 = vmul.f32 %v1835_v50, %v1828_v51 }
 0x1f3   :  { %v1656_v19 = vpop.f32.mrf.mxu2 }
 0x1f4   :  { %v1852_v39 = vpack.c.bf16 %v1847_v4, %v1846_v16 }
 0x1f6   :  { %1855 = vst [vmem:[%s4269_s4] sm:$0xff] %v1852_v39 }
 0x1f9   :  { %v1745_v40 = vpop.f32.mrf.mxu1 }
 0x1fd   :  { %v1693_v57 = vpop.f32.mrf.mxu3 }
 0x1fe   :  { %v1706_v21 = vpop.f32.mrf.mxu2  ;;  %v1694_v0 = vadd.f32 %v1693_v57, %v1681_v17 }
 0x200   :  { %v1707_v13 = vadd.f32 %v1706_v21, %v1694_v0 }
 0x201   :  { %v1747_v20 = vpop.f32.mrf.mxu1 }
 0x202   :  { %v1829_v30 = vmax.f32 %v1707_v13, 0.0 }
 0x204   :  { %v1848_v32 = vmul.f32 %v1836_v59, %v1829_v30 }
 0x205   :  { %v1695_v60 = vpop.f32.mrf.mxu3 }
 0x206   :  { %v1708_v36 = vpop.f32.mrf.mxu2 }
 0x20a   :  { %v1784_v58 = vpop.f32.mrf.mxu1 }
 0x212   :  { %v1786_v3 = vpop.f32.mrf.mxu1 }
 0x213   :  { %v1771_v2 = vpop.f32.mrf.mxu0 }
 0x21b   :  { %v1773_v61 = vpop.f32.mrf.mxu0 }
 0x21d   :  { %v1758_v37 = vpop.f32.mrf.mxu3 }
 0x21e   :  { %v1732_v27 = vpop.f32.mrf.mxu2  ;;  %v1759_v41 = vadd.f32 %v1758_v37, %v1037_v46 }
 0x21f   :  { %v1733_v52 = vadd.f32 %v1732_v27, %v1720_v28 }
 0x220   :  { %v1772_v14 = vadd.f32 %v1771_v2, %v1759_v41 }
 0x221   :  { %v1746_v49 = vadd.f32 %v1745_v40, %v1733_v52 }
 0x222   :  { %v1785_v5 = vadd.f32 %v1784_v58, %v1772_v14 }
 0x223   :  { %v1830_v1 = vmax.f32 %v1746_v49, 0.0 }
 0x224   :  { %v1831_v48 = vmax.f32 %v1785_v5, 0.0 }
 0x225   :  { %v1760_v23 = vpop.f32.mrf.mxu3  ;;  %v1849_v56 = vmul.f32 %v1837_v6, %v1830_v1 }
 0x226   :  { %v1734_v42 = vpop.f32.mrf.mxu2  ;;  %v1850_v43 = vmul.f32 %v1838_v18, %v1831_v48 }
 0x227   :  { %v1853_v33 = vpack.c.bf16 %v1849_v56, %v1848_v32 }
 0x228   :  { %v1810_v29 = vpop.f32.mrf.mxu1 }
 0x229   :  { %1856 = vst [vmem:[%s4269_s4 + $0x8] sm:$0xff] %v1853_v33 }
 0x22d   :  { %v1823_v45 = vpop.f32.mrf.mxu3 }
 0x230   :  { %v1812_v25 = vpop.f32.mrf.mxu1 }
 0x235   :  { %v1825_v8 = vpop.f32.mrf.mxu3 }
 0x23e   :  { %v1797_v44 = vpop.f32.mrf.mxu2 }
 0x23f   :  { %v1798_v55 = vadd.f32 %v1797_v44, %v1037_v46 }
 0x241   :  { %v1811_v54 = vadd.f32 %v1810_v29, %v1798_v55 }
 0x243   :  { %v1824_v24 = vadd.f32 %v1823_v45, %v1811_v54 }
 0x245   :  { %v1832_v9 = vmax.f32 %v1824_v24, 0.0 }
 0x246   :  { %v1799_v31 = vpop.f32.mrf.mxu2 }
 0x247   :  { %v1851_v38 = vmul.f32 %v1839_v12, %v1832_v9 }
 0x249   :  { %v1854_v22 = vpack.c.bf16 %v1851_v38, %v1850_v43 }
 0x24b   :  { %1857 = vst [vmem:[%s4269_s4 + $0x10] sm:$0xff] %v1854_v22 }

</bundles_post_ra>
